<compile_context>
chip_gen: v7x
topology: tpu7x:2x2x1
jax: 0.10.0
libtpu: 0.0.40
codegen_flags: <defaults>
</compile_context>

<pallas_src>
import jax
import jax.numpy as jnp
from jax.experimental import pallas as pl
from jax.experimental.pallas import tpu as pltpu


# ----------------------------- kernel body -----------------------------------

def _conv_relu(xf, is_first, is_last, w_ref, b_ref):
    """Conv1d(kernel=3, padding=1) + ReLU on flattened (Bb*T, Cin) activations.

    w_ref: (3, Cin, Cout), with w_ref[k][ci, co] == torch_w[co, ci, k]
    b_ref: (1, Cout) float32
    is_first / is_last: (Bb*T, 1) bool masks, True where t == 0 / t == T-1.
    """
    M = xf.shape[0]
    lhs_dt = w_ref.dtype                       # bf16 (or f32) matmul operands

    xp = jnp.pad(xf, ((1, 1), (0, 0)))         # (M+2, Cin)
    x_prev = jnp.where(is_first, 0.0, xp[0:M, :])        # x[t-1], 0 at t==0
    x_next = jnp.where(is_last, 0.0, xp[2:M + 2, :])     # x[t+1], 0 at t==T-1

    acc = jnp.dot(x_prev.astype(lhs_dt), w_ref[0],
                  preferred_element_type=jnp.float32)
    acc = acc + jnp.dot(xf.astype(lhs_dt), w_ref[1],
                        preferred_element_type=jnp.float32)
    acc = acc + jnp.dot(x_next.astype(lhs_dt), w_ref[2],
                        preferred_element_type=jnp.float32)
    return jnp.maximum(acc + b_ref[...], 0.0)            # bias + ReLU in f32


def encoder_kernel(x_ref, w1_ref, b1_ref, w2_ref, b2_ref, w3_ref, b3_ref,
                   wfc_ref, bfc_ref, out_ref):
    Bb, T, F = x_ref.shape
    M = Bb * T

    # Flatten the batch block to (Bb*T, F) rows (leading-dim collapse only).
    xf = x_ref[...].astype(jnp.float32).reshape(M, F)

    # Sequence-boundary masks inside the flattened row axis (computed once,
    # reused by all three conv layers).
    row_t = jax.lax.broadcasted_iota(jnp.int32, (M, 1), 0) % T
    is_first = row_t == 0              # t == 0   -> no "previous" timestep
    is_last = row_t == (T - 1)         # t == T-1 -> no "next" timestep

    h = _conv_relu(xf, is_first, is_last, w1_ref, b1_ref)   # (M, 32)
    h = _conv_relu(h, is_first, is_last, w2_ref, b2_ref)    # (M, 64)
    h = _conv_relu(h, is_first, is_last, w3_ref, b3_ref)    # (M, 32)

    # torch flatten order (t-major, c-minor): lane-concatenate the T slices,
    # then a single (Bb, T*C) @ (T*C, L) matmul replaces the old per-t loop.
    C = h.shape[1]
    h3d = h.reshape(Bb, T, C)                               # leading-dim split
    hf = jnp.concatenate([h3d[:, t, :] for t in range(T)], axis=1)  # (Bb, T*C)

    z = jnp.dot(hf.astype(wfc_ref.dtype), wfc_ref[...],
                preferred_element_type=jnp.float32) + bfc_ref[...]
    out_ref[...] = z.astype(out_ref.dtype)


# ------------------------------- wrapper --------------------------------------

def _const_spec(p):
    n = p.ndim
    return pl.BlockSpec(p.shape, lambda b: (0,) * n)


def conv1d_encoder_pallas(x, packed, block_b=None):
    """x: (B, T, F) float32 -> (B, latent_dim) float32."""
    B, T, F = x.shape
    w1, b1, w2, b2, w3, b3, wfc, bfc = packed
    L = bfc.shape[-1]

    if block_b is None:
        # ~512 activation rows (Bb*T) per grid step: >=128 for v5e's 4x128 MXU,
        # >=256 for v6e/v7x, while the in-kernel intermediates stay far below
        # the default scoped VMEM limit (also on v7x's 64 MiB / 32 MiB scoped).
        block_b = max(1, min(max(512 // max(T, 1), 1), B))

    grid_b = pl.cdiv(B, block_b)
    Bp = grid_b * block_b
    if Bp != B:                                  # pad tail block; sliced below
        x = jnp.pad(x, ((0, Bp - B), (0, 0), (0, 0)))

    grid_spec = pltpu.PrefetchScalarGridSpec(
        num_scalar_prefetch=0,
        grid=(grid_b,),
        in_specs=[pl.BlockSpec((block_b, T, F), lambda b: (b, 0, 0)),
                  _const_spec(w1), _const_spec(b1),
                  _const_spec(w2), _const_spec(b2),
                  _const_spec(w3), _const_spec(b3),
                  _const_spec(wfc), _const_spec(bfc)],
        out_specs=pl.BlockSpec((block_b, L), lambda b: (b, 0)),
    )
    out = pl.pallas_call(
        encoder_kernel,
        out_shape=jax.ShapeDtypeStruct((Bp, L), jnp.float32),
        grid_spec=grid_spec,
        compiler_params=pltpu.CompilerParams(
            dimension_semantics=("parallel",)),   # batch blocks -> both TCs on v7x
    )(x, w1, b1, w2, b2, w3, b3, wfc, bfc)
    return out[:B]


# ---------------- parameter setup (deterministic, torch layouts) --------------

def init_torch_params(key, F, T, L):
    ks = jax.random.split(key, 8)

    def conv_w(k, cout, cin):
        fan = cin * 3
        return jax.random.uniform(k, (cout, cin, 3), jnp.float32,
                                  -1.0 / jnp.sqrt(fan), 1.0 / jnp.sqrt(fan))

    w1 = conv_w(ks[0], 32, F)
    b1 = jax.random.normal(ks[1], (32,), jnp.float32) * 0.02
    w2 = conv_w(ks[2], 64, 32)
    b2 = jax.random.normal(ks[3], (64,), jnp.float32) * 0.02
    w3 = conv_w(ks[4], 32, 64)
    b3 = jax.random.normal(ks[5], (32,), jnp.float32) * 0.02
    wfc = jax.random.uniform(ks[6], (L, 32 * T), jnp.float32,
                             -1.0 / jnp.sqrt(32 * T), 1.0 / jnp.sqrt(32 * T))
    bfc = jax.random.normal(ks[7], (L,), jnp.float32) * 0.02
    return (w1, b1, w2, b2, w3, b3, wfc, bfc)


def pack_params(tp, compute_dtype=jnp.bfloat16):
    """Pack torch-layout params for the kernel.

    Conv weights (Cout, Cin, K) -> (K, Cin, Cout); fc weight (L, 32T) -> (32T, L).
    Matmul operands are cast to `compute_dtype` (bf16 = native MXU path);
    biases stay f32 (elementwise epilogue runs in f32 everywhere).
    """
    w1, b1, w2, b2, w3, b3, wfc, bfc = tp

    def pack_conv(w):
        return jnp.transpose(w, (2, 1, 0)).astype(compute_dtype)

    return (pack_conv(w1), b1[None, :].astype(jnp.float32),
            pack_conv(w2), b2[None, :].astype(jnp.float32),
            pack_conv(w3), b3[None, :].astype(jnp.float32),
            wfc.T.astype(compute_dtype), bfc[None, :].astype(jnp.float32))


# ---------------- pure-JAX reference of the PyTorch forward -------------------

def reference(x, tp, matmul_dtype=jnp.float32):
    """Torch-semantics forward; `matmul_dtype` sets the matmul operand precision
    (bf16 reproduces the kernel's MXU inputs; accumulation is always f32)."""
    w1, b1, w2, b2, w3, b3, wfc, bfc = tp
    md = matmul_dtype

    def conv1d(h, w, b):  # h: (B, Cin, T), w: (Cout, Cin, 3)
        T = h.shape[-1]
        hp = jnp.pad(h, ((0, 0), (0, 0), (1, 1)))
        stk = jnp.stack([hp[:, :, k:k + T] for k in range(3)], axis=2)  # (B,Cin,3,T)
        return jnp.einsum('oik,bikt->bot', w.astype(md), stk.astype(md),
                          preferred_element_type=jnp.float32) + b[None, :, None]

    h = jnp.transpose(x, (0, 2, 1))            # (B, F, T)
    h = jax.nn.relu(conv1d(h, w1, b1))
    h = jax.nn.relu(conv1d(h, w2, b2))
    h = jax.nn.relu(conv1d(h, w3, b3))
    h = jnp.transpose(h, (0, 2, 1)).reshape(x.shape[0], -1)   # (B, T*32)
    return jnp.dot(h.astype(md), wfc.T.astype(md),
                   preferred_element_type=jnp.float32) + bfc[None, :]


if __name__ == "__main__":
    # Small but blocking-relevant shapes: B=96 exercises batch blocking
    # (Bb=64 -> 512-row matmuls), the non-divisible tail (96 -> pad to 128),
    # and a grid of 2 parallel blocks (both TensorCores on v7x).
    B, T, F, L = 96, 8, 4, 16
    key = jax.random.PRNGKey(0)
    kx, kp = jax.random.split(key)

    x = jax.random.normal(kx, (B, T, F), jnp.float32)
    torch_params = init_torch_params(kp, F, T, L)
    packed = pack_params(torch_params)          # bf16 matmul operands

    z = conv1d_encoder_pallas(x, packed)
    z = jax.block_until_ready(z)
    assert z.shape == (B, L)

    # 1) Tight check vs a precision-matched reference (bf16 operands, f32 acc):
    #    only accumulation order differs, so this verifies the kernel math.
    z_ref_matched = reference(x, torch_params, matmul_dtype=jnp.bfloat16)
    assert jnp.allclose(z, z_ref_matched, atol=2e-3, rtol=2e-3), \
        "mismatch vs precision-matched reference"

    # 2) Loose check vs full-f32 torch semantics (tolerance covers bf16 MXU
    #    operand rounding through 3 conv layers + fc).
    z_ref_f32 = reference(x, torch_params, matmul_dtype=jnp.float32)
    assert jnp.allclose(z, z_ref_f32, atol=1e-2, rtol=5e-2), \
        "mismatch vs f32 torch-semantics reference"

    print("KERNEL_OK")
</pallas_src>

<mosaic_0001>
module attributes {stable_mosaic.version = 11 : i64} {
  func.func @encoder_kernel(%arg0: i32, %arg1: memref<64x8x4xf32, #tpu.memory_space<vmem>>, %arg2: memref<3x4x32xbf16, #tpu.memory_space<vmem>>, %arg3: memref<1x32xf32, #tpu.memory_space<vmem>>, %arg4: memref<3x32x64xbf16, #tpu.memory_space<vmem>>, %arg5: memref<1x64xf32, #tpu.memory_space<vmem>>, %arg6: memref<3x64x32xbf16, #tpu.memory_space<vmem>>, %arg7: memref<1x32xf32, #tpu.memory_space<vmem>>, %arg8: memref<256x16xbf16, #tpu.memory_space<vmem>>, %arg9: memref<1x16xf32, #tpu.memory_space<vmem>>, %arg10: memref<64x16xf32, #tpu.memory_space<vmem>>) attributes {dimension_semantics = [#tpu.dimension_semantics<parallel>], iteration_bounds = array<i64: 2>, scalar_prefetch = 0 : i64, scratch_operands = 0 : i64, tpu.core_type = #tpu.core_type<tc>, window_params = [{transform_indices = @transform_0, window_bounds = array<i64: 64, 8, 4>}, {pipeline_mode = #tpu.pipeline_mode<synchronous>, transform_indices = @transform_1, window_bounds = array<i64: 3, 4, 32>}, {pipeline_mode = #tpu.pipeline_mode<synchronous>, transform_indices = @transform_2, window_bounds = array<i64: 1, 32>}, {pipeline_mode = #tpu.pipeline_mode<synchronous>, transform_indices = @transform_3, window_bounds = array<i64: 3, 32, 64>}, {pipeline_mode = #tpu.pipeline_mode<synchronous>, transform_indices = @transform_4, window_bounds = array<i64: 1, 64>}, {pipeline_mode = #tpu.pipeline_mode<synchronous>, transform_indices = @transform_5, window_bounds = array<i64: 3, 64, 32>}, {pipeline_mode = #tpu.pipeline_mode<synchronous>, transform_indices = @transform_6, window_bounds = array<i64: 1, 32>}, {pipeline_mode = #tpu.pipeline_mode<synchronous>, transform_indices = @transform_7, window_bounds = array<i64: 256, 16>}, {pipeline_mode = #tpu.pipeline_mode<synchronous>, transform_indices = @transform_8, window_bounds = array<i64: 1, 16>}, {transform_indices = @transform_9, window_bounds = array<i64: 64, 16>}]} {
    %c0 = arith.constant 0 : index
    %c0_0 = arith.constant 0 : index
    %c0_1 = arith.constant 0 : index
    %0 = vector.load %arg1[%c0, %c0_0, %c0_1] : memref<64x8x4xf32, #tpu.memory_space<vmem>>, vector<64x8x4xf32>
    %1 = vector.shape_cast %0 : vector<64x8x4xf32> to vector<512x4xf32>
    %2 = tpu.iota {dimensions = array<i32: 0>} : vector<512x1xi32>
    %c8_i32 = arith.constant 8 : i32
    %c0_i32 = arith.constant 0 : i32
    %3 = arith.cmpi eq, %c8_i32, %c0_i32 : i32
    %c1_i32 = arith.constant 1 : i32
    %4 = arith.select %3, %c1_i32, %c8_i32 : i32
    %5 = vector.broadcast %4 : i32 to vector<512x1xi32>
    %6 = arith.remsi %2, %5 : vector<512x1xi32>
    %c0_i32_2 = arith.constant 0 : i32
    %7 = vector.broadcast %c0_i32_2 : i32 to vector<512x1xi32>
    %8 = arith.cmpi ne, %6, %7 : vector<512x1xi32>
    %c0_i32_3 = arith.constant 0 : i32
    %9 = vector.broadcast %c0_i32_3 : i32 to vector<512x1xi32>
    %10 = arith.cmpi slt, %6, %9 : vector<512x1xi32>
    %c0_i32_4 = arith.constant 0 : i32
    %11 = arith.cmpi slt, %4, %c0_i32_4 : i32
    %12 = vector.broadcast %11 : i1 to vector<512x1xi1>
    %13 = vector.broadcast %12 : vector<512x1xi1> to vector<512x1xi1>
    %14 = arith.xori %10, %13 : vector<512x1xi1>
    %15 = arith.andi %14, %8 : vector<512x1xi1>
    %16 = vector.broadcast %4 : i32 to vector<512x1xi32>
    %17 = arith.addi %6, %16 : vector<512x1xi32>
    %18 = arith.select %15, %17, %6 : vector<512x1xi1>, vector<512x1xi32>
    %c0_i32_5 = arith.constant 0 : i32
    %19 = vector.broadcast %c0_i32_5 : i32 to vector<512x1xi32>
    %20 = arith.cmpi eq, %18, %19 : vector<512x1xi32>
    %c7_i32 = arith.constant 7 : i32
    %21 = vector.broadcast %c7_i32 : i32 to vector<512x1xi32>
    %22 = arith.cmpi eq, %18, %21 : vector<512x1xi32>
    %c0_i32_6 = arith.constant 0 : i32
    %23 = arith.sitofp %c0_i32_6 : i32 to f32
    %24 = vector.broadcast %23 : f32 to vector<1x4xf32>
    %25 = tpu.concatenate %24, %1 in 0 : vector<1x4xf32>, vector<512x4xf32> -> vector<513x4xf32>
    %26 = vector.broadcast %23 : f32 to vector<1x4xf32>
    %27 = tpu.concatenate %25, %26 in 0 : vector<513x4xf32>, vector<1x4xf32> -> vector<514x4xf32>
    %28 = vector.extract_strided_slice %27 {offsets = [0, 0], sizes = [512, 4], strides = [1, 1]} : vector<514x4xf32> to vector<512x4xf32>
    %cst = arith.constant 0.000000e+00 : f32
    %29 = vector.shape_cast %20 : vector<512x1xi1> to vector<512x1xi1>
    %30 = vector.broadcast %29 : vector<512x1xi1> to vector<512x4xi1>
    %31 = vector.broadcast %cst : f32 to vector<512x4xf32>
    %32 = arith.select %30, %31, %28 : vector<512x4xi1>, vector<512x4xf32>
    %33 = vector.extract_strided_slice %27 {offsets = [2, 0], sizes = [512, 4], strides = [1, 1]} : vector<514x4xf32> to vector<512x4xf32>
    %cst_7 = arith.constant 0.000000e+00 : f32
    %34 = vector.shape_cast %22 : vector<512x1xi1> to vector<512x1xi1>
    %35 = vector.broadcast %34 : vector<512x1xi1> to vector<512x4xi1>
    %36 = vector.broadcast %cst_7 : f32 to vector<512x4xf32>
    %37 = arith.select %35, %36, %33 : vector<512x4xi1>, vector<512x4xf32>
    %38 = arith.truncf %32 : vector<512x4xf32> to vector<512x4xbf16>
    %c0_8 = arith.constant 0 : index
    %c0_9 = arith.constant 0 : index
    %c0_10 = arith.constant 0 : index
    %39 = vector.load %arg2[%c0_8, %c0_9, %c0_10] : memref<3x4x32xbf16, #tpu.memory_space<vmem>>, vector<1x4x32xbf16>
    %40 = vector.shape_cast %39 : vector<1x4x32xbf16> to vector<4x32xbf16>
    %cst_11 = arith.constant dense<0.000000e+00> : vector<512x32xf32>
    %41 = tpu.matmul %38, %40, %cst_11 {dimension_numbers = #tpu.dot_dimension_numbers<[1], [0], [0], [1], [0, 0, 1, 1], [], []>} : vector<512x4xbf16>, vector<4x32xbf16>, vector<512x32xf32> -> vector<512x32xf32>
    %42 = arith.truncf %1 : vector<512x4xf32> to vector<512x4xbf16>
    %c1 = arith.constant 1 : index
    %c0_12 = arith.constant 0 : index
    %c0_13 = arith.constant 0 : index
    %43 = vector.load %arg2[%c1, %c0_12, %c0_13] : memref<3x4x32xbf16, #tpu.memory_space<vmem>>, vector<1x4x32xbf16>
    %44 = vector.shape_cast %43 : vector<1x4x32xbf16> to vector<4x32xbf16>
    %cst_14 = arith.constant dense<0.000000e+00> : vector<512x32xf32>
    %45 = tpu.matmul %42, %44, %cst_14 {dimension_numbers = #tpu.dot_dimension_numbers<[1], [0], [0], [1], [0, 0, 1, 1], [], []>} : vector<512x4xbf16>, vector<4x32xbf16>, vector<512x32xf32> -> vector<512x32xf32>
    %46 = arith.addf %41, %45 : vector<512x32xf32>
    %47 = arith.truncf %37 : vector<512x4xf32> to vector<512x4xbf16>
    %c2 = arith.constant 2 : index
    %c0_15 = arith.constant 0 : index
    %c0_16 = arith.constant 0 : index
    %48 = vector.load %arg2[%c2, %c0_15, %c0_16] : memref<3x4x32xbf16, #tpu.memory_space<vmem>>, vector<1x4x32xbf16>
    %49 = vector.shape_cast %48 : vector<1x4x32xbf16> to vector<4x32xbf16>
    %cst_17 = arith.constant dense<0.000000e+00> : vector<512x32xf32>
    %50 = tpu.matmul %47, %49, %cst_17 {dimension_numbers = #tpu.dot_dimension_numbers<[1], [0], [0], [1], [0, 0, 1, 1], [], []>} : vector<512x4xbf16>, vector<4x32xbf16>, vector<512x32xf32> -> vector<512x32xf32>
    %51 = arith.addf %46, %50 : vector<512x32xf32>
    %c0_18 = arith.constant 0 : index
    %c0_19 = arith.constant 0 : index
    %52 = vector.load %arg3[%c0_18, %c0_19] : memref<1x32xf32, #tpu.memory_space<vmem>>, vector<1x32xf32>
    %53 = vector.broadcast %52 : vector<1x32xf32> to vector<512x32xf32>
    %54 = arith.addf %51, %53 : vector<512x32xf32>
    %cst_20 = arith.constant 0.000000e+00 : f32
    %55 = vector.broadcast %cst_20 : f32 to vector<512x32xf32>
    %56 = arith.maximumf %54, %55 : vector<512x32xf32>
    %c0_i32_21 = arith.constant 0 : i32
    %57 = arith.sitofp %c0_i32_21 : i32 to f32
    %58 = vector.broadcast %57 : f32 to vector<1x32xf32>
    %59 = tpu.concatenate %58, %56 in 0 : vector<1x32xf32>, vector<512x32xf32> -> vector<513x32xf32>
    %60 = vector.broadcast %57 : f32 to vector<1x32xf32>
    %61 = tpu.concatenate %59, %60 in 0 : vector<513x32xf32>, vector<1x32xf32> -> vector<514x32xf32>
    %62 = vector.extract_strided_slice %61 {offsets = [0, 0], sizes = [512, 32], strides = [1, 1]} : vector<514x32xf32> to vector<512x32xf32>
    %cst_22 = arith.constant 0.000000e+00 : f32
    %63 = vector.shape_cast %20 : vector<512x1xi1> to vector<512x1xi1>
    %64 = vector.broadcast %63 : vector<512x1xi1> to vector<512x32xi1>
    %65 = vector.broadcast %cst_22 : f32 to vector<512x32xf32>
    %66 = arith.select %64, %65, %62 : vector<512x32xi1>, vector<512x32xf32>
    %67 = vector.extract_strided_slice %61 {offsets = [2, 0], sizes = [512, 32], strides = [1, 1]} : vector<514x32xf32> to vector<512x32xf32>
    %cst_23 = arith.constant 0.000000e+00 : f32
    %68 = vector.shape_cast %22 : vector<512x1xi1> to vector<512x1xi1>
    %69 = vector.broadcast %68 : vector<512x1xi1> to vector<512x32xi1>
    %70 = vector.broadcast %cst_23 : f32 to vector<512x32xf32>
    %71 = arith.select %69, %70, %67 : vector<512x32xi1>, vector<512x32xf32>
    %72 = arith.truncf %66 : vector<512x32xf32> to vector<512x32xbf16>
    %c0_24 = arith.constant 0 : index
    %c0_25 = arith.constant 0 : index
    %c0_26 = arith.constant 0 : index
    %73 = vector.load %arg4[%c0_24, %c0_25, %c0_26] : memref<3x32x64xbf16, #tpu.memory_space<vmem>>, vector<1x32x64xbf16>
    %74 = vector.shape_cast %73 : vector<1x32x64xbf16> to vector<32x64xbf16>
    %cst_27 = arith.constant dense<0.000000e+00> : vector<512x64xf32>
    %75 = tpu.matmul %72, %74, %cst_27 {dimension_numbers = #tpu.dot_dimension_numbers<[1], [0], [0], [1], [0, 0, 1, 1], [], []>} : vector<512x32xbf16>, vector<32x64xbf16>, vector<512x64xf32> -> vector<512x64xf32>
    %76 = arith.truncf %56 : vector<512x32xf32> to vector<512x32xbf16>
    %c1_28 = arith.constant 1 : index
    %c0_29 = arith.constant 0 : index
    %c0_30 = arith.constant 0 : index
    %77 = vector.load %arg4[%c1_28, %c0_29, %c0_30] : memref<3x32x64xbf16, #tpu.memory_space<vmem>>, vector<1x32x64xbf16>
    %78 = vector.shape_cast %77 : vector<1x32x64xbf16> to vector<32x64xbf16>
    %cst_31 = arith.constant dense<0.000000e+00> : vector<512x64xf32>
    %79 = tpu.matmul %76, %78, %cst_31 {dimension_numbers = #tpu.dot_dimension_numbers<[1], [0], [0], [1], [0, 0, 1, 1], [], []>} : vector<512x32xbf16>, vector<32x64xbf16>, vector<512x64xf32> -> vector<512x64xf32>
    %80 = arith.addf %75, %79 : vector<512x64xf32>
    %81 = arith.truncf %71 : vector<512x32xf32> to vector<512x32xbf16>
    %c2_32 = arith.constant 2 : index
    %c0_33 = arith.constant 0 : index
    %c0_34 = arith.constant 0 : index
    %82 = vector.load %arg4[%c2_32, %c0_33, %c0_34] : memref<3x32x64xbf16, #tpu.memory_space<vmem>>, vector<1x32x64xbf16>
    %83 = vector.shape_cast %82 : vector<1x32x64xbf16> to vector<32x64xbf16>
    %cst_35 = arith.constant dense<0.000000e+00> : vector<512x64xf32>
    %84 = tpu.matmul %81, %83, %cst_35 {dimension_numbers = #tpu.dot_dimension_numbers<[1], [0], [0], [1], [0, 0, 1, 1], [], []>} : vector<512x32xbf16>, vector<32x64xbf16>, vector<512x64xf32> -> vector<512x64xf32>
    %85 = arith.addf %80, %84 : vector<512x64xf32>
    %c0_36 = arith.constant 0 : index
    %c0_37 = arith.constant 0 : index
    %86 = vector.load %arg5[%c0_36, %c0_37] : memref<1x64xf32, #tpu.memory_space<vmem>>, vector<1x64xf32>
    %87 = vector.broadcast %86 : vector<1x64xf32> to vector<512x64xf32>
    %88 = arith.addf %85, %87 : vector<512x64xf32>
    %cst_38 = arith.constant 0.000000e+00 : f32
    %89 = vector.broadcast %cst_38 : f32 to vector<512x64xf32>
    %90 = arith.maximumf %88, %89 : vector<512x64xf32>
    %c0_i32_39 = arith.constant 0 : i32
    %91 = arith.sitofp %c0_i32_39 : i32 to f32
    %92 = vector.broadcast %91 : f32 to vector<1x64xf32>
    %93 = tpu.concatenate %92, %90 in 0 : vector<1x64xf32>, vector<512x64xf32> -> vector<513x64xf32>
    %94 = vector.broadcast %91 : f32 to vector<1x64xf32>
    %95 = tpu.concatenate %93, %94 in 0 : vector<513x64xf32>, vector<1x64xf32> -> vector<514x64xf32>
    %96 = vector.extract_strided_slice %95 {offsets = [0, 0], sizes = [512, 64], strides = [1, 1]} : vector<514x64xf32> to vector<512x64xf32>
    %cst_40 = arith.constant 0.000000e+00 : f32
    %97 = vector.shape_cast %20 : vector<512x1xi1> to vector<512x1xi1>
    %98 = vector.broadcast %97 : vector<512x1xi1> to vector<512x64xi1>
    %99 = vector.broadcast %cst_40 : f32 to vector<512x64xf32>
    %100 = arith.select %98, %99, %96 : vector<512x64xi1>, vector<512x64xf32>
    %101 = vector.extract_strided_slice %95 {offsets = [2, 0], sizes = [512, 64], strides = [1, 1]} : vector<514x64xf32> to vector<512x64xf32>
    %cst_41 = arith.constant 0.000000e+00 : f32
    %102 = vector.shape_cast %22 : vector<512x1xi1> to vector<512x1xi1>
    %103 = vector.broadcast %102 : vector<512x1xi1> to vector<512x64xi1>
    %104 = vector.broadcast %cst_41 : f32 to vector<512x64xf32>
    %105 = arith.select %103, %104, %101 : vector<512x64xi1>, vector<512x64xf32>
    %106 = arith.truncf %100 : vector<512x64xf32> to vector<512x64xbf16>
    %c0_42 = arith.constant 0 : index
    %c0_43 = arith.constant 0 : index
    %c0_44 = arith.constant 0 : index
    %107 = vector.load %arg6[%c0_42, %c0_43, %c0_44] : memref<3x64x32xbf16, #tpu.memory_space<vmem>>, vector<1x64x32xbf16>
    %108 = vector.shape_cast %107 : vector<1x64x32xbf16> to vector<64x32xbf16>
    %cst_45 = arith.constant dense<0.000000e+00> : vector<512x32xf32>
    %109 = tpu.matmul %106, %108, %cst_45 {dimension_numbers = #tpu.dot_dimension_numbers<[1], [0], [0], [1], [0, 0, 1, 1], [], []>} : vector<512x64xbf16>, vector<64x32xbf16>, vector<512x32xf32> -> vector<512x32xf32>
    %110 = arith.truncf %90 : vector<512x64xf32> to vector<512x64xbf16>
    %c1_46 = arith.constant 1 : index
    %c0_47 = arith.constant 0 : index
    %c0_48 = arith.constant 0 : index
    %111 = vector.load %arg6[%c1_46, %c0_47, %c0_48] : memref<3x64x32xbf16, #tpu.memory_space<vmem>>, vector<1x64x32xbf16>
    %112 = vector.shape_cast %111 : vector<1x64x32xbf16> to vector<64x32xbf16>
    %cst_49 = arith.constant dense<0.000000e+00> : vector<512x32xf32>
    %113 = tpu.matmul %110, %112, %cst_49 {dimension_numbers = #tpu.dot_dimension_numbers<[1], [0], [0], [1], [0, 0, 1, 1], [], []>} : vector<512x64xbf16>, vector<64x32xbf16>, vector<512x32xf32> -> vector<512x32xf32>
    %114 = arith.addf %109, %113 : vector<512x32xf32>
    %115 = arith.truncf %105 : vector<512x64xf32> to vector<512x64xbf16>
    %c2_50 = arith.constant 2 : index
    %c0_51 = arith.constant 0 : index
    %c0_52 = arith.constant 0 : index
    %116 = vector.load %arg6[%c2_50, %c0_51, %c0_52] : memref<3x64x32xbf16, #tpu.memory_space<vmem>>, vector<1x64x32xbf16>
    %117 = vector.shape_cast %116 : vector<1x64x32xbf16> to vector<64x32xbf16>
    %cst_53 = arith.constant dense<0.000000e+00> : vector<512x32xf32>
    %118 = tpu.matmul %115, %117, %cst_53 {dimension_numbers = #tpu.dot_dimension_numbers<[1], [0], [0], [1], [0, 0, 1, 1], [], []>} : vector<512x64xbf16>, vector<64x32xbf16>, vector<512x32xf32> -> vector<512x32xf32>
    %119 = arith.addf %114, %118 : vector<512x32xf32>
    %c0_54 = arith.constant 0 : index
    %c0_55 = arith.constant 0 : index
    %120 = vector.load %arg7[%c0_54, %c0_55] : memref<1x32xf32, #tpu.memory_space<vmem>>, vector<1x32xf32>
    %121 = vector.broadcast %120 : vector<1x32xf32> to vector<512x32xf32>
    %122 = arith.addf %119, %121 : vector<512x32xf32>
    %cst_56 = arith.constant 0.000000e+00 : f32
    %123 = vector.broadcast %cst_56 : f32 to vector<512x32xf32>
    %124 = arith.maximumf %122, %123 : vector<512x32xf32>
    %125 = vector.shape_cast %124 : vector<512x32xf32> to vector<64x8x32xf32>
    %126 = vector.extract_strided_slice %125 {offsets = [0, 0, 0], sizes = [64, 1, 32], strides = [1, 1, 1]} : vector<64x8x32xf32> to vector<64x1x32xf32>
    %127 = vector.shape_cast %126 : vector<64x1x32xf32> to vector<64x32xf32>
    %128 = vector.extract_strided_slice %125 {offsets = [0, 1, 0], sizes = [64, 1, 32], strides = [1, 1, 1]} : vector<64x8x32xf32> to vector<64x1x32xf32>
    %129 = vector.shape_cast %128 : vector<64x1x32xf32> to vector<64x32xf32>
    %130 = vector.extract_strided_slice %125 {offsets = [0, 2, 0], sizes = [64, 1, 32], strides = [1, 1, 1]} : vector<64x8x32xf32> to vector<64x1x32xf32>
    %131 = vector.shape_cast %130 : vector<64x1x32xf32> to vector<64x32xf32>
    %132 = vector.extract_strided_slice %125 {offsets = [0, 3, 0], sizes = [64, 1, 32], strides = [1, 1, 1]} : vector<64x8x32xf32> to vector<64x1x32xf32>
    %133 = vector.shape_cast %132 : vector<64x1x32xf32> to vector<64x32xf32>
    %134 = vector.extract_strided_slice %125 {offsets = [0, 4, 0], sizes = [64, 1, 32], strides = [1, 1, 1]} : vector<64x8x32xf32> to vector<64x1x32xf32>
    %135 = vector.shape_cast %134 : vector<64x1x32xf32> to vector<64x32xf32>
    %136 = vector.extract_strided_slice %125 {offsets = [0, 5, 0], sizes = [64, 1, 32], strides = [1, 1, 1]} : vector<64x8x32xf32> to vector<64x1x32xf32>
    %137 = vector.shape_cast %136 : vector<64x1x32xf32> to vector<64x32xf32>
    %138 = vector.extract_strided_slice %125 {offsets = [0, 6, 0], sizes = [64, 1, 32], strides = [1, 1, 1]} : vector<64x8x32xf32> to vector<64x1x32xf32>
    %139 = vector.shape_cast %138 : vector<64x1x32xf32> to vector<64x32xf32>
    %140 = vector.extract_strided_slice %125 {offsets = [0, 7, 0], sizes = [64, 1, 32], strides = [1, 1, 1]} : vector<64x8x32xf32> to vector<64x1x32xf32>
    %141 = vector.shape_cast %140 : vector<64x1x32xf32> to vector<64x32xf32>
    %142 = tpu.concatenate %127, %129, %131, %133, %135, %137, %139, %141 in 1 : vector<64x32xf32>, vector<64x32xf32>, vector<64x32xf32>, vector<64x32xf32>, vector<64x32xf32>, vector<64x32xf32>, vector<64x32xf32>, vector<64x32xf32> -> vector<64x256xf32>
    %143 = arith.truncf %142 : vector<64x256xf32> to vector<64x256xbf16>
    %c0_57 = arith.constant 0 : index
    %c0_58 = arith.constant 0 : index
    %144 = vector.load %arg8[%c0_57, %c0_58] : memref<256x16xbf16, #tpu.memory_space<vmem>>, vector<256x16xbf16>
    %cst_59 = arith.constant dense<0.000000e+00> : vector<64x16xf32>
    %145 = tpu.matmul %143, %144, %cst_59 {dimension_numbers = #tpu.dot_dimension_numbers<[1], [0], [0], [1], [0, 0, 1, 1], [], []>} : vector<64x256xbf16>, vector<256x16xbf16>, vector<64x16xf32> -> vector<64x16xf32>
    %c0_60 = arith.constant 0 : index
    %c0_61 = arith.constant 0 : index
    %146 = vector.load %arg9[%c0_60, %c0_61] : memref<1x16xf32, #tpu.memory_space<vmem>>, vector<1x16xf32>
    %147 = vector.broadcast %146 : vector<1x16xf32> to vector<64x16xf32>
    %148 = arith.addf %145, %147 : vector<64x16xf32>
    %c0_62 = arith.constant 0 : index
    %c0_63 = arith.constant 0 : index
    %149 = vector.load %arg10[%c0_62, %c0_63] : memref<64x16xf32, #tpu.memory_space<vmem>>, vector<64x16xf32>
    tpu.vector_store %arg10[%c0_62, %c0_63], %148 {strides = array<i32>} : memref<64x16xf32, #tpu.memory_space<vmem>>, vector<64x16xf32>,
    return
  }
  func.func @transform_0(%arg0: i32) -> (i32, i32, i32) {
    %c0_i32 = arith.constant 0 : i32
    %c0_i32_0 = arith.constant 0 : i32
    %c0_i32_1 = arith.constant 0 : i32
    return %arg0, %c0_i32, %c0_i32_0 : i32, i32, i32
  }
  func.func @transform_1(%arg0: i32) -> (i32, i32, i32) {
    %c0_i32 = arith.constant 0 : i32
    %c0_i32_0 = arith.constant 0 : i32
    %c0_i32_1 = arith.constant 0 : i32
    %c0_i32_2 = arith.constant 0 : i32
    return %c0_i32, %c0_i32_0, %c0_i32_1 : i32, i32, i32
  }
  func.func @transform_2(%arg0: i32) -> (i32, i32) {
    %c0_i32 = arith.constant 0 : i32
    %c0_i32_0 = arith.constant 0 : i32
    %c0_i32_1 = arith.constant 0 : i32
    return %c0_i32, %c0_i32_0 : i32, i32
  }
  func.func @transform_3(%arg0: i32) -> (i32, i32, i32) {
    %c0_i32 = arith.constant 0 : i32
    %c0_i32_0 = arith.constant 0 : i32
    %c0_i32_1 = arith.constant 0 : i32
    %c0_i32_2 = arith.constant 0 : i32
    return %c0_i32, %c0_i32_0, %c0_i32_1 : i32, i32, i32
  }
  func.func @transform_4(%arg0: i32) -> (i32, i32) {
    %c0_i32 = arith.constant 0 : i32
    %c0_i32_0 = arith.constant 0 : i32
    %c0_i32_1 = arith.constant 0 : i32
    return %c0_i32, %c0_i32_0 : i32, i32
  }
  func.func @transform_5(%arg0: i32) -> (i32, i32, i32) {
    %c0_i32 = arith.constant 0 : i32
    %c0_i32_0 = arith.constant 0 : i32
    %c0_i32_1 = arith.constant 0 : i32
    %c0_i32_2 = arith.constant 0 : i32
    return %c0_i32, %c0_i32_0, %c0_i32_1 : i32, i32, i32
  }
  func.func @transform_6(%arg0: i32) -> (i32, i32) {
    %c0_i32 = arith.constant 0 : i32
    %c0_i32_0 = arith.constant 0 : i32
    %c0_i32_1 = arith.constant 0 : i32
    return %c0_i32, %c0_i32_0 : i32, i32
  }
  func.func @transform_7(%arg0: i32) -> (i32, i32) {
    %c0_i32 = arith.constant 0 : i32
    %c0_i32_0 = arith.constant 0 : i32
    %c0_i32_1 = arith.constant 0 : i32
    return %c0_i32, %c0_i32_0 : i32, i32
  }
  func.func @transform_8(%arg0: i32) -> (i32, i32) {
    %c0_i32 = arith.constant 0 : i32
    %c0_i32_0 = arith.constant 0 : i32
    %c0_i32_1 = arith.constant 0 : i32
    return %c0_i32, %c0_i32_0 : i32, i32
  }
  func.func @transform_9(%arg0: i32) -> (i32, i32) {
    %c0_i32 = arith.constant 0 : i32
    %c0_i32_0 = arith.constant 0 : i32
    return %arg0, %c0_i32 : i32, i32
  }
}

</mosaic_0001>

<bundles_post_ra>
// kernel: tpu_custom_call.1
= control target key start
LH: loop header
LB: loop body
LE: loop exit
PB: predicated region body
PF: predicated region fallthrough
CT: control target
= control target key end

     0   :  { %s11279_s30 = smov 0   ;;  %s17741_s0 = inlined_call_operand.vmem [shape: f32[128,8,4], index: 0, kind: input, shape index: {}]   ;;  %s17742_s1 = inlined_call_operand.vmem [shape: bf16[3,4,32], index: 1, kind: input, shape index: {}]   ;;  %s17743_s2 = inlined_call_operand.vmem [shape: f32[1,32], index: 2, kind: input, shape index: {}]   ;;  %s17744_s3 = inlined_call_operand.vmem [shape: bf16[3,32,64], index: 3, kind: input, shape index: {}]   ;;  %s17745_s4 = inlined_call_operand.vmem [shape: f32[1,64], index: 4, kind: input, shape index: {}]   ;;  %s17746_s5 = inlined_call_operand.vmem [shape: bf16[3,64,32], index: 5, kind: input, shape index: {}]   ;;  %s17747_s6 = inlined_call_operand.vmem [shape: f32[1,32], index: 6, kind: input, shape index: {}]   ;;  %s17748_s7 = inlined_call_operand.vmem [shape: bf16[256,16], index: 7, kind: input, shape index: {}]   ;;  %s17749_s8 = inlined_call_operand.vmem [shape: f32[1,16], index: 8, kind: input, shape index: {}]   ;;  %s17750_s9 = inlined_call_operand.vmem [shape: f32[128,16], index: 9, kind: output, shape index: {}]  }
   0x1 LB: > { %s9328_s10 = sadd.s32 4294967295, %s11224_s30   ;;  %p9332_p0 = scmp.ge.s32.totalorder %s11224_s30, 1  ;;  %s11224_s30 = sphi %s11279_s30, %s19_s30  }
   0x2   : > { %p288_p1 = scmp.lt.s32.totalorder %s11224_s30, 3 }
   0x4   : > { %p289_p2 = pnand %p9332_p0, %p288_p1 }
   0x6   : > { %292 = sbr.rel (%p289_p2) target bundleno = 2022 (0x7e6), region = 56 }
   0xd   : > { %v9337_v0 = vld [vmem:[%s17742_s1 + $0x2] sm:$0x3]  ;;  %vm2365_vm0 = vcmask 1041408   ;;  %s9333_s13 = sshll.u32 %s9328_s10, 6  ;;  %v401_v1 = vlaneseq  ;;  %v2233_v3 = vld [vmem:[%s17742_s1] sm:$0x3] }
   0xe   : > { %11044 = vmatprep.subr.msk.bf16.mxu1 %vm2365_vm0, %v9337_v0  ;;  %v2367_v2 = vsel %vm2365_vm0, %v9337_v0, 0  ;;  %p325_p3 = scmp.lt.s32.totalorder %s9333_s13, 127  ;;  %11045 = vmatprep.subr.msk.bf16.mxu0 %vm2365_vm0, %v2233_v3  ;;  %v2755_v4 = vsel %vm2365_vm0, %v2233_v3, 0  ;;  %v9402_v6 = vld [vmem:[%s17742_s1 + $0x4] sm:$0x3]  ;;  %vm17759_vm1 = vcmask 1040384  }
   0xf   : > { %10041 = vmatpush3.bf16.msra.mxu1 %v2367_v2  ;;  %v11299_v5 = vshrl.u32 %v401_v1, 7  ;;  %10107 = vmatpush3.bf16.msra.mxu0 %v2755_v4  ;;  %vm17757_vm2 = vcmask 31744   ;;  %vm17751_vm3 = vcmask 1045504   ;;  %v11313_v11 = vsel %vm2365_vm0, %v9402_v6, 0  ;;  %s11226_s19 = smov 32   ;;  %s11227_s20 = smov 64  }
  0x10   : > { %s20536_s13 = smov (!%p325_p3, %s9333_s13), 127  ;;  %11046 = vmatprep.subr.msk.bf16.mxu1 %vm2365_vm0, %v2233_v3  ;;  %11047 = vmatprep.subr.msk.bf16.mxu0 %vm2365_vm0, %v9402_v6  ;;  %v18445_v20 = vmov 0  ;;  %v18448_v30 = vmov 0  ;;  %v18451_v35 = vmov 0  ;;  %v18454_v43 = vmov 0  ;;  %s11228_s25 = smov 96  }
  0x11   : > { %v11306_v7 = vadd.s32 8, %v11299_v5  ;;  %v17771_v8 = vand.u32 7, %v11299_v5  ;;  %v404_v9 = vadd.s32 16, %v11299_v5  ;;  %v405_v10 = vadd.s32 24, %v11299_v5  ;;  %s9334_s18 = sshll.u32 %s20536_s13, 3 }
  0x12   : > { %v11316_v12 = vadd.s32 32, %v11299_v5  ;;  %s11321_s21 = scalar_lea.vmem %s17741_s0, %s9334_s18  ;;  %v11325_v15 = vadd.s32 40, %v11299_v5  ;;  %v11328_v16 = vadd.s32 48, %v11299_v5  ;;  %v11340_v22 = vadd.s32 56, %v11299_v5 }
  0x13   : > { %v17770_v13 = vand.u32 7, %v11306_v7  ;;  %v484_v14 = vand.u32 7, %v404_v9  ;;  %v337_v17 = vld [vmem:[%s11321_s21] sm:$0xff]  ;;  %v338_v18 = vld [vmem:[%s11321_s21 + $0x8] sm:$0xff]  ;;  %v339_v19 = vld [vmem:[%s11321_s21 + $0x10] sm:$0xff]  ;;  %vm11335_vm4 = vcmp.eq.s32.totalorder %v17771_v8, 0 }
  0x14   : > { %v18446_v20 = vsel %vm11335_vm4, 4294967295, %v18445_v20  ;;  %v491_v21 = vand.u32 7, %v405_v10  ;;  %v1427_v23 = vrot.slane %v337_v17, 7  ;;  %v1428_v24 = vrot.slane %v338_v18, 7  ;;  %v340_v27 = vld [vmem:[%s11321_s21 + $0x18] sm:$0xff]  ;;  %v341_v36 = vld [vmem:[%s11321_s21 + $0x20] sm:$0xff] }
  0x15   : > { %18447 = vst [vmem:[#allocation2_spill] sm:$0xff] %v18446_v20  ;;  %v1430_v25 = vrot.slane %v339_v19, 7  ;;  %v2234_v26 = vpack.c.bf16 %v338_v18, %v337_v17  ;;  %v1432_v28 = vrot.slane %v340_v27, 7  ;;  %v2235_v29 = vpack.c.bf16 %v340_v27, %v339_v19  ;;  %v342_v44 = vld [vmem:[%s11321_s21 + $0x28] sm:$0xff]  ;;  %v343_v45 = vld [vmem:[%s11321_s21 + $0x30] sm:$0xff]  ;;  %v344_v51 = vld [vmem:[%s11321_s21 + $0x38] sm:$0xff] }
  0x16   : > { %vm11345_vm5 = vcmp.eq.s32.totalorder %v17770_v13, 0  ;;  %v17769_v31 = vand.u32 7, %v11316_v12  ;;  %v1429_v33 = vsel %vm17759_vm1, %v1427_v23, %v1428_v24  ;;  %v1619_v34 = vsel %vm17759_vm1, 0.0, %v1427_v23 }
  0x17   : > { %v18449_v30 = vsel %vm11345_vm5, 4294967295, %v18448_v30  ;;  %v1431_v32 = vsel %vm17759_vm1, %v1428_v24, %v1430_v25  ;;  %10042 = vmatprep.mubr.msk.bf16.mxu1 %vm17757_vm2, %v2234_v26  ;;  %vm11354_vm6 = vcmp.eq.s32.totalorder %v484_v14, 0  ;;  %v1749_v38 = vsel %vm11335_vm4, 0.0, %v1619_v34  ;;  %v348_v26 = vld [vmem:[%s11321_s21 + $0x58] sm:$0xff] }
  0x18   : > { %18450 = vst [vmem:[#allocation3_spill] sm:$0xff] %v18449_v30  ;;  %v18452_v35 = vsel %vm11354_vm6, 4294967295, %v18451_v35  ;;  %v1947_v37 = vrot.slane %v1431_v32, 2  ;;  %10043 = vmatmul.mubr.msk.bf16.vlgmr.msra.gmra.mrb[0].mxu1 %vm17757_vm2, %v2235_v29  ;;  %v1750_v39 = vsel %vm11345_vm5, 0.0, %v1429_v33  ;;  %v1944_v40 = vrot.slane %v1619_v34, 2 }
  0x19   : > { %18453 = vst [vmem:[#allocation4_spill] sm:$0xff] %v18452_v35  ;;  %v1945_v41 = vrot.slane %v1429_v33, 2  ;;  %v2201_v42 = vpack.c.bf16 %v1750_v39, %v1749_v38  ;;  %vm11364_vm7 = vcmp.eq.s32.totalorder %v491_v21, 0  ;;  %v17768_v46 = vand.u32 7, %v11325_v15  ;;  %10659 = vmatpush3.bf16.msra.mxu1 %v2755_v4 }
  0x1a   : > { %v18455_v43 = vsel %vm11364_vm7, 4294967295, %v18454_v43  ;;  %vm11371_vm8 = vcmp.eq.s32.totalorder %v484_v14, 7  ;;  %v18457_v47 = vmov 0  ;;  %v1433_v48 = vsel %vm17759_vm1, %v1430_v25, %v1432_v28  ;;  %v345_v14 = vld [vmem:[%s11321_s21 + $0x40] sm:$0xff]  ;;  %v347_v25 = vld [vmem:[%s11321_s21 + $0x50] sm:$0xff] }
  0x1b   : > { %18456 = vst [vmem:[#allocation5_spill] sm:$0xff] %v18455_v43  ;;  %v18458_v47 = vsel %vm11371_vm8, 4294967295, %v18457_v47  ;;  %v1751_v49 = vsel %vm11354_vm6, 0.0, %v1431_v32  ;;  %v1434_v50 = vrot.slane %v341_v36, 7  ;;  %v11380_v52 = vsel %vm17751_vm3, %v1944_v40, %v1945_v41  ;;  %10108 = vmatprep.mubr.msk.bf16.mxu0 %vm17757_vm2, %v2201_v42 }
  0x1c   : > { %18459 = vst [vmem:[#allocation6_spill] sm:$0xff] %v18458_v47  ;;  %v11383_v53 = vsel %vm17751_vm3, %v1945_v41, %v1947_v37  ;;  %v1752_v54 = vsel %vm11364_vm7, 0.0, %v1433_v48  ;;  %v1949_v55 = vrot.slane %v1433_v48, 2  ;;  %v1436_v57 = vrot.slane %v342_v44, 7 }
  0x1d   : > { %v2202_v56 = vpack.c.bf16 %v1752_v54, %v1751_v49  ;;  %v2236_v58 = vpack.c.bf16 %v342_v44, %v341_v36  ;;  %v1438_v59 = vrot.slane %v343_v45, 7  ;;  %v1440_v61 = vrot.slane %v344_v51, 7 }
  0x1e   : > { %v1950_v60 = vsel %vm17751_vm3, %v1947_v37, %v1949_v55  ;;  %v2237_v62 = vpack.c.bf16 %v344_v51, %v343_v45  ;;  %vm11391_vm9 = vcmp.eq.s32.totalorder %v17769_v31, 0  ;;  %v18460_v63 = vmov 0 }
  0x1f   : > { %v18461_v63 = vsel %vm11391_vm9, 4294967295, %v18460_v63  ;;  %vm11395_vm10 = vcmp.eq.s32.totalorder %v491_v21, 7  ;;  %v18463_v0 = vmov 0  ;;  %10109 = vmatmul.mubr.msk.bf16.vlgmr.msra.gmra.mrb[0].mxu0 %vm17757_vm2, %v2202_v56  ;;  %10046 = vmatprep.mubr.msk.bf16.mxu1 %vm17757_vm2, %v2236_v58  ;;  %vm11403_vm11 = vcmp.eq.s32.totalorder %v17768_v46, 0  ;;  %v346_v21 = vld [vmem:[%s11321_s21 + $0x48] sm:$0xff] }
  0x20   : > { %18462 = vst [vmem:[#allocation7_spill] sm:$0xff] %v18461_v63  ;;  %v18464_v0 = vsel %vm11395_vm10, 4294967295, %v18463_v0  ;;  %v18466_v1 = vmov 0  ;;  %v11408_v2 = vsel %vm17759_vm1, %v1432_v28, %v1434_v50  ;;  %v11411_v3 = vsel %vm17759_vm1, %v1434_v50, %v1436_v57  ;;  %10173 = vmatpush3.bf16.msra.mxu0 %v11313_v11  ;;  %10047 = vmatmul.mubr.msk.bf16.gmra.mrb[4].mxu1 %vm17757_vm2, %v2237_v62  ;;  %v349_v50 = vld [vmem:[%s11321_s21 + $0x60] sm:$0xff]  ;;  %v350_v62 = vld [vmem:[%s11321_s21 + $0x68] sm:$0xff] }
  0x21   : > { %18465 = vst [vmem:[#allocation8_spill] sm:$0xff] %v18464_v0  ;;  %v18467_v1 = vsel %vm11403_vm11, 4294967295, %v18466_v1  ;;  %v2139_v4 = vsel %vm11371_vm8, 0.0, %v1950_v60  ;;  %v1753_v6 = vsel %vm11391_vm9, 0.0, %v11408_v2  ;;  %v1754_v9 = vsel %vm11403_vm11, 0.0, %v11411_v3  ;;  %v11723_v0 = vld [vmem:[%s11321_s21 + $0xd8] sm:$0xff] }
  0x22   : > { %18468 = vst [vmem:[#allocation9_spill] sm:$0xff] %v18467_v1  ;;  %v17766_v10 = vrot.slane %v11408_v2, 2  ;;  %v2203_v17 = vpack.c.bf16 %v1754_v9, %v1753_v6  ;;  %v17765_v18 = vand.u32 7, %v11328_v16  ;;  %v17764_v19 = vand.u32 7, %v11340_v22  ;;  %v351_v9 = vld [vmem:[%s11321_s21 + $0x70] sm:$0xff] }
  0x23   : > { %v11428_v11 = vsel %vm17759_vm1, %v1436_v57, %v1438_v59  ;;  %v11435_v24 = vsel %vm17759_vm1, %v1438_v59, %v1440_v61  ;;  %v18469_v28 = vmov 0  ;;  %v18472_v29 = vmov 0 }
  0x24   : > { %v1952_v23 = vsel %vm17751_vm3, %v1949_v55, %v17766_v10  ;;  %10112 = vmatprep.mubr.msk.bf16.mxu0 %vm17757_vm2, %v2203_v17  ;;  %vm11444_vm12 = vcmp.eq.s32.totalorder %v17765_v18, 0  ;;  %vm11450_vm13 = vcmp.eq.s32.totalorder %v17764_v19, 0  ;;  %v1442_v32 = vrot.slane %v345_v14, 7 }
  0x25   : > { %v2140_v27 = vsel %vm11395_vm10, 0.0, %v1952_v23  ;;  %v18470_v28 = vsel %vm11444_vm12, 4294967295, %v18469_v28  ;;  %v18473_v29 = vsel %vm11450_vm13, 4294967295, %v18472_v29  ;;  %v1755_v34 = vsel %vm11444_vm12, 0.0, %v11428_v11 }
  0x26   : > { %18471 = vst [vmem:[#allocation10_spill] sm:$0xff] %v18470_v28  ;;  %18474 = vst [vmem:[#allocation11_spill] sm:$0xff] %v18473_v29  ;;  %v11454_v33 = vpack.c.bf16 %v2140_v27, %v2139_v4  ;;  %v1756_v36 = vsel %vm11450_vm13, 0.0, %v11435_v24  ;;  %v1444_v37 = vrot.slane %v346_v21, 7  ;;  %v2238_v39 = vpack.c.bf16 %v346_v21, %v345_v14  ;;  %v352_v14 = vld [vmem:[%s11321_s21 + $0x78] sm:$0xff] }
  0x27   : > { %v2204_v38 = vpack.c.bf16 %v1756_v36, %v1755_v34  ;;  %v1446_v40 = vrot.slane %v347_v25, 7  ;;  %v1448_v41 = vrot.slane %v348_v26, 7  ;;  %v2239_v42 = vpack.c.bf16 %v348_v26, %v347_v25 }
  0x28   : > { %v11463_v44 = vadd.s32 64, %v11299_v5  ;;  %v11466_v45 = vadd.s32 72, %v11299_v5  ;;  %10050 = vmatprep.mubr.msk.bf16.mxu1 %vm17757_vm2, %v2238_v39  ;;  %v11471_v48 = vadd.s32 80, %v11299_v5  ;;  %v11474_v49 = vadd.s32 88, %v11299_v5 }
  0x29   : > { %10113 = vmatmul.mubr.msk.bf16.gmra.mrb[4].mxu0 %vm17757_vm2, %v2204_v38  ;;  %v11480_v55 = vsel %vm17759_vm1, %v1440_v61, %v1442_v32  ;;  %v11483_v56 = vsel %vm17759_vm1, %v1442_v32, %v1444_v37  ;;  %10051 = vmatmul.mubr.msk.bf16.gmra.mrb[8].mxu1 %vm17757_vm2, %v2239_v42  ;;  %v11489_v59 = vsel %vm17759_vm1, %v1444_v37, %v1446_v40  ;;  %v18475_v61 = vmov 0 }
  0x2a   : > { %v17760_v51 = vand.u32 7, %v11463_v44  ;;  %v17754_v54 = vand.u32 7, %v11466_v45  ;;  %v17753_v57 = vand.u32 7, %v11471_v48  ;;  %v17752_v58 = vand.u32 7, %v11474_v49 }
  0x2b   : > { %v11492_v60 = vsel %vm17759_vm1, %v1446_v40, %v1448_v41  ;;  %v18478_v4 = vmov 0  ;;  %v1450_v6 = vrot.slane %v349_v50, 7  ;;  %v18481_v23 = vmov 0 }
  0x2c   : > { %vm11497_vm14 = vcmp.eq.s32.totalorder %v17760_v51, 0  ;;  %vm11503_vm15 = vcmp.eq.s32.totalorder %v17754_v54, 0  ;;  %vm11517_vm0 = vcmp.eq.s32.totalorder %v17753_v57, 0  ;;  %vm11523_vm3 = vcmp.eq.s32.totalorder %v17752_v58, 0  ;;  %v354_v57 = vld [vmem:[%s11321_s21 + $0x88] sm:$0xff]  ;;  %v355_v54 = vld [vmem:[%s11321_s21 + $0x90] sm:$0xff] }
  0x2d   : > { %v18476_v61 = vsel %vm11497_vm14, 4294967295, %v18475_v61  ;;  %v18479_v4 = vsel %vm11503_vm15, 4294967295, %v18478_v4  ;;  %v1757_v17 = vsel %vm11497_vm14, 0.0, %v11480_v55  ;;  %v1758_v21 = vsel %vm11503_vm15, 0.0, %v11483_v56 }
  0x2e   : > { %18477 = vst [vmem:[#allocation12_spill] sm:$0xff] %v18476_v61  ;;  %18480 = vst [vmem:[#allocation13_spill] sm:$0xff] %v18479_v4  ;;  %v18482_v23 = vsel %vm11517_vm0, 4294967295, %v18481_v23  ;;  %v18484_v25 = vmov 0  ;;  %v2205_v26 = vpack.c.bf16 %v1758_v21, %v1757_v17  ;;  %v1759_v27 = vsel %vm11517_vm0, 0.0, %v11489_v59 }
  0x2f   : > { %18483 = vst [vmem:[#allocation14_spill] sm:$0xff] %v18482_v23  ;;  %v18485_v25 = vsel %vm11523_vm3, 4294967295, %v18484_v25  ;;  %v1760_v32 = vsel %vm11523_vm3, 0.0, %v11492_v60  ;;  %v1452_v34 = vrot.slane %v350_v62, 7  ;;  %v2240_v37 = vpack.c.bf16 %v350_v62, %v349_v50  ;;  %v353_v62 = vld [vmem:[%s11321_s21 + $0x80] sm:$0xff] }
  0x30   : > { %18486 = vst [vmem:[#allocation15_spill] sm:$0xff] %v18485_v25  ;;  %v2206_v36 = vpack.c.bf16 %v1760_v32, %v1759_v27  ;;  %v1454_v38 = vrot.slane %v351_v9, 7  ;;  %v1456_v39 = vrot.slane %v352_v14, 7  ;;  %10116 = vmatprep.mubr.msk.bf16.mxu0 %vm17757_vm2, %v2205_v26  ;;  %v2241_v40 = vpack.c.bf16 %v352_v14, %v351_v9 }
  0x31   : > { %v11535_v42 = vadd.s32 96, %v11299_v5  ;;  %v11538_v17 = vadd.s32 104, %v11299_v5  ;;  %10054 = vmatprep.mubr.msk.bf16.mxu1 %vm17757_vm2, %v2240_v37  ;;  %v11543_v21 = vadd.s32 112, %v11299_v5  ;;  %v11546_v50 = vadd.s32 120, %v11299_v5 }
  0x32   : > { %10117 = vmatmul.mubr.msk.bf16.gmra.mrb[8].mxu0 %vm17757_vm2, %v2206_v36  ;;  %v11552_v26 = vsel %vm17759_vm1, %v1448_v41, %v1450_v6  ;;  %v11555_v27 = vsel %vm17759_vm1, %v1450_v6, %v1452_v34  ;;  %10055 = vmatmul.mubr.msk.bf16.gmra.mrb[12].mxu1 %vm17757_vm2, %v2241_v40  ;;  %v11561_v37 = vsel %vm17759_vm1, %v1452_v34, %v1454_v38  ;;  %v18492_v41 = vmov 0  ;;  %v11581_v34 = vld [vmem:[%s11321_s21 + $0x98] sm:$0xff] }
  0x33   : > { %18487 = vst [vmem:[#allocation16_spill] sm:$0xff] %v11543_v21  ;;  %18488 = vst [vmem:[#allocation17_spill] sm:$0xff] %v11546_v50  ;;  %v17758_v9 = vand.u32 7, %v11535_v42  ;;  %v17763_v14 = vand.u32 7, %v11538_v17  ;;  %v17767_v32 = vand.u32 7, %v11543_v21  ;;  %v17774_v36 = vand.u32 7, %v11546_v50 }
  0x34   : > { %18489 = vst [vmem:[#allocation18_spill] sm:$0xff] %v11555_v27  ;;  %18490 = vst [vmem:[#allocation19_spill] sm:$0xff] %v11561_v37  ;;  %v11564_v58 = vsel %vm17759_vm1, %v1454_v38, %v1456_v39  ;;  %v18495_v6 = vmov 0  ;;  %v1458_v40 = vrot.slane %v353_v62, 7  ;;  %v18498_v51 = vmov 0 }
  0x35   : > { %18491 = vst [vmem:[#allocation20_spill] sm:$0xff] %v11564_v58  ;;  %vm11570_vm3 = vcmp.eq.s32.totalorder %v17758_v9, 0  ;;  %vm11576_vm2 = vcmp.eq.s32.totalorder %v17763_v14, 0  ;;  %vm11591_vm1 = vcmp.eq.s32.totalorder %v17767_v32, 0  ;;  %vm11597_vm0 = vcmp.eq.s32.totalorder %v17774_v36, 0 }
  0x36   : > { %v18493_v41 = vsel %vm11570_vm3, 4294967295, %v18492_v41  ;;  %v18496_v6 = vsel %vm11576_vm2, 4294967295, %v18495_v6  ;;  %v1761_v38 = vsel %vm11570_vm3, 0.0, %v11552_v26  ;;  %v1762_v9 = vsel %vm11576_vm2, 0.0, %v11555_v27 }
  0x37   : > { %18494 = vst [vmem:[#allocation21_spill] sm:$0xff] %v18493_v41  ;;  %18497 = vst [vmem:[#allocation22_spill] sm:$0xff] %v18496_v6  ;;  %v18499_v51 = vsel %vm11591_vm1, 4294967295, %v18498_v51  ;;  %v18501_v14 = vmov 0  ;;  %v2207_v19 = vpack.c.bf16 %v1762_v9, %v1761_v38  ;;  %v1763_v18 = vsel %vm11591_vm1, 0.0, %v11561_v37 }
  0x38   : > { %18500 = vst [vmem:[#allocation23_spill] sm:$0xff] %v18499_v51  ;;  %v18502_v14 = vsel %vm11597_vm0, 4294967295, %v18501_v14  ;;  %v1764_v10 = vsel %vm11597_vm0, 0.0, %v11564_v58  ;;  %v1460_v32 = vrot.slane %v354_v57, 7  ;;  %v2242_v31 = vpack.c.bf16 %v354_v57, %v353_v62  ;;  %v359_v57 = vld [vmem:[%s11321_s21 + $0xb0] sm:$0xff] }
  0x39   : > { %18503 = vst [vmem:[#allocation24_spill] sm:$0xff] %v18502_v14  ;;  %v2208_v46 = vpack.c.bf16 %v1764_v10, %v1763_v18  ;;  %v1462_v13 = vrot.slane %v355_v54, 7  ;;  %v1464_v8 = vrot.slane %v11581_v34, 7  ;;  %vm18504_vm2 = vcmask 31744  }
  0x3a   : > { %10120 = vmatprep.mubr.msk.bf16.mxu0 %vm18504_vm2, %v2207_v19  ;;  %v2243_v36 = vpack.c.bf16 %v11581_v34, %v355_v54  ;;  %v11611_v9 = vadd.s32 128, %v11299_v5  ;;  %v11614_v38 = vadd.s32 136, %v11299_v5  ;;  %vm18507_vm1 = vmmov %vm18504_vm2  ;;  %v11619_v10 = vadd.s32 144, %v11299_v5  ;;  %v357_v19 = vld [vmem:[%s11321_s21 + $0xa0] sm:$0xff]  ;;  %v358_v54 = vld [vmem:[%s11321_s21 + $0xa8] sm:$0xff] }
  0x3b   : > { %10121 = vmatmul.mubr.msk.bf16.gmra.mrb[12].mxu0 %vm18507_vm1, %v2208_v46  ;;  %vm18508_vm0 = vmmov %vm18507_vm1  ;;  %v11622_v18 = vadd.s32 152, %v11299_v5  ;;  %vm18511_vm2 = vcmask 1040384   ;;  %v18518_v6 = vmov 0  ;;  %v11657_v46 = vld [vmem:[%s11321_s21 + $0xb8] sm:$0xff]  ;;  %v18525_v41 = vmov 0 }
  0x3c   : > { %18505 = vst [vmem:[#allocation25_spill] sm:$0xff] %v11611_v9  ;;  %18506 = vst [vmem:[#allocation26_spill] sm:$0xff] %v11614_v38  ;;  %10058 = vmatprep.mubr.msk.bf16.mxu1 %vm18508_vm0, %v2242_v31  ;;  %v11628_v62 = vsel %vm18511_vm2, %v1456_v39, %v1458_v40  ;;  %v17801_v31 = vand.u32 7, %v11619_v10  ;;  %v18517_v39 = vand.u32 7, %v11611_v9  ;;  %v18529_v25 = vmov 0 }
  0x3d   : > { %18509 = vst [vmem:[#allocation27_spill] sm:$0xff] %v11619_v10  ;;  %18510 = vst [vmem:[#allocation28_spill] sm:$0xff] %v11622_v18  ;;  %v1468_v4 = vrot.slane %v358_v54, 7  ;;  %v2244_v61 = vpack.c.bf16 %v358_v54, %v357_v19  ;;  %v1470_v29 = vrot.slane %v359_v57, 7  ;;  %v1472_v28 = vrot.slane %v11657_v46, 7 }
  0x3e   : > { %18512 = vst [vmem:[#allocation29_spill] sm:$0xff] %v11628_v62  ;;  %vm18513_vm3 = vmmov %vm18511_vm2  ;;  %v18553_v1 = vmov 0  ;;  %v18557_v63 = vmov 0  ;;  %v1480_v20 = vrot.slane %v11723_v0, 7  ;;  %v18628_v58 = vmov 0 }
  0x3f   : > { %v11631_v34 = vsel %vm18513_vm3, %v1458_v40, %v1460_v32  ;;  %vm18514_vm1 = vmmov %vm18508_vm0  ;;  %v18522_v40 = vmov 0  ;;  %vm18933_vm12 = vcmask 31744   ;;  %vm19190_vm10 = vcmask 31744  }
  0x40   : > { %10059 = vmatmul.mubr.msk.bf16.gmra.mrb[16].mxu1 %vm18514_vm1, %v2243_v36  ;;  %vm18515_vm0 = vmmov %vm18511_vm2  ;;  %vm11646_vm2 = vcmp.eq.s32.totalorder %v18517_v39, 0  ;;  %v18521_v36 = vand.u32 7, %v11614_v38 }
  0x41   : > { %v11637_v14 = vsel %vm18515_vm0, %v1460_v32, %v1462_v13  ;;  %vm18516_vm15 = vmmov %vm18515_vm0  ;;  %v18519_v6 = vsel %vm11646_vm2, 4294967295, %v18518_v6  ;;  %v1466_v32 = vrot.slane %v357_v19, 7  ;;  %vm18532_vm0 = vcmask 31744  }
  0x42   : > { %v11640_v51 = vsel %vm18516_vm15, %v1462_v13, %v1464_v8  ;;  %18520 = vst [vmem:[#allocation30_spill] sm:$0xff] %v18519_v6  ;;  %vm11652_vm3 = vcmp.eq.s32.totalorder %v18521_v36, 0  ;;  %v1765_v13 = vsel %vm11646_vm2, 0.0, %v11628_v62  ;;  %vm11667_vm15 = vcmp.eq.s32.totalorder %v17801_v31, 0 }
  0x43   : > { %v18523_v40 = vsel %vm11652_vm3, 4294967295, %v18522_v40  ;;  %v1766_v39 = vsel %vm11652_vm3, 0.0, %v11631_v34  ;;  %v18526_v41 = vsel %vm11667_vm15, 4294967295, %v18525_v41  ;;  %v18528_v36 = vand.u32 7, %v11622_v18 }
  0x44   : > { %18524 = vst [vmem:[#allocation31_spill] sm:$0xff] %v18523_v40  ;;  %18527 = vst [vmem:[#allocation32_spill] sm:$0xff] %v18526_v41  ;;  %v2209_v23 = vpack.c.bf16 %v1766_v39, %v1765_v13  ;;  %v1767_v6 = vsel %vm11667_vm15, 0.0, %v11637_v14  ;;  %v2245_v13 = vpack.c.bf16 %v11657_v46, %v359_v57  ;;  %v11688_v39 = vadd.s32 160, %v11299_v5  ;;  %v363_v57 = vld [vmem:[%s11321_s21 + $0xd0] sm:$0xff] }
  0x45   : > { %vm11673_vm1 = vcmp.eq.s32.totalorder %v18528_v36, 0  ;;  %v361_v36 = vld [vmem:[%s11321_s21 + $0xc0] sm:$0xff]  ;;  %v11691_v41 = vadd.s32 168, %v11299_v5  ;;  %vm18536_vm15 = vmmov %vm18532_vm0  ;;  %v11701_v19 = vadd.s32 184, %v11299_v5  ;;  %v1478_v43 = vrot.slane %v363_v57, 7 }
  0x46   : > { %v18530_v25 = vsel %vm11673_vm1, 4294967295, %v18529_v25  ;;  %v1768_v40 = vsel %vm11673_vm1, 0.0, %v11640_v51  ;;  %10124 = vmatprep.mubr.msk.bf16.mxu0 %vm18532_vm0, %v2209_v23  ;;  %18533 = vst [vmem:[#allocation34_spill] sm:$0xff] %v11688_v39  ;;  %vm18535_vm1 = vmmov %vm18532_vm0  ;;  %10062 = vmatprep.mubr.msk.bf16.mxu1 %vm18536_vm15, %v2244_v61  ;;  %v11698_v23 = vadd.s32 176, %v11299_v5  ;;  %vm18539_vm0 = vcmask 1040384  }
  0x47   : > { %18531 = vst [vmem:[#allocation33_spill] sm:$0xff] %v18530_v25  ;;  %v2210_v31 = vpack.c.bf16 %v1768_v40, %v1767_v6  ;;  %18534 = vst [vmem:[#allocation35_spill] sm:$0xff] %v11691_v41  ;;  %v11706_v46 = vsel %vm18539_vm0, %v1464_v8, %v1466_v32  ;;  %v362_v6 = vld [vmem:[%s11321_s21 + $0xc8] sm:$0xff]  ;;  %v18647_v62 = vand.u32 7, %v11306_v7 }
  0x48   : > { %18537 = vst [vmem:[#allocation36_spill] sm:$0xff] %v11698_v23  ;;  %18538 = vst [vmem:[#allocation37_spill] sm:$0xff] %v11701_v19  ;;  %10063 = vmatmul.mubr.msk.bf16.gmra.mrb[20].mxu1 %vm18535_vm1, %v2245_v13  ;;  %v18545_v13 = vmov 0  ;;  %v1476_v30 = vrot.slane %v362_v6, 7  ;;  %v2246_v35 = vpack.c.bf16 %v362_v6, %v361_v36 }
  0x49   : > { %10125 = vmatmul.mubr.msk.bf16.gmra.mrb[16].mxu0 %vm18535_vm1, %v2210_v31  ;;  %vm18540_vm3 = vmmov %vm18539_vm0  ;;  %v18548_v31 = vand.u32 7, %v11691_v41  ;;  %vm12001_vm14 = vcmp.eq.s32.totalorder %v18647_v62, 7 }
  0x4a   : > { %v11709_v40 = vsel %vm18540_vm3, %v1466_v32, %v1468_v4  ;;  %vm18542_vm15 = vmmov %vm18539_vm0  ;;  %v18544_v32 = vand.u32 7, %v11688_v39 }
  0x4b   : > { %18541 = vst [vmem:[#allocation38_spill] sm:$0xff] %v11709_v40  ;;  %v11716_v25 = vsel %vm18542_vm15, %v1468_v4, %v1470_v29  ;;  %vm18543_vm2 = vmmov %vm18539_vm0  ;;  %vm11734_vm0 = vcmp.eq.s32.totalorder %v18548_v31, 0  ;;  %v18549_v4 = vmov 0  ;;  %v18556_v31 = vand.u32 7, %v11701_v19  ;;  %v11802_v19 = vld [vmem:[%s11321_s21 + $0xf8] sm:$0xff] }
  0x4c   : > { %v11719_v54 = vsel %vm18543_vm2, %v1470_v29, %v1472_v28  ;;  %vm11728_vm3 = vcmp.eq.s32.totalorder %v18544_v32, 0  ;;  %v18550_v4 = vsel %vm11734_vm0, 4294967295, %v18549_v4  ;;  %v1474_v29 = vrot.slane %v361_v36, 7  ;;  %v366_v36 = vld [vmem:[%s11321_s21 + $0xe8] sm:$0xff] }
  0x4d   : > { %v18546_v13 = vsel %vm11728_vm3, 4294967295, %v18545_v13  ;;  %18551 = vst [vmem:[#allocation40_spill] sm:$0xff] %v18550_v4  ;;  %v1769_v61 = vsel %vm11728_vm3, 0.0, %v11706_v46  ;;  %v1770_v8 = vsel %vm11734_vm0, 0.0, %v11709_v40  ;;  %v18552_v32 = vand.u32 7, %v11698_v23 }
  0x4e   : > { %18547 = vst [vmem:[#allocation39_spill] sm:$0xff] %v18546_v13  ;;  %vm11752_vm1 = vcmp.eq.s32.totalorder %v18556_v31, 0  ;;  %v2211_v47 = vpack.c.bf16 %v1770_v8, %v1769_v61  ;;  %v365_v31 = vld [vmem:[%s11321_s21 + $0xe0] sm:$0xff]  ;;  %vm18560_vm15 = vcmask 31744   ;;  %v2247_v61 = vpack.c.bf16 %v11723_v0, %v363_v57  ;;  %v367_v57 = vld [vmem:[%s11321_s21 + $0xf0] sm:$0xff] }
  0x4f   : > { %vm11746_vm2 = vcmp.eq.s32.totalorder %v18552_v32, 0  ;;  %v18558_v63 = vsel %vm11752_vm1, 4294967295, %v18557_v63  ;;  %v1772_v4 = vsel %vm11752_vm1, 0.0, %v11719_v54  ;;  %v11767_v8 = vadd.s32 192, %v11299_v5  ;;  %vm18563_vm1 = vmmov %vm18560_vm15 }
  0x50   : > { %v18554_v1 = vsel %vm11746_vm2, 4294967295, %v18553_v1  ;;  %18559 = vst [vmem:[#allocation42_spill] sm:$0xff] %v18558_v63  ;;  %v1771_v13 = vsel %vm11746_vm2, 0.0, %v11716_v25  ;;  %10128 = vmatprep.mubr.msk.bf16.mxu0 %vm18560_vm15, %v2211_v47  ;;  %vm18564_vm2 = vmmov %vm18563_vm1  ;;  %v11777_v47 = vadd.s32 208, %v11299_v5  ;;  %v11780_v0 = vadd.s32 216, %v11299_v5 }
  0x51   : > { %18555 = vst [vmem:[#allocation41_spill] sm:$0xff] %v18554_v1  ;;  %v2212_v32 = vpack.c.bf16 %v1772_v4, %v1771_v13  ;;  %18561 = vst [vmem:[#allocation43_spill] sm:$0xff] %v11767_v8  ;;  %v11770_v1 = vadd.s32 200, %v11299_v5  ;;  %10066 = vmatprep.mubr.msk.bf16.mxu1 %vm18564_vm2, %v2246_v35  ;;  %vm18567_vm15 = vcmask 1040384   ;;  %v2248_v41 = vpack.c.bf16 %v366_v36, %v365_v31 }
  0x52   : > { %18565 = vst [vmem:[#allocation45_spill] sm:$0xff] %v11777_v47  ;;  %18566 = vst [vmem:[#allocation46_spill] sm:$0xff] %v11780_v0  ;;  %v11785_v13 = vsel %vm18567_vm15, %v1472_v28, %v1474_v29  ;;  %10067 = vmatmul.mubr.msk.bf16.gmra.mrb[24].mxu1 %vm18563_vm1, %v2247_v61  ;;  %v18572_v61 = vmov 0  ;;  %v1486_v39 = vrot.slane %v367_v57, 7  ;;  %v1488_v18 = vrot.slane %v11802_v19, 7 }
  0x53   : > { %18562 = vst [vmem:[#allocation44_spill] sm:$0xff] %v11770_v1  ;;  %10129 = vmatmul.mubr.msk.bf16.gmra.mrb[20].mxu0 %vm18563_vm1, %v2212_v32  ;;  %vm18568_vm0 = vmmov %vm18567_vm15  ;;  %v18575_v32 = vand.u32 7, %v11770_v1  ;;  %v18584_v1 = vmov 0  ;;  %v18680_v40 = vmov 0 }
  0x54   : > { %v11788_v4 = vsel %vm18568_vm0, %v1474_v29, %v1476_v30  ;;  %vm18569_vm2 = vmmov %vm18568_vm0  ;;  %v18571_v29 = vand.u32 7, %v11767_v8  ;;  %v18580_v8 = vmov 0 }
  0x55   : > { %v11795_v63 = vsel %vm18569_vm2, %v1476_v30, %v1478_v43  ;;  %vm18570_vm3 = vmmov %vm18568_vm0  ;;  %vm11813_vm15 = vcmp.eq.s32.totalorder %v18575_v32, 0  ;;  %v18576_v30 = vmov 0  ;;  %v18583_v32 = vand.u32 7, %v11780_v0  ;;  %v11881_v0 = vld [vmem:[%s11321_s21 + $0x118] sm:$0xff] }
  0x56   : > { %v11798_v6 = vsel %vm18570_vm3, %v1478_v43, %v1480_v20  ;;  %vm11807_vm0 = vcmp.eq.s32.totalorder %v18571_v29, 0  ;;  %v18577_v30 = vsel %vm11813_vm15, 4294967295, %v18576_v30  ;;  %v1482_v43 = vrot.slane %v365_v31, 7  ;;  %v370_v31 = vld [vmem:[%s11321_s21 + $0x108] sm:$0xff] }
  0x57   : > { %v18573_v61 = vsel %vm11807_vm0, 4294967295, %v18572_v61  ;;  %18578 = vst [vmem:[#allocation48_spill] sm:$0xff] %v18577_v30  ;;  %v1773_v35 = vsel %vm11807_vm0, 0.0, %v11785_v13  ;;  %v1774_v28 = vsel %vm11813_vm15, 0.0, %v11788_v4  ;;  %v18579_v29 = vand.u32 7, %v11777_v47 }
  0x58   : > { %18574 = vst [vmem:[#allocation47_spill] sm:$0xff] %v18573_v61  ;;  %vm11831_vm1 = vcmp.eq.s32.totalorder %v18583_v32, 0  ;;  %v2213_v23 = vpack.c.bf16 %v1774_v28, %v1773_v35  ;;  %v1484_v47 = vrot.slane %v366_v36, 7  ;;  %v369_v32 = vld [vmem:[%s11321_s21 + $0x100] sm:$0xff]  ;;  %vm18587_vm2 = vcmask 31744  }
  0x59   : > { %vm11825_vm3 = vcmp.eq.s32.totalorder %v18579_v29, 0  ;;  %v18585_v1 = vsel %vm11831_vm1, 4294967295, %v18584_v1  ;;  %v1776_v30 = vsel %vm11831_vm1, 0.0, %v11798_v6  ;;  %v2249_v35 = vpack.c.bf16 %v11802_v19, %v367_v57  ;;  %vm18590_vm1 = vmmov %vm18587_vm2  ;;  %v371_v57 = vld [vmem:[%s11321_s21 + $0x110] sm:$0xff] }
  0x5a   : > { %v18581_v8 = vsel %vm11825_vm3, 4294967295, %v18580_v8  ;;  %18586 = vst [vmem:[#allocation50_spill] sm:$0xff] %v18585_v1  ;;  %v1775_v61 = vsel %vm11825_vm3, 0.0, %v11795_v63  ;;  %10132 = vmatprep.mubr.msk.bf16.mxu0 %vm18587_vm2, %v2213_v23  ;;  %v11846_v28 = vadd.s32 224, %v11299_v5  ;;  %vm18591_vm3 = vmmov %vm18590_vm1  ;;  %v11856_v23 = vadd.s32 240, %v11299_v5 }
  0x5b   : > { %18582 = vst [vmem:[#allocation49_spill] sm:$0xff] %v18581_v8  ;;  %v2214_v29 = vpack.c.bf16 %v1776_v30, %v1775_v61  ;;  %v11849_v8 = vadd.s32 232, %v11299_v5  ;;  %10070 = vmatprep.mubr.msk.bf16.mxu1 %vm18591_vm3, %v2248_v41  ;;  %v11859_v19 = vadd.s32 248, %v11299_v5  ;;  %vm18594_vm2 = vcmask 1040384  }
  0x5c   : > { %18588 = vst [vmem:[#allocation51_spill] sm:$0xff] %v11846_v28  ;;  %18592 = vst [vmem:[#allocation53_spill] sm:$0xff] %v11856_v23  ;;  %v11864_v61 = vsel %vm18594_vm2, %v1480_v20, %v1482_v43  ;;  %10071 = vmatmul.mubr.msk.bf16.gmra.mrb[28].mxu1 %vm18590_vm1, %v2249_v35  ;;  %v18599_v35 = vmov 0  ;;  %v2250_v38 = vpack.c.bf16 %v370_v31, %v369_v32  ;;  %v1494_v9 = vrot.slane %v371_v57, 7 }
  0x5d   : > { %18589 = vst [vmem:[#allocation52_spill] sm:$0xff] %v11849_v8  ;;  %10133 = vmatmul.mubr.msk.bf16.gmra.mrb[24].mxu0 %vm18590_vm1, %v2214_v29  ;;  %18593 = vst [vmem:[#allocation54_spill] sm:$0xff] %v11859_v19  ;;  %v18602_v29 = vand.u32 7, %v11849_v8  ;;  %v18611_v8 = vmov 0  ;;  %v1496_v50 = vrot.slane %v11881_v0, 7 }
  0x5e   : > { %vm18595_vm15 = vmmov %vm18594_vm2 }
  0x5f   : > { %v11867_v30 = vsel %vm18595_vm15, %v1482_v43, %v1484_v47  ;;  %vm18596_vm3 = vmmov %vm18594_vm2  ;;  %v18598_v43 = vand.u32 7, %v11846_v28  ;;  %v18607_v28 = vmov 0 }
  0x60   : > { %v11874_v1 = vsel %vm18596_vm3, %v1484_v47, %v1486_v39  ;;  %vm18597_vm0 = vmmov %vm18594_vm2  ;;  %vm11892_vm2 = vcmp.eq.s32.totalorder %v18602_v29, 0  ;;  %v18603_v47 = vmov 0  ;;  %v18610_v29 = vand.u32 7, %v11859_v19  ;;  %v11960_v19 = vld [vmem:[%s11321_s21 + $0x138] sm:$0xff] }
  0x61   : > { %v11877_v36 = vsel %vm18597_vm0, %v1486_v39, %v1488_v18  ;;  %vm11886_vm15 = vcmp.eq.s32.totalorder %v18598_v43, 0  ;;  %v18604_v47 = vsel %vm11892_vm2, 4294967295, %v18603_v47  ;;  %v1490_v39 = vrot.slane %v369_v32, 7  ;;  %v374_v32 = vld [vmem:[%s11321_s21 + $0x128] sm:$0xff]  ;;  %18626 = vst [vmem:[#allocation63_spill] sm:$0xff] %v11960_v19 }
  0x62   : > { %v18600_v35 = vsel %vm11886_vm15, 4294967295, %v18599_v35  ;;  %18605 = vst [vmem:[#allocation56_spill] sm:$0xff] %v18604_v47  ;;  %v1777_v41 = vsel %vm11886_vm15, 0.0, %v11864_v61  ;;  %v1778_v20 = vsel %vm11892_vm2, 0.0, %v11867_v30  ;;  %v18606_v43 = vand.u32 7, %v11856_v23 }
  0x63   : > { %18601 = vst [vmem:[#allocation55_spill] sm:$0xff] %v18600_v35  ;;  %vm11910_vm1 = vcmp.eq.s32.totalorder %v18610_v29, 0  ;;  %v2215_v10 = vpack.c.bf16 %v1778_v20, %v1777_v41  ;;  %v1492_v23 = vrot.slane %v370_v31, 7  ;;  %v373_v29 = vld [vmem:[%s11321_s21 + $0x120] sm:$0xff]  ;;  %vm18614_vm3 = vcmask 31744  }
  0x64   : > { %vm11904_vm0 = vcmp.eq.s32.totalorder %v18606_v43, 0  ;;  %v18612_v8 = vsel %vm11910_vm1, 4294967295, %v18611_v8  ;;  %v1780_v47 = vsel %vm11910_vm1, 0.0, %v11877_v36  ;;  %v2251_v41 = vpack.c.bf16 %v11881_v0, %v371_v57  ;;  %vm18617_vm1 = vmmov %vm18614_vm3  ;;  %v375_v57 = vld [vmem:[%s11321_s21 + $0x130] sm:$0xff] }
  0x65   : > { %v18608_v28 = vsel %vm11904_vm0, 4294967295, %v18607_v28  ;;  %18613 = vst [vmem:[#allocation58_spill] sm:$0xff] %v18612_v8  ;;  %v1779_v35 = vsel %vm11904_vm0, 0.0, %v11874_v1  ;;  %10136 = vmatprep.mubr.msk.bf16.mxu0 %vm18614_vm3, %v2215_v10  ;;  %v11925_v20 = vadd.s32 256, %v11299_v5  ;;  %vm18618_vm0 = vmmov %vm18617_vm1  ;;  %v11935_v10 = vadd.s32 272, %v11299_v5 }
  0x66   : > { %18609 = vst [vmem:[#allocation57_spill] sm:$0xff] %v18608_v28  ;;  %v2216_v43 = vpack.c.bf16 %v1780_v47, %v1779_v35  ;;  %v11928_v28 = vadd.s32 264, %v11299_v5  ;;  %10074 = vmatprep.mubr.msk.bf16.mxu1 %vm18618_vm0, %v2250_v38  ;;  %v11938_v0 = vadd.s32 280, %v11299_v5  ;;  %vm18621_vm3 = vcmask 1040384  }
  0x67   : > { %18615 = vst [vmem:[#allocation59_spill] sm:$0xff] %v11925_v20  ;;  %18619 = vst [vmem:[#allocation61_spill] sm:$0xff] %v11935_v10  ;;  %v11943_v35 = vsel %vm18621_vm3, %v1488_v18, %v1490_v39  ;;  %v18636_v38 = vmov 0  ;;  %v2252_v21 = vpack.c.bf16 %v374_v32, %v373_v29  ;;  %v1502_v37 = vrot.slane %v375_v57, 7 }
  0x68   : > { %18616 = vst [vmem:[#allocation60_spill] sm:$0xff] %v11928_v28  ;;  %10137 = vmatmul.mubr.msk.bf16.gmra.mrb[28].mxu0 %vm18617_vm1, %v2216_v43  ;;  %18620 = vst [vmem:[#allocation62_spill] sm:$0xff] %v11938_v0  ;;  %v18632_v43 = vmov 0  ;;  %v17932_v27 = vrot.slane %v11960_v19, 7  ;;  %v2253_v62 = vpack.c.bf16 %v11960_v19, %v375_v57 }
  0x69   : > { %vm18622_vm2 = vmmov %vm18621_vm3 }
  0x6a   : > { %v11946_v47 = vsel %vm18622_vm2, %v1490_v39, %v1492_v23  ;;  %vm18623_vm1 = vmmov %vm18618_vm0  ;;  %v18627_v39 = vand.u32 7, %v11925_v20  ;;  %v18643_v20 = vand.u32 7, %v11938_v0  ;;  %v1500_v0 = vrot.slane %v374_v32, 7 }
  0x6b   : > { %10075 = vmatmul.mubr.msk.bf16.gmra.mrb[32].mxu1 %vm18623_vm1, %v2251_v41  ;;  %vm18624_vm0 = vmmov %vm18622_vm2  ;;  %v18631_v41 = vand.u32 7, %v11928_v28  ;;  %v18640_v28 = vmov 0  ;;  %v12029_v32 = vadd.s32 312, %v11299_v5 }
  0x6c   : > { %v11953_v8 = vsel %vm18624_vm0, %v1492_v23, %v1494_v9  ;;  %vm18625_vm15 = vmmov %vm18624_vm0  ;;  %vm11965_vm2 = vcmp.eq.s32.totalorder %v18627_v39, 0  ;;  %v1498_v23 = vrot.slane %v373_v29, 7  ;;  %vm11995_vm0 = vcmp.eq.s32.totalorder %v18643_v20, 0 }
  0x6d   : > { %v11956_v31 = vsel %vm18625_vm15, %v1494_v9, %v1496_v50  ;;  %v18629_v58 = vsel %vm11965_vm2, 4294967295, %v18628_v58  ;;  %vm11971_vm3 = vcmp.eq.s32.totalorder %v18631_v41, 0  ;;  %v18635_v9 = vand.u32 7, %v11299_v5  ;;  %18657 = vst [vmem:[#allocation73_spill] sm:$0xff] %v12029_v32 }
  0x6e   : > { %18630 = vst [vmem:[#allocation64_spill] sm:$0xff] %v18629_v58  ;;  %v18633_v43 = vsel %vm11971_vm3, 4294967295, %v18632_v43  ;;  %v1781_v39 = vsel %vm11965_vm2, 0.0, %v11943_v35  ;;  %v1782_v18 = vsel %vm11971_vm3, 0.0, %v11946_v47  ;;  %v18639_v41 = vand.u32 7, %v11935_v10 }
  0x6f   : > { %18634 = vst [vmem:[#allocation65_spill] sm:$0xff] %v18633_v43  ;;  %vm11977_vm15 = vcmp.eq.s32.totalorder %v18635_v9, 7  ;;  %v18644_v9 = vmov 0  ;;  %v18648_v58 = vmov 0  ;;  %v2217_v43 = vpack.c.bf16 %v1782_v18, %v1781_v39 }
  0x70   : > { %v18637_v38 = vsel %vm11977_vm15, 4294967295, %v18636_v38  ;;  %vm11989_vm1 = vcmp.eq.s32.totalorder %v18639_v41, 0  ;;  %v18645_v9 = vsel %vm11995_vm0, 4294967295, %v18644_v9  ;;  %v18649_v58 = vsel %vm12001_vm14, 4294967295, %v18648_v58 }
  0x71   : > { %18638 = vst [vmem:[#allocation66_spill] sm:$0xff] %v18637_v38  ;;  %v18641_v28 = vsel %vm11989_vm1, 4294967295, %v18640_v28  ;;  %18646 = vst [vmem:[#allocation68_spill] sm:$0xff] %v18645_v9  ;;  %v1783_v41 = vsel %vm11989_vm1, 0.0, %v11953_v8  ;;  %v1784_v10 = vsel %vm11995_vm0, 0.0, %v11956_v31  ;;  %vm18651_vm3 = vcmask 31744  }
  0x72   : > { %18642 = vst [vmem:[#allocation67_spill] sm:$0xff] %v18641_v28  ;;  %18650 = vst [vmem:[#allocation69_spill] sm:$0xff] %v18649_v58  ;;  %v2218_v20 = vpack.c.bf16 %v1784_v10, %v1783_v41  ;;  %10140 = vmatprep.mubr.msk.bf16.mxu0 %vm18651_vm3, %v2217_v43  ;;  %v12016_v18 = vadd.s32 288, %v11299_v5  ;;  %v12019_v39 = vadd.s32 296, %v11299_v5  ;;  %v12026_v29 = vadd.s32 304, %v11299_v5  ;;  %v12089_v28 = vld [vmem:[%s11321_s21 + $0x150] sm:$0xff] }
  0x73   : > { %vm18654_vm0 = vmmov %vm18651_vm3  ;;  %vm18658_vm3 = vcmask 1040384  }
  0x74   : > { %18652 = vst [vmem:[#allocation70_spill] sm:$0xff] %v12016_v18  ;;  %18653 = vst [vmem:[#allocation71_spill] sm:$0xff] %v12019_v39  ;;  %10141 = vmatmul.mubr.msk.bf16.gmra.mrb[32].mxu0 %vm18654_vm0, %v2218_v20  ;;  %v17933_v57 = vand.u32 7, %v12016_v18  ;;  %v17934_v43 = vand.u32 7, %v12019_v39  ;;  %v12034_v41 = vsel %vm18658_vm3, %v1496_v50, %v1498_v23  ;;  %v12065_v20 = vld [vmem:[%s11321_s21 + $0x140] sm:$0xff]  ;;  %v18672_v50 = vmov 0 }
  0x75   : > { %vm18655_vm1 = vmmov %vm18654_vm0  ;;  %18656 = vst [vmem:[#allocation72_spill] sm:$0xff] %v12026_v29 }
  0x76   : > { %10078 = vmatprep.mubr.msk.bf16.mxu1 %vm18655_vm1, %v2252_v21  ;;  %vm18659_vm2 = vmmov %vm18658_vm3  ;;  %v17942_v21 = vand.u32 7, %v12026_v29  ;;  %vm12060_vm3 = vcmp.eq.s32.totalorder %v17934_v43, 0  ;;  %v18671_v43 = vand.u32 7, %v12029_v32  ;;  %v12114_v32 = vld [vmem:[%s11321_s21 + $0x160] sm:$0xff]  ;;  %v12117_v29 = vld [vmem:[%s11321_s21 + $0x168] sm:$0xff] }
  0x77   : > { %v12037_v10 = vsel %vm18659_vm2, %v1498_v23, %v1500_v0  ;;  %10079 = vmatmul.mubr.msk.bf16.gmra.mrb[36].mxu1 %vm18654_vm0, %v2253_v62  ;;  %vm18660_vm1 = vmmov %vm18659_vm2  ;;  %vm12054_vm2 = vcmp.eq.s32.totalorder %v17933_v57, 0  ;;  %v18662_v62 = vmov 0  ;;  %v18668_v23 = vmov 0 }
  0x78   : > { %v12043_v9 = vsel %vm18660_vm1, %v1500_v0, %v1502_v37  ;;  %vm18661_vm13 = vmmov %vm18660_vm1  ;;  %v18663_v62 = vsel %vm12054_vm2, 4294967295, %v18662_v62  ;;  %v18665_v0 = vmov 0  ;;  %v1786_v57 = vsel %vm12060_vm3, 0.0, %v12037_v10 }
  0x79   : > { %v12048_v7 = vsel %vm18661_vm13, %v1502_v37, %v17932_v27  ;;  %18664 = vst [vmem:[#allocation74_spill] sm:$0xff] %v18663_v62  ;;  %v18666_v0 = vsel %vm12060_vm3, 4294967295, %v18665_v0  ;;  %v12068_v37 = vld [vmem:[%s11321_s21 + $0x148] sm:$0xff]  ;;  %v1785_v27 = vsel %vm12054_vm2, 0.0, %v12034_v41  ;;  %vm12078_vm13 = vcmp.eq.s32.totalorder %v17942_v21, 0  ;;  %v12092_v62 = vld [vmem:[%s11321_s21 + $0x158] sm:$0xff] }
  0x7a   : > { %18667 = vst [vmem:[#allocation75_spill] sm:$0xff] %v18666_v0  ;;  %v18669_v23 = vsel %vm12078_vm13, 4294967295, %v18668_v23  ;;  %vm12084_vm0 = vcmp.eq.s32.totalorder %v18671_v43, 0  ;;  %v2219_v39 = vpack.c.bf16 %v1786_v57, %v1785_v27  ;;  %v1787_v21 = vsel %vm12078_vm13, 0.0, %v12043_v9 }
  0x7b   : > { %18670 = vst [vmem:[#allocation76_spill] sm:$0xff] %v18669_v23  ;;  %v18673_v50 = vsel %vm12084_vm0, 4294967295, %v18672_v50  ;;  %v1788_v43 = vsel %vm12084_vm0, 0.0, %v12048_v7  ;;  %v2254_v19 = vpack.c.bf16 %v12068_v37, %v12065_v20  ;;  %vm18675_vm1 = vcmask 31744  }
  0x7c   : > { %18674 = vst [vmem:[#allocation77_spill] sm:$0xff] %v18673_v50  ;;  %v2220_v18 = vpack.c.bf16 %v1788_v43, %v1787_v21  ;;  %10144 = vmatprep.mubr.msk.bf16.mxu0 %vm18675_vm1, %v2219_v39  ;;  %v2255_v57 = vpack.c.bf16 %v12092_v62, %v12089_v28  ;;  %v2137_v0 = vsel %vm11977_vm15, 0.0, %v11380_v52  ;;  %vm18676_vm0 = vmmov %vm18675_vm1  ;;  %v2138_v39 = vsel %vm12001_vm14, 0.0, %v11383_v53 }
  0x7d   : > { %vm18677_vm1 = vmmov %vm18676_vm0  ;;  %v3046_v38 = vpack.c.bf16 %v2138_v39, %v2137_v0  ;;  %v12142_v39 = vld [vmem:[%s11321_s21 + $0x170] sm:$0xff]  ;;  %v18679_v53 = vand.u32 7, %v11316_v12  ;;  %v18683_v21 = vand.u32 7, %v11325_v15  ;;  %v18684_v0 = vmov 0 }
  0x7e   : > { %10145 = vmatmul.mubr.msk.bf16.gmra.mrb[36].mxu0 %vm18676_vm0, %v2220_v18  ;;  %10082 = vmatprep.mubr.msk.bf16.mxu1 %vm18677_vm1, %v2254_v19  ;;  %v2256_v19 = vpack.c.bf16 %v12117_v29, %v12114_v32  ;;  %vm18678_vm1 = vmmov %vm18676_vm0  ;;  %v12145_v18 = vld [vmem:[%s11321_s21 + $0x178] sm:$0xff]  ;;  %v18688_v52 = vrot.slane %v11408_v2, 2  ;;  %v18693_v15 = vand.u32 7, %v11328_v16  ;;  %v18698_v2 = vmov 0 }
  0x7f   : > { %10083 = vmatmul.mubr.msk.bf16.gmra.mrb[40].mxu1 %vm18676_vm0, %v2255_v57  ;;  %10174 = vmatprep.mubr.msk.bf16.mxu0 %vm18678_vm1, %v3046_v38  ;;  %vm12151_vm14 = vcmp.eq.s32.totalorder %v18679_v53, 7  ;;  %vm12157_vm15 = vcmp.eq.s32.totalorder %v18683_v21, 7  ;;  %v18687_v38 = vrot.slane %v11411_v3, 2  ;;  %vm18689_vm1 = vcmask 1045504   ;;  %v12189_v3 = vld [vmem:[%s11321_s21 + $0x188] sm:$0xff] }
  0x80   : > { %10086 = vmatprep.mubr.msk.bf16.mxu1 %vm18676_vm0, %v2256_v19  ;;  %v18681_v40 = vsel %vm12151_vm14, 4294967295, %v18680_v40  ;;  %v18685_v0 = vsel %vm12157_vm15, 4294967295, %v18684_v0  ;;  %v18690_v19 = vrot.slane %v11428_v11, 2  ;;  %vm18692_vm0 = vmmov %vm18689_vm1  ;;  %vm12175_vm13 = vcmp.eq.s32.totalorder %v18693_v15, 7 }
  0x81   : > { %18682 = vst [vmem:[#allocation78_spill] sm:$0xff] %v18681_v40  ;;  %18686 = vst [vmem:[#allocation79_spill] sm:$0xff] %v18685_v0  ;;  %v1954_v43 = vsel %vm18689_vm1, %v18688_v52, %v18687_v38  ;;  %v18691_v12 = vmov %v18687_v38  ;;  %v18694_v21 = vmov 0  ;;  %v18697_v57 = vand.u32 7, %v11340_v22  ;;  %v12186_v52 = vld [vmem:[%s11321_s21 + $0x180] sm:$0xff] }
  0x82   : > { %v1956_v53 = vsel %vm18692_vm0, %v18691_v12, %v18690_v19  ;;  %v2141_v27 = vsel %vm12151_vm14, 0.0, %v1954_v43  ;;  %v18695_v21 = vsel %vm12175_vm13, 4294967295, %v18694_v21  ;;  %v2257_v38 = vpack.c.bf16 %v12145_v18, %v12142_v39  ;;  %vm18702_vm1 = vmmov %vm18692_vm0 }
  0x83   : > { %18696 = vst [vmem:[#allocation80_spill] sm:$0xff] %v18695_v21  ;;  %vm12181_vm3 = vcmp.eq.s32.totalorder %v18697_v57, 7  ;;  %v2142_v16 = vsel %vm12157_vm15, 0.0, %v1956_v53  ;;  %v18701_v43 = vrot.slane %v11435_v24, 2  ;;  %v18703_v57 = vrot.slane %v11480_v55, 2 }
  0x84   : > { %v18699_v2 = vsel %vm12181_vm3, 4294967295, %v18698_v2  ;;  %v3048_v58 = vpack.c.bf16 %v2142_v16, %v2141_v27  ;;  %v12211_v11 = vadd.s32 336, %v11299_v5  ;;  %v1510_v27 = vrot.slane %v12089_v28, 7 }
  0x85   : > { %18700 = vst [vmem:[#allocation81_spill] sm:$0xff] %v18699_v2  ;;  %v1958_v22 = vsel %vm18702_vm1, %v18690_v19, %v18701_v43  ;;  %v18704_v12 = vmov %v18701_v43  ;;  %v12214_v43 = vadd.s32 344, %v11299_v5  ;;  %vm18707_vm1 = vcmask 31744   ;;  %v18759_v2 = vld [vmem:[#allocation17_spill] sm:$0xff] }
  0x86   : > { %v1960_v15 = vsel %vm18692_vm0, %v18704_v12, %v18703_v57  ;;  %v2143_v53 = vsel %vm12175_vm13, 0.0, %v1958_v22  ;;  %18705 = vst [vmem:[#allocation82_spill] sm:$0xff] %v12211_v11  ;;  %10175 = vmatmul.mubr.msk.bf16.vlgmr.msra.gmra.mrb[0].mxu0 %vm18707_vm1, %v11454_v33  ;;  %v2258_v19 = vpack.c.bf16 %v12189_v3, %v12186_v52  ;;  %vm18708_vm0 = vmmov %vm18707_vm1  ;;  %v18709_v16 = vand.u32 7, %v11463_v44  ;;  %v12241_v44 = vld [vmem:[%s11321_s21 + $0x190] sm:$0xff]  ;;  %v12244_v12 = vld [vmem:[%s11321_s21 + $0x198] sm:$0xff] }
  0x87   : > { %v2144_v0 = vsel %vm12181_vm3, 0.0, %v1960_v15  ;;  %18706 = vst [vmem:[#allocation83_spill] sm:$0xff] %v12214_v43  ;;  %10178 = vmatprep.mubr.msk.bf16.mxu0 %vm18708_vm0, %v3048_v58  ;;  %v18710_v22 = vmov 0  ;;  %v18713_v57 = vand.u32 7, %v11466_v45  ;;  %v18714_v33 = vmov 0  ;;  %10087 = vmatmul.mubr.msk.bf16.gmra.mrb[44].mxu1 %vm18708_vm0, %v2257_v38 }
  0x88   : > { %v3049_v24 = vpack.c.bf16 %v2144_v0, %v2143_v53  ;;  %vm12224_vm3 = vcmp.eq.s32.totalorder %v18709_v16, 7  ;;  %v18717_v0 = vrot.slane %v11483_v56, 2  ;;  %v18718_v28 = vrot.slane %v11480_v55, 2  ;;  %10090 = vmatprep.mubr.msk.bf16.mxu1 %vm18708_vm0, %v2258_v19 }
  0x89   : > { %v18711_v22 = vsel %vm12224_vm3, 4294967295, %v18710_v22  ;;  %vm12230_vm13 = vcmp.eq.s32.totalorder %v18713_v57, 7  ;;  %vm18719_vm1 = vcmask 1045504   ;;  %v18720_v15 = vrot.slane %v11489_v59, 2 }
  0x8a   : > { %18712 = vst [vmem:[#allocation84_spill] sm:$0xff] %v18711_v22  ;;  %v18715_v33 = vsel %vm12230_vm13, 4294967295, %v18714_v33  ;;  %v1962_v58 = vsel %vm18719_vm1, %v18718_v28, %v18717_v0  ;;  %v18721_v45 = vmov %v18717_v0  ;;  %vm18722_vm15 = vmmov %vm18719_vm1  ;;  %v18723_v57 = vand.u32 7, %v11471_v48  ;;  %v12283_v28 = vld [vmem:[%s11321_s21 + $0x1a8] sm:$0xff] }
  0x8b   : > { %18716 = vst [vmem:[#allocation85_spill] sm:$0xff] %v18715_v33  ;;  %v1964_v53 = vsel %vm18722_vm15, %v18721_v45, %v18720_v15  ;;  %v2145_v16 = vsel %vm12224_vm3, 0.0, %v1962_v58  ;;  %v18724_v55 = vmov 0  ;;  %v18727_v38 = vand.u32 7, %v11474_v49  ;;  %vm18735_vm3 = vmmov %vm18722_vm15 }
  0x8c   : > { %vm12255_vm14 = vcmp.eq.s32.totalorder %v18723_v57, 7  ;;  %v18728_v0 = vmov 0  ;;  %v2146_v56 = vsel %vm12230_vm13, 0.0, %v1964_v53  ;;  %v18731_v58 = vrot.slane %v11492_v60, 2 }
  0x8d   : > { %v18725_v55 = vsel %vm12255_vm14, 4294967295, %v18724_v55  ;;  %vm12261_vm1 = vcmp.eq.s32.totalorder %v18727_v38, 7  ;;  %v18732_v48 = vmov %v18720_v15  ;;  %v18733_v45 = vrot.slane %v11552_v26, 2  ;;  %v12280_v38 = vld [vmem:[%s11321_s21 + $0x1a0] sm:$0xff] }
  0x8e   : > { %18726 = vst [vmem:[#allocation86_spill] sm:$0xff] %v18725_v55  ;;  %v18729_v0 = vsel %vm12261_vm1, 4294967295, %v18728_v0  ;;  %v1966_v15 = vsel %vm18722_vm15, %v18732_v48, %v18731_v58  ;;  %v18734_v49 = vmov %v18731_v58  ;;  %v3050_v40 = vpack.c.bf16 %v2146_v56, %v2145_v16 }
  0x8f   : > { %18730 = vst [vmem:[#allocation87_spill] sm:$0xff] %v18729_v0  ;;  %v1968_v57 = vsel %vm18735_vm3, %v18734_v49, %v18733_v45  ;;  %v2147_v53 = vsel %vm12255_vm14, 0.0, %v1966_v15  ;;  %v18736_v48 = vrot.slane %v12068_v37, 7  ;;  %vm18737_vm0 = vcmask 1040384  }
  0x90   : > { %v2148_v59 = vsel %vm12261_vm1, 0.0, %v1968_v57  ;;  %v2259_v45 = vpack.c.bf16 %v12244_v12, %v12241_v44  ;;  %v2260_v16 = vpack.c.bf16 %v12283_v28, %v12280_v38  ;;  %v18738_v56 = vand.u32 7, %v11535_v42 }
  0x91   : > { %v12294_v60 = vsel %vm18737_vm0, %v18736_v48, %v1510_v27  ;;  %v3051_v49 = vpack.c.bf16 %v2148_v59, %v2147_v53  ;;  %v18739_v15 = vmov 0  ;;  %v18742_v57 = vand.u32 7, %v11538_v17  ;;  %v18746_v48 = vld [vmem:[#allocation18_spill] sm:$0xff]  ;;  %v18750_v59 = vld [vmem:[#allocation19_spill] sm:$0xff]  ;;  %v18754_v17 = vld [vmem:[#allocation16_spill] sm:$0xff] }
  0x92   : > { %vm12302_vm3 = vcmp.eq.s32.totalorder %v18738_v56, 7  ;;  %v18743_v58 = vmov 0  ;;  %v18747_v19 = vrot.slane %v18746_v48, 2  ;;  %v18748_v0 = vrot.slane %v11552_v26, 2  ;;  %v18769_v48 = vld [vmem:[#allocation20_spill] sm:$0xff] }
  0x93   : > { %v18740_v15 = vsel %vm12302_vm3, 4294967295, %v18739_v15  ;;  %vm12308_vm15 = vcmp.eq.s32.totalorder %v18742_v57, 7  ;;  %vm18749_vm0 = vcmask 1045504   ;;  %v18751_v55 = vrot.slane %v18750_v59, 2 }
  0x94   : > { %18741 = vst [vmem:[#allocation88_spill] sm:$0xff] %v18740_v15  ;;  %v18744_v58 = vsel %vm12308_vm15, 4294967295, %v18743_v58  ;;  %v1970_v53 = vsel %vm18749_vm0, %v18748_v0, %v18747_v19  ;;  %v18752_v42 = vmov %v18747_v19  ;;  %vm18753_vm1 = vmmov %vm18749_vm0  ;;  %v18755_v57 = vand.u32 7, %v18754_v17  ;;  %v18801_v15 = vld [vmem:[#allocation27_spill] sm:$0xff] }
  0x95   : > { %18745 = vst [vmem:[#allocation89_spill] sm:$0xff] %v18744_v58  ;;  %v1972_v56 = vsel %vm18753_vm1, %v18752_v42, %v18751_v55  ;;  %v2149_v33 = vsel %vm12302_vm3, 0.0, %v1970_v53  ;;  %v18756_v22 = vmov 0  ;;  %v18760_v21 = vand.u32 7, %v18759_v2  ;;  %v18773_v2 = vld [vmem:[#allocation29_spill] sm:$0xff]  ;;  %v12413_v58 = vld [vmem:[%s11321_s21 + $0x1c8] sm:$0xff] }
  0x96   : > { %vm12326_vm14 = vcmp.eq.s32.totalorder %v18755_v57, 7  ;;  %v18761_v26 = vmov 0  ;;  %v18764_v0 = vand.u32 7, %v12211_v11  ;;  %v18765_v19 = vmov 0  ;;  %v18871_v11 = vld [vmem:[#allocation45_spill] sm:$0xff] }
  0x97   : > { %v18757_v22 = vsel %vm12326_vm14, 4294967295, %v18756_v22  ;;  %vm12332_vm13 = vcmp.eq.s32.totalorder %v18760_v21, 7  ;;  %vm18768_vm1 = vcmask 31744   ;;  %v2150_v55 = vsel %vm12308_vm15, 0.0, %v1972_v56 }
  0x98   : > { %18758 = vst [vmem:[#allocation18_spill] sm:$0xff] %v18757_v22  ;;  %v18762_v26 = vsel %vm12332_vm13, 4294967295, %v18761_v26  ;;  %vm12338_vm0 = vcmp.eq.s32.totalorder %v18764_v0, 0  ;;  %10179 = vmatmul.mubr.msk.bf16.gmra.mrb[4].mxu0 %vm18768_vm1, %v3049_v24  ;;  %v18770_v53 = vrot.slane %v18769_v48, 2  ;;  %v18771_v42 = vrot.slane %v18750_v59, 2  ;;  %v12358_v24 = vld [vmem:[%s17744_s3 + $0x10] sm:$0xff]   ;;  %10091 = vmatmul.mubr.msk.bf16.gmra.mrb[48].mxu1 %vm18768_vm1, %v2259_v45 }
  0x99   : > { %18763 = vst [vmem:[#allocation19_spill] sm:$0xff] %v18762_v26  ;;  %v18766_v19 = vsel %vm12338_vm0, 4294967295, %v18765_v19  ;;  %vm18772_vm3 = vcmask 1045504   ;;  %v18774_v17 = vrot.slane %v18773_v2, 2  ;;  %10182 = vmatprep.mubr.msk.bf16.mxu0 %vm18768_vm1, %v3050_v40  ;;  %v3052_v59 = vpack.c.bf16 %v2150_v55, %v2149_v33  ;;  %10238 = vmatprep.subr.bf16.mxu1 %v12358_v24  ;;  %v18790_v45 = vld [vmem:[#allocation26_spill] sm:$0xff] }
  0x9a   : > { %18767 = vst [vmem:[#allocation16_spill] sm:$0xff] %v18766_v19  ;;  %v1974_v21 = vsel %vm18772_vm3, %v18771_v42, %v18770_v53  ;;  %v18775_v57 = vmov %v18770_v53  ;;  %vm18776_vm2 = vmmov %vm18772_vm3  ;;  %v18777_v42 = vand.u32 7, %v12214_v43  ;;  %vm18782_vm3 = vcmask 1040384   ;;  %v12410_v22 = vld [vmem:[%s11321_s21 + $0x1c0] sm:$0xff] }
  0x9b   : > { %v1976_v0 = vsel %vm18776_vm2, %v18775_v57, %v18774_v17  ;;  %v2151_v53 = vsel %vm12326_vm14, 0.0, %v1974_v21  ;;  %v18778_v17 = vmov 0  ;;  %v18781_v57 = vrot.slane %v12092_v62, 7  ;;  %v12387_v21 = vld [vmem:[%s11321_s21 + $0x1b0] sm:$0xff] }
  0x9c   : > { %v2152_v48 = vsel %vm12332_vm13, 0.0, %v1976_v0  ;;  %vm12368_vm2 = vcmp.eq.s32.totalorder %v18777_v42, 0  ;;  %v1791_v55 = vsel %vm12338_vm0, 0.0, %v12294_v60  ;;  %vm18784_vm13 = vmmov %vm18768_vm1  ;;  %v12390_v0 = vld [vmem:[%s11321_s21 + $0x1b8] sm:$0xff]  ;;  %v18795_v40 = vrot.slane %v11631_v34, 2 }
  0x9d   : > { %v18779_v17 = vsel %vm12368_vm2, 4294967295, %v18778_v17  ;;  %v12375_v56 = vsel %vm18782_vm3, %v1510_v27, %v18781_v57  ;;  %v12379_v33 = vpack.c.bf16 %v2152_v48, %v2151_v53  ;;  %10094 = vmatprep.mubr.msk.bf16.mxu1 %vm18784_vm13, %v2260_v16  ;;  %v18785_v27 = vld [vmem:[#allocation25_spill] sm:$0xff]  ;;  %v18787_v57 = vmov 0 }
  0x9e   : > { %18780 = vst [vmem:[#allocation17_spill] sm:$0xff] %v18779_v17  ;;  %18783 = vst [vmem:[#allocation20_spill] sm:$0xff] %v12375_v56  ;;  %v18786_v42 = vand.u32 7, %v18785_v27  ;;  %v18791_v53 = vand.u32 7, %v18790_v45  ;;  %v18792_v48 = vmov 0  ;;  %v18796_v16 = vrot.slane %v18773_v2, 2 }
  0x9f   : > { %vm18797_vm13 = vcmask 1045504   ;;  %v18798_v27 = vrot.slane %v11637_v14, 2  ;;  %v18802_v19 = vand.u32 7, %v18801_v15  ;;  %v18803_v50 = vmov 0  ;;  %v18806_v2 = vld [vmem:[#allocation28_spill] sm:$0xff] }
  0xa0   : > { %vm12394_vm3 = vcmp.eq.s32.totalorder %v18786_v42, 7  ;;  %vm12400_vm1 = vcmp.eq.s32.totalorder %v18791_v53, 7  ;;  %v1978_v26 = vsel %vm18797_vm13, %v18796_v16, %v18795_v40  ;;  %v18799_v42 = vmov %v18795_v40  ;;  %vm18800_vm14 = vmmov %vm18797_vm13 }
  0xa1   : > { %v18788_v57 = vsel %vm12394_vm3, 4294967295, %v18787_v57  ;;  %v18793_v48 = vsel %vm12400_vm1, 4294967295, %v18792_v48  ;;  %v1980_v45 = vsel %vm18800_vm14, %v18799_v42, %v18798_v27  ;;  %v2153_v53 = vsel %vm12394_vm3, 0.0, %v1978_v26  ;;  %vm18815_vm3 = vmmov %vm18800_vm14 }
  0xa2   : > { %18789 = vst [vmem:[#allocation29_spill] sm:$0xff] %v18788_v57  ;;  %18794 = vst [vmem:[#allocation25_spill] sm:$0xff] %v18793_v48  ;;  %vm12424_vm15 = vcmp.eq.s32.totalorder %v18802_v19, 7  ;;  %v18807_v40 = vand.u32 7, %v18806_v2  ;;  %v18808_v16 = vmov 0  ;;  %v1792_v34 = vsel %vm12368_vm2, 0.0, %v12375_v56 }
  0xa3   : > { %v18804_v50 = vsel %vm12424_vm15, 4294967295, %v18803_v50  ;;  %v2154_v27 = vsel %vm12400_vm1, 0.0, %v1980_v45  ;;  %v18811_v26 = vrot.slane %v11640_v51, 2  ;;  %v18812_v15 = vrot.slane %v11637_v14, 2  ;;  %v18827_v14 = vld [vmem:[#allocation38_spill] sm:$0xff] }
  0xa4   : > { %18805 = vst [vmem:[#allocation26_spill] sm:$0xff] %v18804_v50  ;;  %vm12430_vm13 = vcmp.eq.s32.totalorder %v18807_v40, 7  ;;  %v18813_v42 = vrot.slane %v11706_v46, 2  ;;  %v2261_v57 = vpack.c.bf16 %v12390_v0, %v12387_v21  ;;  %v3054_v17 = vpack.c.bf16 %v2154_v27, %v2153_v53  ;;  %v18817_v53 = vld [vmem:[#allocation34_spill] sm:$0xff] }
  0xa5   : > { %v18809_v16 = vsel %vm12430_vm13, 4294967295, %v18808_v16  ;;  %v1982_v19 = vsel %vm18800_vm14, %v18812_v15, %v18811_v26  ;;  %v18814_v2 = vmov %v18811_v26  ;;  %v2262_v51 = vpack.c.bf16 %v12413_v58, %v12410_v22 }
  0xa6   : > { %18810 = vst [vmem:[#allocation27_spill] sm:$0xff] %v18809_v16  ;;  %v1984_v40 = vsel %vm18815_vm3, %v18814_v2, %v18813_v42  ;;  %v2155_v45 = vsel %vm12424_vm15, 0.0, %v1982_v19  ;;  %v12461_v42 = vpack.c.bf16 %v1792_v34, %v1791_v55  ;;  %vm18816_vm3 = vcmask 31744   ;;  %v18822_v2 = vld [vmem:[#allocation35_spill] sm:$0xff]  ;;  %v12484_v34 = vld [vmem:[%s11321_s21 + $0x1d0] sm:$0xff] }
  0xa7   : > { %v2156_v48 = vsel %vm12430_vm13, 0.0, %v1984_v40  ;;  %10183 = vmatmul.mubr.msk.bf16.gmra.mrb[8].mxu0 %vm18816_vm3, %v3051_v49  ;;  %v18818_v27 = vand.u32 7, %v18817_v53  ;;  %v18819_v19 = vmov 0  ;;  %v18823_v40 = vand.u32 7, %v18822_v2  ;;  %v18834_v16 = vld [vmem:[#allocation36_spill] sm:$0xff] }
  0xa8   : > { %v12459_v15 = vpack.c.bf16 %v2156_v48, %v2155_v45  ;;  %v18824_v26 = vmov 0  ;;  %v18828_v48 = vrot.slane %v18827_v14, 2  ;;  %v18829_v45 = vrot.slane %v11706_v46, 2  ;;  %10186 = vmatprep.mubr.msk.bf16.mxu0 %vm18816_vm3, %v3052_v59  ;;  %v12502_v59 = vld [vmem:[%s11321_s21 + $0x1d8] sm:$0xff]  ;;  %v12508_v14 = vld [vmem:[%s11321_s21 + $0x1e8] sm:$0xff] }
  0xa9   : > { %vm12466_vm14 = vcmp.eq.s32.totalorder %v18818_v27, 7  ;;  %vm12472_vm13 = vcmp.eq.s32.totalorder %v18823_v40, 7  ;;  %vm18830_vm15 = vcmask 1045504   ;;  %v18831_v53 = vrot.slane %v11716_v25, 2 }
  0xaa   : > { %v18820_v19 = vsel %vm12466_vm14, 4294967295, %v18819_v19  ;;  %v18825_v26 = vsel %vm12472_vm13, 4294967295, %v18824_v26  ;;  %v1986_v55 = vsel %vm18830_vm15, %v18829_v45, %v18828_v48  ;;  %v18832_v27 = vmov %v18828_v48  ;;  %vm18833_vm1 = vmmov %vm18830_vm15  ;;  %v12505_v45 = vld [vmem:[%s11321_s21 + $0x1e0] sm:$0xff] }
  0xab   : > { %18821 = vst [vmem:[#allocation28_spill] sm:$0xff] %v18820_v19  ;;  %18826 = vst [vmem:[#allocation34_spill] sm:$0xff] %v18825_v26  ;;  %v1988_v2 = vsel %vm18833_vm1, %v18832_v27, %v18831_v53  ;;  %v2157_v40 = vsel %vm12466_vm14, 0.0, %v1986_v55  ;;  %v18835_v50 = vand.u32 7, %v18834_v16  ;;  %v18836_v46 = vmov 0  ;;  %v18840_v55 = vld [vmem:[#allocation37_spill] sm:$0xff] }
  0xac   : > { %vm18839_vm15 = vmmov %vm18816_vm3  ;;  %v2158_v53 = vsel %vm12472_vm13, 0.0, %v1988_v2  ;;  %v18841_v27 = vand.u32 7, %v18840_v55  ;;  %v18845_v16 = vrot.slane %v11719_v54, 2  ;;  %v18846_v48 = vrot.slane %v11716_v25, 2 }
  0xad   : > { %vm12495_vm2 = vcmp.eq.s32.totalorder %v18835_v50, 7  ;;  %10095 = vmatmul.mubr.msk.bf16.gmra.mrb[52].mxu1 %vm18839_vm15, %v2261_v57  ;;  %v18842_v50 = vmov 0  ;;  %vm18847_vm3 = vcmask 1045504   ;;  %v12524_v49 = vpack.c.bf16 %v2158_v53, %v2157_v40 }
  0xae   : > { %v18837_v46 = vsel %vm12495_vm2, 4294967295, %v18836_v46  ;;  %vm12514_vm1 = vcmp.eq.s32.totalorder %v18841_v27, 7  ;;  %v1990_v57 = vsel %vm18847_vm3, %v18846_v48, %v18845_v16  ;;  %10098 = vmatprep.mubr.msk.bf16.mxu1 %vm18839_vm15, %v2262_v51  ;;  %v18848_v19 = vrot.slane %v11785_v13, 2  ;;  %vm18850_vm13 = vmmov %vm18847_vm3 }
  0xaf   : > { %18838 = vst [vmem:[#allocation35_spill] sm:$0xff] %v18837_v46  ;;  %v18843_v50 = vsel %vm12514_vm1, 4294967295, %v18842_v50  ;;  %v18849_v2 = vmov %v18845_v16  ;;  %v2159_v27 = vsel %vm12495_vm2, 0.0, %v1990_v57  ;;  %v12534_v26 = vadd.s32 320, %v11299_v5  ;;  %v18865_v16 = vld [vmem:[#allocation63_spill] sm:$0xff] }
  0xb0   : > { %18844 = vst [vmem:[#allocation38_spill] sm:$0xff] %v18843_v50  ;;  %v1992_v55 = vsel %vm18850_vm13, %v18849_v2, %v18848_v19  ;;  %v12541_v40 = vadd.s32 328, %v11299_v5  ;;  %v2263_v54 = vpack.c.bf16 %v12502_v59, %v12484_v34  ;;  %v2264_v19 = vpack.c.bf16 %v12508_v14, %v12505_v45  ;;  %v18851_v2 = vld [vmem:[#allocation43_spill] sm:$0xff] }
  0xb1   : > { %v2160_v51 = vsel %vm12514_vm1, 0.0, %v1992_v55  ;;  %v18852_v48 = vand.u32 7, %v18851_v2  ;;  %v18853_v25 = vmov 0  ;;  %v18856_v55 = vld [vmem:[#allocation44_spill] sm:$0xff]  ;;  %v18858_v46 = vmov 0 }
  0xb2   : > { %v12547_v53 = vpack.c.bf16 %v2160_v51, %v2159_v27  ;;  %v18857_v50 = vand.u32 7, %v18856_v55  ;;  %v18861_v23 = vrot.slane %v11788_v4, 2  ;;  %v18862_v27 = vrot.slane %v11785_v13, 2 }
  0xb3   : > { %vm12553_vm13 = vcmp.eq.s32.totalorder %v18852_v48, 7  ;;  %vm18863_vm15 = vcmask 1045504   ;;  %v18864_v57 = vrot.slane %v12065_v20, 7  ;;  %v18866_v2 = vrot.slane %v18865_v16, 7 }
  0xb4   : > { %v18854_v25 = vsel %vm12553_vm13, 4294967295, %v18853_v25  ;;  %vm12559_vm3 = vcmp.eq.s32.totalorder %v18857_v50, 7  ;;  %v1994_v51 = vsel %vm18863_vm15, %v18862_v27, %v18861_v23  ;;  %vm18867_vm1 = vcmask 1040384   ;;  %vm18870_vm2 = vmmov %vm18863_vm15 }
  0xb5   : > { %18855 = vst [vmem:[#allocation36_spill] sm:$0xff] %v18854_v25  ;;  %v18859_v46 = vsel %vm12559_vm3, 4294967295, %v18858_v46  ;;  %v12573_v48 = vsel %vm18867_vm1, %v18866_v2, %v18864_v57  ;;  %v18868_v43 = vrot.slane %v11795_v63, 2  ;;  %v18869_v50 = vmov %v18861_v23  ;;  %v18883_v2 = vld [vmem:[#allocation46_spill] sm:$0xff] }
  0xb6   : > { %18860 = vst [vmem:[#allocation37_spill] sm:$0xff] %v18859_v46  ;;  %v2161_v13 = vsel %vm12553_vm13, 0.0, %v1994_v51  ;;  %v18872_v23 = vand.u32 7, %v18871_v11  ;;  %v18873_v27 = vmov 0  ;;  %vm18876_vm1 = vcmask 31744  }
  0xb7   : > { %v1996_v55 = vsel %vm18870_vm2, %v18869_v50, %v18868_v43  ;;  %10187 = vmatmul.mubr.msk.bf16.gmra.mrb[12].mxu0 %vm18876_vm1, %v12379_v33  ;;  %v18877_v16 = vand.u32 7, %v12534_v26  ;;  %v18878_v4 = vmov 0  ;;  %v18881_v43 = vrot.slane %v12068_v37, 7  ;;  %10099 = vmatmul.mubr.msk.bf16.gmra.mrb[56].mxu1 %vm18876_vm1, %v2263_v54 }
  0xb8   : > { %vm12584_vm15 = vcmp.eq.s32.totalorder %v18872_v23, 7  ;;  %vm18882_vm2 = vcmask 1040384   ;;  %v2162_v11 = vsel %vm12559_vm3, 0.0, %v1996_v55  ;;  %v18884_v50 = vand.u32 7, %v18883_v2  ;;  %10190 = vmatprep.mubr.msk.bf16.mxu0 %vm18876_vm1, %v3054_v17 }
  0xb9   : > { %v18874_v27 = vsel %vm12584_vm15, 4294967295, %v18873_v27  ;;  %vm12592_vm14 = vcmp.eq.s32.totalorder %v18877_v16, 0  ;;  %v12601_v51 = vsel %vm18882_vm2, %v18864_v57, %v18881_v43  ;;  %v18885_v33 = vmov 0 }
  0xba   : > { %18875 = vst [vmem:[#allocation43_spill] sm:$0xff] %v18874_v27  ;;  %v18879_v4 = vsel %vm12592_vm14, 4294967295, %v18878_v4  ;;  %vm12607_vm13 = vcmp.eq.s32.totalorder %v18884_v50, 7  ;;  %v18888_v23 = vand.u32 7, %v12541_v40  ;;  %v18889_v37 = vmov 0 }
  0xbb   : > { %18880 = vst [vmem:[#allocation44_spill] sm:$0xff] %v18879_v4  ;;  %v18886_v33 = vsel %vm12607_vm13, 4294967295, %v18885_v33  ;;  %v12618_v20 = vpack.c.bf16 %v2162_v11, %v2161_v13  ;;  %v18892_v16 = vrot.slane %v11798_v6, 2  ;;  %v18893_v55 = vrot.slane %v11795_v63, 2  ;;  %v12636_v13 = vld [vmem:[%s11321_s21 + $0x1f8] sm:$0xff] }
  0xbc   : > { %18887 = vst [vmem:[#allocation63_spill] sm:$0xff] %v18886_v33  ;;  %vm12614_vm0 = vcmp.eq.s32.totalorder %v18888_v23, 0  ;;  %vm18894_vm2 = vcmask 1045504   ;;  %v18895_v57 = vrot.slane %v11864_v61, 2  ;;  %v12633_v23 = vld [vmem:[%s11321_s21 + $0x1f0] sm:$0xff]  ;;  %v12661_v6 = vadd.s32 368, %v11299_v5 }
  0xbd   : > { %v18890_v37 = vsel %vm12614_vm0, 4294967295, %v18889_v37  ;;  %v1998_v43 = vsel %vm18894_vm2, %v18893_v55, %v18892_v16  ;;  %v18896_v2 = vmov %v18892_v16  ;;  %vm18897_vm3 = vmmov %vm18894_vm2  ;;  %v12643_v16 = vadd.s32 352, %v11299_v5 }
  0xbe   : > { %18891 = vst [vmem:[#allocation45_spill] sm:$0xff] %v18890_v37  ;;  %v2000_v17 = vsel %vm18897_vm3, %v18896_v2, %v18895_v57  ;;  %v2163_v11 = vsel %vm12584_vm15, 0.0, %v1998_v43  ;;  %vm18899_vm3 = vmmov %vm18876_vm1  ;;  %v12651_v57 = vadd.s32 360, %v11299_v5  ;;  %v1789_v43 = vsel %vm12592_vm14, 0.0, %v12573_v48 }
  0xbf   : > { %v2164_v63 = vsel %vm12607_vm13, 0.0, %v2000_v17  ;;  %18898 = vst [vmem:[#allocation46_spill] sm:$0xff] %v12643_v16  ;;  %10102 = vmatprep.mubr.msk.bf16.mxu1 %vm18899_vm3, %v2264_v19  ;;  %v1790_v2 = vsel %vm12614_vm0, 0.0, %v12601_v51  ;;  %v18073_v17 = vand.u32 7, %v12643_v16  ;;  %v12668_v55 = vadd.s32 376, %v11299_v5 }
  0xc0   : > { %v12648_v54 = vpack.c.bf16 %v2164_v63, %v2163_v11  ;;  %v2265_v11 = vpack.c.bf16 %v12636_v13, %v12633_v23  ;;  %v18900_v50 = vmov 0  ;;  %v18903_v33 = vrot.slane %v12114_v32, 7 }
  0xc1   : > { %vm12672_vm2 = vcmp.eq.s32.totalorder %v18073_v17, 0  ;;  %v18904_v27 = vrot.slane %v12092_v62, 7  ;;  %vm18905_vm1 = vcmask 1040384   ;;  %v18906_v46 = vrot.slane %v12117_v29, 7 }
  0xc2   : > { %v18901_v50 = vsel %vm12672_vm2, 4294967295, %v18900_v50  ;;  %v18907_v63 = vmov %v18903_v33  ;;  %vm18908_vm3 = vmmov %vm18905_vm1  ;;  %v18086_v37 = vand.u32 7, %v12661_v6  ;;  %v2221_v17 = vpack.c.bf16 %v1790_v2, %v1789_v43  ;;  %v18925_v2 = vld [vmem:[#allocation52_spill] sm:$0xff] }
  0xc3   : > { %18902 = vst [vmem:[#allocation90_spill] sm:$0xff] %v18901_v50  ;;  %v12681_v19 = vsel %vm18905_vm1, %v18904_v27, %v18903_v33  ;;  %v12688_v25 = vsel %vm18908_vm3, %v18907_v63, %v18906_v46  ;;  %v18909_v4 = vand.u32 7, %v12651_v57  ;;  %v18910_v16 = vmov 0  ;;  %v18913_v27 = vld [vmem:[#allocation51_spill] sm:$0xff] }
  0xc4   : > { %v18093_v62 = vand.u32 7, %v12668_v55  ;;  %v18914_v33 = vand.u32 7, %v18913_v27  ;;  %v18915_v56 = vmov 0  ;;  %vm18918_vm3 = vcmask 31744  }
  0xc5   : > { %vm12693_vm13 = vcmp.eq.s32.totalorder %v18909_v4, 0  ;;  %10191 = vmatmul.mubr.msk.bf16.gmra.mrb[16].mxu0 %vm18918_vm3, %v12459_v15  ;;  %vm12708_vm15 = vcmp.eq.s32.totalorder %v18086_v37, 0  ;;  %v18919_v32 = vmov 0  ;;  %v18922_v46 = vrot.slane %v12142_v39, 7 }
  0xc6   : > { %v18911_v16 = vsel %vm12693_vm13, 4294967295, %v18910_v16  ;;  %vm12700_vm1 = vcmp.eq.s32.totalorder %v18914_v33, 7  ;;  %v18920_v32 = vsel %vm12708_vm15, 4294967295, %v18919_v32  ;;  %v18923_v4 = vrot.slane %v12117_v29, 7  ;;  %10194 = vmatprep.mubr.msk.bf16.mxu0 %vm18933_vm12, %v12524_v49 }
  0xc7   : > { %18912 = vst [vmem:[#allocation91_spill] sm:$0xff] %v18911_v16  ;;  %v18916_v56 = vsel %vm12700_vm1, 4294967295, %v18915_v56  ;;  %18921 = vst [vmem:[#allocation92_spill] sm:$0xff] %v18920_v32  ;;  %vm18924_vm0 = vcmask 1040384   ;;  %v18926_v63 = vand.u32 7, %v18925_v2  ;;  %v18927_v27 = vmov 0 }
  0xc8   : > { %18917 = vst [vmem:[#allocation51_spill] sm:$0xff] %v18916_v56  ;;  %v12717_v43 = vsel %vm18924_vm0, %v18923_v4, %v18922_v46  ;;  %v18930_v15 = vrot.slane %v11867_v30, 2  ;;  %v18931_v33 = vrot.slane %v11864_v61, 2  ;;  %vm18932_vm3 = vcmask 1045504  }
  0xc9   : > { %vm12721_vm14 = vcmp.eq.s32.totalorder %v18926_v63, 7  ;;  %v1793_v29 = vsel %vm12672_vm2, 0.0, %v12681_v19  ;;  %v1794_v46 = vsel %vm12693_vm13, 0.0, %v12688_v25  ;;  %v18934_v4 = vrot.slane %v12145_v18, 7  ;;  %vm18937_vm12 = vmmov %vm18932_vm3 }
  0xca   : > { %v18928_v27 = vsel %vm12721_vm14, 4294967295, %v18927_v27  ;;  %v2002_v37 = vsel %vm18932_vm3, %v18931_v33, %v18930_v15  ;;  %v18935_v2 = vrot.slane %v12142_v39, 7  ;;  %v18936_v61 = vrot.slane %v11874_v1, 2 }
  0xcb   : > { %18929 = vst [vmem:[#allocation52_spill] sm:$0xff] %v18928_v27  ;;  %vm18938_vm3 = vcmask 31744   ;;  %vm12753_vm2 = vcmp.eq.s32.totalorder %v18093_v62, 0  ;;  %v18939_v33 = vmov 0  ;;  %v2165_v39 = vsel %vm12700_vm1, 0.0, %v2002_v37 }
  0xcc   : > { %v12743_v63 = vsel %vm18924_vm0, %v18935_v2, %v18934_v4  ;;  %v2004_v49 = vsel %vm18937_vm12, %v18930_v15, %v18936_v61  ;;  %10103 = vmatmul.mubr.msk.bf16.gmra.mrb[60].mxu1 %vm18938_vm3, %v2265_v11  ;;  %v18940_v33 = vsel %vm12753_vm2, 4294967295, %v18939_v33  ;;  %v18942_v2 = vld [vmem:[#allocation53_spill] sm:$0xff]  ;;  %v18944_v30 = vmov 0  ;;  %vm18947_vm12 = vmmov %vm18938_vm3  ;;  %v18948_v15 = vld [vmem:[#allocation54_spill] sm:$0xff] }
  0xcd   : > { %18941 = vst [vmem:[#allocation93_spill] sm:$0xff] %v18940_v33  ;;  %v2166_v4 = vsel %vm12721_vm14, 0.0, %v2004_v49  ;;  %v18943_v16 = vand.u32 7, %v18942_v2  ;;  %10148 = vmatprep.mubr.msk.bf16.mxu1 %vm18947_vm12, %v2221_v17  ;;  %v1795_v11 = vsel %vm12708_vm15, 0.0, %v12717_v43  ;;  %v18949_v62 = vand.u32 7, %v18948_v15 }
  0xce   : > { %v12771_v61 = vpack.c.bf16 %v2166_v4, %v2165_v39  ;;  %v18950_v37 = vmov 0  ;;  %v18953_v49 = vrot.slane %v11877_v36, 2  ;;  %vm18955_vm14 = vcmask 1045504  }
  0xcf   : > { %vm12763_vm0 = vcmp.eq.s32.totalorder %v18943_v16, 7  ;;  %vm12775_vm3 = vcmp.eq.s32.totalorder %v18949_v62, 7  ;;  %v18954_v16 = vrot.slane %v11874_v1, 2  ;;  %v18956_v17 = vrot.slane %v11943_v35, 2  ;;  %vm18958_vm12 = vmmov %vm18955_vm14 }
  0xd0   : > { %v18945_v30 = vsel %vm12763_vm0, 4294967295, %v18944_v30  ;;  %v18951_v37 = vsel %vm12775_vm3, 4294967295, %v18950_v37  ;;  %v18957_v27 = vmov %v18953_v49  ;;  %v12792_v62 = vadd.s32 384, %v11299_v5 }
  0xd1   : > { %18946 = vst [vmem:[#allocation53_spill] sm:$0xff] %v18945_v30  ;;  %18952 = vst [vmem:[#allocation54_spill] sm:$0xff] %v18951_v37  ;;  %v2006_v2 = vsel %vm18955_vm14, %v18954_v16, %v18953_v49  ;;  %v2008_v56 = vsel %vm18958_vm12, %v18957_v27, %v18956_v17  ;;  %v12795_v4 = vadd.s32 392, %v11299_v5  ;;  %v1796_v1 = vsel %vm12753_vm2, 0.0, %v12743_v63 }
  0xd2   : > { %v2167_v39 = vsel %vm12763_vm0, 0.0, %v2006_v2  ;;  %v2168_v15 = vsel %vm12775_vm3, 0.0, %v2008_v56  ;;  %v18959_v36 = vrot.slane %v12186_v52, 7  ;;  %v18960_v27 = vrot.slane %v12145_v18, 7 }
  0xd3   : > { %vm18961_vm14 = vcmask 1040384   ;;  %v12810_v16 = vadd.s32 400, %v11299_v5  ;;  %v12812_v2 = vpack.c.bf16 %v2168_v15, %v2167_v39  ;;  %v18110_v30 = vand.u32 7, %v12795_v4 }
  0xd4   : > { %v12807_v49 = vsel %vm18961_vm14, %v18960_v27, %v18959_v36  ;;  %v18962_v33 = vrot.slane %v12189_v3, 7  ;;  %v18963_v56 = vmov %v18959_v36  ;;  %vm18964_vm12 = vmmov %vm18961_vm14  ;;  %v2223_v36 = vpack.c.bf16 %v1794_v46, %v1793_v29  ;;  %v11180_v46 = vld [vmem:[%s17744_s3 + $0x18] sm:$0xff]  }
  0xd5   : > { %v12825_v27 = vadd.s32 408, %v11299_v5  ;;  %v18117_v39 = vand.u32 7, %v12810_v16  ;;  %vm18965_vm14 = vcmask 31744   ;;  %v18966_v52 = vand.u32 7, %v12792_v62 }
  0xd6   : > { %v12821_v37 = vsel %vm18964_vm12, %v18963_v56, %v18962_v33  ;;  %10195 = vmatmul.mubr.msk.bf16.gmra.mrb[20].mxu0 %vm18965_vm14, %v12547_v53  ;;  %v18967_v33 = vmov 0  ;;  %vm12840_vm12 = vcmp.eq.s32.totalorder %v18110_v30, 0  ;;  %v18970_v29 = vmov 0  ;;  %vm18973_vm0 = vmmov %vm18965_vm14 }
  0xd7   : > { %vm12834_vm3 = vcmp.eq.s32.totalorder %v18966_v52, 0  ;;  %v18971_v29 = vsel %vm12840_vm12, 4294967295, %v18970_v29  ;;  %10198 = vmatprep.mubr.msk.bf16.mxu0 %vm18973_vm0, %v12618_v20  ;;  %v2224_v53 = vpack.c.bf16 %v1796_v1, %v1795_v11  ;;  %v1798_v52 = vsel %vm12840_vm12, 0.0, %v12821_v37  ;;  %vm18974_vm14 = vmmov %vm18973_vm0 }
  0xd8   : > { %v18968_v33 = vsel %vm12834_vm3, 4294967295, %v18967_v33  ;;  %18972 = vst [vmem:[#allocation95_spill] sm:$0xff] %v18971_v29  ;;  %v1797_v56 = vsel %vm12834_vm3, 0.0, %v12807_v49  ;;  %10149 = vmatmul.mubr.msk.bf16.vlgmr.msra.gmra.mrb[40].mxu1 %vm18974_vm14, %v12461_v42  ;;  %vm12860_vm1 = vcmp.eq.s32.totalorder %v18117_v39, 0  ;;  %v18975_v17 = vmov 0  ;;  %v18984_v42 = vld [vmem:[#allocation59_spill] sm:$0xff] }
  0xd9   : > { %18969 = vst [vmem:[#allocation94_spill] sm:$0xff] %v18968_v33  ;;  %v18976_v17 = vsel %vm12860_vm1, 4294967295, %v18975_v17  ;;  %v18978_v20 = vrot.slane %v12241_v44, 7  ;;  %v18979_v11 = vrot.slane %v12189_v3, 7  ;;  %vm18980_vm0 = vcmask 1040384   ;;  %v18990_v3 = vld [vmem:[#allocation60_spill] sm:$0xff]  ;;  %10239 = vmatpush3.bf16.msra.mxu1 %v12358_v24 }
  0xda   : > { %18977 = vst [vmem:[#allocation96_spill] sm:$0xff] %v18976_v17  ;;  %v18981_v15 = vrot.slane %v12244_v12, 7  ;;  %vm18983_vm12 = vmmov %vm18980_vm0  ;;  %v18985_v29 = vand.u32 7, %v18984_v42  ;;  %v18986_v39 = vmov 0  ;;  %vm18989_vm3 = vcmask 31744   ;;  %10240 = vmatprep.subr.bf16.mxu1 %v11180_v46 }
  0xdb   : > { %v12869_v1 = vsel %vm18980_vm0, %v18979_v11, %v18978_v20  ;;  %v18982_v18 = vmov %v18978_v20  ;;  %10152 = vmatprep.mubr.msk.bf16.mxu1 %vm18989_vm3, %v2223_v36  ;;  %v2225_v33 = vpack.c.bf16 %v1798_v52, %v1797_v56  ;;  %v18991_v32 = vand.u32 7, %v18990_v3  ;;  %v19005_v52 = vld [vmem:[#allocation61_spill] sm:$0xff] }
  0xdc   : > { %v12876_v30 = vsel %vm18983_vm12, %v18982_v18, %v18981_v15  ;;  %vm12880_vm14 = vcmp.eq.s32.totalorder %v18985_v29, 7  ;;  %v18992_v20 = vmov 0  ;;  %v18995_v44 = vrot.slane %v11946_v47, 2 }
  0xdd   : > { %v18987_v39 = vsel %vm12880_vm14, 4294967295, %v18986_v39  ;;  %vm12887_vm0 = vcmp.eq.s32.totalorder %v18991_v32, 7  ;;  %v18996_v18 = vrot.slane %v11943_v35, 2  ;;  %vm18997_vm12 = vcmask 1045504   ;;  %10241 = vmatpush3.bf16.msra.mxu1 %v11180_v46 }
  0xde   : > { %18988 = vst [vmem:[#allocation59_spill] sm:$0xff] %v18987_v39  ;;  %v18993_v20 = vsel %vm12887_vm0, 4294967295, %v18992_v20  ;;  %v18998_v29 = vrot.slane %v11953_v8, 2  ;;  %v18999_v11 = vmov %v18995_v44  ;;  %vm19000_vm2 = vmmov %vm18997_vm12  ;;  %v19001_v36 = vand.u32 7, %v12825_v27 }
  0xdf   : > { %18994 = vst [vmem:[#allocation60_spill] sm:$0xff] %v18993_v20  ;;  %v2010_v15 = vsel %vm18997_vm12, %v18996_v18, %v18995_v44  ;;  %v19002_v32 = vmov 0  ;;  %v19006_v3 = vand.u32 7, %v19005_v52  ;;  %v19007_v47 = vmov 0  ;;  %v19010_v18 = vld [vmem:[#allocation62_spill] sm:$0xff] }
  0xe0   : > { %v2012_v42 = vsel %vm19000_vm2, %v18999_v11, %v18998_v29  ;;  %vm12904_vm3 = vcmp.eq.s32.totalorder %v19001_v36, 0  ;;  %v2169_v56 = vsel %vm12880_vm14, 0.0, %v2010_v15  ;;  %v1799_v24 = vsel %vm12860_vm1, 0.0, %v12869_v1 }
  0xe1   : > { %v19003_v32 = vsel %vm12904_vm3, 4294967295, %v19002_v32  ;;  %v2170_v35 = vsel %vm12887_vm0, 0.0, %v2012_v42  ;;  %vm12914_vm12 = vcmp.eq.s32.totalorder %v19006_v3, 7  ;;  %v19011_v29 = vand.u32 7, %v19010_v18 }
  0xe2   : > { %19004 = vst [vmem:[#allocation97_spill] sm:$0xff] %v19003_v32  ;;  %v19008_v47 = vsel %vm12914_vm12, 4294967295, %v19007_v47  ;;  %v3062_v44 = vpack.c.bf16 %v2170_v35, %v2169_v56  ;;  %v19012_v11 = vmov 0  ;;  %v19015_v15 = vrot.slane %v11956_v31, 2 }
  0xe3   : > { %19009 = vst [vmem:[#allocation61_spill] sm:$0xff] %v19008_v47  ;;  %vm12923_vm2 = vcmp.eq.s32.totalorder %v19011_v29, 7  ;;  %v19016_v42 = vrot.slane %v11953_v8, 2  ;;  %vm19017_vm0 = vcmask 1045504   ;;  %v19018_v52 = vrot.slane %v12034_v41, 2 }
  0xe4   : > { %v19013_v11 = vsel %vm12923_vm2, 4294967295, %v19012_v11  ;;  %v19019_v3 = vmov %v19015_v15  ;;  %vm19020_vm14 = vmmov %vm19017_vm0  ;;  %v12940_v35 = vadd.s32 416, %v11299_v5  ;;  %v12943_v18 = vadd.s32 424, %v11299_v5 }
  0xe5   : > { %19014 = vst [vmem:[#allocation62_spill] sm:$0xff] %v19013_v11  ;;  %v2014_v36 = vsel %vm19017_vm0, %v19016_v42, %v19015_v15  ;;  %v2016_v20 = vsel %vm19020_vm14, %v19019_v3, %v19018_v52  ;;  %v1800_v8 = vsel %vm12904_vm3, 0.0, %v12876_v30  ;;  %v19021_v31 = vrot.slane %v12280_v38, 7 }
  0xe6   : > { %v2171_v56 = vsel %vm12914_vm12, 0.0, %v2014_v36  ;;  %v2172_v29 = vsel %vm12923_vm2, 0.0, %v2016_v20  ;;  %v19022_v15 = vrot.slane %v12244_v12, 7  ;;  %vm19023_vm14 = vcmask 1040384  }
  0xe7   : > { %v12958_v36 = vadd.s32 432, %v11299_v5  ;;  %vm19024_vm0 = vcmask 31744   ;;  %v12962_v52 = vpack.c.bf16 %v2172_v29, %v2171_v56  ;;  %v18138_v3 = vand.u32 7, %v12940_v35  ;;  %vm19027_vm2 = vmmov %vm19023_vm14 }
  0xe8   : > { %v12955_v42 = vsel %vm19023_vm14, %v19022_v15, %v19021_v31  ;;  %10199 = vmatmul.mubr.msk.bf16.gmra.mrb[24].mxu0 %vm19024_vm0, %v12648_v54  ;;  %v19025_v11 = vrot.slane %v12283_v28, 7  ;;  %v19026_v12 = vmov %v19021_v31  ;;  %vm19028_vm14 = vmmov %vm19024_vm0  ;;  %v12978_v54 = vadd.s32 440, %v11299_v5  ;;  %10153 = vmatmul.mubr.msk.bf16.gmra.mrb[44].mxu1 %vm19024_vm0, %v2224_v53 }
  0xe9   : > { %10202 = vmatprep.mubr.msk.bf16.mxu0 %vm19028_vm14, %v12771_v61  ;;  %v18145_v56 = vand.u32 7, %v12958_v36  ;;  %v2023_v20 = vrot.slane %v12573_v48, 2  ;;  %v19029_v38 = vmov 0  ;;  %v19033_v61 = vmov 0  ;;  %vm19036_vm12 = vmmov %vm19024_vm0 }
  0xea   : > { %v12971_v31 = vsel %vm19027_vm2, %v19026_v12, %v19025_v11  ;;  %vm12986_vm2 = vcmp.eq.s32.totalorder %v18138_v3, 0  ;;  %v19032_v11 = vand.u32 7, %v12943_v18  ;;  %10156 = vmatprep.mubr.msk.bf16.mxu1 %vm19036_vm12, %v2225_v33  ;;  %v2226_v12 = vpack.c.bf16 %v1800_v8, %v1799_v24  ;;  %v19046_v3 = vld [vmem:[#allocation70_spill] sm:$0xff] }
  0xeb   : > { %v19030_v38 = vsel %vm12986_vm2, 4294967295, %v19029_v38  ;;  %v1801_v48 = vsel %vm12986_vm2, 0.0, %v12955_v42  ;;  %vm13006_vm0 = vcmp.eq.s32.totalorder %v18145_v56, 0  ;;  %v19040_v29 = vrot.slane %v12387_v21, 7 }
  0xec   : > { %19031 = vst [vmem:[#allocation98_spill] sm:$0xff] %v19030_v38  ;;  %vm12992_vm14 = vcmp.eq.s32.totalorder %v19032_v11, 0  ;;  %v19037_v11 = vmov 0  ;;  %v19041_v33 = vrot.slane %v12283_v28, 7  ;;  %vm19042_vm12 = vcmask 1040384  }
  0xed   : > { %v19034_v61 = vsel %vm12992_vm14, 4294967295, %v19033_v61  ;;  %v1802_v53 = vsel %vm12992_vm14, 0.0, %v12971_v31  ;;  %v19038_v11 = vsel %vm13006_vm0, 4294967295, %v19037_v11  ;;  %v19043_v8 = vrot.slane %v12390_v0, 7  ;;  %vm19045_vm14 = vmmov %vm19042_vm12 }
  0xee   : > { %19035 = vst [vmem:[#allocation99_spill] sm:$0xff] %v19034_v61  ;;  %19039 = vst [vmem:[#allocation100_spill] sm:$0xff] %v19038_v11  ;;  %v13015_v24 = vsel %vm19042_vm12, %v19041_v33, %v19040_v29  ;;  %v19044_v46 = vmov %v19040_v29  ;;  %v19047_v47 = vand.u32 7, %v19046_v3  ;;  %v19048_v56 = vmov 0  ;;  %v19051_v61 = vld [vmem:[#allocation71_spill] sm:$0xff] }
  0xef   : > { %v13022_v15 = vsel %vm19045_vm14, %v19044_v46, %v19043_v8  ;;  %v2227_v39 = vpack.c.bf16 %v1802_v53, %v1801_v48  ;;  %v19052_v38 = vand.u32 7, %v19051_v61  ;;  %v19053_v28 = vmov 0  ;;  %v19066_v53 = vld [vmem:[#allocation72_spill] sm:$0xff] }
  0xf0   : > { %vm13026_vm2 = vcmp.eq.s32.totalorder %v19047_v47, 7  ;;  %v19056_v29 = vrot.slane %v12037_v10, 2  ;;  %v19057_v21 = vrot.slane %v12034_v41, 2  ;;  %vm19058_vm12 = vcmask 1045504  }
  0xf1   : > { %v19049_v56 = vsel %vm13026_vm2, 4294967295, %v19048_v56  ;;  %vm13032_vm3 = vcmp.eq.s32.totalorder %v19052_v38, 7  ;;  %v19059_v33 = vrot.slane %v12043_v9, 2  ;;  %vm19061_vm14 = vmmov %vm19058_vm12  ;;  %v19062_v48 = vand.u32 7, %v12978_v54 }
  0xf2   : > { %19050 = vst [vmem:[#allocation70_spill] sm:$0xff] %v19049_v56  ;;  %v19054_v28 = vsel %vm13032_vm3, 4294967295, %v19053_v28  ;;  %v2018_v46 = vsel %vm19058_vm12, %v19057_v21, %v19056_v29  ;;  %v19060_v47 = vmov %v19056_v29  ;;  %v19063_v61 = vmov 0 }
  0xf3   : > { %19055 = vst [vmem:[#allocation71_spill] sm:$0xff] %v19054_v28  ;;  %v2020_v3 = vsel %vm19061_vm14, %v19060_v47, %v19059_v33  ;;  %vm13048_vm1 = vcmp.eq.s32.totalorder %v19062_v48, 0  ;;  %v2173_v38 = vsel %vm13026_vm2, 0.0, %v2018_v46  ;;  %v19067_v8 = vand.u32 7, %v19066_v53  ;;  %v19071_v33 = vld [vmem:[#allocation73_spill] sm:$0xff] }
  0xf4   : > { %v19064_v61 = vsel %vm13048_vm1, 4294967295, %v19063_v61  ;;  %v2174_v41 = vsel %vm13032_vm3, 0.0, %v2020_v3  ;;  %v19068_v29 = vmov 0  ;;  %v1803_v10 = vsel %vm13006_vm0, 0.0, %v13015_v24 }
  0xf5   : > { %19065 = vst [vmem:[#allocation101_spill] sm:$0xff] %v19064_v61  ;;  %vm13058_vm12 = vcmp.eq.s32.totalorder %v19067_v8, 7  ;;  %v3064_v21 = vpack.c.bf16 %v2174_v41, %v2173_v38  ;;  %v19072_v47 = vand.u32 7, %v19071_v33  ;;  %v19073_v48 = vmov 0 }
  0xf6   : > { %v19069_v29 = vsel %vm13058_vm12, 4294967295, %v19068_v29  ;;  %v19076_v46 = vrot.slane %v12048_v7, 2  ;;  %v19077_v3 = vrot.slane %v12043_v9, 2  ;;  %vm19078_vm3 = vcmask 1045504  }
  0xf7   : > { %19070 = vst [vmem:[#allocation72_spill] sm:$0xff] %v19069_v29  ;;  %vm13067_vm14 = vcmp.eq.s32.totalorder %v19072_v47, 7  ;;  %vm19079_vm2 = vcmask 31744   ;;  %vm19081_vm15 = vmmov %vm19078_vm3  ;;  %v13084_v41 = vadd.s32 448, %v11299_v5  ;;  %v13087_v33 = vadd.s32 456, %v11299_v5 }
  0xf8   : > { %v19074_v48 = vsel %vm13067_vm14, 4294967295, %v19073_v48  ;;  %v2022_v53 = vsel %vm19078_vm3, %v19077_v3, %v19076_v46  ;;  %10203 = vmatmul.mubr.msk.bf16.gmra.mrb[28].mxu0 %vm19079_vm2, %v12812_v2  ;;  %v19080_v8 = vmov %v19076_v46  ;;  %vm19082_vm0 = vmmov %vm19079_vm2  ;;  %v1804_v9 = vsel %vm13048_vm1, 0.0, %v13022_v15 }
  0xf9   : > { %19075 = vst [vmem:[#allocation73_spill] sm:$0xff] %v19074_v48  ;;  %v2024_v28 = vsel %vm19081_vm15, %v19080_v8, %v2023_v20  ;;  %v2175_v38 = vsel %vm13058_vm12, 0.0, %v2022_v53  ;;  %10206 = vmatprep.mubr.msk.bf16.mxu0 %vm19082_vm0, %v3062_v44  ;;  %v19083_v2 = vrot.slane %v12410_v22, 7  ;;  %v19084_v47 = vrot.slane %v12390_v0, 7  ;;  %vm19086_vm3 = vmmov %vm19082_vm0 }
  0xfa   : > { %v2176_v7 = vsel %vm13067_vm14, 0.0, %v2024_v28  ;;  %vm19085_vm15 = vcmask 1040384   ;;  %v13103_v3 = vadd.s32 464, %v11299_v5  ;;  %10157 = vmatmul.mubr.msk.bf16.gmra.mrb[48].mxu1 %vm19086_vm3, %v2226_v12  ;;  %v18171_v53 = vand.u32 7, %v13084_v41 }
  0xfb   : > { %v13100_v46 = vsel %vm19085_vm15, %v19084_v47, %v19083_v2  ;;  %v3065_v44 = vpack.c.bf16 %v2176_v7, %v2175_v38  ;;  %v18170_v8 = vand.u32 7, %v13087_v33  ;;  %v19087_v48 = vrot.slane %v12413_v58, 7  ;;  %vm19089_vm2 = vmmov %vm19085_vm15  ;;  %10160 = vmatprep.mubr.msk.bf16.mxu1 %vm19082_vm0, %v2227_v39 }
  0xfc   : > { %v19088_v28 = vmov %v19083_v2  ;;  %v1550_v0 = vrot.slane %v12633_v23, 7  ;;  %v2025_v2 = vrot.slane %v12601_v51, 2  ;;  %v13119_v12 = vadd.s32 472, %v11299_v5  ;;  %vm19103_vm14 = vmmov %vm19089_vm2 }
  0xfd   : > { %v13113_v29 = vsel %vm19089_vm2, %v19088_v28, %v19087_v48  ;;  %v18188_v38 = vand.u32 7, %v13103_v3  ;;  %v2228_v47 = vpack.c.bf16 %v1804_v9, %v1803_v10  ;;  %vm13125_vm15 = vcmp.eq.s32.totalorder %v18171_v53, 0 }
  0xfe   : > { %v19090_v22 = vmov 0  ;;  %vm13131_vm3 = vcmp.eq.s32.totalorder %v18170_v8, 0  ;;  %v19093_v51 = vmov 0  ;;  %v1805_v23 = vsel %vm13125_vm15, 0.0, %v13100_v46 }
  0xff   : > { %v19091_v22 = vsel %vm13125_vm15, 4294967295, %v19090_v22  ;;  %v19094_v51 = vsel %vm13131_vm3, 4294967295, %v19093_v51  ;;  %v1806_v39 = vsel %vm13131_vm3, 0.0, %v13113_v29  ;;  %v19096_v48 = vrot.slane %v12484_v34, 7 }
 0x100   : > { %19092 = vst [vmem:[#allocation102_spill] sm:$0xff] %v19091_v22  ;;  %19095 = vst [vmem:[#allocation103_spill] sm:$0xff] %v19094_v51  ;;  %v19097_v9 = vrot.slane %v12413_v58, 7  ;;  %v2229_v8 = vpack.c.bf16 %v1806_v39, %v1805_v23  ;;  %vm13151_vm0 = vcmp.eq.s32.totalorder %v18188_v38, 0  ;;  %v19098_v53 = vmov 0 }
 0x101   : > { %v19099_v53 = vsel %vm13151_vm0, 4294967295, %v19098_v53  ;;  %v19101_v7 = vrot.slane %v12502_v59, 7  ;;  %v19102_v56 = vmov %v19096_v48  ;;  %v19104_v51 = vand.u32 7, %v12534_v26 }
 0x102   : > { %v13147_v28 = vsel %vm19089_vm2, %v19097_v9, %v19096_v48  ;;  %19100 = vst [vmem:[#allocation104_spill] sm:$0xff] %v19099_v53  ;;  %v19105_v58 = vmov 0  ;;  %v19108_v23 = vand.u32 7, %v13119_v12  ;;  %v19109_v39 = vmov 0 }
 0x103   : > { %v13160_v10 = vsel %vm19103_vm14, %v19102_v56, %v19101_v7  ;;  %vm13164_vm12 = vcmp.eq.s32.totalorder %v19104_v51, 7  ;;  %v19112_v48 = vand.u32 7, %v12541_v40  ;;  %v19113_v9 = vmov 0 }
 0x104   : > { %v19106_v58 = vsel %vm13164_vm12, 4294967295, %v19105_v58  ;;  %vm13170_vm2 = vcmp.eq.s32.totalorder %v19108_v23, 0  ;;  %vm19116_vm14 = vcmask 1045504   ;;  %v2027_v26 = vrot.slane %v12294_v60, 2  ;;  %v19119_v60 = vld [vmem:[#allocation20_spill] sm:$0xff] }
 0x105   : > { %19107 = vst [vmem:[#allocation105_spill] sm:$0xff] %v19106_v58  ;;  %v19110_v39 = vsel %vm13170_vm2, 4294967295, %v19109_v39  ;;  %vm13176_vm3 = vcmp.eq.s32.totalorder %v19112_v48, 7  ;;  %v2026_v34 = vsel %vm19116_vm14, %v2023_v20, %v2025_v2  ;;  %v2031_v56 = vrot.slane %v12681_v19, 2  ;;  %v19130_v58 = vld [vmem:[#allocation83_spill] sm:$0xff] }
 0x106   : > { %19111 = vst [vmem:[#allocation106_spill] sm:$0xff] %v19110_v39  ;;  %v19114_v9 = vsel %vm13176_vm3, 4294967295, %v19113_v9  ;;  %v2033_v7 = vrot.slane %v12688_v25, 2  ;;  %v2035_v51 = vrot.slane %v12717_v43, 2  ;;  %v2037_v23 = vrot.slane %v12743_v63, 2 }
 0x107   : > { %19115 = vst [vmem:[#allocation107_spill] sm:$0xff] %v19114_v9  ;;  %vm19117_vm15 = vcmask 31744   ;;  %v1807_v40 = vsel %vm13151_vm0, 0.0, %v13147_v28  ;;  %v2028_v20 = vsel %vm19116_vm14, %v2025_v2, %v2027_v26  ;;  %v2029_v48 = vrot.slane %v19119_v60, 2 }
 0x108   : > { %10207 = vmatmul.mubr.msk.bf16.gmra.mrb[32].mxu0 %vm19117_vm15, %v12962_v52  ;;  %vm19118_vm1 = vmmov %vm19117_vm15  ;;  %v13195_v19 = vadd.s32 480, %v11299_v5  ;;  %v1808_v25 = vsel %vm13170_vm2, 0.0, %v13160_v10  ;;  %v2177_v43 = vsel %vm13164_vm12, 0.0, %v2026_v34  ;;  %v2178_v63 = vsel %vm13176_vm3, 0.0, %v2028_v20 }
 0x109   : > { %10210 = vmatprep.mubr.msk.bf16.mxu0 %vm19118_vm1, %v3064_v21  ;;  %vm19120_vm13 = vmmov %vm19118_vm1  ;;  %v13206_v52 = vadd.s32 488, %v11299_v5  ;;  %v19121_v21 = vld [vmem:[#allocation82_spill] sm:$0xff]  ;;  %v19123_v60 = vmov 0  ;;  %v19127_v34 = vrot.slane %v12505_v45, 7  ;;  %v19128_v9 = vrot.slane %v12502_v59, 7 }
 0x10a   : > { %10161 = vmatmul.mubr.msk.bf16.gmra.mrb[52].mxu1 %vm19120_vm13, %v2228_v47  ;;  %v19122_v2 = vand.u32 7, %v19121_v21  ;;  %vm19126_vm13 = vmmov %vm19116_vm14  ;;  %vm19129_vm14 = vcmask 1040384   ;;  %v19131_v39 = vand.u32 7, %v19130_v58  ;;  %v2230_v59 = vpack.c.bf16 %v1808_v25, %v1807_v40 }
 0x10b   : > { %10164 = vmatprep.mubr.msk.bf16.mxu1 %vm19118_vm1, %v2229_v8  ;;  %v2030_v47 = vsel %vm19126_vm13, %v2027_v26, %v2029_v48  ;;  %v13222_v20 = vsel %vm19129_vm14, %v19128_v9, %v19127_v34  ;;  %v19132_v8 = vmov 0  ;;  %vm19135_vm3 = vmmov %vm19126_vm13  ;;  %v19136_v26 = vrot.slane %v12508_v14, 7 }
 0x10c   : > { %vm13211_vm15 = vcmp.eq.s32.totalorder %v19122_v2, 7  ;;  %vm13226_vm1 = vcmp.eq.s32.totalorder %v19131_v39, 7  ;;  %v2032_v21 = vsel %vm19135_vm3, %v2029_v48, %v2031_v56  ;;  %v18201_v2 = vand.u32 7, %v13206_v52  ;;  %vm19138_vm13 = vmmov %vm19129_vm14 }
 0x10d   : > { %v19124_v60 = vsel %vm13211_vm15, 4294967295, %v19123_v60  ;;  %v19133_v8 = vsel %vm13226_vm1, 4294967295, %v19132_v8  ;;  %v19137_v38 = vmov %v19127_v34  ;;  %v3066_v9 = vpack.c.bf16 %v2178_v63, %v2177_v43  ;;  %vm19149_vm12 = vmmov %vm19138_vm13 }
 0x10e   : > { %19125 = vst [vmem:[#allocation20_spill] sm:$0xff] %v19124_v60  ;;  %19134 = vst [vmem:[#allocation82_spill] sm:$0xff] %v19133_v8  ;;  %v13237_v53 = vsel %vm19138_vm13, %v19137_v38, %v19136_v26  ;;  %v19139_v34 = vand.u32 7, %v13195_v19  ;;  %v19140_v58 = vmov 0  ;;  %v13246_v39 = vadd.s32 496, %v11299_v5  ;;  %v19150_v8 = vld [vmem:[#allocation46_spill] sm:$0xff] }
 0x10f   : > { %v2179_v48 = vsel %vm13211_vm15, 0.0, %v2030_v47  ;;  %vm13252_vm3 = vcmp.eq.s32.totalorder %v18201_v2, 0  ;;  %v19143_v45 = vmov 0  ;;  %v13260_v40 = vadd.s32 504, %v11299_v5 }
 0x110   : > { %vm13241_vm14 = vcmp.eq.s32.totalorder %v19139_v34, 0  ;;  %v19144_v45 = vsel %vm13252_vm3, 4294967295, %v19143_v45  ;;  %v2180_v25 = vsel %vm13226_vm1, 0.0, %v2032_v21  ;;  %v1810_v43 = vsel %vm13252_vm3, 0.0, %v13237_v53 }
 0x111   : > { %v19141_v58 = vsel %vm13241_vm14, 4294967295, %v19140_v58  ;;  %19145 = vst [vmem:[#allocation108_spill] sm:$0xff] %v19144_v45  ;;  %v1809_v38 = vsel %vm13241_vm14, 0.0, %v13222_v20  ;;  %v904_v63 = vand.u32 7, %v13246_v39  ;;  %v19146_v47 = vmov %v19136_v26 }
 0x112   : > { %19142 = vst [vmem:[#allocation83_spill] sm:$0xff] %v19141_v58  ;;  %v13271_v26 = vsel %vm19138_vm13, %v19146_v47, %v1550_v0  ;;  %vm19147_vm15 = vcmask 31744   ;;  %v2231_v34 = vpack.c.bf16 %v1810_v43, %v1809_v38  ;;  %v18220_v5 = vand.u32 7, %v13260_v40 }
 0x113   : > { %10211 = vmatmul.mubr.msk.bf16.gmra.mrb[36].mxu0 %vm19147_vm15, %v3065_v44  ;;  %v19148_v2 = vrot.slane %v12636_v13, 7  ;;  %v19151_v60 = vand.u32 7, %v19150_v8  ;;  %v19152_v45 = vmov 0  ;;  %vm19155_vm3 = vmmov %vm19147_vm15  ;;  %vm13289_vm13 = vcmp.eq.s32.totalorder %v904_v63, 0 }
 0x114   : > { %10214 = vmatprep.mubr.msk.bf16.mxu0 %vm19155_vm3, %v3066_v9  ;;  %v19156_v14 = vmov 0  ;;  %v19159_v44 = vand.u32 7, %v12651_v57  ;;  %v19160_v38 = vmov 0  ;;  %v2039_v8 = vrot.slane %v12807_v49, 2  ;;  %vm19165_vm2 = vmmov %vm19155_vm3 }
 0x115   : > { %v13278_v21 = vsel %vm19149_vm12, %v1550_v0, %v19148_v2  ;;  %vm13282_vm1 = vcmp.eq.s32.totalorder %v19151_v60, 7  ;;  %v19157_v14 = vsel %vm13289_vm13, 4294967295, %v19156_v14  ;;  %vm19163_vm12 = vcmask 1045504   ;;  %10165 = vmatmul.mubr.msk.bf16.gmra.mrb[56].mxu1 %vm19165_vm2, %v2230_v59 }
 0x116   : > { %v19153_v45 = vsel %vm13282_vm1, 4294967295, %v19152_v45  ;;  %19158 = vst [vmem:[#allocation109_spill] sm:$0xff] %v19157_v14  ;;  %vm13295_vm15 = vcmp.eq.s32.totalorder %v19159_v44, 7  ;;  %v2034_v0 = vsel %vm19163_vm12, %v2031_v56, %v2033_v7  ;;  %vm19164_vm14 = vmmov %vm19163_vm12  ;;  %vm13305_vm3 = vcmp.eq.s32.totalorder %v18220_v5, 0 }
 0x117   : > { %19154 = vst [vmem:[#allocation46_spill] sm:$0xff] %v19153_v45  ;;  %v19161_v38 = vsel %vm13295_vm15, 4294967295, %v19160_v38  ;;  %v2036_v60 = vsel %vm19164_vm14, %v2033_v7, %v2035_v51  ;;  %v19166_v2 = vmov 0  ;;  %v2181_v57 = vsel %vm13282_vm1, 0.0, %v2034_v0  ;;  %vm19169_vm14 = vmmov %vm19165_vm2 }
 0x118   : > { %19162 = vst [vmem:[#allocation110_spill] sm:$0xff] %v19161_v38  ;;  %v19167_v2 = vsel %vm13305_vm3, 4294967295, %v19166_v2  ;;  %v2182_v9 = vsel %vm13295_vm15, 0.0, %v2036_v60  ;;  %v2041_v56 = vrot.slane %v12821_v37, 2  ;;  %v2043_v7 = vrot.slane %v12869_v1, 2  ;;  %10168 = vmatprep.mubr.msk.bf16.mxu1 %vm19169_vm14, %v2231_v34 }
 0x119   : > { %19168 = vst [vmem:[#allocation111_spill] sm:$0xff] %v19167_v2  ;;  %v1811_v49 = vsel %vm13289_vm13, 0.0, %v13271_v26  ;;  %v1812_v59 = vsel %vm13305_vm3, 0.0, %v13278_v21  ;;  %v3067_v43 = vpack.c.bf16 %v2180_v25, %v2179_v48  ;;  %v3068_v47 = vpack.c.bf16 %v2182_v9, %v2181_v57 }
 0x11a   : > { %v19170_v44 = vand.u32 7, %v12661_v6  ;;  %v19171_v0 = vmov 0  ;;  %v2232_v37 = vpack.c.bf16 %v1812_v59, %v1811_v49  ;;  %v19174_v1 = vand.u32 7, %v12668_v55 }
 0x11b   : > { %v19175_v34 = vmov 0  ;;  %vm19178_vm14 = vcmask 1045504   ;;  %v19180_v48 = vand.u32 7, %v12792_v62  ;;  %v19181_v25 = vmov 0  ;;  %10215 = vmatmul.mubr.msk.bf16.gmra.mrb[40].mxu0 %vm19190_vm10, %v3067_v43 }
 0x11c   : > { %vm13324_vm2 = vcmp.eq.s32.totalorder %v19170_v44, 7  ;;  %vm13330_vm12 = vcmp.eq.s32.totalorder %v19174_v1, 7  ;;  %v2038_v60 = vsel %vm19178_vm14, %v2035_v51, %v2037_v23  ;;  %vm19179_vm15 = vmmov %vm19178_vm14  ;;  %v19184_v6 = vand.u32 7, %v12795_v4 }
 0x11d   : > { %v19172_v0 = vsel %vm13324_vm2, 4294967295, %v19171_v0  ;;  %v19176_v34 = vsel %vm13330_vm12, 4294967295, %v19175_v34  ;;  %v2040_v5 = vsel %vm19179_vm15, %v2037_v23, %v2039_v8  ;;  %vm13338_vm1 = vcmp.eq.s32.totalorder %v19180_v48, 7  ;;  %vm19188_vm13 = vmmov %vm19178_vm14 }
 0x11e   : > { %19173 = vst [vmem:[#allocation112_spill] sm:$0xff] %v19172_v0  ;;  %19177 = vst [vmem:[#allocation113_spill] sm:$0xff] %v19176_v34  ;;  %v19182_v25 = vsel %vm13338_vm1, 4294967295, %v19181_v25  ;;  %vm13344_vm3 = vcmp.eq.s32.totalorder %v19184_v6, 7  ;;  %v19185_v57 = vmov 0  ;;  %v2042_v55 = vsel %vm19188_vm13, %v2039_v8, %v2041_v56 }
 0x11f   : > { %19183 = vst [vmem:[#allocation114_spill] sm:$0xff] %v19182_v25  ;;  %v19186_v57 = vsel %vm13344_vm3, 4294967295, %v19185_v57  ;;  %vm19189_vm0 = vmmov %vm19188_vm13  ;;  %v2183_v62 = vsel %vm13324_vm2, 0.0, %v2038_v60  ;;  %v2184_v51 = vsel %vm13330_vm12, 0.0, %v2040_v5  ;;  %v2045_v4 = vrot.slane %v12876_v30, 2 }
 0x120   : > { %19187 = vst [vmem:[#allocation115_spill] sm:$0xff] %v19186_v57  ;;  %v2044_v9 = vsel %vm19189_vm0, %v2041_v56, %v2043_v7  ;;  %vm19191_vm14 = vmmov %vm19190_vm10  ;;  %v2047_v23 = vrot.slane %v12955_v42, 2  ;;  %v2185_v8 = vsel %vm13338_vm1, 0.0, %v2042_v55  ;;  %v2049_v49 = vrot.slane %v12971_v31, 2 }
 0x121   : > { %10218 = vmatprep.mubr.msk.bf16.mxu0 %vm19191_vm14, %v3068_v47  ;;  %vm19192_vm15 = vmmov %vm19190_vm10  ;;  %v2186_v56 = vsel %vm13344_vm3, 0.0, %v2044_v9  ;;  %v2051_v59 = vrot.slane %v13015_v24, 2  ;;  %v3069_v43 = vpack.c.bf16 %v2184_v51, %v2183_v62  ;;  %v19193_v5 = vand.u32 7, %v12810_v16 }
 0x122   : > { %10169 = vmatmul.mubr.msk.bf16.gmra.mrb[60].mxu1 %vm19192_vm15, %v2232_v37  ;;  %v3070_v47 = vpack.c.bf16 %v2186_v56, %v2185_v8  ;;  %v19194_v30 = vmov 0  ;;  %v19197_v42 = vand.u32 7, %v12825_v27  ;;  %v19198_v44 = vmov 0  ;;  %vm19201_vm14 = vmmov %vm19188_vm13 }
 0x123   : > { %vm13367_vm10 = vcmp.eq.s32.totalorder %v19193_v5, 7  ;;  %v2046_v37 = vsel %vm19188_vm13, %v2043_v7, %v2045_v4  ;;  %v2048_v31 = vsel %vm19201_vm14, %v2045_v4, %v2047_v23  ;;  %v19202_v24 = vand.u32 7, %v12940_v35  ;;  %vm19210_vm1 = vmmov %vm19188_vm13 }
 0x124   : > { %v19195_v30 = vsel %vm13367_vm10, 4294967295, %v19194_v30  ;;  %vm13373_vm0 = vcmp.eq.s32.totalorder %v19197_v42, 7  ;;  %v19203_v1 = vmov 0  ;;  %v19206_v16 = vand.u32 7, %v12943_v18  ;;  %vm19211_vm12 = vmmov %vm19210_vm1 }
 0x125   : > { %19196 = vst [vmem:[#allocation116_spill] sm:$0xff] %v19195_v30  ;;  %v19199_v44 = vsel %vm13373_vm0, 4294967295, %v19198_v44  ;;  %vm13381_vm15 = vcmp.eq.s32.totalorder %v19202_v24, 7  ;;  %v19207_v60 = vmov 0  ;;  %v2050_v27 = vsel %vm19210_vm1, %v2047_v23, %v2049_v49  ;;  %vm19222_vm14 = vmmov %vm19211_vm12 }
 0x126   : > { %19200 = vst [vmem:[#allocation117_spill] sm:$0xff] %v19199_v44  ;;  %v19204_v1 = vsel %vm13381_vm15, 4294967295, %v19203_v1  ;;  %vm13387_vm3 = vcmp.eq.s32.totalorder %v19206_v16, 7  ;;  %v2052_v48 = vsel %vm19211_vm12, %v2049_v49, %v2051_v59  ;;  %vm19212_vm2 = vcmask 31744  }
 0x127   : > { %19205 = vst [vmem:[#allocation118_spill] sm:$0xff] %v19204_v1  ;;  %v19208_v60 = vsel %vm13387_vm3, 4294967295, %v19207_v60  ;;  %10219 = vmatmul.mubr.msk.bf16.gmra.mrb[44].mxu0 %vm19212_vm2, %v3069_v43  ;;  %vm19213_vm13 = vmmov %vm19212_vm2  ;;  %v2187_v35 = vsel %vm13367_vm10, 0.0, %v2046_v37  ;;  %v2188_v7 = vsel %vm13373_vm0, 0.0, %v2048_v31  ;;  %v2053_v18 = vrot.slane %v13022_v15, 2 }
 0x128   : > { %19209 = vst [vmem:[#allocation119_spill] sm:$0xff] %v19208_v60  ;;  %10222 = vmatprep.mubr.msk.bf16.mxu0 %vm19213_vm13, %v3070_v47  ;;  %v2055_v6 = vrot.slane %v13100_v46, 2  ;;  %v2189_v55 = vsel %vm13381_vm15, 0.0, %v2050_v27  ;;  %v2190_v9 = vsel %vm13387_vm3, 0.0, %v2052_v48  ;;  %v2057_v62 = vrot.slane %v13113_v29, 2  ;;  %vm19231_vm15 = vmmov %vm19211_vm12 }
 0x129   : > { %v2059_v51 = vrot.slane %v13147_v28, 2  ;;  %v3071_v4 = vpack.c.bf16 %v2188_v7, %v2187_v35  ;;  %v3072_v23 = vpack.c.bf16 %v2190_v9, %v2189_v55  ;;  %v19214_v8 = vand.u32 7, %v12958_v36  ;;  %vm19232_vm0 = vmmov %vm19211_vm12 }
 0x12a   : > { %v19215_v56 = vmov 0  ;;  %v19218_v15 = vand.u32 7, %v12978_v54  ;;  %v19219_v46 = vmov 0  ;;  %v2054_v49 = vsel %vm19211_vm12, %v2051_v59, %v2053_v18 }
 0x12b   : > { %vm13409_vm1 = vcmp.eq.s32.totalorder %v19214_v8, 7  ;;  %v2056_v29 = vsel %vm19222_vm14, %v2053_v18, %v2055_v6  ;;  %v19223_v28 = vand.u32 7, %v13084_v41  ;;  %v19224_v43 = vmov 0 }
 0x12c   : > { %v19216_v56 = vsel %vm13409_vm1, 4294967295, %v19215_v56  ;;  %vm13415_vm2 = vcmp.eq.s32.totalorder %v19218_v15, 7  ;;  %v19227_v36 = vand.u32 7, %v13087_v33  ;;  %v19228_v47 = vmov 0 }
 0x12d   : > { %19217 = vst [vmem:[#allocation120_spill] sm:$0xff] %v19216_v56  ;;  %v19220_v46 = vsel %vm13415_vm2, 4294967295, %v19219_v46  ;;  %vm13423_vm13 = vcmp.eq.s32.totalorder %v19223_v28, 7  ;;  %v2058_v54 = vsel %vm19231_vm15, %v2055_v6, %v2057_v62  ;;  %v2060_v5 = vsel %vm19232_vm0, %v2057_v62, %v2059_v51 }
 0x12e   : > { %19221 = vst [vmem:[#allocation121_spill] sm:$0xff] %v19220_v46  ;;  %v19225_v43 = vsel %vm13423_vm13, 4294967295, %v19224_v43  ;;  %vm13429_vm3 = vcmp.eq.s32.totalorder %v19227_v36, 7  ;;  %vm19233_vm10 = vcmask 31744   ;;  %v2191_v41 = vsel %vm13409_vm1, 0.0, %v2054_v49 }
 0x12f   : > { %19226 = vst [vmem:[#allocation122_spill] sm:$0xff] %v19225_v43  ;;  %v19229_v47 = vsel %vm13429_vm3, 4294967295, %v19228_v47  ;;  %10223 = vmatmul.mubr.msk.bf16.gmra.mrb[48].mxu0 %vm19233_vm10, %v3071_v4  ;;  %vm19234_vm12 = vmmov %vm19233_vm10  ;;  %v2192_v59 = vsel %vm13415_vm2, 0.0, %v2056_v29  ;;  %v2061_v33 = vrot.slane %v13160_v10, 2  ;;  %v2063_v42 = vrot.slane %v13222_v20, 2 }
 0x130   : > { %19230 = vst [vmem:[#allocation123_spill] sm:$0xff] %v19229_v47  ;;  %10226 = vmatprep.mubr.msk.bf16.mxu0 %vm19234_vm12, %v3072_v23  ;;  %v2193_v37 = vsel %vm13423_vm13, 0.0, %v2058_v54  ;;  %v2194_v31 = vsel %vm13429_vm3, 0.0, %v2060_v5  ;;  %v2065_v24 = vrot.slane %v13237_v53, 2  ;;  %v2067_v16 = vrot.slane %v13271_v26, 2  ;;  %vm19245_vm12 = vmmov %vm19222_vm14 }
 0x131   : > { %v3073_v27 = vpack.c.bf16 %v2192_v59, %v2191_v41  ;;  %v19235_v48 = vrot.slane %v12636_v13, 7  ;;  %vm19236_vm10 = vcmask 1040384   ;;  %v3074_v7 = vpack.c.bf16 %v2194_v31, %v2193_v37  ;;  %vm19254_vm13 = vmmov %vm19245_vm12  ;;  %v13591_v43 = vld [vmem:[%s17743_s2] ss:$0 sm:$0xff] }
 0x132   : > { %v19237_v10 = vand.u32 7, %v13103_v3  ;;  %v19238_v20 = vmov 0  ;;  %v19241_v18 = vand.u32 7, %v13119_v12  ;;  %v19242_v6 = vmov 0  ;;  %vm19255_vm2 = vmmov %vm19245_vm12 }
 0x133   : > { %v1620_v35 = vsel %vm19236_vm10, %v19235_v48, 0.0  ;;  %v2062_v53 = vsel %vm19222_vm14, %v2059_v51, %v2061_v33  ;;  %v2064_v26 = vsel %vm19245_vm12, %v2061_v33, %v2063_v42  ;;  %v19246_v13 = vand.u32 7, %v13195_v19  ;;  %v13483_v51 = vld [vmem:[%s17744_s3] sm:$0xff]  }
 0x134   : > { %vm13454_vm0 = vcmp.eq.s32.totalorder %v19237_v10, 7  ;;  %vm13460_vm15 = vcmp.eq.s32.totalorder %v19241_v18, 7  ;;  %v19247_v55 = vmov 0  ;;  %v19250_v3 = vand.u32 7, %v13206_v52  ;;  %10306 = vmatprep.subr.bf16.mxu1 %v13483_v51 }
 0x135   : > { %v19239_v20 = vsel %vm13454_vm0, 4294967295, %v19238_v20  ;;  %v19243_v6 = vsel %vm13460_vm15, 4294967295, %v19242_v6  ;;  %vm13468_vm10 = vcmp.eq.s32.totalorder %v19246_v13, 7  ;;  %v19251_v9 = vmov 0 }
 0x136   : > { %19240 = vst [vmem:[#allocation124_spill] sm:$0xff] %v19239_v20  ;;  %19244 = vst [vmem:[#allocation125_spill] sm:$0xff] %v19243_v6  ;;  %v19248_v55 = vsel %vm13468_vm10, 4294967295, %v19247_v55  ;;  %vm13474_vm3 = vcmp.eq.s32.totalorder %v19250_v3, 7  ;;  %v2066_v12 = vsel %vm19254_vm13, %v2063_v42, %v2065_v24  ;;  %v2068_v62 = vsel %vm19255_vm2, %v2065_v24, %v2067_v16 }
 0x137   : > { %19249 = vst [vmem:[#allocation126_spill] sm:$0xff] %v19248_v55  ;;  %v19252_v9 = vsel %vm13474_vm3, 4294967295, %v19251_v9  ;;  %vm19256_vm14 = vcmask 31744   ;;  %v2195_v19 = vsel %vm13454_vm0, 0.0, %v2062_v53  ;;  %v2196_v52 = vsel %vm13460_vm15, 0.0, %v2064_v26 }
 0x138   : > { %19253 = vst [vmem:[#allocation127_spill] sm:$0xff] %v19252_v9  ;;  %10227 = vmatmul.mubr.msk.bf16.gmra.mrb[52].mxu0 %vm19256_vm14, %v3073_v27  ;;  %vm19257_vm12 = vmmov %vm19256_vm14  ;;  %v2071_v4 = vrot.slane %v1620_v35, 2  ;;  %v2069_v23 = vrot.slane %v13278_v21, 2  ;;  %v2197_v8 = vsel %vm13468_vm10, 0.0, %v2066_v12  ;;  %v2198_v15 = vsel %vm13474_vm3, 0.0, %v2068_v62 }
 0x139   : > { %10230 = vmatprep.mubr.msk.bf16.mxu0 %vm19257_vm12, %v3074_v7  ;;  %v3075_v49 = vpack.c.bf16 %v2196_v52, %v2195_v19  ;;  %v3076_v29 = vpack.c.bf16 %v2198_v15, %v2197_v8  ;;  %vm13499_vm2 = vcmp.eq.s32.totalorder %v904_v63, 7  ;;  %v19258_v28 = vmov 0 }
 0x13a   : > { %v19259_v28 = vsel %vm13499_vm2, 4294967295, %v19258_v28  ;;  %v19261_v36 = vand.u32 7, %v13260_v40  ;;  %v19262_v54 = vmov 0  ;;  %vm19265_vm14 = vcmask 1045504   ;;  %v10044_v40 = vpop.f32.mrb[0].mxu1 }
 0x13b   : > { %19260 = vst [vmem:[#allocation128_spill] sm:$0xff] %v19259_v28  ;;  %v2070_v21 = vsel %vm19265_vm14, %v2067_v16, %v2069_v23  ;;  %vm19266_vm12 = vmmov %vm19265_vm14  ;;  %vm19267_vm10 = vcmask 31744   ;;  %v2403_v59 = vpop.f32.mrb[1].mxu1 }
 0x13c   : > { %vm13505_vm13 = vcmp.eq.s32.totalorder %v19261_v36, 7  ;;  %v2072_v5 = vsel %vm19266_vm12, %v2069_v23, %v2071_v4  ;;  %vm19268_vm3 = vmmov %vm19267_vm10  ;;  %v2199_v39 = vsel %vm13499_vm2, 0.0, %v2070_v21  ;;  %v10045_v33 = vpop.f32.mrb[2].mxu1 }
 0x13d   : > { %v19263_v54 = vsel %vm13505_vm13, 4294967295, %v19262_v54  ;;  %v2200_v63 = vsel %vm13505_vm13, 0.0, %v2072_v5  ;;  %vm19269_vm15 = vmmov %vm19268_vm3  ;;  %v2406_v42 = vpop.f32.mrb[3].mxu1 }
 0x13e   : > { %19264 = vst [vmem:[#allocation129_spill] sm:$0xff] %v19263_v54  ;;  %v3077_v41 = vpack.c.bf16 %v2200_v63, %v2199_v39  ;;  %v10048_v37 = vpop.f32.mrb[4].mxu1 }
 0x13f   : > { %v13518_v31 = vpop.f32.mrb[5].mxu1 }
 0x140   : > { %10231 = vmatmul.mubr.msk.bf16.gmra.mrb[56].mxu0 %vm19267_vm10, %v3075_v49  ;;  %v13520_v24 = vpop.f32.mrb[6].mxu1 }
 0x141   : > { %10234 = vmatprep.mubr.msk.bf16.mxu0 %vm19268_vm3, %v3076_v29  ;;  %v13522_v16 = vpop.f32.mrb[7].mxu1  ;;  %vm18316_vm3 = vcmask 261120  }
 0x142   : > { %v13524_v27 = vpop.f32.mrb[8].mxu1 }
 0x143   : > { %v13526_v48 = vpop.f32.mrb[9].mxu1 }
 0x144   : > { %v13528_v35 = vpop.f32.mrb[10].mxu1 }
 0x145   : > { %v13530_v7 = vpop.f32.mrb[11].mxu1 }
 0x146   : > { %v13532_v10 = vpop.f32.mrb[12].mxu1 }
 0x147   : > { %v13534_v18 = vpop.f32.mrb[13].mxu1 }
 0x148   : > { %10235 = vmatmul.mubr.msk.bf16.gmra.mrb[60].mxu0 %vm19269_vm15, %v3077_v41  ;;  %v13536_v53 = vpop.f32.mrb[14].mxu1  ;;  %vm19270_vm15 = vcmask 1040384  }
 0x149   : > { %v13538_v26 = vpop.f32.mrb[15].mxu1  ;;  %vm19272_vm10 = vmmov %vm19270_vm15 }
 0x14a   : > { %v13540_v13 = vpop.f32.mrb[16].mxu1  ;;  %vm19274_vm14 = vmmov %vm19272_vm10 }
 0x14b   : > { %v13542_v3 = vpop.f32.mrb[17].mxu1  ;;  %vm19278_vm12 = vmmov %vm19272_vm10 }
 0x14c   : > { %v13544_v12 = vpop.f32.mrb[18].mxu1 }
 0x14d   : > { %v13546_v62 = vpop.f32.mrb[19].mxu1 }
 0x14e   : > { %v13548_v19 = vpop.f32.mrb[20].mxu1 }
 0x14f   : > { %v13550_v52 = vpop.f32.mrb[21].mxu1 }
 0x150   : > { %v13552_v4 = vpop.f32.mrb[22].mxu1 }
 0x151   : > { %v13554_v23 = vpop.f32.mrb[23].mxu1 }
 0x152   : > { %v13556_v8 = vpop.f32.mrb[24].mxu1 }
 0x153   : > { %v13558_v15 = vpop.f32.mrb[25].mxu1 }
 0x154   : > { %v13560_v49 = vpop.f32.mrb[26].mxu1 }
 0x155   : > { %v13562_v29 = vpop.f32.mrb[27].mxu1 }
 0x156   : > { %v13564_v36 = vpop.f32.mrb[28].mxu1 }
 0x157   : > { %v13566_v21 = vpop.f32.mrb[29].mxu1 }
 0x158   : > { %v13568_v5 = vpop.f32.mrb[30].mxu1 }
 0x159   : > { %v13570_v39 = vpop.f32.mrb[31].mxu1  ;;  %v10176_v47 = vpop.f32.mrb[0].mxu0 }
 0x15a   : > { %v13572_v63 = vpop.f32.mrb[32].mxu1  ;;  %v10660_v46 = vadd.f32 %v10176_v47, %v10044_v40  ;;  %v3213_v56 = vpop.f32.mrb[1].mxu0 }
 0x15b   : > { %v13574_v41 = vpop.f32.mrb[33].mxu1  ;;  %v10661_v60 = vadd.f32 %v3213_v56, %v2403_v59  ;;  %v10177_v1 = vpop.f32.mrb[2].mxu0 }
 0x15c   : > { %v13576_v54 = vpop.f32.mrb[34].mxu1  ;;  %v3541_v44 = vadd.f32 %v10660_v46, %v13591_v43  ;;  %v10662_v30 = vadd.f32 %v10177_v1, %v10045_v33  ;;  %v3216_v57 = vpop.f32.mrb[3].mxu0 }
 0x15d   : > { %v13578_v28 = vpop.f32.mrb[35].mxu1  ;;  %v3539_v25 = vadd.f32 %v10661_v60, %v13591_v43  ;;  %v10663_v34 = vadd.f32 %v3216_v57, %v2406_v42 }
 0x15e   : > { %v13580_v9 = vpop.f32.mrb[36].mxu1  ;;  %v3605_v0 = vmax.f32 %v3541_v44, 0.0  ;;  %v3542_v38 = vadd.f32 %v10662_v30, %v13591_v43 }
 0x15f   : > { %v13582_v55 = vpop.f32.mrb[37].mxu1  ;;  %v3603_v45 = vmax.f32 %v3539_v25, 0.0  ;;  %v3540_v2 = vadd.f32 %v10663_v34, %v13591_v43 }
 0x160   : > { %v13584_v6 = vpop.f32.mrb[38].mxu1  ;;  %v3606_v14 = vmax.f32 %v3542_v38, 0.0  ;;  %v3734_v56 = vrot.slane %v3605_v0, 7 }
 0x161   : > { %v13586_v20 = vpop.f32.mrb[39].mxu1  ;;  %v3731_v58 = vrot.slane %v3603_v45, 7  ;;  %v3604_v22 = vmax.f32 %v3540_v2, 0.0 }
 0x162   : > { %v3736_v40 = vrot.slane %v3606_v14, 7  ;;  %v4285_v59 = vpack.c.bf16 %v3606_v14, %v3605_v0  ;;  %v11182_v14 = vld [vmem:[%s17744_s3 + $0x8] sm:$0xff]  }
 0x163   : > { %v3923_v33 = vsel %vm19270_vm15, 0.0, %v3731_v58  ;;  %v3732_v60 = vrot.slane %v3604_v22, 7  ;;  %v4284_v57 = vpack.c.bf16 %v3604_v22, %v3603_v45  ;;  %vm19279_vm15 = vcmask 1045504  }
 0x164   : > { %v3925_v34 = vsel %vm11335_vm4, 0.0, %v3923_v33  ;;  %v13602_v38 = vsel %vm19272_vm10, %v3734_v56, %v3736_v40 }
 0x165   : > { %v3928_v22 = vsel %vm11364_vm7, 0.0, %v13602_v38  ;;  %v3996_v45 = vrot.slane %v13602_v38, 2  ;;  %10242 = vmatprep.mubr.msk.bf16.mxu1 %vm18316_vm3, %v4284_v57  ;;  %v13628_v57 = vsel %vm19278_vm12, %v3731_v58, %v3732_v60  ;;  %vm19285_vm12 = vmmov %vm19272_vm10 }
 0x166   : > { %10243 = vmatmul.mubr.msk.bf16.vlgmr.msra.gmra.mrb[64].mxu1 %vm18316_vm3, %v4285_v59  ;;  %v3926_v59 = vsel %vm11345_vm5, 0.0, %v13628_v57 }
 0x167   : > { %10307 = vmatpush3.bf16.msra.mxu1 %v13483_v51 }
 0x168   : > { %10308 = vmatprep.subr.bf16.mxu1 %v11182_v14 }
 0x16b   : > { %v10180_v47 = vpop.f32.mrb[4].mxu0  ;;  %10309 = vmatpush3.bf16.msra.mxu1 %v11182_v14 }
 0x16c   : > { %v10664_v46 = vadd.f32 %v10180_v47, %v10048_v37  ;;  %v3229_v1 = vpop.f32.mrb[5].mxu0  ;;  %v13613_v37 = vsel %vm19274_vm14, %v3732_v60, %v3734_v56  ;;  %v18313_v60 = vrot.slane %v13628_v57, 2  ;;  %vm19283_vm14 = vmmov %vm19279_vm15 }
 0x16d   : > { %v10665_v44 = vadd.f32 %v3229_v1, %v13518_v31  ;;  %v10181_v30 = vpop.f32.mrb[6].mxu0  ;;  %19275 = vst [vmem:[#allocation130_spill] sm:$0xff] %v13613_v37  ;;  %v18309_v1 = vrot.slane %v13613_v37, 2 }
 0x16e   : > { %v3545_v2 = vadd.f32 %v10664_v46, %v13591_v43  ;;  %v3232_v42 = vpop.f32.mrb[7].mxu0  ;;  %v3927_v46 = vsel %vm11354_vm6, 0.0, %v13613_v37  ;;  %v10666_v61 = vadd.f32 %v10181_v30, %v13520_v24 }
 0x16f   : > { %v3543_v31 = vadd.f32 %v10665_v44, %v13591_v43  ;;  %v13623_v0 = vpack.c.bf16 %v3928_v22, %v3927_v46  ;;  %v10667_v56 = vadd.f32 %v3232_v42, %v13522_v16  ;;  %v3991_v44 = vrot.slane %v3923_v33, 2  ;;  %v11183_v16 = vld [vmem:[%s17744_s3 + $0x20] sm:$0xff]  }
 0x170   : > { %v3609_v25 = vmax.f32 %v3545_v2, 0.0  ;;  %v3997_v47 = vsel %vm19279_vm15, %v18309_v1, %v3996_v45  ;;  %v3546_v2 = vadd.f32 %v10666_v61, %v13591_v43  ;;  %v13645_v1 = vpack.c.bf16 %v3926_v59, %v3925_v34  ;;  %10374 = vmatprep.subr.bf16.mxu1 %v11183_v16  ;;  %vm19286_vm15 = vmmov %vm19272_vm10 }
 0x171   : > { %19277 = vst [vmem:[#allocation131_spill] sm:$0xff] %v13623_v0  ;;  %v3607_v38 = vmax.f32 %v3543_v31, 0.0  ;;  %v3544_v58 = vadd.f32 %v10667_v56, %v13591_v43  ;;  %v4186_v22 = vsel %vm11371_vm8, 0.0, %v3997_v47  ;;  %v13654_v56 = vsel %vm19283_vm14, %v3991_v44, %v18313_v60 }
 0x172   : > { %v3742_v51 = vrot.slane %v3609_v25, 7  ;;  %v3610_v61 = vmax.f32 %v3546_v2, 0.0 }
 0x173   : > { %v3738_v30 = vrot.slane %v3607_v38, 7  ;;  %v3608_v24 = vmax.f32 %v3544_v58, 0.0 }
 0x174   : > { %v3744_v47 = vrot.slane %v3610_v61, 7  ;;  %v4287_v2 = vpack.c.bf16 %v3610_v61, %v3609_v25 }
 0x175   : > { %v13649_v11 = vsel %vm19272_vm10, %v3736_v40, %v3738_v30  ;;  %v3740_v58 = vrot.slane %v3608_v24, 7  ;;  %vm19288_vm10 = vmmov %vm19283_vm14 }
 0x176   : > { %19282 = vst [vmem:[#allocation132_spill] sm:$0xff] %v13649_v11  ;;  %v3929_v60 = vsel %vm11391_vm9, 0.0, %v13649_v11  ;;  %v18314_v25 = vrot.slane %v13649_v11, 2  ;;  %v13694_v11 = vsel %vm19285_vm12, %v3742_v51, %v3744_v47 }
 0x17a   : > { %v10184_v33 = vpop.f32.mrb[8].mxu0 }
 0x17b   : > { %v10668_v31 = vadd.f32 %v10184_v33, %v13524_v27  ;;  %v3245_v46 = vpop.f32.mrb[9].mxu0 }
 0x17c   : > { %v10669_v0 = vadd.f32 %v3245_v46, %v13526_v48  ;;  %v10185_v37 = vpop.f32.mrb[10].mxu0  ;;  %v4286_v48 = vpack.c.bf16 %v3608_v24, %v3607_v38 }
 0x17d   : > { %v3549_v27 = vadd.f32 %v10668_v31, %v13591_v43  ;;  %v10670_v34 = vadd.f32 %v10185_v37, %v13528_v35  ;;  %v3248_v59 = vpop.f32.mrb[11].mxu0  ;;  %v13668_v37 = vsel %vm19285_vm12, %v3738_v30, %v3740_v58  ;;  %v3999_v31 = vsel %vm19288_vm10, %v3996_v45, %v18314_v25 }
 0x17e   : > { %v3547_v14 = vadd.f32 %v10669_v0, %v13591_v43  ;;  %v10671_v40 = vadd.f32 %v3248_v59, %v13530_v7  ;;  %10246 = vmatprep.mubr.msk.bf16.mxu1 %vm18316_vm3, %v4286_v48  ;;  %v13671_v0 = vsel %vm19286_vm15, %v3740_v58, %v3742_v51  ;;  %v3930_v16 = vsel %vm11403_vm11, 0.0, %v13668_v37  ;;  %v19289_v48 = vld [vmem:[#allocation8_spill] sm:$0xff] }
 0x17f   : > { %v3613_v33 = vmax.f32 %v3549_v27, 0.0  ;;  %v3550_v46 = vadd.f32 %v10670_v34, %v13591_v43  ;;  %10247 = vmatmul.mubr.msk.bf16.gmra.mrb[68].mxu1 %vm18316_vm3, %v4287_v2  ;;  %vm19290_vm14 = vnez %v19289_v48  ;;  %v13686_v24 = vpack.c.bf16 %v3930_v16, %v3929_v60 }
 0x180   : > { %v3611_v61 = vmax.f32 %v3547_v14, 0.0  ;;  %v3548_v35 = vadd.f32 %v10671_v40, %v13591_v43  ;;  %v4187_v58 = vsel %vm19290_vm14, 0.0, %v3999_v31 }
 0x181   : > { %v3750_v7 = vrot.slane %v3613_v33, 7  ;;  %v3614_v38 = vmax.f32 %v3550_v46, 0.0  ;;  %19291 = vst [vmem:[#allocation133_spill] sm:$0xff] %v13686_v24 }
 0x182   : > { %v3746_v27 = vrot.slane %v3611_v61, 7  ;;  %v3612_v34 = vmax.f32 %v3548_v35, 0.0  ;;  %v13689_v35 = vpack.c.bf16 %v4187_v58, %v4186_v22 }
 0x183   : > { %v13683_v14 = vrot.slane %v3614_v38, 7  ;;  %v4289_v40 = vpack.c.bf16 %v3614_v38, %v3613_v33 }
 0x184   : > { %v3748_v44 = vrot.slane %v3612_v34, 7  ;;  %v4288_v42 = vpack.c.bf16 %v3612_v34, %v3611_v61  ;;  %19292 = vst [vmem:[#allocation134_spill] sm:$0xff] %v13689_v35 }
 0x186   : > { %10250 = vmatprep.mubr.msk.bf16.mxu1 %vm18316_vm3, %v4288_v42  ;;  %vm19298_vm3 = vmmov %vm19285_vm12 }
 0x187   : > { %v13715_v42 = vsel %vm19298_vm3, %v3746_v27, %v3748_v44 }
 0x18a   : > { %v10188_v59 = vpop.f32.mrb[12].mxu0 }
 0x18b   : > { %v10672_v2 = vadd.f32 %v10188_v59, %v13532_v10  ;;  %v3261_v46 = vpop.f32.mrb[13].mxu0  ;;  %v19293_v10 = vld [vmem:[#allocation10_spill] sm:$0xff] }
 0x18c   : > { %v10673_v45 = vadd.f32 %v3261_v46, %v13534_v18  ;;  %v10189_v25 = vpop.f32.mrb[14].mxu0  ;;  %vm19294_vm15 = vnez %v19293_v10  ;;  %v19295_v18 = vld [vmem:[#allocation11_spill] sm:$0xff]  ;;  %v19302_v46 = vld [vmem:[#allocation13_spill] sm:$0xff] }
 0x18d   : > { %v3553_v30 = vadd.f32 %v10672_v2, %v13591_v43  ;;  %v10674_v48 = vadd.f32 %v10189_v25, %v13536_v53  ;;  %v3264_v31 = vpop.f32.mrb[15].mxu0  ;;  %v3931_v60 = vsel %vm19294_vm15, 0.0, %v13671_v0  ;;  %vm19296_vm10 = vnez %v19295_v18 }
 0x18e   : > { %v3551_v33 = vadd.f32 %v10673_v45, %v13591_v43  ;;  %v10675_v61 = vadd.f32 %v3264_v31, %v13538_v26  ;;  %v3932_v22 = vsel %vm19296_vm10, 0.0, %v13694_v11  ;;  %v13712_v26 = vsel %vm19285_vm12, %v3744_v47, %v3746_v27 }
 0x18f   : > { %v3617_v25 = vmax.f32 %v3553_v30, 0.0  ;;  %v3554_v51 = vadd.f32 %v10674_v48, %v13591_v43  ;;  %v13708_v16 = vpack.c.bf16 %v3932_v22, %v3931_v60  ;;  %vm19299_vm10 = vcmask 261120   ;;  %v19300_v30 = vld [vmem:[#allocation12_spill] sm:$0xff] }
 0x190   : > { %v3615_v34 = vmax.f32 %v3551_v33, 0.0  ;;  %v3552_v59 = vadd.f32 %v10675_v61, %v13591_v43  ;;  %10251 = vmatmul.mubr.msk.bf16.gmra.mrb[72].mxu1 %vm19299_vm10, %v4289_v40  ;;  %vm19301_vm14 = vnez %v19300_v30  ;;  %vm19303_vm15 = vnez %v19302_v46  ;;  %vm19305_vm10 = vmmov %vm19298_vm3 }
 0x191   : > { %19297 = vst [vmem:[#allocation135_spill] sm:$0xff] %v13708_v16  ;;  %v13717_v58 = vrot.slane %v3617_v25, 7  ;;  %v3618_v2 = vmax.f32 %v3554_v51, 0.0  ;;  %v3933_v48 = vsel %vm19301_vm14, 0.0, %v13712_v26  ;;  %v3934_v45 = vsel %vm19303_vm15, 0.0, %v13715_v42 }
 0x192   : > { %v3754_v31 = vrot.slane %v3615_v34, 7  ;;  %v3616_v60 = vmax.f32 %v3552_v59, 0.0  ;;  %v13731_v38 = vpack.c.bf16 %v3934_v45, %v3933_v48  ;;  %v13735_v59 = vsel %vm19298_vm3, %v3748_v44, %v3750_v7  ;;  %v19309_v44 = vld [vmem:[#allocation15_spill] sm:$0xff] }
 0x193   : > { %v13728_v61 = vrot.slane %v3618_v2, 7  ;;  %v4291_v22 = vpack.c.bf16 %v3618_v2, %v3617_v25  ;;  %v13741_v25 = vsel %vm19305_vm10, %v3750_v7, %v13683_v14  ;;  %vm19308_vm15 = vcmask 261120  }
 0x194   : > { %19304 = vst [vmem:[#allocation136_spill] sm:$0xff] %v13731_v38  ;;  %v3756_v53 = vrot.slane %v3616_v60, 7  ;;  %v4290_v30 = vpack.c.bf16 %v3616_v60, %v3615_v34  ;;  %vm19310_vm3 = vnez %v19309_v44 }
 0x195   : > { %v3936_v48 = vsel %vm19310_vm3, 0.0, %v13741_v25  ;;  %vm19313_vm3 = vcmask 261120  }
 0x196   : > { %10254 = vmatprep.mubr.msk.bf16.mxu1 %vm19308_vm15, %v4290_v30  ;;  %vm19312_vm15 = vmmov %vm19305_vm10 }
 0x198   : > { %v10192_v47 = vpop.f32.mrb[16].mxu0  ;;  %10255 = vmatmul.mubr.msk.bf16.gmra.mrb[76].mxu1 %vm19313_vm3, %v4291_v22  ;;  %vm19319_vm3 = vmmov %vm19305_vm10 }
 0x199   : > { %v10676_v40 = vadd.f32 %v10192_v47, %v13540_v13  ;;  %v3277_v51 = vpop.f32.mrb[17].mxu0  ;;  %v19306_v13 = vld [vmem:[#allocation14_spill] sm:$0xff] }
 0x19a   : > { %v10677_v46 = vadd.f32 %v3277_v51, %v13542_v3  ;;  %v10193_v18 = vpop.f32.mrb[18].mxu0  ;;  %vm19307_vm12 = vnez %v19306_v13  ;;  %v19316_v51 = vld [vmem:[#allocation22_spill] sm:$0xff] }
 0x19b   : > { %v3557_v33 = vadd.f32 %v10676_v40, %v13591_v43  ;;  %v10678_v27 = vadd.f32 %v10193_v18, %v13544_v12  ;;  %v3280_v10 = vpop.f32.mrb[19].mxu0  ;;  %v3935_v2 = vsel %vm19307_vm12, 0.0, %v13735_v59  ;;  %vm19317_vm14 = vnez %v19316_v51 }
 0x19c   : > { %v3555_v34 = vadd.f32 %v10677_v46, %v13591_v43  ;;  %v10679_v3 = vadd.f32 %v3280_v10, %v13546_v62  ;;  %v13755_v60 = vpack.c.bf16 %v3936_v48, %v3935_v2  ;;  %v13760_v62 = vsel %vm19305_vm10, %v13683_v14, %v3754_v31  ;;  %vm19320_vm10 = vmmov %vm19319_vm3 }
 0x19d   : > { %v3621_v18 = vmax.f32 %v3557_v33, 0.0  ;;  %v3558_v7 = vadd.f32 %v10678_v27, %v13591_v43  ;;  %v13763_v10 = vsel %vm19312_vm15, %v3754_v31, %v3756_v53  ;;  %v19314_v33 = vld [vmem:[#allocation21_spill] sm:$0xff] }
 0x19e   : > { %19311 = vst [vmem:[#allocation137_spill] sm:$0xff] %v13755_v60  ;;  %v3619_v47 = vmax.f32 %v3555_v34, 0.0  ;;  %v3556_v46 = vadd.f32 %v10679_v3, %v13591_v43  ;;  %vm19315_vm12 = vnez %v19314_v33  ;;  %v3938_v2 = vsel %vm19317_vm14, 0.0, %v13763_v10 }
 0x19f   : > { %v13765_v30 = vrot.slane %v3621_v18, 7  ;;  %v3622_v40 = vmax.f32 %v3558_v7, 0.0  ;;  %v3937_v27 = vsel %vm19315_vm12, 0.0, %v13760_v62 }
 0x1a0   : > { %v3762_v34 = vrot.slane %v3619_v47, 7  ;;  %v3620_v3 = vmax.f32 %v3556_v46, 0.0  ;;  %v13779_v44 = vpack.c.bf16 %v3938_v2, %v3937_v27  ;;  %v13786_v46 = vsel %vm19319_vm3, %v3756_v53, %v13717_v58 }
 0x1a1   : > { %v13776_v45 = vrot.slane %v3622_v40, 7  ;;  %v4293_v7 = vpack.c.bf16 %v3622_v40, %v3621_v18  ;;  %vm19324_vm3 = vcmask 261120  }
 0x1a2   : > { %19318 = vst [vmem:[#allocation138_spill] sm:$0xff] %v13779_v44  ;;  %v3764_v33 = vrot.slane %v3620_v3, 7  ;;  %v4292_v13 = vpack.c.bf16 %v3620_v3, %v3619_v47  ;;  %v13795_v47 = vsel %vm19320_vm10, %v13717_v58, %v13728_v61 }
 0x1a3   : > { %19321 = vst [vmem:[#allocation139_spill] sm:$0xff] %v13795_v47 }
 0x1a4   : > { %10258 = vmatprep.mubr.msk.bf16.mxu1 %vm19324_vm3, %v4292_v13  ;;  %vm19329_vm3 = vmmov %vm19320_vm10 }
 0x1a9   : > { %v10196_v14 = vpop.f32.mrb[20].mxu0 }
 0x1aa   : > { %v10680_v22 = vadd.f32 %v10196_v14, %v13548_v19  ;;  %v3293_v12 = vpop.f32.mrb[21].mxu0 }
 0x1ab   : > { %v10681_v51 = vadd.f32 %v3293_v12, %v13550_v52  ;;  %v10197_v35 = vpop.f32.mrb[22].mxu0  ;;  %v13782_v60 = vpop.f32.mrb[40].mxu1  ;;  %v19322_v52 = vld [vmem:[#allocation23_spill] sm:$0xff] }
 0x1ac   : > { %v3561_v31 = vadd.f32 %v10680_v22, %v13591_v43  ;;  %v10682_v18 = vadd.f32 %v10197_v35, %v13552_v4  ;;  %v3296_v40 = vpop.f32.mrb[23].mxu0  ;;  %v13790_v19 = vpop.f32.mrb[41].mxu1  ;;  %vm19323_vm15 = vnez %v19322_v52  ;;  %v19325_v4 = vld [vmem:[#allocation24_spill] sm:$0xff] }
 0x1ad   : > { %v3939_v12 = vsel %vm19323_vm15, 0.0, %v13786_v46  ;;  %v3559_v27 = vadd.f32 %v10681_v51, %v13591_v43  ;;  %v10683_v53 = vadd.f32 %v3296_v40, %v13554_v23  ;;  %v13803_v2 = vpop.f32.mrb[42].mxu1  ;;  %vm19326_vm14 = vnez %v19325_v4 }
 0x1ae   : > { %v3940_v35 = vsel %vm19326_vm14, 0.0, %v13795_v47  ;;  %v3625_v58 = vmax.f32 %v3561_v31, 0.0  ;;  %v3562_v14 = vadd.f32 %v10682_v18, %v13591_v43  ;;  %v13810_v22 = vpop.f32.mrb[43].mxu1  ;;  %v13818_v40 = vsel %vm19320_vm10, %v13728_v61, %v3762_v34  ;;  %v19332_v18 = vld [vmem:[#allocation30_spill] sm:$0xff]  ;;  %vm19339_vm10 = vmmov %vm19329_vm3 }
 0x1af   : > { %v13813_v51 = vpack.c.bf16 %v3940_v35, %v3939_v12  ;;  %v3623_v23 = vmax.f32 %v3559_v27, 0.0  ;;  %v3560_v13 = vadd.f32 %v10683_v53, %v13591_v43  ;;  %19328 = vst [vmem:[#allocation141_spill] sm:$0xff] %v13818_v40  ;;  %v13821_v4 = vsel %vm19329_vm3, %v3762_v34, %v3764_v33  ;;  %v19334_v27 = vld [vmem:[#allocation31_spill] sm:$0xff] }
 0x1b0   : > { %19330 = vst [vmem:[#allocation142_spill] sm:$0xff] %v13821_v4  ;;  %v13823_v3 = vrot.slane %v3625_v58, 7  ;;  %v3626_v31 = vmax.f32 %v3562_v14, 0.0  ;;  %vm19331_vm14 = vcmask 261120   ;;  %vm19333_vm15 = vnez %v19332_v18 }
 0x1b1   : > { %19327 = vst [vmem:[#allocation140_spill] sm:$0xff] %v13813_v51  ;;  %10259 = vmatmul.mubr.msk.bf16.gmra.mrb[80].mxu1 %vm19331_vm14, %v4293_v7  ;;  %v3941_v12 = vsel %vm19333_vm15, 0.0, %v13818_v40  ;;  %vm19335_vm12 = vnez %v19334_v27  ;;  %v3770_v35 = vrot.slane %v3623_v23, 7  ;;  %v3624_v48 = vmax.f32 %v3560_v13, 0.0  ;;  %vm19337_vm14 = vmmov %vm19329_vm3 }
 0x1b2   : > { %v3942_v53 = vsel %vm19335_vm12, 0.0, %v13821_v4  ;;  %v13834_v51 = vrot.slane %v3626_v31, 7  ;;  %v4295_v14 = vpack.c.bf16 %v3626_v31, %v3625_v58  ;;  %v13844_v13 = vsel %vm19337_vm14, %v3764_v33, %v13765_v30 }
 0x1b3   : > { %v13837_v38 = vpack.c.bf16 %v3942_v53, %v3941_v12  ;;  %v3772_v18 = vrot.slane %v3624_v48, 7  ;;  %v4294_v16 = vpack.c.bf16 %v3624_v48, %v3623_v23  ;;  %19338 = vst [vmem:[#allocation144_spill] sm:$0xff] %v13844_v13  ;;  %v13853_v48 = vsel %vm19339_vm10, %v13765_v30, %v13776_v45 }
 0x1b4   : > { %19340 = vst [vmem:[#allocation145_spill] sm:$0xff] %v13853_v48  ;;  %vm19343_vm14 = vcmask 261120  }
 0x1b5   : > { %19336 = vst [vmem:[#allocation143_spill] sm:$0xff] %v13837_v38  ;;  %10262 = vmatprep.mubr.msk.bf16.mxu1 %vm19343_vm14, %v4294_v16  ;;  %vm19348_vm14 = vmmov %vm19339_vm10 }
 0x1bb   : > { %v10200_v61 = vpop.f32.mrb[24].mxu0  ;;  %v13840_v47 = vpop.f32.mrb[44].mxu1 }
 0x1bc   : > { %v10684_v7 = vadd.f32 %v10200_v61, %v13556_v8  ;;  %v3309_v44 = vpop.f32.mrb[25].mxu0  ;;  %v13848_v8 = vpop.f32.mrb[45].mxu1 }
 0x1bd   : > { %v10685_v27 = vadd.f32 %v3309_v44, %v13558_v15  ;;  %v10201_v24 = vpop.f32.mrb[26].mxu0  ;;  %v19341_v15 = vld [vmem:[#allocation32_spill] sm:$0xff]  ;;  %v13861_v12 = vpop.f32.mrb[46].mxu1 }
 0x1be   : > { %v3565_v34 = vadd.f32 %v10684_v7, %v13591_v43  ;;  %v10686_v58 = vadd.f32 %v10201_v24, %v13560_v49  ;;  %v3312_v31 = vpop.f32.mrb[27].mxu0  ;;  %vm19342_vm3 = vnez %v19341_v15  ;;  %v19344_v49 = vld [vmem:[#allocation33_spill] sm:$0xff]  ;;  %v13868_v7 = vpop.f32.mrb[47].mxu1 }
 0x1bf   : > { %v3943_v44 = vsel %vm19342_vm3, 0.0, %v13844_v13  ;;  %v3563_v23 = vadd.f32 %v10685_v27, %v13591_v43  ;;  %v10687_v33 = vadd.f32 %v3312_v31, %v13562_v29  ;;  %vm19345_vm12 = vnez %v19344_v49 }
 0x1c0   : > { %v3944_v24 = vsel %vm19345_vm12, 0.0, %v13853_v48  ;;  %v3629_v30 = vmax.f32 %v3565_v34, 0.0  ;;  %v3566_v61 = vadd.f32 %v10686_v58, %v13591_v43  ;;  %v13876_v31 = vsel %vm19339_vm10, %v13776_v45, %v3770_v35  ;;  %v19351_v58 = vld [vmem:[#allocation39_spill] sm:$0xff] }
 0x1c1   : > { %v13871_v27 = vpack.c.bf16 %v3944_v24, %v3943_v44  ;;  %v3627_v29 = vmax.f32 %v3563_v23, 0.0  ;;  %v3564_v16 = vadd.f32 %v10687_v33, %v13591_v43  ;;  %19347 = vst [vmem:[#allocation147_spill] sm:$0xff] %v13876_v31  ;;  %v13879_v49 = vsel %vm19348_vm14, %v3770_v35, %v3772_v18  ;;  %v19353_v23 = vld [vmem:[#allocation40_spill] sm:$0xff] }
 0x1c2   : > { %19349 = vst [vmem:[#allocation148_spill] sm:$0xff] %v13879_v49  ;;  %v13881_v53 = vrot.slane %v3629_v30, 7  ;;  %v3630_v34 = vmax.f32 %v3566_v61, 0.0  ;;  %vm19350_vm12 = vcmask 261120   ;;  %vm19352_vm3 = vnez %v19351_v58 }
 0x1c3   : > { %19346 = vst [vmem:[#allocation146_spill] sm:$0xff] %v13871_v27  ;;  %10263 = vmatmul.mubr.msk.bf16.gmra.mrb[84].mxu1 %vm19350_vm12, %v4295_v14  ;;  %v3945_v44 = vsel %vm19352_vm3, 0.0, %v13876_v31  ;;  %vm19354_vm15 = vnez %v19353_v23  ;;  %v3778_v24 = vrot.slane %v3627_v29, 7  ;;  %v3628_v52 = vmax.f32 %v3564_v16, 0.0  ;;  %vm19356_vm12 = vmmov %vm19339_vm10 }
 0x1c4   : > { %v3946_v33 = vsel %vm19354_vm15, 0.0, %v13879_v49  ;;  %v13892_v27 = vrot.slane %v3630_v34, 7  ;;  %v4297_v61 = vpack.c.bf16 %v3630_v34, %v3629_v30  ;;  %v13902_v16 = vsel %vm19356_vm12, %v3772_v18, %v13823_v3 }
 0x1c5   : > { %v13895_v48 = vpack.c.bf16 %v3946_v33, %v3945_v44  ;;  %v3780_v58 = vrot.slane %v3628_v52, 7  ;;  %v4296_v13 = vpack.c.bf16 %v3628_v52, %v3627_v29  ;;  %19357 = vst [vmem:[#allocation150_spill] sm:$0xff] %v13902_v16  ;;  %v13911_v52 = vsel %vm19339_vm10, %v13823_v3, %v13834_v51 }
 0x1c6   : > { %19358 = vst [vmem:[#allocation151_spill] sm:$0xff] %v13911_v52  ;;  %vm19361_vm12 = vcmask 261120  }
 0x1c7   : > { %19355 = vst [vmem:[#allocation149_spill] sm:$0xff] %v13895_v48  ;;  %10266 = vmatprep.mubr.msk.bf16.mxu1 %vm19361_vm12, %v4296_v13  ;;  %vm19366_vm12 = vmmov %vm19339_vm10 }
 0x1cb   : > { %v10204_v45 = vpop.f32.mrb[28].mxu0 }
 0x1cc   : > { %v10688_v14 = vadd.f32 %v10204_v45, %v13564_v36  ;;  %v3325_v38 = vpop.f32.mrb[29].mxu0 }
 0x1cd   : > { %v10689_v23 = vadd.f32 %v3325_v38, %v13566_v21  ;;  %v10205_v4 = vpop.f32.mrb[30].mxu0  ;;  %v13898_v40 = vpop.f32.mrb[48].mxu1  ;;  %v19359_v21 = vld [vmem:[#allocation41_spill] sm:$0xff] }
 0x1ce   : > { %v3569_v35 = vadd.f32 %v10688_v14, %v13591_v43  ;;  %v10690_v30 = vadd.f32 %v10205_v4, %v13568_v5  ;;  %v3328_v34 = vpop.f32.mrb[31].mxu0  ;;  %v13906_v36 = vpop.f32.mrb[49].mxu1  ;;  %vm19360_vm14 = vnez %v19359_v21  ;;  %v19362_v5 = vld [vmem:[#allocation42_spill] sm:$0xff]  ;;  %v13937_v21 = vsel %vm19366_vm12, %v3778_v24, %v3780_v58 }
 0x1cf   : > { %v3947_v38 = vsel %vm19360_vm14, 0.0, %v13902_v16  ;;  %v3567_v29 = vadd.f32 %v10689_v23, %v13591_v43  ;;  %v10691_v18 = vadd.f32 %v3328_v34, %v13570_v39  ;;  %v13919_v44 = vpop.f32.mrb[50].mxu1  ;;  %vm19363_vm15 = vnez %v19362_v5  ;;  %19367 = vst [vmem:[#allocation154_spill] sm:$0xff] %v13937_v21 }
 0x1d0   : > { %v3948_v4 = vsel %vm19363_vm15, 0.0, %v13911_v52  ;;  %v3633_v3 = vmax.f32 %v3569_v35, 0.0  ;;  %v3570_v45 = vadd.f32 %v10690_v30, %v13591_v43  ;;  %v13926_v14 = vpop.f32.mrb[51].mxu1  ;;  %v13934_v34 = vsel %vm19339_vm10, %v13834_v51, %v3778_v24  ;;  %v19369_v30 = vld [vmem:[#allocation47_spill] sm:$0xff] }
 0x1d1   : > { %v13929_v23 = vpack.c.bf16 %v3948_v4, %v3947_v38  ;;  %v3631_v39 = vmax.f32 %v3567_v29, 0.0  ;;  %v3568_v13 = vadd.f32 %v10691_v18, %v13591_v43  ;;  %19365 = vst [vmem:[#allocation153_spill] sm:$0xff] %v13934_v34  ;;  %vm19368_vm14 = vcmask 261120   ;;  %v19371_v29 = vld [vmem:[#allocation48_spill] sm:$0xff] }
 0x1d2   : > { %v13939_v33 = vrot.slane %v3633_v3, 7  ;;  %v3634_v35 = vmax.f32 %v3570_v45, 0.0  ;;  %10267 = vmatmul.mubr.msk.bf16.gmra.mrb[88].mxu1 %vm19368_vm14, %v4297_v61  ;;  %vm19370_vm15 = vnez %v19369_v30  ;;  %vm19372_vm3 = vnez %v19371_v29  ;;  %vm19374_vm14 = vmmov %vm19339_vm10 }
 0x1d3   : > { %19364 = vst [vmem:[#allocation152_spill] sm:$0xff] %v13929_v23  ;;  %v3949_v38 = vsel %vm19370_vm15, 0.0, %v13934_v34  ;;  %v3950_v18 = vsel %vm19372_vm3, 0.0, %v13937_v21  ;;  %v3786_v4 = vrot.slane %v3631_v39, 7  ;;  %v3632_v15 = vmax.f32 %v3568_v13, 0.0 }
 0x1d4   : > { %v13950_v23 = vrot.slane %v3634_v35, 7  ;;  %v4299_v45 = vpack.c.bf16 %v3634_v35, %v3633_v3  ;;  %v13953_v52 = vpack.c.bf16 %v3950_v18, %v3949_v38  ;;  %v13960_v13 = vsel %vm19374_vm14, %v3780_v58, %v13881_v53 }
 0x1d5   : > { %v3788_v30 = vrot.slane %v3632_v15, 7  ;;  %v4298_v16 = vpack.c.bf16 %v3632_v15, %v3631_v39  ;;  %19375 = vst [vmem:[#allocation156_spill] sm:$0xff] %v13960_v13  ;;  %v13969_v15 = vsel %vm19339_vm10, %v13881_v53, %v13892_v27  ;;  %vm19379_vm14 = vcmask 261120  }
 0x1d6   : > { %19373 = vst [vmem:[#allocation155_spill] sm:$0xff] %v13953_v52  ;;  %19376 = vst [vmem:[#allocation157_spill] sm:$0xff] %v13969_v15 }
 0x1d7   : > { %10270 = vmatprep.mubr.msk.bf16.mxu1 %vm19379_vm14, %v4298_v16  ;;  %vm19384_vm14 = vmmov %vm19339_vm10 }
 0x1db   : > { %v10208_v51 = vpop.f32.mrb[32].mxu0 }
 0x1dc   : > { %v10692_v61 = vadd.f32 %v10208_v51, %v13572_v63  ;;  %v3341_v48 = vpop.f32.mrb[33].mxu0 }
 0x1dd   : > { %v10693_v29 = vadd.f32 %v3341_v48, %v13574_v41  ;;  %v10209_v49 = vpop.f32.mrb[34].mxu0  ;;  %v13956_v31 = vpop.f32.mrb[52].mxu1  ;;  %v19377_v41 = vld [vmem:[#allocation49_spill] sm:$0xff] }
 0x1de   : > { %v3573_v24 = vadd.f32 %v10692_v61, %v13591_v43  ;;  %v10694_v3 = vadd.f32 %v10209_v49, %v13576_v54  ;;  %v3344_v35 = vpop.f32.mrb[35].mxu0  ;;  %v13964_v63 = vpop.f32.mrb[53].mxu1  ;;  %vm19378_vm12 = vnez %v19377_v41  ;;  %v19380_v54 = vld [vmem:[#allocation50_spill] sm:$0xff]  ;;  %v13995_v41 = vsel %vm19384_vm14, %v3786_v4, %v3788_v30 }
 0x1df   : > { %v3951_v48 = vsel %vm19378_vm12, 0.0, %v13960_v13  ;;  %v3571_v39 = vadd.f32 %v10693_v29, %v13591_v43  ;;  %v10695_v58 = vadd.f32 %v3344_v35, %v13578_v28  ;;  %v13977_v38 = vpop.f32.mrb[54].mxu1  ;;  %vm19381_vm3 = vnez %v19380_v54  ;;  %19385 = vst [vmem:[#allocation160_spill] sm:$0xff] %v13995_v41 }
 0x1e0   : > { %v3952_v49 = vsel %vm19381_vm3, 0.0, %v13969_v15  ;;  %v3637_v53 = vmax.f32 %v3573_v24, 0.0  ;;  %v3574_v51 = vadd.f32 %v10694_v3, %v13591_v43  ;;  %v13984_v61 = vpop.f32.mrb[55].mxu1  ;;  %v13992_v35 = vsel %vm19339_vm10, %v13892_v27, %v3786_v4  ;;  %v19387_v3 = vld [vmem:[#allocation55_spill] sm:$0xff] }
 0x1e1   : > { %v13987_v29 = vpack.c.bf16 %v3952_v49, %v3951_v48  ;;  %v3635_v28 = vmax.f32 %v3571_v39, 0.0  ;;  %v3572_v16 = vadd.f32 %v10695_v58, %v13591_v43  ;;  %19383 = vst [vmem:[#allocation159_spill] sm:$0xff] %v13992_v35  ;;  %vm19386_vm12 = vcmask 261120   ;;  %v19389_v39 = vld [vmem:[#allocation56_spill] sm:$0xff] }
 0x1e2   : > { %v13997_v18 = vrot.slane %v3637_v53, 7  ;;  %v3638_v24 = vmax.f32 %v3574_v51, 0.0  ;;  %10271 = vmatmul.mubr.msk.bf16.gmra.mrb[92].mxu1 %vm19386_vm12, %v4299_v45  ;;  %vm19388_vm3 = vnez %v19387_v3  ;;  %vm19390_vm15 = vnez %v19389_v39  ;;  %vm19392_vm12 = vmmov %vm19339_vm10 }
 0x1e3   : > { %19382 = vst [vmem:[#allocation158_spill] sm:$0xff] %v13987_v29  ;;  %v3953_v48 = vsel %vm19388_vm3, 0.0, %v13992_v35  ;;  %v3954_v58 = vsel %vm19390_vm15, 0.0, %v13995_v41  ;;  %v3794_v49 = vrot.slane %v3635_v28, 7  ;;  %v3636_v5 = vmax.f32 %v3572_v16, 0.0 }
 0x1e4   : > { %v14008_v29 = vrot.slane %v3638_v24, 7  ;;  %v4301_v51 = vpack.c.bf16 %v3638_v24, %v3637_v53  ;;  %v14011_v15 = vpack.c.bf16 %v3954_v58, %v3953_v48  ;;  %v14018_v16 = vsel %vm19392_vm12, %v3788_v30, %v13939_v33 }
 0x1e5   : > { %v3796_v3 = vrot.slane %v3636_v5, 7  ;;  %v4300_v13 = vpack.c.bf16 %v3636_v5, %v3635_v28  ;;  %19393 = vst [vmem:[#allocation162_spill] sm:$0xff] %v14018_v16  ;;  %v14027_v5 = vsel %vm19339_vm10, %v13939_v33, %v13950_v23  ;;  %vm19397_vm12 = vcmask 261120  }
 0x1e6   : > { %v10212_v27 = vpop.f32.mrb[36].mxu0  ;;  %19391 = vst [vmem:[#allocation161_spill] sm:$0xff] %v14011_v15  ;;  %19394 = vst [vmem:[#allocation163_spill] sm:$0xff] %v14027_v5 }
 0x1e7   : > { %v10696_v45 = vadd.f32 %v10212_v27, %v13580_v9  ;;  %v3357_v52 = vpop.f32.mrb[37].mxu0  ;;  %10274 = vmatprep.mubr.msk.bf16.mxu1 %vm19397_vm12, %v4300_v13  ;;  %vm19401_vm12 = vmmov %vm19339_vm10 }
 0x1e8   : > { %v10697_v39 = vadd.f32 %v3357_v52, %v13582_v55  ;;  %v10213_v21 = vpop.f32.mrb[38].mxu0  ;;  %v14014_v34 = vpop.f32.mrb[56].mxu1  ;;  %v19395_v55 = vld [vmem:[#allocation57_spill] sm:$0xff] }
 0x1e9   : > { %v3577_v4 = vadd.f32 %v10696_v45, %v13591_v43  ;;  %v10698_v53 = vadd.f32 %v10213_v21, %v13584_v6  ;;  %v3360_v24 = vpop.f32.mrb[39].mxu0  ;;  %v14022_v9 = vpop.f32.mrb[57].mxu1  ;;  %vm19396_vm14 = vnez %v19395_v55  ;;  %v19398_v6 = vld [vmem:[#allocation58_spill] sm:$0xff]  ;;  %v14053_v55 = vsel %vm19401_vm12, %v3794_v49, %v3796_v3 }
 0x1ea   : > { %v3955_v52 = vsel %vm19396_vm14, 0.0, %v14018_v16  ;;  %v3575_v28 = vadd.f32 %v10697_v39, %v13591_v43  ;;  %v10699_v30 = vadd.f32 %v3360_v24, %v13586_v20  ;;  %v14035_v48 = vpop.f32.mrb[58].mxu1  ;;  %vm19399_vm15 = vnez %v19398_v6  ;;  %19402 = vst [vmem:[#allocation165_spill] sm:$0xff] %v14053_v55 }
 0x1eb   : > { %v3956_v21 = vsel %vm19399_vm15, 0.0, %v14027_v5  ;;  %v3641_v33 = vmax.f32 %v3577_v4, 0.0  ;;  %v3578_v27 = vadd.f32 %v10698_v53, %v13591_v43  ;;  %v14042_v45 = vpop.f32.mrb[59].mxu1  ;;  %v14050_v24 = vsel %vm19339_vm10, %v13950_v23, %v3794_v49  ;;  %v19404_v53 = vld [vmem:[#allocation64_spill] sm:$0xff] }
 0x1ec   : > { %v14045_v39 = vpack.c.bf16 %v3956_v21, %v3955_v52  ;;  %v3639_v20 = vmax.f32 %v3575_v28, 0.0  ;;  %v3576_v13 = vadd.f32 %v10699_v30, %v13591_v43  ;;  %vm19403_vm14 = vcmask 261120   ;;  %v19406_v28 = vld [vmem:[#allocation65_spill] sm:$0xff] }
 0x1ed   : > { %v14055_v58 = vrot.slane %v3641_v33, 7  ;;  %v3642_v4 = vmax.f32 %v3578_v27, 0.0  ;;  %10275 = vmatmul.mubr.msk.bf16.gmra.mrb[96].mxu1 %vm19403_vm14, %v4301_v51  ;;  %vm19405_vm15 = vnez %v19404_v53  ;;  %vm19407_vm3 = vnez %v19406_v28  ;;  %vm19409_vm14 = vmmov %vm19339_vm10 }
 0x1ee   : > { %19400 = vst [vmem:[#allocation164_spill] sm:$0xff] %v14045_v39  ;;  %v3957_v52 = vsel %vm19405_vm15, 0.0, %v14050_v24  ;;  %v3958_v30 = vsel %vm19407_vm3, 0.0, %v14053_v55  ;;  %v3802_v21 = vrot.slane %v3639_v20, 7  ;;  %v3640_v54 = vmax.f32 %v3576_v13, 0.0  ;;  %v10216_v23 = vpop.f32.mrb[40].mxu0 }
 0x1ef   : > { %v14066_v39 = vrot.slane %v3642_v4, 7  ;;  %v4303_v27 = vpack.c.bf16 %v3642_v4, %v3641_v33  ;;  %v10700_v51 = vadd.f32 %v10216_v23, %v13782_v60  ;;  %v3373_v15 = vpop.f32.mrb[41].mxu0  ;;  %v14069_v5 = vpack.c.bf16 %v3958_v30, %v3957_v52 }
 0x1f0   : > { %v3804_v53 = vrot.slane %v3640_v54, 7  ;;  %v4302_v16 = vpack.c.bf16 %v3640_v54, %v3639_v20  ;;  %v10701_v28 = vadd.f32 %v3373_v15, %v13790_v19  ;;  %v10217_v41 = vpop.f32.mrb[42].mxu0  ;;  %v14076_v13 = vsel %vm19409_vm14, %v3796_v3, %v13997_v18  ;;  %v19412_v19 = vld [vmem:[#allocation67_spill] sm:$0xff] }
 0x1f1   : > { %19408 = vst [vmem:[#allocation166_spill] sm:$0xff] %v14069_v5  ;;  %19410 = vst [vmem:[#allocation167_spill] sm:$0xff] %v14076_v13  ;;  %v3581_v49 = vadd.f32 %v10700_v51, %v13591_v43  ;;  %v10702_v33 = vadd.f32 %v10217_v41, %v13803_v2  ;;  %v3376_v4 = vpop.f32.mrb[43].mxu0  ;;  %v14085_v54 = vsel %vm19339_vm10, %v13997_v18, %v14008_v29  ;;  %vm19413_vm12 = vnez %v19412_v19  ;;  %v19415_v2 = vld [vmem:[#allocation68_spill] sm:$0xff] }
 0x1f2   : > { %19411 = vst [vmem:[#allocation168_spill] sm:$0xff] %v14085_v54  ;;  %v3959_v15 = vsel %vm19413_vm12, 0.0, %v14076_v13  ;;  %v3579_v20 = vadd.f32 %v10701_v28, %v13591_v43  ;;  %v10703_v3 = vadd.f32 %v3376_v4, %v13810_v22  ;;  %vm19414_vm14 = vcmask 261120  }
 0x1f3   : > { %10278 = vmatprep.mubr.msk.bf16.mxu1 %vm19414_vm14, %v4302_v16  ;;  %vm19416_vm3 = vnez %v19415_v2  ;;  %v3645_v18 = vmax.f32 %v3581_v49, 0.0  ;;  %v3582_v23 = vadd.f32 %v10702_v33, %v13591_v43  ;;  %v14108_v4 = vsel %vm19339_vm10, %v14008_v29, %v3802_v21  ;;  %vm19418_vm14 = vmmov %vm19339_vm10  ;;  %v19421_v33 = vld [vmem:[#allocation74_spill] sm:$0xff] }
 0x1f4   : > { %v3960_v41 = vsel %vm19416_vm3, 0.0, %v14085_v54  ;;  %v3643_v22 = vmax.f32 %v3579_v20, 0.0  ;;  %v3580_v16 = vadd.f32 %v10703_v3, %v13591_v43  ;;  %v14111_v19 = vsel %vm19418_vm14, %v3802_v21, %v3804_v53 }
 0x1f5   : > { %v14072_v35 = vpop.f32.mrb[60].mxu1  ;;  %v14103_v28 = vpack.c.bf16 %v3960_v41, %v3959_v15  ;;  %19419 = vst [vmem:[#allocation170_spill] sm:$0xff] %v14111_v19  ;;  %v3814_v30 = vrot.slane %v3645_v18, 7  ;;  %v3646_v49 = vmax.f32 %v3582_v23, 0.0  ;;  %vm19420_vm12 = vcmask 261120   ;;  %v19423_v15 = vld [vmem:[#allocation75_spill] sm:$0xff] }
 0x1f6   : > { %v14080_v60 = vpop.f32.mrb[61].mxu1  ;;  %10279 = vmatmul.mubr.msk.bf16.gmra.mrb[100].mxu1 %vm19420_vm12, %v4303_v27  ;;  %vm19422_vm3 = vnez %v19421_v33  ;;  %vm19424_vm15 = vnez %v19423_v15  ;;  %v3810_v3 = vrot.slane %v3643_v22, 7  ;;  %v3644_v41 = vmax.f32 %v3580_v16, 0.0  ;;  %vm19426_vm12 = vmmov %vm19339_vm10 }
 0x1f7   : > { %v14093_v52 = vpop.f32.mrb[62].mxu1  ;;  %19417 = vst [vmem:[#allocation169_spill] sm:$0xff] %v14103_v28  ;;  %v3961_v6 = vsel %vm19422_vm3, 0.0, %v14108_v4  ;;  %v3962_v20 = vsel %vm19424_vm15, 0.0, %v14111_v19  ;;  %v14122_v28 = vrot.slane %v3646_v49, 7  ;;  %v4305_v23 = vpack.c.bf16 %v3646_v49, %v3645_v18 }
 0x1f8   : > { %v14100_v51 = vpop.f32.mrb[63].mxu1  ;;  %v14125_v54 = vpack.c.bf16 %v3962_v20, %v3961_v6  ;;  %v3812_v33 = vrot.slane %v3644_v41, 7  ;;  %v4304_v13 = vpack.c.bf16 %v3644_v41, %v3643_v22  ;;  %v14130_v16 = vsel %vm19426_vm12, %v3804_v53, %v14055_v58  ;;  %v19427_v6 = vld [vmem:[#allocation76_spill] sm:$0xff]  ;;  %v19430_v53 = vld [vmem:[#allocation77_spill] sm:$0xff] }
 0x1f9   : > { %vm19428_vm14 = vnez %v19427_v6  ;;  %vm19429_vm12 = vcmask 261120   ;;  %vm19431_vm15 = vnez %v19430_v53 }
 0x1fa   : > { %v10220_v2 = vpop.f32.mrb[44].mxu0  ;;  %19425 = vst [vmem:[#allocation171_spill] sm:$0xff] %v14125_v54  ;;  %10282 = vmatprep.mubr.msk.bf16.mxu1 %vm19429_vm12, %v4304_v13  ;;  %vm19433_vm12 = vmmov %vm19339_vm10 }
 0x1fb   : > { %v10704_v27 = vadd.f32 %v10220_v2, %v13840_v47  ;;  %v3389_v5 = vpop.f32.mrb[45].mxu0  ;;  %v14137_v47 = vsel %vm19339_vm10, %v14055_v58, %v14066_v39  ;;  %v3963_v2 = vsel %vm19428_vm14, 0.0, %v14130_v16  ;;  %v14159_v13 = vsel %vm19433_vm12, %v3810_v3, %v3812_v33 }
 0x1fc   : > { %v10705_v15 = vadd.f32 %v3389_v5, %v13848_v8  ;;  %v10221_v55 = vpop.f32.mrb[46].mxu0  ;;  %vm19434_vm14 = vcmask 261120  }
 0x1fd   : > { %v3585_v29 = vadd.f32 %v10704_v27, %v13591_v43  ;;  %v10706_v21 = vadd.f32 %v10221_v55, %v13861_v12  ;;  %v3392_v19 = vpop.f32.mrb[47].mxu0  ;;  %v3964_v12 = vsel %vm19431_vm15, 0.0, %v14137_v47  ;;  %v19437_v27 = vld [vmem:[#allocation45_spill] sm:$0xff] }
 0x1fe   : > { %v3583_v8 = vadd.f32 %v10705_v15, %v13591_v43  ;;  %v10707_v5 = vadd.f32 %v3392_v19, %v13868_v7  ;;  %v14151_v49 = vpack.c.bf16 %v3964_v12, %v3963_v2  ;;  %v14156_v7 = vsel %vm19339_vm10, %v14066_v39, %v3810_v3  ;;  %10283 = vmatmul.mubr.msk.bf16.gmra.mrb[104].mxu1 %vm19434_vm14, %v4305_v23  ;;  %vm19439_vm14 = vmmov %vm19339_vm10 }
 0x1ff   : > { %v3649_v18 = vmax.f32 %v3585_v29, 0.0  ;;  %v3586_v58 = vadd.f32 %v10706_v21, %v13591_v43  ;;  %v19435_v29 = vld [vmem:[#allocation44_spill] sm:$0xff]  ;;  %vm19438_vm3 = vnez %v19437_v27 }
 0x200   : > { %19432 = vst [vmem:[#allocation172_spill] sm:$0xff] %v14151_v49  ;;  %v3647_v20 = vmax.f32 %v3583_v8, 0.0  ;;  %v3584_v15 = vadd.f32 %v10707_v5, %v13591_v43  ;;  %vm19436_vm15 = vnez %v19435_v29  ;;  %v3966_v2 = vsel %vm19438_vm3, 0.0, %v14159_v13 }
 0x201   : > { %v14161_v19 = vrot.slane %v3649_v18, 7  ;;  %v3650_v41 = vmax.f32 %v3586_v58, 0.0  ;;  %v3965_v21 = vsel %vm19436_vm15, 0.0, %v14156_v7  ;;  %vm19442_vm3 = vcmask 261120  }
 0x202   : > { %v3818_v8 = vrot.slane %v3647_v20, 7  ;;  %v3648_v5 = vmax.f32 %v3584_v15, 0.0  ;;  %v10224_v39 = vpop.f32.mrb[48].mxu0  ;;  %v14175_v6 = vpack.c.bf16 %v3966_v2, %v3965_v21  ;;  %v14179_v15 = vsel %vm19439_vm14, %v3812_v33, %v3814_v30  ;;  %v19443_v33 = vld [vmem:[#allocation17_spill] sm:$0xff] }
 0x203   : > { %v14172_v22 = vrot.slane %v3650_v41, 7  ;;  %v4307_v58 = vpack.c.bf16 %v3650_v41, %v3649_v18  ;;  %v10708_v23 = vadd.f32 %v10224_v39, %v13898_v40  ;;  %v3405_v55 = vpop.f32.mrb[49].mxu0  ;;  %v14185_v18 = vsel %vm19339_vm10, %v3814_v30, %v14122_v28  ;;  %v19440_v40 = vld [vmem:[#allocation16_spill] sm:$0xff] }
 0x204   : > { %v3820_v29 = vrot.slane %v3648_v5, 7  ;;  %v4306_v53 = vpack.c.bf16 %v3648_v5, %v3647_v20  ;;  %v10709_v27 = vadd.f32 %v3405_v55, %v13906_v36  ;;  %v10225_v49 = vpop.f32.mrb[50].mxu0  ;;  %vm19441_vm12 = vnez %v19440_v40 }
 0x205   : > { %v3589_v12 = vadd.f32 %v10708_v23, %v13591_v43  ;;  %v10710_v3 = vadd.f32 %v10225_v49, %v13919_v44  ;;  %v3408_v54 = vpop.f32.mrb[51].mxu0  ;;  %v3967_v41 = vsel %vm19441_vm12, 0.0, %v14179_v15  ;;  %vm19444_vm14 = vnez %v19443_v33 }
 0x206   : > { %v3587_v20 = vadd.f32 %v10709_v27, %v13591_v43  ;;  %v10711_v36 = vadd.f32 %v3408_v54, %v13926_v14  ;;  %10286 = vmatprep.mubr.msk.bf16.mxu1 %vm19442_vm3, %v4306_v53  ;;  %v3968_v55 = vsel %vm19444_vm14, 0.0, %v14185_v18  ;;  %v14204_v14 = vsel %vm19339_vm10, %v14122_v28, %v3818_v8  ;;  %vm19446_vm3 = vmmov %vm19339_vm10 }
 0x207   : > { %v3653_v49 = vmax.f32 %v3589_v12, 0.0  ;;  %v3590_v30 = vadd.f32 %v10710_v3, %v13591_v43  ;;  %v14199_v2 = vpack.c.bf16 %v3968_v55, %v3967_v41  ;;  %v14207_v54 = vsel %vm19446_vm3, %v3818_v8, %v3820_v29  ;;  %v19449_v3 = vld [vmem:[#allocation91_spill] sm:$0xff]  ;;  %v14233_v8 = vld [vmem:[%s17743_s2] ss:$0 sm:$0xff]  ;;  %vm19453_vm10 = vmmov %vm19446_vm3 }
 0x208   : > { %v3651_v5 = vmax.f32 %v3587_v20, 0.0  ;;  %v3588_v27 = vadd.f32 %v10711_v36, %v13591_v43  ;;  %vm19447_vm12 = vcmask 261120   ;;  %vm19448_vm14 = vnez %v18901_v50 }
 0x209   : > { %19445 = vst [vmem:[#allocation173_spill] sm:$0xff] %v14199_v2  ;;  %v14209_v53 = vrot.slane %v3653_v49, 7  ;;  %v3654_v39 = vmax.f32 %v3590_v30, 0.0  ;;  %10287 = vmatmul.mubr.msk.bf16.gmra.mrb[108].mxu1 %vm19447_vm12, %v4307_v58  ;;  %v3969_v12 = vsel %vm19448_vm14, 0.0, %v14204_v14  ;;  %vm19450_vm15 = vnez %v19449_v3  ;;  %vm19452_vm12 = vmmov %vm19446_vm3 }
 0x20a   : > { %v3970_v43 = vsel %vm19450_vm15, 0.0, %v14207_v54  ;;  %v3826_v23 = vrot.slane %v3651_v5, 7  ;;  %v3652_v41 = vmax.f32 %v3588_v27, 0.0  ;;  %v14228_v27 = vsel %vm19452_vm12, %v3820_v29, %v14161_v19 }
 0x20b   : > { %v10228_v28 = vpop.f32.mrb[52].mxu0  ;;  %v14220_v36 = vrot.slane %v3654_v39, 7  ;;  %v4309_v55 = vpack.c.bf16 %v3654_v39, %v3653_v49  ;;  %v14223_v21 = vpack.c.bf16 %v3970_v43, %v3969_v12  ;;  %vm19456_vm12 = vcmask 261120  }
 0x20c   : > { %v10712_v58 = vadd.f32 %v10228_v28, %v13956_v31  ;;  %v3421_v30 = vpop.f32.mrb[53].mxu0  ;;  %v3828_v44 = vrot.slane %v3652_v41, 7  ;;  %v4308_v50 = vpack.c.bf16 %v3652_v41, %v3651_v5  ;;  %v14240_v5 = vsel %vm19453_vm10, %v14161_v19, %v14172_v22  ;;  %v19457_v41 = vld [vmem:[#allocation93_spill] sm:$0xff] }
 0x20d   : > { %19451 = vst [vmem:[#allocation174_spill] sm:$0xff] %v14223_v21  ;;  %v10713_v3 = vadd.f32 %v3421_v30, %v13964_v63  ;;  %v10229_v40 = vpop.f32.mrb[54].mxu0  ;;  %v19454_v63 = vld [vmem:[#allocation92_spill] sm:$0xff]  ;;  %vm19458_vm15 = vnez %v19457_v41 }
 0x20e   : > { %v3593_v49 = vadd.f32 %v14233_v8, %v10712_v58  ;;  %v10714_v31 = vadd.f32 %v10229_v40, %v13977_v38  ;;  %v3424_v39 = vpop.f32.mrb[55].mxu0  ;;  %vm19455_vm3 = vnez %v19454_v63  ;;  %10290 = vmatprep.mubr.msk.bf16.mxu1 %vm19456_vm12, %v4308_v50  ;;  %v3972_v38 = vsel %vm19458_vm15, 0.0, %v14240_v5  ;;  %vm19460_vm12 = vmmov %vm19453_vm10 }
 0x20f   : > { %v3971_v29 = vsel %vm19455_vm3, 0.0, %v14228_v27  ;;  %v3591_v12 = vadd.f32 %v14233_v8, %v10713_v3  ;;  %v10715_v43 = vadd.f32 %v3424_v39, %v13984_v61  ;;  %v14259_v61 = vsel %vm19453_vm10, %v14172_v22, %v3826_v23 }
 0x210   : > { %v3657_v28 = vmax.f32 %v3593_v49, 0.0  ;;  %v3594_v19 = vadd.f32 %v14233_v8, %v10714_v31  ;;  %v14254_v30 = vpack.c.bf16 %v3972_v38, %v3971_v29  ;;  %v14262_v50 = vsel %vm19460_vm12, %v3826_v23, %v3828_v44  ;;  %v19462_v49 = vld [vmem:[#allocation94_spill] sm:$0xff]  ;;  %v19464_v29 = vld [vmem:[#allocation95_spill] sm:$0xff] }
 0x211   : > { %v3655_v20 = vmax.f32 %v3591_v12, 0.0  ;;  %v3592_v3 = vadd.f32 %v14233_v8, %v10715_v43  ;;  %vm19461_vm3 = vcmask 261120   ;;  %vm19463_vm15 = vnez %v19462_v49 }
 0x212   : > { %19459 = vst [vmem:[#allocation175_spill] sm:$0xff] %v14254_v30  ;;  %v3838_v39 = vrot.slane %v3657_v28, 7  ;;  %v3658_v63 = vmax.f32 %v3594_v19, 0.0  ;;  %10291 = vmatmul.mubr.msk.bf16.gmra.mrb[112].mxu1 %vm19461_vm3, %v4309_v55  ;;  %v3973_v31 = vsel %vm19463_vm15, 0.0, %v14259_v61  ;;  %vm19465_vm14 = vnez %v19464_v29  ;;  %vm19466_vm3 = vmmov %vm19453_vm10 }
 0x213   : > { %v3974_v12 = vsel %vm19465_vm14, 0.0, %v14262_v50  ;;  %v3834_v43 = vrot.slane %v3655_v20, 7  ;;  %v3656_v38 = vmax.f32 %v3592_v3, 0.0  ;;  %v10232_v58 = vpop.f32.mrb[56].mxu0  ;;  %v14281_v3 = vsel %vm19466_vm3, %v3828_v44, %v14209_v53  ;;  %vm19467_vm10 = vmmov %vm19466_vm3 }
 0x214   : > { %v14273_v40 = vrot.slane %v3658_v63, 7  ;;  %v4311_v19 = vpack.c.bf16 %v3658_v63, %v3657_v28  ;;  %v10716_v55 = vadd.f32 %v10232_v58, %v14014_v34  ;;  %v3437_v41 = vpop.f32.mrb[57].mxu0  ;;  %v14276_v33 = vpack.c.bf16 %v3974_v12, %v3973_v31  ;;  %v19473_v12 = vld [vmem:[#allocation98_spill] sm:$0xff] }
 0x215   : > { %v3836_v49 = vrot.slane %v3656_v38, 7  ;;  %v4310_v30 = vpack.c.bf16 %v3656_v38, %v3655_v20  ;;  %v10717_v29 = vadd.f32 %v3437_v41, %v14022_v9  ;;  %v10233_v21 = vpop.f32.mrb[58].mxu0  ;;  %v14288_v34 = vsel %vm19467_vm10, %v14209_v53, %v14220_v36 }
 0x216   : > { %v3597_v22 = vadd.f32 %v14233_v8, %v10716_v55  ;;  %v10718_v23 = vadd.f32 %v10233_v21, %v14035_v48  ;;  %v3440_v2 = vpop.f32.mrb[59].mxu0  ;;  %vm19468_vm12 = vnez %v18976_v17  ;;  %vm19469_vm3 = vcmask 261120  }
 0x217   : > { %v3975_v20 = vsel %vm19468_vm12, 0.0, %v14281_v3  ;;  %v3595_v9 = vadd.f32 %v14233_v8, %v10717_v29  ;;  %v10719_v63 = vadd.f32 %v3440_v2, %v14042_v45  ;;  %10294 = vmatprep.mubr.msk.bf16.mxu1 %vm19469_vm3, %v4310_v30  ;;  %vm19470_vm14 = vnez %v19003_v32  ;;  %vm19471_vm3 = vmmov %vm19467_vm10 }
 0x218   : > { %v3976_v48 = vsel %vm19470_vm14, 0.0, %v14288_v34  ;;  %v3661_v21 = vmax.f32 %v3597_v22, 0.0  ;;  %v3598_v53 = vadd.f32 %v14233_v8, %v10718_v23  ;;  %v14307_v45 = vsel %vm19467_vm10, %v14220_v36, %v3834_v43  ;;  %v19475_v22 = vld [vmem:[#allocation99_spill] sm:$0xff]  ;;  %vm19478_vm10 = vmmov %vm19471_vm3 }
 0x219   : > { %v14302_v28 = vpack.c.bf16 %v3976_v48, %v3975_v20  ;;  %v3659_v58 = vmax.f32 %v3595_v9, 0.0  ;;  %v3596_v31 = vadd.f32 %v14233_v8, %v10719_v63  ;;  %v14310_v2 = vsel %vm19471_vm3, %v3834_v43, %v3836_v49 }
 0x21a   : > { %v3846_v30 = vrot.slane %v3661_v21, 7  ;;  %v3662_v29 = vmax.f32 %v3598_v53, 0.0  ;;  %vm19472_vm12 = vcmask 261120   ;;  %vm19474_vm14 = vnez %v19473_v12 }
 0x21b   : > { %10295 = vmatmul.mubr.msk.bf16.gmra.mrb[116].mxu1 %vm19472_vm12, %v4311_v19  ;;  %v3977_v38 = vsel %vm19474_vm14, 0.0, %v14307_v45  ;;  %vm19476_vm15 = vnez %v19475_v22  ;;  %v3842_v55 = vrot.slane %v3659_v58, 7  ;;  %v3660_v20 = vmax.f32 %v3596_v31, 0.0  ;;  %v10236_v9 = vpop.f32.mrb[60].mxu0  ;;  %vm19477_vm12 = vmmov %vm19471_vm3 }
 0x21c   : > { %v3978_v23 = vsel %vm19476_vm15, 0.0, %v14310_v2  ;;  %v3848_v63 = vrot.slane %v3662_v29, 7  ;;  %v4313_v48 = vpack.c.bf16 %v3662_v29, %v3661_v21  ;;  %v10720_v53 = vadd.f32 %v10236_v9, %v14072_v35  ;;  %v3453_v19 = vpop.f32.mrb[61].mxu0  ;;  %v19479_v35 = vld [vmem:[#allocation100_spill] sm:$0xff] }
 0x21d   : > { %v14322_v41 = vpack.c.bf16 %v3978_v23, %v3977_v38  ;;  %v3844_v44 = vrot.slane %v3660_v20, 7  ;;  %v4312_v12 = vpack.c.bf16 %v3660_v20, %v3659_v58  ;;  %v10721_v17 = vadd.f32 %v3453_v19, %v14080_v60  ;;  %v10237_v22 = vpop.f32.mrb[62].mxu0 }
 0x21e   : > { %v14326_v32 = vsel %vm19477_vm12, %v3836_v49, %v3838_v39  ;;  %v3601_v31 = vadd.f32 %v14233_v8, %v10720_v53  ;;  %v10722_v36 = vadd.f32 %v10237_v22, %v14093_v52  ;;  %v3456_v43 = vpop.f32.mrb[63].mxu0  ;;  %v14332_v21 = vsel %vm19478_vm10, %v3838_v39, %v14273_v40  ;;  %v19482_v49 = vld [vmem:[#allocation101_spill] sm:$0xff] }
 0x21f   : > { %vm19480_vm3 = vnez %v19479_v35  ;;  %v3599_v58 = vadd.f32 %v14233_v8, %v10721_v17  ;;  %v10723_v60 = vadd.f32 %v3456_v43, %v14100_v51  ;;  %vm19481_vm15 = vcmask 261120  }
 0x220   : > { %v3979_v29 = vsel %vm19480_vm3, 0.0, %v14326_v32  ;;  %10298 = vmatprep.mubr.msk.bf16.mxu1 %vm19481_vm15, %v4312_v12  ;;  %vm19483_vm12 = vnez %v19482_v49  ;;  %v3665_v22 = vmax.f32 %v3601_v31, 0.0  ;;  %v3602_v39 = vadd.f32 %v14233_v8, %v10722_v36  ;;  %vm19484_vm15 = vmmov %vm19478_vm10  ;;  %v19486_v36 = vld [vmem:[#allocation102_spill] sm:$0xff]  ;;  %v19488_v31 = vld [vmem:[#allocation103_spill] sm:$0xff] }
 0x221   : > { %v3980_v38 = vsel %vm19483_vm12, 0.0, %v14332_v21  ;;  %v3663_v9 = vmax.f32 %v3599_v58, 0.0  ;;  %v3600_v17 = vadd.f32 %v14233_v8, %v10723_v60  ;;  %v14351_v51 = vsel %vm19478_vm10, %v14273_v40, %v3842_v55  ;;  %v19494_v60 = vld [vmem:[#allocation106_spill] sm:$0xff] }
 0x222   : > { %v14346_v20 = vpack.c.bf16 %v3980_v38, %v3979_v29  ;;  %v14354_v12 = vsel %vm19484_vm15, %v3842_v55, %v3844_v44  ;;  %v3854_v43 = vrot.slane %v3665_v22, 7  ;;  %v3666_v53 = vmax.f32 %v3602_v39, 0.0 }
 0x223   : > { %vm19485_vm3 = vcmask 261120   ;;  %vm19487_vm12 = vnez %v19486_v36  ;;  %vm19489_vm14 = vnez %v19488_v31  ;;  %v3850_v8 = vrot.slane %v3663_v9, 7  ;;  %v19491_v31 = vld [vmem:[#allocation104_spill] sm:$0xff] }
 0x224   : > { %10299 = vmatmul.mubr.msk.bf16.gmra.mrb[120].mxu1 %vm19485_vm3, %v4313_v48  ;;  %v3981_v19 = vsel %vm19487_vm12, 0.0, %v14351_v51  ;;  %v3982_v29 = vsel %vm19489_vm14, 0.0, %v14354_v12  ;;  %v3664_v58 = vmax.f32 %v3600_v17, 0.0  ;;  %v3856_v55 = vrot.slane %v3666_v53, 7  ;;  %vm19490_vm3 = vmmov %vm19478_vm10 }
 0x225   : > { %v4315_v38 = vpack.c.bf16 %v3666_v53, %v3665_v22  ;;  %v14365_v23 = vpack.c.bf16 %v3982_v29, %v3981_v19  ;;  %v14368_v48 = vsel %vm19478_vm10, %v3844_v44, %v3846_v30  ;;  %v14371_v36 = vsel %vm19490_vm3, %v3846_v30, %v3848_v63  ;;  %vm19493_vm14 = vmmov %vm19490_vm3  ;;  %v19500_v53 = vld [vmem:[#allocation108_spill] sm:$0xff] }
 0x226   : > { %v3852_v39 = vrot.slane %v3664_v58, 7  ;;  %v4314_v52 = vpack.c.bf16 %v3664_v58, %v3663_v9  ;;  %vm19492_vm15 = vnez %v19491_v31  ;;  %v14377_v40 = vsel %vm19493_vm14, %v3856_v55, 0.0  ;;  %v19498_v58 = vld [vmem:[#allocation83_spill] sm:$0xff]  ;;  %v19508_v9 = vld [vmem:[#allocation109_spill] sm:$0xff] }
 0x227   : > { %v3983_v17 = vsel %vm19492_vm15, 0.0, %v14368_v48  ;;  %vm19495_vm12 = vnez %v19494_v60  ;;  %vm19496_vm10 = vcmask 261120   ;;  %v14389_v19 = vsel %vm19490_vm3, %v3848_v63, %v3850_v8  ;;  %vm19497_vm15 = vmmov %vm19490_vm3 }
 0x228   : > { %v3984_v22 = vsel %vm19495_vm12, 0.0, %v14371_v36  ;;  %10302 = vmatprep.mubr.msk.bf16.mxu1 %vm19496_vm10, %v4314_v52  ;;  %v14392_v29 = vsel %vm19497_vm15, %v3850_v8, %v3852_v39  ;;  %vm19499_vm14 = vnez %v19498_v58  ;;  %vm19501_vm12 = vnez %v19500_v53  ;;  %vm19502_vm10 = vmmov %vm19490_vm3 }
 0x229   : > { %v14386_v30 = vpack.c.bf16 %v3984_v22, %v3983_v17  ;;  %v3985_v31 = vsel %vm19499_vm14, 0.0, %v14389_v19  ;;  %v3986_v44 = vsel %vm19501_vm12, 0.0, %v14392_v29  ;;  %v14405_v63 = vsel %vm19502_vm10, %v3852_v39, %v3854_v43  ;;  %v19503_v22 = vld [vmem:[#allocation130_spill] sm:$0xff] }
 0x22a   : > { %v14402_v17 = vpack.c.bf16 %v3986_v44, %v3985_v31  ;;  %v14408_v8 = vsel %vm19490_vm3, %v3854_v43, %v3856_v55  ;;  %v19504_v60 = vrot.slane %v19503_v22, 2  ;;  %v19505_v58 = vrot.slane %v13628_v57, 2  ;;  %v19510_v31 = vld [vmem:[#allocation111_spill] sm:$0xff] }
 0x22b   : > { %vm19506_vm15 = vcmask 1045504   ;;  %vm19507_vm14 = vcmask 261120   ;;  %vm19509_vm12 = vnez %v19508_v9  ;;  %vm19511_vm11 = vnez %v19510_v31  ;;  %v19518_v9 = vld [vmem:[#allocation132_spill] sm:$0xff] }
 0x22c   : > { %v3995_v35 = vsel %vm19506_vm15, %v19505_v58, %v19504_v60  ;;  %10303 = vmatmul.mubr.msk.bf16.gmra.mrb[124].mxu1 %vm19507_vm14, %v4315_v38  ;;  %v3987_v52 = vsel %vm19509_vm12, 0.0, %v14405_v63  ;;  %v3988_v39 = vsel %vm19511_vm11, 0.0, %v14408_v8  ;;  %vm19512_vm10 = vmmov %vm19507_vm14  ;;  %v19513_v60 = vld [vmem:[#allocation66_spill] sm:$0xff]  ;;  %v19515_v38 = vld [vmem:[#allocation69_spill] sm:$0xff]  ;;  %v19517_v22 = vrot.slane %v13668_v37, 2 }
 0x22d   : > { %10310 = vmatprep.mubr.msk.bf16.mxu1 %vm19512_vm10, %v13645_v1  ;;  %v14426_v57 = vpack.c.bf16 %v3988_v39, %v3987_v52  ;;  %vm19514_vm14 = vnez %v19513_v60  ;;  %vm19516_vm3 = vnez %v19515_v38  ;;  %v19519_v53 = vrot.slane %v19518_v9, 2  ;;  %vm19522_vm10 = vmmov %vm19506_vm15  ;;  %v19523_v39 = vld [vmem:[#allocation78_spill] sm:$0xff]  ;;  %v19528_v9 = vld [vmem:[#allocation79_spill] sm:$0xff] }
 0x22e   : > { %v4184_v55 = vsel %vm19514_vm14, 0.0, %v13654_v56  ;;  %v4185_v58 = vsel %vm19516_vm3, 0.0, %v3995_v35  ;;  %v19520_v43 = vrot.slane %v13671_v0, 2  ;;  %v19521_v1 = vmov %v19517_v22  ;;  %vm19527_vm11 = vmmov %vm19522_vm10 }
 0x22f   : > { %v4001_v44 = vsel %vm19506_vm15, %v19519_v53, %v19517_v22  ;;  %v14438_v31 = vpack.c.bf16 %v4185_v58, %v4184_v55  ;;  %vm19524_vm12 = vnez %v19523_v39  ;;  %v19525_v49 = vrot.slane %v13694_v11, 2  ;;  %vm19532_vm15 = vmmov %vm19522_vm10  ;;  %v19533_v22 = vld [vmem:[#allocation80_spill] sm:$0xff] }
 0x230   : > { %v4003_v52 = vsel %vm19522_vm10, %v19521_v1, %v19520_v43  ;;  %v4188_v56 = vsel %vm19524_vm12, 0.0, %v4001_v44  ;;  %v19526_v35 = vmov %v19520_v43  ;;  %vm19529_vm9 = vnez %v19528_v9  ;;  %vm19537_vm12 = vmmov %vm19527_vm11  ;;  %v19545_v9 = vld [vmem:[#allocation85_spill] sm:$0xff] }
 0x231   : > { %v4005_v38 = vsel %vm19527_vm11, %v19526_v35, %v19525_v49  ;;  %v4189_v53 = vsel %vm19529_vm9, 0.0, %v4003_v52  ;;  %v19530_v55 = vrot.slane %v13712_v26, 2  ;;  %v19531_v58 = vmov %v19525_v49  ;;  %v19538_v49 = vld [vmem:[#allocation81_spill] sm:$0xff]  ;;  %vm19542_vm9 = vmmov %vm19537_vm12 }
 0x232   : > { %vm19534_vm10 = vnez %v19533_v22  ;;  %v19535_v44 = vrot.slane %v13715_v42, 2  ;;  %v14466_v39 = vpack.c.bf16 %v4189_v53, %v4188_v56  ;;  %vm19539_vm11 = vnez %v19538_v49  ;;  %v19597_v49 = vld [vmem:[#allocation147_spill] sm:$0xff] }
 0x233   : > { %v4007_v37 = vsel %vm19532_vm15, %v19531_v58, %v19530_v55  ;;  %v4190_v43 = vsel %vm19534_vm10, 0.0, %v4005_v38  ;;  %v19536_v1 = vmov %v19530_v55  ;;  %v19540_v35 = vrot.slane %v13735_v59, 2  ;;  %v19543_v58 = vld [vmem:[#allocation84_spill] sm:$0xff] }
 0x234   : > { %v4009_v0 = vsel %vm19537_vm12, %v19536_v1, %v19535_v44  ;;  %v4191_v52 = vsel %vm19539_vm11, 0.0, %v4007_v37  ;;  %v19541_v11 = vmov %v19535_v44  ;;  %vm19544_vm15 = vnez %v19543_v58  ;;  %vm19549_vm12 = vmmov %vm19542_vm9 }
 0x235   : > { %v4011_v55 = vsel %vm19542_vm9, %v19541_v11, %v19540_v35  ;;  %v4192_v38 = vsel %vm19544_vm15, 0.0, %v4009_v0  ;;  %v14477_v22 = vpack.c.bf16 %v4191_v52, %v4190_v43  ;;  %vm19546_vm10 = vnez %v19545_v9  ;;  %vm19552_vm11 = vmmov %vm19542_vm9  ;;  %v11184_v43 = vld [vmem:[%s17744_s3 + $0x28] sm:$0xff]   ;;  %v19553_v52 = vld [vmem:[#allocation86_spill] sm:$0xff] }
 0x236   : > { %v4193_v26 = vsel %vm19546_vm10, 0.0, %v4011_v55  ;;  %v19547_v56 = vrot.slane %v13741_v25, 2  ;;  %v19548_v53 = vmov %v19540_v35  ;;  %v19550_v44 = vrot.slane %v13760_v62, 2  ;;  %v19555_v11 = vld [vmem:[#allocation87_spill] sm:$0xff] }
 0x237   : > { %v14494_v0 = vpack.c.bf16 %v4193_v26, %v4192_v38  ;;  %vm19554_vm9 = vnez %v19553_v52  ;;  %vm19556_vm10 = vnez %v19555_v11  ;;  %v19557_v55 = vrot.slane %v13763_v10, 2  ;;  %v19562_v26 = vld [vmem:[#allocation88_spill] sm:$0xff]  ;;  %v19564_v52 = vld [vmem:[#allocation139_spill] sm:$0xff] }
 0x238   : > { %v4013_v37 = vsel %vm19549_vm12, %v19548_v53, %v19547_v56  ;;  %v19551_v42 = vmov %v19547_v56  ;;  %v19558_v56 = vmov %v19550_v44  ;;  %vm19559_vm12 = vmmov %vm19552_vm11  ;;  %vm19563_vm15 = vnez %v19562_v26  ;;  %v19568_v62 = vld [vmem:[#allocation131_spill] sm:$0xff]  ;;  %v19578_v26 = vld [vmem:[#allocation142_spill] sm:$0xff] }
 0x239   : > { %v4015_v1 = vsel %vm19552_vm11, %v19551_v42, %v19550_v44  ;;  %v4194_v35 = vsel %vm19554_vm9, 0.0, %v4013_v37  ;;  %v4017_v25 = vsel %vm19559_vm12, %v19558_v56, %v19557_v55  ;;  %v19560_v44 = vrot.slane %v13786_v46, 2 }
 0x23a   : > { %v4195_v59 = vsel %vm19556_vm10, 0.0, %v4015_v1  ;;  %v19561_v42 = vmov %v19557_v55  ;;  %v4196_v37 = vsel %vm19563_vm15, 0.0, %v4017_v25  ;;  %v19565_v11 = vrot.slane %v19564_v52, 2  ;;  %vm19567_vm10 = vmmov %vm19552_vm11  ;;  %v19572_v55 = vld [vmem:[#allocation141_spill] sm:$0xff] }
 0x23b   : > { %v14505_v53 = vpack.c.bf16 %v4195_v59, %v4194_v35  ;;  %v4019_v38 = vsel %vm19552_vm11, %v19561_v42, %v19560_v44  ;;  %v19566_v1 = vmov %v19560_v44  ;;  %vm19569_vm9 = vcmask 261120   ;;  %v19570_v35 = vld [vmem:[#allocation89_spill] sm:$0xff]  ;;  %vm19575_vm11 = vmmov %vm19567_vm10  ;;  %v19576_v42 = vld [vmem:[#allocation18_spill] sm:$0xff] }
 0x23c   : > { %v4021_v9 = vsel %vm19567_vm10, %v19566_v1, %v19565_v11  ;;  %10311 = vmatmul.mubr.msk.bf16.vlgmr.msra.gmra.mrb[64].mxu1 %vm19569_vm9, %v19568_v62  ;;  %vm19571_vm12 = vnez %v19570_v35  ;;  %v19573_v56 = vrot.slane %v19572_v55, 2  ;;  %v19574_v10 = vmov %v19565_v11  ;;  %v11214_v1 = vld [vmem:[%s17744_s3 + $0x20] sm:$0xff]   ;;  %v19582_v62 = vld [vmem:[#allocation19_spill] sm:$0xff] }
 0x23d   : > { %v4197_v59 = vsel %vm19571_vm12, 0.0, %v4019_v38  ;;  %vm19577_vm15 = vnez %v19576_v42  ;;  %v19579_v58 = vrot.slane %v19578_v26, 2  ;;  %10375 = vmatpush3.bf16.msra.mxu1 %v11214_v1  ;;  %v19581_v38 = vld [vmem:[#allocation133_spill] sm:$0xff]  ;;  %v19598_v60 = vrot.slane %v19597_v49, 2  ;;  %v19620_v49 = vld [vmem:[#allocation34_spill] sm:$0xff] }
 0x23e   : > { %v4023_v44 = vsel %vm19575_vm11, %v19574_v10, %v19573_v56  ;;  %v4198_v25 = vsel %vm19577_vm15, 0.0, %v4021_v9  ;;  %v19580_v46 = vmov %v19573_v56  ;;  %10314 = vmatprep.mubr.msk.bf16.mxu1 %vm19569_vm9, %v19581_v38  ;;  %v14540_v52 = vpack.c.bf16 %v4197_v59, %v4196_v37  ;;  %v19584_v9 = vld [vmem:[#allocation144_spill] sm:$0xff]  ;;  %vm19587_vm15 = vmmov %vm19567_vm10  ;;  %10376 = vmatprep.subr.bf16.mxu1 %v11184_v43  ;;  %v19591_v1 = vld [vmem:[#allocation25_spill] sm:$0xff] }
 0x23f   : > { %v4025_v11 = vsel %vm19567_vm10, %v19580_v46, %v19579_v58  ;;  %vm19583_vm11 = vnez %v19582_v62  ;;  %v19585_v10 = vrot.slane %v19584_v9, 2  ;;  %v19586_v42 = vmov %v19579_v58  ;;  %v19588_v58 = vld [vmem:[#allocation29_spill] sm:$0xff]  ;;  %vm19596_vm9 = vmmov %vm19587_vm15 }
 0x240   : > { %v4199_v56 = vsel %vm19583_vm11, 0.0, %v4023_v44  ;;  %vm19589_vm10 = vnez %v19588_v58  ;;  %vm19592_vm12 = vnez %v19591_v1  ;;  %v19593_v37 = vld [vmem:[#allocation145_spill] sm:$0xff]  ;;  %v19606_v1 = vld [vmem:[#allocation148_spill] sm:$0xff]  ;;  %v19608_v9 = vmov %v19598_v60 }
 0x241   : > { %v4027_v55 = vsel %vm19587_vm15, %v19586_v42, %v19585_v10  ;;  %v4200_v46 = vsel %vm19589_vm10, 0.0, %v4025_v11  ;;  %v14551_v35 = vpack.c.bf16 %v4199_v56, %v4198_v25  ;;  %v19594_v59 = vrot.slane %v19593_v37, 2  ;;  %vm19600_vm15 = vmmov %vm19596_vm9  ;;  %v19602_v11 = vld [vmem:[#allocation26_spill] sm:$0xff]  ;;  %v19604_v56 = vld [vmem:[#allocation27_spill] sm:$0xff]  ;;  %10377 = vmatpush3.bf16.msra.mxu1 %v11184_v43 }
 0x242   : > { %v4201_v38 = vsel %vm19592_vm12, 0.0, %v4027_v55  ;;  %v19595_v62 = vmov %v19585_v10  ;;  %vm19603_vm10 = vnez %v19602_v11  ;;  %vm19605_vm11 = vnez %v19604_v56  ;;  %vm19609_vm12 = vmmov %vm19596_vm9  ;;  %v19632_v43 = vld [vmem:[#allocation38_spill] sm:$0xff] }
 0x243   : > { %19590 = vst [vmem:[#allocation130_spill] sm:$0xff] %v14551_v35  ;;  %v4029_v44 = vsel %vm19596_vm9, %v19595_v62, %v19594_v59  ;;  %v19599_v26 = vmov %v19594_v59  ;;  %v14565_v10 = vpack.c.bf16 %v4201_v38, %v4200_v46  ;;  %v19607_v58 = vrot.slane %v19606_v1, 2  ;;  %v19611_v35 = vld [vmem:[#allocation150_spill] sm:$0xff]  ;;  %v19614_v38 = vld [vmem:[#allocation28_spill] sm:$0xff] }
 0x244   : > { %v4031_v42 = vsel %vm19600_vm15, %v19599_v26, %v19598_v60  ;;  %v4202_v25 = vsel %vm19603_vm10, 0.0, %v4029_v44  ;;  %v19612_v37 = vrot.slane %v19611_v35, 2  ;;  %vm19615_vm15 = vnez %v19614_v38  ;;  %v19616_v26 = vld [vmem:[#allocation151_spill] sm:$0xff]  ;;  %vm19625_vm10 = vmmov %vm19596_vm9 }
 0x245   : > { %19601 = vst [vmem:[#allocation132_spill] sm:$0xff] %v14565_v10  ;;  %v4203_v55 = vsel %vm19605_vm11, 0.0, %v4031_v42  ;;  %v4033_v62 = vsel %vm19609_vm12, %v19608_v9, %v19607_v58  ;;  %v19613_v60 = vmov %v19607_v58  ;;  %v19617_v56 = vrot.slane %v19616_v26, 2  ;;  %vm19619_vm11 = vmmov %vm19596_vm9  ;;  %v19641_v10 = vld [vmem:[#allocation37_spill] sm:$0xff] }
 0x246   : > { %v14576_v59 = vpack.c.bf16 %v4203_v55, %v4202_v25  ;;  %v4035_v46 = vsel %vm19596_vm9, %v19613_v60, %v19612_v37  ;;  %v4204_v44 = vsel %vm19615_vm15, 0.0, %v4033_v62  ;;  %v19618_v42 = vmov %v19612_v37  ;;  %v19622_v25 = vld [vmem:[#allocation153_spill] sm:$0xff]  ;;  %v19626_v37 = vld [vmem:[#allocation35_spill] sm:$0xff]  ;;  %v19628_v62 = vld [vmem:[#allocation154_spill] sm:$0xff] }
 0x247   : > { %v4037_v11 = vsel %vm19619_vm11, %v19618_v42, %v19617_v56  ;;  %vm19621_vm12 = vnez %v19620_v49  ;;  %v19623_v55 = vrot.slane %v19622_v25, 2  ;;  %v19624_v9 = vmov %v19617_v56  ;;  %vm19631_vm15 = vmmov %vm19625_vm10  ;;  %v19634_v42 = vld [vmem:[#allocation156_spill] sm:$0xff] }
 0x248   : > { %19610 = vst [vmem:[#allocation139_spill] sm:$0xff] %v14576_v59  ;;  %v4205_v58 = vsel %vm19621_vm12, 0.0, %v4035_v46  ;;  %vm19627_vm9 = vnez %v19626_v37  ;;  %v19629_v38 = vrot.slane %v19628_v62, 2  ;;  %vm19633_vm11 = vnez %v19632_v43  ;;  %vm19637_vm12 = vmmov %vm19625_vm10 }
 0x249   : > { %v4039_v1 = vsel %vm19625_vm10, %v19624_v9, %v19623_v55  ;;  %v4206_v60 = vsel %vm19627_vm9, 0.0, %v4037_v11  ;;  %v19630_v59 = vmov %v19623_v55  ;;  %v14604_v56 = vpack.c.bf16 %v4205_v58, %v4204_v44  ;;  %v19638_v9 = vld [vmem:[#allocation36_spill] sm:$0xff] }
 0x24a   : > { %v4041_v35 = vsel %vm19631_vm15, %v19630_v59, %v19629_v38  ;;  %v4207_v46 = vsel %vm19633_vm11, 0.0, %v4039_v1  ;;  %v19635_v49 = vrot.slane %v19634_v42, 2  ;;  %v19636_v26 = vmov %v19629_v38  ;;  %v19643_v59 = vld [vmem:[#allocation157_spill] sm:$0xff]  ;;  %vm19646_vm15 = vmmov %vm19637_vm12  ;;  %v19647_v1 = vld [vmem:[#allocation159_spill] sm:$0xff] }
 0x24b   : > { %vm19639_vm10 = vnez %v19638_v9  ;;  %v14615_v37 = vpack.c.bf16 %v4207_v46, %v4206_v60  ;;  %vm19642_vm9 = vnez %v19641_v10  ;;  %v19644_v38 = vrot.slane %v19643_v59, 2  ;;  %vm19650_vm11 = vmmov %vm19637_vm12  ;;  %v19658_v42 = vld [vmem:[#allocation160_spill] sm:$0xff] }
 0x24c   : > { %v4043_v55 = vsel %vm19637_vm12, %v19636_v26, %v19635_v49  ;;  %v4208_v11 = vsel %vm19639_vm10, 0.0, %v4041_v35  ;;  %v19645_v44 = vmov %v19635_v49  ;;  %v19648_v43 = vrot.slane %v19647_v1, 2  ;;  %v19651_v26 = vld [vmem:[#allocation135_spill] sm:$0xff]  ;;  %v19662_v59 = vld [vmem:[#allocation136_spill] sm:$0xff] }
 0x24d   : > { %19640 = vst [vmem:[#allocation131_spill] sm:$0xff] %v14615_v37  ;;  %v4209_v25 = vsel %vm19642_vm9, 0.0, %v4043_v55  ;;  %v4045_v58 = vsel %vm19646_vm15, %v19645_v44, %v19644_v38  ;;  %v19649_v62 = vmov %v19644_v38  ;;  %vm19652_vm12 = vcmask 261120   ;;  %v19654_v35 = vld [vmem:[#allocation43_spill] sm:$0xff]  ;;  %vm19661_vm15 = vmmov %vm19650_vm11  ;;  %v19693_v37 = vld [vmem:[#allocation60_spill] sm:$0xff] }
 0x24e   : > { %v4047_v49 = vsel %vm19650_vm11, %v19649_v62, %v19648_v43  ;;  %10315 = vmatmul.mubr.msk.bf16.gmra.mrb[68].mxu1 %vm19652_vm12, %v19651_v26  ;;  %v14631_v60 = vpack.c.bf16 %v4209_v25, %v4208_v11  ;;  %vm19655_vm10 = vnez %v19654_v35  ;;  %v19656_v55 = vld [vmem:[#allocation63_spill] sm:$0xff]  ;;  %v19659_v9 = vrot.slane %v19658_v42, 2  ;;  %vm19663_vm3 = vmmov %vm19652_vm12  ;;  %v19665_v62 = vld [vmem:[#allocation162_spill] sm:$0xff] }
 0x24f   : > { %v4210_v46 = vsel %vm19655_vm10, 0.0, %v4045_v58  ;;  %vm19657_vm9 = vnez %v19656_v55  ;;  %v19660_v38 = vmov %v19648_v43  ;;  %10318 = vmatprep.mubr.msk.bf16.mxu1 %vm19663_vm3, %v19662_v59  ;;  %v19666_v11 = vrot.slane %v19665_v62, 2  ;;  %v19668_v26 = vld [vmem:[#allocation51_spill] sm:$0xff] }
 0x250   : > { %19653 = vst [vmem:[#allocation141_spill] sm:$0xff] %v14631_v60  ;;  %v4211_v10 = vsel %vm19657_vm9, 0.0, %v4047_v49  ;;  %v4049_v44 = vsel %vm19661_vm15, %v19660_v38, %v19659_v9  ;;  %v19667_v25 = vmov %v19659_v9  ;;  %vm19669_vm12 = vnez %v19668_v26  ;;  %v19670_v55 = vld [vmem:[#allocation163_spill] sm:$0xff]  ;;  %vm19673_vm9 = vmmov %vm19650_vm11  ;;  %v19674_v38 = vld [vmem:[#allocation52_spill] sm:$0xff] }
 0x251   : > { %v14644_v43 = vpack.c.bf16 %v4211_v10, %v4210_v46  ;;  %v4051_v58 = vsel %vm19650_vm11, %v19667_v25, %v19666_v11  ;;  %v4212_v49 = vsel %vm19669_vm12, 0.0, %v4049_v44  ;;  %v19671_v35 = vrot.slane %v19670_v55, 2  ;;  %vm19678_vm3 = vmmov %vm19673_vm9  ;;  %v19681_v25 = vld [vmem:[#allocation165_spill] sm:$0xff] }
 0x252   : > { %v19672_v1 = vmov %v19666_v11  ;;  %vm19675_vm15 = vnez %v19674_v38  ;;  %v19676_v10 = vrot.slane %v14050_v24, 2  ;;  %v19682_v44 = vrot.slane %v19681_v25, 2  ;;  %vm19684_vm12 = vmmov %vm19678_vm3 }
 0x253   : > { %19664 = vst [vmem:[#allocation142_spill] sm:$0xff] %v14644_v43  ;;  %v4053_v9 = vsel %vm19673_vm9, %v19672_v1, %v19671_v35  ;;  %v4213_v59 = vsel %vm19675_vm15, 0.0, %v4051_v58  ;;  %v19677_v46 = vmov %v19671_v35  ;;  %v19679_v43 = vld [vmem:[#allocation53_spill] sm:$0xff]  ;;  %v19685_v35 = vld [vmem:[#allocation54_spill] sm:$0xff]  ;;  %v19687_v1 = vld [vmem:[#allocation167_spill] sm:$0xff] }
 0x254   : > { %v4055_v42 = vsel %vm19678_vm3, %v19677_v46, %v19676_v10  ;;  %vm19680_vm11 = vnez %v19679_v43  ;;  %v19683_v26 = vmov %v19676_v10  ;;  %v14672_v60 = vpack.c.bf16 %v4213_v59, %v4212_v49  ;;  %vm19690_vm15 = vmmov %vm19678_vm3  ;;  %v19691_v46 = vld [vmem:[#allocation59_spill] sm:$0xff] }
 0x255   : > { %v4214_v11 = vsel %vm19680_vm11, 0.0, %v4053_v9  ;;  %v4057_v62 = vsel %vm19684_vm12, %v19683_v26, %v19682_v44  ;;  %vm19686_vm9 = vnez %v19685_v35  ;;  %v19688_v38 = vrot.slane %v19687_v1, 2  ;;  %v19695_v26 = vld [vmem:[#allocation168_spill] sm:$0xff] }
 0x256   : > { %v4215_v58 = vsel %vm19686_vm9, 0.0, %v4055_v42  ;;  %v19689_v55 = vmov %v19682_v44  ;;  %vm19692_vm3 = vnez %v19691_v46  ;;  %vm19694_vm11 = vnez %v19693_v37  ;;  %vm19700_vm9 = vmmov %vm19684_vm12  ;;  %v19705_v37 = vld [vmem:[#allocation170_spill] sm:$0xff] }
 0x257   : > { %v4059_v10 = vsel %vm19690_vm15, %v19689_v55, %v19688_v38  ;;  %v4216_v9 = vsel %vm19692_vm3, 0.0, %v4057_v62  ;;  %v14683_v43 = vpack.c.bf16 %v4215_v58, %v4214_v11  ;;  %v19696_v49 = vrot.slane %v19695_v26, 2  ;;  %v19701_v62 = vld [vmem:[#allocation61_spill] sm:$0xff]  ;;  %v19703_v58 = vld [vmem:[#allocation62_spill] sm:$0xff] }
 0x258   : > { %v4217_v24 = vsel %vm19694_vm11, 0.0, %v4059_v10  ;;  %v19697_v59 = vmov %v19688_v38  ;;  %v19698_v44 = vrot.slane %v14108_v4, 2  ;;  %vm19702_vm15 = vnez %v19701_v62  ;;  %vm19708_vm11 = vmmov %vm19700_vm9  ;;  %v19716_v4 = vld [vmem:[#allocation71_spill] sm:$0xff] }
 0x259   : > { %v4061_v42 = vsel %vm19684_vm12, %v19697_v59, %v19696_v49  ;;  %v19699_v25 = vmov %v19696_v49  ;;  %v14697_v55 = vpack.c.bf16 %v4217_v24, %v4216_v9  ;;  %vm19704_vm3 = vnez %v19703_v58  ;;  %v19711_v24 = vld [vmem:[#allocation70_spill] sm:$0xff] }
 0x25a   : > { %v4063_v38 = vsel %vm19700_vm9, %v19699_v25, %v19698_v44  ;;  %v4218_v11 = vsel %vm19702_vm15, 0.0, %v4061_v42  ;;  %v19706_v46 = vrot.slane %v19705_v37, 2  ;;  %v19707_v1 = vmov %v19698_v44 }
 0x25b   : > { %v4219_v10 = vsel %vm19704_vm3, 0.0, %v4063_v38  ;;  %v19709_v26 = vrot.slane %v14130_v16, 2  ;;  %vm19712_vm12 = vnez %v19711_v24  ;;  %v19713_v25 = vrot.slane %v14137_v47, 2  ;;  %vm19715_vm3 = vmmov %vm19700_vm9  ;;  %v19726_v24 = vld [vmem:[#allocation137_spill] sm:$0xff] }
 0x25c   : > { %v4065_v49 = vsel %vm19708_vm11, %v19707_v1, %v19706_v46  ;;  %v14708_v59 = vpack.c.bf16 %v4219_v10, %v4218_v11  ;;  %v19710_v44 = vmov %v19706_v46  ;;  %vm19717_vm15 = vnez %v19716_v4  ;;  %vm19720_vm11 = vmmov %vm19715_vm3  ;;  %v19721_v1 = vld [vmem:[#allocation72_spill] sm:$0xff] }
 0x25d   : > { %v4067_v9 = vsel %vm19700_vm9, %v19710_v44, %v19709_v26  ;;  %v4220_v42 = vsel %vm19712_vm12, 0.0, %v4065_v49  ;;  %v19714_v38 = vmov %v19709_v26  ;;  %v19718_v11 = vrot.slane %v14156_v7, 2  ;;  %vm19725_vm12 = vmmov %vm19715_vm3  ;;  %v19734_v7 = vld [vmem:[#allocation138_spill] sm:$0xff] }
 0x25e   : > { %v4069_v58 = vsel %vm19715_vm3, %v19714_v38, %v19713_v25  ;;  %v4221_v46 = vsel %vm19717_vm15, 0.0, %v4067_v9  ;;  %v19719_v10 = vmov %v19713_v25  ;;  %vm19722_vm9 = vnez %v19721_v1  ;;  %v19728_v9 = vld [vmem:[#allocation73_spill] sm:$0xff] }
 0x25f   : > { %v4071_v37 = vsel %vm19720_vm11, %v19719_v10, %v19718_v11  ;;  %v4222_v26 = vsel %vm19722_vm9, 0.0, %v4069_v58  ;;  %v19723_v49 = vrot.slane %v14159_v13, 2  ;;  %v19724_v44 = vmov %v19718_v11  ;;  %v19732_v10 = vld [vmem:[#allocation105_spill] sm:$0xff] }
 0x260   : > { %vm19727_vm3 = vcmask 261120   ;;  %v14738_v25 = vpack.c.bf16 %v4221_v46, %v4220_v42  ;;  %vm19729_vm15 = vnez %v19728_v9  ;;  %v19730_v47 = vrot.slane %v14179_v15, 2 }
 0x261   : > { %v4073_v16 = vsel %vm19725_vm12, %v19724_v44, %v19723_v49  ;;  %10319 = vmatmul.mubr.msk.bf16.gmra.mrb[72].mxu1 %vm19727_vm3, %v19726_v24  ;;  %v4223_v38 = vsel %vm19729_vm15, 0.0, %v4071_v37  ;;  %v19731_v11 = vmov %v19723_v49  ;;  %vm19733_vm9 = vnez %v19732_v10  ;;  %vm19735_vm10 = vmmov %vm19727_vm3  ;;  %v19736_v24 = vld [vmem:[#allocation107_spill] sm:$0xff] }
 0x262   : > { %v4075_v58 = vsel %vm19720_vm11, %v19731_v11, %v19730_v47  ;;  %v4224_v1 = vsel %vm19733_vm9, 0.0, %v4073_v16  ;;  %10322 = vmatprep.mubr.msk.bf16.mxu1 %vm19735_vm10, %v19734_v7  ;;  %v14751_v49 = vpack.c.bf16 %v4223_v38, %v4222_v26  ;;  %vm19737_vm12 = vnez %v19736_v24  ;;  %vm19740_vm3 = vmmov %vm19720_vm11  ;;  %v19744_v7 = vld [vmem:[#allocation20_spill] sm:$0xff]  ;;  %v19746_v38 = vld [vmem:[#allocation82_spill] sm:$0xff] }
 0x263   : > { %v4225_v42 = vsel %vm19737_vm12, 0.0, %v4075_v58  ;;  %v19738_v46 = vrot.slane %v14185_v18, 2  ;;  %v19739_v37 = vmov %v19730_v47  ;;  %v19741_v13 = vrot.slane %v14204_v14, 2  ;;  %vm19743_vm11 = vmmov %vm19740_vm3  ;;  %v19758_v14 = vld [vmem:[#allocation110_spill] sm:$0xff] }
 0x264   : > { %v14765_v11 = vpack.c.bf16 %v4225_v42, %v4224_v1  ;;  %vm19745_vm10 = vnez %v19744_v7  ;;  %vm19747_vm9 = vnez %v19746_v38  ;;  %v19748_v24 = vrot.slane %v14207_v54, 2  ;;  %vm19750_vm12 = vmmov %vm19740_vm3  ;;  %v19753_v42 = vld [vmem:[#allocation46_spill] sm:$0xff] }
 0x265   : > { %v4077_v44 = vsel %vm19740_vm3, %v19739_v37, %v19738_v46  ;;  %v19742_v47 = vmov %v19738_v46  ;;  %v19749_v15 = vmov %v19741_v13  ;;  %v19751_v18 = vrot.slane %v14228_v27, 2 }
 0x266   : > { %v4079_v16 = vsel %vm19743_vm11, %v19742_v47, %v19741_v13  ;;  %v4226_v26 = vsel %vm19745_vm10, 0.0, %v4077_v44  ;;  %v4081_v46 = vsel %vm19750_vm12, %v19749_v15, %v19748_v24  ;;  %v19752_v13 = vmov %v19748_v24  ;;  %vm19762_vm12 = vmmov %vm19740_vm3  ;;  %v19763_v15 = vld [vmem:[#allocation112_spill] sm:$0xff] }
 0x267   : > { %v4227_v58 = vsel %vm19747_vm9, 0.0, %v4079_v16  ;;  %v4083_v1 = vsel %vm19740_vm3, %v19752_v13, %v19751_v18  ;;  %vm19754_vm11 = vnez %v19753_v42  ;;  %v19755_v47 = vrot.slane %v14240_v5, 2  ;;  %vm19757_vm9 = vmmov %vm19740_vm3 }
 0x268   : > { %v14776_v37 = vpack.c.bf16 %v4227_v58, %v4226_v26  ;;  %v4228_v44 = vsel %vm19754_vm11, 0.0, %v4081_v46  ;;  %v19756_v16 = vmov %v19751_v18  ;;  %vm19759_vm10 = vnez %v19758_v14  ;;  %vm19767_vm11 = vmmov %vm19757_vm9  ;;  %v19775_v14 = vld [vmem:[#allocation115_spill] sm:$0xff] }
 0x269   : > { %v4085_v38 = vsel %vm19757_vm9, %v19756_v16, %v19755_v47  ;;  %v4229_v24 = vsel %vm19759_vm10, 0.0, %v4083_v1  ;;  %v19760_v26 = vrot.slane %v14259_v61, 2  ;;  %v19761_v58 = vmov %v19755_v47  ;;  %v19768_v47 = vld [vmem:[#allocation113_spill] sm:$0xff]  ;;  %vm19772_vm10 = vmmov %vm19767_vm11 }
 0x26a   : > { %vm19764_vm3 = vnez %v19763_v15  ;;  %v19765_v46 = vrot.slane %v14262_v50, 2  ;;  %v14804_v42 = vpack.c.bf16 %v4229_v24, %v4228_v44  ;;  %vm19769_vm9 = vnez %v19768_v47 }
 0x26b   : > { %v4087_v54 = vsel %vm19762_vm12, %v19761_v58, %v19760_v26  ;;  %v4230_v18 = vsel %vm19764_vm3, 0.0, %v4085_v38  ;;  %v19766_v13 = vmov %v19760_v26  ;;  %v19770_v16 = vrot.slane %v14281_v3, 2  ;;  %v19773_v58 = vld [vmem:[#allocation114_spill] sm:$0xff] }
 0x26c   : > { %v4089_v27 = vsel %vm19767_vm11, %v19766_v13, %v19765_v46  ;;  %v4231_v1 = vsel %vm19769_vm9, 0.0, %v4087_v54  ;;  %v19771_v5 = vmov %v19765_v46  ;;  %vm19774_vm12 = vnez %v19773_v58  ;;  %vm19779_vm11 = vmmov %vm19772_vm10 }
 0x26d   : > { %v4091_v26 = vsel %vm19772_vm10, %v19771_v5, %v19770_v16  ;;  %v4232_v38 = vsel %vm19774_vm12, 0.0, %v4089_v27  ;;  %v14815_v15 = vpack.c.bf16 %v4231_v1, %v4230_v18  ;;  %vm19776_vm3 = vnez %v19775_v14  ;;  %vm19782_vm9 = vmmov %vm19772_vm10  ;;  %v19783_v27 = vld [vmem:[#allocation116_spill] sm:$0xff]  ;;  %v19785_v1 = vld [vmem:[#allocation117_spill] sm:$0xff] }
 0x26e   : > { %v4233_v61 = vsel %vm19776_vm3, 0.0, %v4091_v26  ;;  %v19777_v44 = vrot.slane %v14288_v34, 2  ;;  %v19778_v24 = vmov %v19770_v16  ;;  %v19780_v46 = vrot.slane %v14307_v45, 2  ;;  %vm19789_vm3 = vmmov %vm19782_vm9 }
 0x26f   : > { %v14829_v16 = vpack.c.bf16 %v4233_v61, %v4232_v38  ;;  %vm19784_vm10 = vnez %v19783_v27  ;;  %vm19786_vm12 = vnez %v19785_v1  ;;  %v19787_v26 = vrot.slane %v14310_v2, 2  ;;  %v19817_v1 = vld [vmem:[#allocation123_spill] sm:$0xff] }
 0x270   : > { %v4093_v54 = vsel %vm19779_vm11, %v19778_v24, %v19777_v44  ;;  %v19781_v50 = vmov %v19777_v44  ;;  %v19788_v3 = vmov %v19780_v46  ;;  %v19790_v24 = vld [vmem:[#allocation140_spill] sm:$0xff]  ;;  %vm19791_vm11 = vcmask 261120   ;;  %v20111_v27 = vld [vmem:[#allocation19_spill] sm:$0xff] }
 0x271   : > { %v4095_v13 = vsel %vm19782_vm9, %v19781_v50, %v19780_v46  ;;  %v4234_v18 = vsel %vm19784_vm10, 0.0, %v4093_v54  ;;  %v4097_v44 = vsel %vm19789_vm3, %v19788_v3, %v19787_v26  ;;  %10323 = vmatmul.mubr.msk.bf16.gmra.mrb[76].mxu1 %vm19791_vm11, %v19790_v24  ;;  %v19792_v38 = vrot.slane %v14326_v32, 2  ;;  %vm19794_vm9 = vmmov %vm19789_vm3  ;;  %v19795_v46 = vld [vmem:[#allocation118_spill] sm:$0xff]  ;;  %v19800_v3 = vld [vmem:[#allocation143_spill] sm:$0xff] }
 0x272   : > { %v4235_v5 = vsel %vm19786_vm12, 0.0, %v4095_v13  ;;  %v19793_v61 = vmov %v19787_v26  ;;  %vm19796_vm10 = vnez %v19795_v46  ;;  %v19797_v13 = vrot.slane %v14332_v21, 2  ;;  %vm19799_vm12 = vmmov %vm19789_vm3 }
 0x273   : > { %v14842_v34 = vpack.c.bf16 %v4235_v5, %v4234_v18  ;;  %v4099_v54 = vsel %vm19794_vm9, %v19793_v61, %v19792_v38  ;;  %v4236_v50 = vsel %vm19796_vm10, 0.0, %v4097_v44  ;;  %v19798_v45 = vmov %v19792_v38  ;;  %vm19801_vm3 = vmmov %vm19791_vm11  ;;  %v19802_v18 = vld [vmem:[#allocation119_spill] sm:$0xff] }
 0x274   : > { %v4101_v26 = vsel %vm19799_vm12, %v19798_v45, %v19797_v13  ;;  %10326 = vmatprep.mubr.msk.bf16.mxu1 %vm19801_vm3, %v19800_v3  ;;  %vm19803_vm11 = vnez %v19802_v18  ;;  %v19804_v24 = vrot.slane %v14351_v51, 2  ;;  %v19805_v2 = vmov %v19797_v13  ;;  %vm19809_vm12 = vmmov %vm19794_vm9  ;;  %v19810_v3 = vld [vmem:[#allocation121_spill] sm:$0xff] }
 0x275   : > { %v4237_v5 = vsel %vm19803_vm11, 0.0, %v4099_v54  ;;  %v4238_v44 = vsel %vm13409_vm1, 0.0, %v4101_v26  ;;  %v19807_v46 = vrot.slane %v14354_v12, 2  ;;  %vm19811_vm3 = vnez %v19810_v3  ;;  %vm19814_vm11 = vmmov %vm19794_vm9 }
 0x276   : > { %v4103_v38 = vsel %vm19794_vm9, %v19805_v2, %v19804_v24  ;;  %v19808_v32 = vmov %v19804_v24  ;;  %v14872_v45 = vpack.c.bf16 %v4237_v5, %v4236_v50  ;;  %v19812_v18 = vrot.slane %v14368_v48, 2  ;;  %v19815_v2 = vld [vmem:[#allocation122_spill] sm:$0xff] }
 0x277   : > { %v4105_v13 = vsel %vm19809_vm12, %v19808_v32, %v19807_v46  ;;  %v4239_v54 = vsel %vm19811_vm3, 0.0, %v4103_v38  ;;  %v19813_v21 = vmov %v19807_v46  ;;  %vm19816_vm9 = vnez %v19815_v2  ;;  %vm19821_vm12 = vmmov %vm19814_vm11 }
 0x278   : > { %v4107_v24 = vsel %vm19814_vm11, %v19813_v21, %v19812_v18  ;;  %v4240_v26 = vsel %vm19816_vm9, 0.0, %v4105_v13  ;;  %v14883_v61 = vpack.c.bf16 %v4239_v54, %v4238_v44  ;;  %vm19818_vm1 = vnez %v19817_v1  ;;  %vm19824_vm3 = vmmov %vm19814_vm11  ;;  %v19826_v54 = vld [vmem:[#allocation125_spill] sm:$0xff] }
 0x279   : > { %v4241_v51 = vsel %vm19818_vm1, 0.0, %v4107_v24  ;;  %v19819_v46 = vrot.slane %v14371_v36, 2  ;;  %v19820_v50 = vmov %v19812_v18  ;;  %v19822_v38 = vrot.slane %v14389_v19, 2  ;;  %vm19830_vm1 = vmmov %vm19824_vm3  ;;  %v19839_v19 = vld [vmem:[#allocation127_spill] sm:$0xff] }
 0x27a   : > { %v14897_v32 = vpack.c.bf16 %v4241_v51, %v4240_v26  ;;  %vm19827_vm11 = vnez %v19826_v54  ;;  %v19828_v24 = vrot.slane %v14392_v29, 2  ;;  %v19831_v36 = vrot.slane %v14405_v63, 2  ;;  %v19834_v51 = vld [vmem:[#allocation126_spill] sm:$0xff] }
 0x27b   : > { %v4109_v5 = vsel %vm19821_vm12, %v19820_v50, %v19819_v46  ;;  %v19823_v12 = vmov %v19819_v46  ;;  %v19829_v48 = vmov %v19822_v38  ;;  %vm19835_vm12 = vnez %v19834_v51  ;;  %v19845_v63 = vld [vmem:[#allocation146_spill] sm:$0xff] }
 0x27c   : > { %v4111_v18 = vsel %vm19824_vm3, %v19823_v12, %v19822_v38  ;;  %v4242_v44 = vsel %vm13454_vm0, 0.0, %v4109_v5  ;;  %v4113_v46 = vsel %vm19830_vm1, %v19829_v48, %v19828_v24  ;;  %v19832_v38 = vmov %v19828_v24  ;;  %vm19833_vm3 = vmmov %vm19830_vm1 }
 0x27d   : > { %v4243_v21 = vsel %vm19827_vm11, 0.0, %v4111_v18  ;;  %v4115_v26 = vsel %vm19833_vm3, %v19832_v38, %v19831_v36  ;;  %v4244_v5 = vsel %vm19835_vm12, 0.0, %v4113_v46  ;;  %v19836_v12 = vrot.slane %v14408_v8, 2  ;;  %vm19838_vm11 = vmmov %vm19830_vm1  ;;  %v19851_v8 = vld [vmem:[#allocation155_spill] sm:$0xff] }
 0x27e   : > { %v14908_v50 = vpack.c.bf16 %v4243_v21, %v4242_v44  ;;  %v19837_v18 = vmov %v19831_v36  ;;  %vm19840_vm0 = vnez %v19839_v19  ;;  %v19841_v44 = vrot.slane %v14377_v40, 2  ;;  %v19849_v40 = vld [vmem:[#allocation152_spill] sm:$0xff] }
 0x27f   : > { %v4117_v54 = vsel %vm19838_vm11, %v19837_v18, %v19836_v12  ;;  %v4245_v24 = vsel %vm19840_vm0, 0.0, %v4115_v26  ;;  %v19842_v21 = vmov %v19836_v12  ;;  %vm19846_vm3 = vcmask 261120   ;;  %v19847_v26 = vld [vmem:[#allocation149_spill] sm:$0xff]  ;;  %v19857_v18 = vld [vmem:[#allocation164_spill] sm:$0xff] }
 0x280   : > { %v4119_v29 = vsel %vm19830_vm1, %v19842_v21, %v19841_v44  ;;  %v4246_v36 = vsel %vm13499_vm2, 0.0, %v4117_v54  ;;  %v14931_v38 = vpack.c.bf16 %v4245_v24, %v4244_v5  ;;  %10327 = vmatmul.mubr.msk.bf16.gmra.mrb[80].mxu1 %vm19846_vm3, %v19845_v63  ;;  %vm19848_vm11 = vmmov %vm19846_vm3  ;;  %v19853_v54 = vld [vmem:[#allocation158_spill] sm:$0xff]  ;;  %v19855_v5 = vld [vmem:[#allocation161_spill] sm:$0xff] }
 0x281   : > { %v4247_v51 = vsel %vm13505_vm13, 0.0, %v4119_v29  ;;  %10330 = vmatprep.mubr.msk.bf16.mxu1 %vm19848_vm11, %v19847_v26  ;;  %vm19850_vm0 = vmmov %vm19846_vm3  ;;  %v19861_v24 = vld [vmem:[#allocation169_spill] sm:$0xff]  ;;  %v19863_v44 = vld [vmem:[#allocation171_spill] sm:$0xff] }
 0x282   : > { %v14937_v12 = vpack.c.bf16 %v4247_v51, %v4246_v36  ;;  %vm19852_vm1 = vmmov %vm19850_vm0  ;;  %v19859_v51 = vld [vmem:[#allocation166_spill] sm:$0xff]  ;;  %v19864_v21 = vld [vmem:[#allocation172_spill] sm:$0xff] }
 0x283   : > { %vm19854_vm2 = vmmov %vm19850_vm0  ;;  %v19867_v29 = vld [vmem:[#allocation173_spill] sm:$0xff]  ;;  %v19869_v36 = vld [vmem:[#allocation174_spill] sm:$0xff] }
 0x284   : > { %vm19856_vm12 = vmmov %vm19850_vm0  ;;  %v19871_v63 = vld [vmem:[#allocation175_spill] sm:$0xff]  ;;  %v11185_v26 = vld [vmem:[%s17746_s5 + $0x20] sm:$0xff]  }
 0x285   : > { %vm19858_vm13 = vmmov %vm19850_vm0  ;;  %10442 = vmatprep.subr.bf16.mxu0 %v11185_v26 }
 0x286   : > { %vm19860_vm3 = vmmov %vm19850_vm0  ;;  %10443 = vmatpush3.bf16.msra.mxu0 %v11185_v26 }
 0x287   : > { %vm19862_vm11 = vmmov %vm19850_vm0 }
 0x288   : > { %10331 = vmatmul.mubr.msk.bf16.gmra.mrb[84].mxu1 %vm19850_vm0, %v19849_v40 }
 0x289   : > { %10334 = vmatprep.mubr.msk.bf16.mxu1 %vm19852_vm1, %v19851_v8  ;;  %vm19865_vm1 = vmmov %vm19850_vm0 }
 0x290   : > { %10335 = vmatmul.mubr.msk.bf16.gmra.mrb[88].mxu1 %vm19854_vm2, %v19853_v54  ;;  %vm19866_vm2 = vmmov %vm19850_vm0  ;;  %v11190_v54 = vld [vmem:[%s17746_s5 + $0x8] sm:$0xff]  }
 0x291   : > { %10338 = vmatprep.mubr.msk.bf16.mxu1 %vm19856_vm12, %v19855_v5  ;;  %vm19868_vm12 = vmmov %vm19850_vm0 }
 0x298   : > { %10339 = vmatmul.mubr.msk.bf16.gmra.mrb[92].mxu1 %vm19858_vm13, %v19857_v18  ;;  %vm19870_vm13 = vmmov %vm19850_vm0 }
 0x299   : > { %10342 = vmatprep.mubr.msk.bf16.mxu1 %vm19860_vm3, %v19859_v51  ;;  %vm19872_vm3 = vmmov %vm19850_vm0 }
 0x2a0   : > { %10343 = vmatmul.mubr.msk.bf16.gmra.mrb[96].mxu1 %vm19862_vm11, %v19861_v24  ;;  %vm19873_vm11 = vmmov %vm19850_vm0 }
 0x2a1   : > { %10346 = vmatprep.mubr.msk.bf16.mxu1 %vm19850_vm0, %v19863_v44 }
 0x2a8   : > { %10347 = vmatmul.mubr.msk.bf16.gmra.mrb[100].mxu1 %vm19865_vm1, %v19864_v21  ;;  %vm19874_vm1 = vmmov %vm19850_vm0 }
 0x2a9   : > { %10350 = vmatprep.mubr.msk.bf16.mxu1 %vm19866_vm2, %v14175_v6  ;;  %vm19875_vm2 = vmmov %vm19850_vm0  ;;  %v11186_v6 = vld [vmem:[%s17746_s5 + $0x28] sm:$0xff]  }
 0x2aa   : > { %10444 = vmatprep.subr.bf16.mxu0 %v11186_v6 }
 0x2ab   : > { %10445 = vmatpush3.bf16.msra.mxu0 %v11186_v6 }
 0x2b0   : > { %10351 = vmatmul.mubr.msk.bf16.gmra.mrb[104].mxu1 %vm19868_vm12, %v19867_v29  ;;  %vm19876_vm12 = vmmov %vm19850_vm0 }
 0x2b1   : > { %10354 = vmatprep.mubr.msk.bf16.mxu1 %vm19870_vm13, %v19869_v36  ;;  %vm19877_vm13 = vmmov %vm19850_vm0 }
 0x2b8   : > { %10355 = vmatmul.mubr.msk.bf16.gmra.mrb[108].mxu1 %vm19872_vm3, %v19871_v63  ;;  %vm19878_vm3 = vmmov %vm19850_vm0 }
 0x2b9   : > { %10358 = vmatprep.mubr.msk.bf16.mxu1 %vm19873_vm11, %v14276_v33  ;;  %vm19879_vm11 = vmmov %vm19850_vm0  ;;  %v11187_v33 = vld [vmem:[%s17746_s5 + $0x30] sm:$0xff]  }
 0x2ba   : > { %10446 = vmatprep.subr.bf16.mxu0 %v11187_v33 }
 0x2bb   : > { %10447 = vmatpush3.bf16.msra.mxu0 %v11187_v33 }
 0x2c0   : > { %10359 = vmatmul.mubr.msk.bf16.gmra.mrb[112].mxu1 %vm19850_vm0, %v14302_v28  ;;  %v19880_v28 = vld [vmem:[#allocation134_spill] sm:$0xff] }
 0x2c1   : > { %10362 = vmatprep.mubr.msk.bf16.mxu1 %vm19874_vm1, %v14322_v41  ;;  %v11188_v41 = vld [vmem:[%s17746_s5 + $0x38] sm:$0xff]   ;;  %vm19881_vm1 = vmmov %vm19850_vm0 }
 0x2c2   : > { %10448 = vmatprep.subr.bf16.mxu0 %v11188_v41 }
 0x2c3   : > { %10449 = vmatpush3.bf16.msra.mxu0 %v11188_v41 }
 0x2c8   : > { %10363 = vmatmul.mubr.msk.bf16.gmra.mrb[116].mxu1 %vm19875_vm2, %v14346_v20  ;;  %vm19882_vm2 = vmmov %vm19850_vm0  ;;  %v19888_v20 = vld [vmem:[#allocation132_spill] sm:$0xff] }
 0x2c9   : > { %10366 = vmatprep.mubr.msk.bf16.mxu1 %vm19876_vm12, %v14365_v23  ;;  %vm19883_vm12 = vmmov %vm19850_vm0  ;;  %v19887_v23 = vld [vmem:[#allocation130_spill] sm:$0xff] }
 0x2d0   : > { %10367 = vmatmul.mubr.msk.bf16.gmra.mrb[120].mxu1 %vm19877_vm13, %v14386_v30  ;;  %vm19884_vm13 = vmmov %vm19850_vm0  ;;  %v19890_v30 = vld [vmem:[#allocation139_spill] sm:$0xff] }
 0x2d1   : > { %10370 = vmatprep.mubr.msk.bf16.mxu1 %vm19878_vm3, %v14402_v17  ;;  %vm19885_vm3 = vmmov %vm19850_vm0  ;;  %v19893_v17 = vld [vmem:[#allocation131_spill] sm:$0xff] }
 0x2d8   : > { %10371 = vmatmul.mubr.msk.bf16.gmra.mrb[124].mxu1 %vm19879_vm11, %v14426_v57  ;;  %vm19886_vm11 = vmmov %vm19850_vm0  ;;  %v19897_v57 = vld [vmem:[#allocation142_spill] sm:$0xff] }
 0x2d9   : > { %10378 = vmatprep.mubr.msk.bf16.mxu1 %vm19850_vm0, %v14438_v31  ;;  %v19895_v31 = vld [vmem:[#allocation141_spill] sm:$0xff] }
 0x2e0   : > { %10379 = vmatmul.mubr.msk.bf16.vlgmr.msra.gmra.mrb[64].mxu1 %vm19881_vm1, %v19880_v28  ;;  %vm19889_vm1 = vmmov %vm19850_vm0 }
 0x2e1   : > { %10382 = vmatprep.mubr.msk.bf16.mxu1 %vm19882_vm2, %v14466_v39  ;;  %vm19891_vm2 = vmmov %vm19850_vm0  ;;  %v11189_v39 = vld [vmem:[%s17746_s5] sm:$0xff]  }
 0x2e2   : > { %10514 = vmatprep.subr.bf16.mxu0 %v11189_v39 }
 0x2e8   : > { %10383 = vmatmul.mubr.msk.bf16.gmra.mrb[68].mxu1 %vm19883_vm12, %v14477_v22  ;;  %vm19892_vm12 = vmmov %vm19850_vm0  ;;  %v15065_v22 = vld [vmem:[%s17745_s4] ss:$0 sm:$0xff] }
 0x2e9   : > { %10386 = vmatprep.mubr.msk.bf16.mxu1 %vm19884_vm13, %v14494_v0  ;;  %vm19894_vm13 = vmmov %vm19850_vm0 }
 0x2f0   : > { %10387 = vmatmul.mubr.msk.bf16.gmra.mrb[72].mxu1 %vm19885_vm3, %v14505_v53  ;;  %vm19896_vm3 = vmmov %vm19850_vm0 }
 0x2f1   : > { %10390 = vmatprep.mubr.msk.bf16.mxu1 %vm19886_vm11, %v14540_v52  ;;  %vm19898_vm11 = vmmov %vm19850_vm0 }
 0x2f8   : > { %10391 = vmatmul.mubr.msk.bf16.gmra.mrb[76].mxu1 %vm19850_vm0, %v19887_v23 }
 0x2f9   : > { %10394 = vmatprep.mubr.msk.bf16.mxu1 %vm19889_vm1, %v19888_v20  ;;  %vm19899_vm1 = vmmov %vm19850_vm0 }
 0x300   : > { %10395 = vmatmul.mubr.msk.bf16.gmra.mrb[80].mxu1 %vm19891_vm2, %v19890_v30  ;;  %vm19900_vm2 = vmmov %vm19850_vm0 }
 0x301   : > { %10398 = vmatprep.mubr.msk.bf16.mxu1 %vm19892_vm12, %v14604_v56  ;;  %vm19901_vm12 = vmmov %vm19850_vm0 }
 0x308   : > { %10399 = vmatmul.mubr.msk.bf16.gmra.mrb[84].mxu1 %vm19894_vm13, %v19893_v17  ;;  %vm19902_vm13 = vmmov %vm19850_vm0  ;;  %v11191_v17 = vld [vmem:[%s17746_s5 + $0x10] sm:$0xff]  }
 0x309   : > { %10402 = vmatprep.mubr.msk.bf16.mxu1 %vm19896_vm3, %v19895_v31  ;;  %vm19903_vm3 = vmmov %vm19850_vm0  ;;  %v19936_v31 = vld [vmem:[#allocation9_spill] sm:$0xff] }
 0x310   : > { %10403 = vmatmul.mubr.msk.bf16.gmra.mrb[88].mxu1 %vm19898_vm11, %v19897_v57  ;;  %vm19904_vm11 = vmmov %vm19850_vm0 }
 0x311   : > { %10406 = vmatprep.mubr.msk.bf16.mxu1 %vm19850_vm0, %v14672_v60 }
 0x318   : > { %10407 = vmatmul.mubr.msk.bf16.gmra.mrb[92].mxu1 %vm19899_vm1, %v14683_v43  ;;  %vm19905_vm1 = vmmov %vm19850_vm0 }
 0x319   : > { %10410 = vmatprep.mubr.msk.bf16.mxu1 %vm19900_vm2, %v14697_v55  ;;  %vm19906_vm2 = vmmov %vm19850_vm0 }
 0x320   : > { %10411 = vmatmul.mubr.msk.bf16.gmra.mrb[96].mxu1 %vm19901_vm12, %v14708_v59  ;;  %vm19907_vm12 = vmmov %vm19850_vm0 }
 0x321   : > { %10414 = vmatprep.mubr.msk.bf16.mxu1 %vm19902_vm13, %v14738_v25  ;;  %vm19908_vm13 = vmmov %vm19850_vm0 }
 0x328   : > { %10415 = vmatmul.mubr.msk.bf16.gmra.mrb[100].mxu1 %vm19903_vm3, %v14751_v49  ;;  %vm19909_vm3 = vmmov %vm19850_vm0 }
 0x329   : > { %10418 = vmatprep.mubr.msk.bf16.mxu1 %vm19904_vm11, %v14765_v11  ;;  %vm19910_vm11 = vmmov %vm19850_vm0 }
 0x330   : > { %10419 = vmatmul.mubr.msk.bf16.gmra.mrb[104].mxu1 %vm19850_vm0, %v14776_v37 }
 0x331   : > { %10422 = vmatprep.mubr.msk.bf16.mxu1 %vm19905_vm1, %v14804_v42  ;;  %vm19911_vm1 = vmmov %vm19850_vm0 }
 0x338   : > { %10423 = vmatmul.mubr.msk.bf16.gmra.mrb[108].mxu1 %vm19906_vm2, %v14815_v15  ;;  %vm19912_vm2 = vmmov %vm19850_vm0 }
 0x339   : > { %10426 = vmatprep.mubr.msk.bf16.mxu1 %vm19907_vm12, %v14829_v16  ;;  %vm19913_vm12 = vmmov %vm19850_vm0 }
 0x340   : > { %10427 = vmatmul.mubr.msk.bf16.gmra.mrb[112].mxu1 %vm19908_vm13, %v14842_v34  ;;  %vm6435_vm13 = vcmask 523264  }
 0x341   : > { %10430 = vmatprep.mubr.msk.bf16.mxu1 %vm19909_vm3, %v14872_v45  ;;  %vm19914_vm3 = vcmask 1040384  }
 0x348   : > { %10431 = vmatmul.mubr.msk.bf16.gmra.mrb[116].mxu1 %vm19910_vm11, %v14883_v61  ;;  %vm19915_vm11 = vmmov %vm19914_vm3 }
 0x349   : > { %10434 = vmatprep.mubr.msk.bf16.mxu1 %vm19850_vm0, %v14897_v32  ;;  %vm19917_vm0 = vmmov %vm19914_vm3 }
 0x350   : > { %10435 = vmatmul.mubr.msk.bf16.gmra.mrb[120].mxu1 %vm19911_vm1, %v14908_v50  ;;  %vm19918_vm1 = vmmov %vm19917_vm0 }
 0x351   : > { %10438 = vmatprep.mubr.msk.bf16.mxu1 %vm19912_vm2, %v14931_v38 }
 0x358   : > { %10439 = vmatmul.mubr.msk.bf16.gmra.mrb[124].mxu1 %vm19913_vm12, %v14937_v12  ;;  %vm19931_vm12 = vmmov %vm19917_vm0 }
 0x3b3   : > { %v10380_v0 = vpop.f32.mrb[64].mxu1 }
 0x3b4   : > { %v5623_v53 = vadd.f32 %v10380_v0, %v15065_v22  ;;  %v5295_v52 = vpop.f32.mrb[65].mxu1 }
 0x3b5   : > { %v5621_v56 = vadd.f32 %v15065_v22, %v5295_v52  ;;  %v10381_v60 = vpop.f32.mrb[66].mxu1 }
 0x3b6   : > { %v5687_v43 = vmax.f32 %v5623_v53, 0.0  ;;  %v5624_v55 = vadd.f32 %v10381_v60, %v15065_v22  ;;  %v5298_v59 = vpop.f32.mrb[67].mxu1 }
 0x3b7   : > { %v5685_v25 = vmax.f32 %v5621_v56, 0.0  ;;  %v5622_v49 = vadd.f32 %v15065_v22, %v5298_v59 }
 0x3b8   : > { %v5688_v11 = vmax.f32 %v5624_v55, 0.0  ;;  %v5816_v15 = vrot.slane %v5687_v43, 7 }
 0x3b9   : > { %v5813_v37 = vrot.slane %v5685_v25, 7  ;;  %v5686_v42 = vmax.f32 %v5622_v49, 0.0 }
 0x3ba   : > { %v5818_v16 = vrot.slane %v5688_v11, 7  ;;  %v6371_v34 = vpack.c.bf16 %v5688_v11, %v5687_v43 }
 0x3bb   : > { %v6005_v61 = vsel %vm19914_vm3, 0.0, %v5813_v37  ;;  %v5814_v45 = vrot.slane %v5686_v42, 7  ;;  %v6370_v32 = vpack.c.bf16 %v5686_v42, %v5685_v25  ;;  %v10384_v50 = vpop.f32.mrb[68].mxu1  ;;  %vm19932_vm3 = vmmov %vm19917_vm0 }
 0x3bc   : > { %v6073_v38 = vrot.slane %v6005_v61, 2  ;;  %v15073_v12 = vsel %vm19915_vm11, %v5816_v15, %v5818_v16  ;;  %v5627_v40 = vadd.f32 %v10384_v50, %v15065_v22  ;;  %v5311_v8 = vpop.f32.mrb[69].mxu1  ;;  %v6007_v52 = vsel %vm11335_vm4, 0.0, %v6005_v61 }
 0x3bd   : > { %v6010_v18 = vsel %vm11364_vm7, 0.0, %v15073_v12  ;;  %v6078_v51 = vrot.slane %v15073_v12, 2  ;;  %v5815_v24 = vsel %vm19917_vm0, %v5813_v37, %v5814_v45  ;;  %v5817_v44 = vsel %vm19918_vm1, %v5814_v45, %v5816_v15  ;;  %v10385_v21 = vpop.f32.mrb[70].mxu1  ;;  %10450 = vmatprep.mubr.msk.bf16.mxu0 %vm6435_vm13, %v6370_v32  ;;  %v19927_v12 = vld [vmem:[#allocation69_spill] sm:$0xff] }
 0x3be   : > { %v6009_v36 = vsel %vm11354_vm6, 0.0, %v5817_v44  ;;  %v6074_v63 = vrot.slane %v5815_v24, 2  ;;  %v6076_v26 = vrot.slane %v5817_v44, 2  ;;  %v5691_v6 = vmax.f32 %v5627_v40, 0.0  ;;  %v5314_v33 = vpop.f32.mrb[71].mxu1  ;;  %10451 = vmatmul.mubr.msk.bf16.vlgmr.msra.gmra.mrb[64].mxu0 %vm6435_vm13, %v6371_v34  ;;  %v11192_v44 = vld [vmem:[%s17746_s5 + $0x18] sm:$0xff]  }
 0x3bf   : > { %v15089_v41 = vpack.c.bf16 %v6010_v18, %v6009_v36  ;;  %v5625_v28 = vadd.f32 %v15065_v22, %v5311_v8  ;;  %v5628_v23 = vadd.f32 %v10385_v21, %v15065_v22  ;;  %v5626_v20 = vadd.f32 %v15065_v22, %v5314_v33  ;;  %10515 = vmatpush3.bf16.msra.mxu0 %v11189_v39 }
 0x3c0   : > { %vm19920_vm7 = vcmask 1045504   ;;  %10516 = vmatprep.subr.bf16.mxu0 %v11190_v54  ;;  %v6008_v57 = vsel %vm11345_vm5, 0.0, %v5815_v24  ;;  %v5824_v59 = vrot.slane %v5691_v6, 7  ;;  %vm19928_vm4 = vnez %v19927_v12  ;;  %vm19929_vm5 = vmmov %vm19917_vm0 }
 0x3c1   : > { %v6079_v30 = vsel %vm19920_vm7, %v6076_v26, %v6078_v51  ;;  %vm19922_vm6 = vmmov %vm19920_vm7  ;;  %v5689_v56 = vmax.f32 %v5625_v28, 0.0  ;;  %v5692_v60 = vmax.f32 %v5628_v23, 0.0  ;;  %v5690_v43 = vmax.f32 %v5626_v20, 0.0  ;;  %v19934_v20 = vld [vmem:[#allocation7_spill] sm:$0xff] }
 0x3c2   : > { %v15101_v0 = vsel %vm19922_vm6, %v6073_v38, %v6074_v63  ;;  %v6268_v55 = vsel %vm11371_vm8, 0.0, %v6079_v30  ;;  %v15107_v25 = vpack.c.bf16 %v6008_v57, %v6007_v52  ;;  %vm19925_vm2 = vmmov %vm19922_vm6  ;;  %vm19935_vm11 = vnez %v19934_v20  ;;  %v19940_v52 = vld [vmem:[#allocation8_spill] sm:$0xff] }
 0x3c3   : > { %v6077_v49 = vsel %vm19925_vm2, %v6074_v63, %v6076_v26  ;;  %v5820_v11 = vrot.slane %v5689_v56, 7  ;;  %v5826_v37 = vrot.slane %v5692_v60, 7  ;;  %v6373_v42 = vpack.c.bf16 %v5692_v60, %v5691_v6  ;;  %v10388_v34 = vpop.f32.mrb[72].mxu1  ;;  %10517 = vmatpush3.bf16.msra.mxu0 %v11190_v54  ;;  %vm19930_vm8 = vmmov %vm19917_vm0 }
 0x3c4   : > { %v5822_v15 = vrot.slane %v5690_v43, 7  ;;  %v6372_v45 = vpack.c.bf16 %v5690_v43, %v5689_v56  ;;  %v5631_v61 = vadd.f32 %v10388_v34, %v15065_v22  ;;  %v5327_v32 = vpop.f32.mrb[73].mxu1  ;;  %10518 = vmatprep.subr.bf16.mxu0 %v11191_v17  ;;  %v6266_v38 = vsel %vm19514_vm14, 0.0, %v15101_v0  ;;  %vm19933_vm14 = vmmov %vm19925_vm2  ;;  %v19938_v0 = vld [vmem:[#allocation10_spill] sm:$0xff] }
 0x3c5   : > { %v6267_v40 = vsel %vm19928_vm4, 0.0, %v6077_v49  ;;  %v5821_v8 = vsel %vm19929_vm5, %v5818_v16, %v5820_v11  ;;  %v15118_v5 = vsel %vm19930_vm8, %v5824_v59, %v5826_v37  ;;  %v10389_v24 = vpop.f32.mrb[74].mxu1  ;;  %v5629_v6 = vadd.f32 %v15065_v22, %v5327_v32  ;;  %vm19947_vm2 = vmmov %vm19932_vm3 }
 0x3c6   : > { %v15121_v18 = vsel %vm19931_vm12, %v5820_v11, %v5822_v15  ;;  %v15124_v54 = vsel %vm19932_vm3, %v5822_v15, %v5824_v59  ;;  %v6080_v21 = vrot.slane %v5821_v8, 2  ;;  %v6086_v29 = vrot.slane %v15118_v5, 2  ;;  %10454 = vmatprep.mubr.msk.bf16.mxu0 %vm6435_vm13, %v6372_v45  ;;  %v5330_v63 = vpop.f32.mrb[75].mxu1  ;;  %v19943_v11 = vld [vmem:[#allocation11_spill] sm:$0xff]  ;;  %vm19948_vm4 = vmmov %vm19947_vm2 }
 0x3c7   : > { %v6082_v36 = vrot.slane %v15121_v18, 2  ;;  %v6084_v16 = vrot.slane %v15124_v54, 2  ;;  %v5695_v26 = vmax.f32 %v5631_v61, 0.0  ;;  %v5632_v33 = vadd.f32 %v10389_v24, %v15065_v22  ;;  %10455 = vmatmul.mubr.msk.bf16.gmra.mrb[68].mxu0 %vm6435_vm13, %v6373_v42  ;;  %vm19949_vm5 = vmmov %vm19933_vm14 }
 0x3c8   : > { %v5630_v28 = vadd.f32 %v15065_v22, %v5330_v63  ;;  %v6081_v23 = vsel %vm19933_vm14, %v6078_v51, %v6080_v21  ;;  %10519 = vmatpush3.bf16.msra.mxu0 %v11191_v17  ;;  %v6011_v30 = vsel %vm19935_vm11, 0.0, %v5821_v8  ;;  %vm19937_vm0 = vnez %v19936_v31  ;;  %v11193_v51 = vld [vmem:[%s17746_s5 + $0x40] sm:$0xff]   ;;  %vm19950_vm8 = vmmov %vm19947_vm2 }
 0x3c9   : > { %v6012_v57 = vsel %vm19937_vm0, 0.0, %v15121_v18  ;;  %vm19939_vm1 = vnez %v19938_v0  ;;  %vm19941_vm7 = vnez %v19940_v52  ;;  %v5832_v60 = vrot.slane %v5695_v26, 7  ;;  %10520 = vmatprep.subr.bf16.mxu0 %v11192_v44  ;;  %vm19951_vm12 = vmmov %vm19947_vm2 }
 0x3ca   : > { %v6013_v53 = vsel %vm19939_vm1, 0.0, %v15124_v54  ;;  %v6269_v56 = vsel %vm19941_vm7, 0.0, %v6081_v23  ;;  %v5693_v43 = vmax.f32 %v5629_v6, 0.0  ;;  %v5696_v39 = vmax.f32 %v5632_v33, 0.0  ;;  %vm19961_vm1 = vmmov %vm19949_vm5 }
 0x3cb   : > { %v15151_v17 = vpack.c.bf16 %v6269_v56, %v6268_v55  ;;  %v5694_v59 = vmax.f32 %v5630_v28, 0.0  ;;  %v15153_v49 = vpack.c.bf16 %v6012_v57, %v6011_v30  ;;  %vm19944_vm6 = vnez %v19943_v11  ;;  %v10392_v61 = vpop.f32.mrb[76].mxu1  ;;  %v19954_v56 = vld [vmem:[#allocation13_spill] sm:$0xff]  ;;  %vm19962_vm7 = vmmov %vm19947_vm2 }
 0x3cc   : > { %v6014_v42 = vsel %vm19944_vm6, 0.0, %v15118_v5  ;;  %v5828_v15 = vrot.slane %v5693_v43, 7  ;;  %v5834_v34 = vrot.slane %v5696_v39, 7  ;;  %v6375_v45 = vpack.c.bf16 %v5696_v39, %v5695_v26  ;;  %v5343_v24 = vpop.f32.mrb[77].mxu1  ;;  %10521 = vmatpush3.bf16.msra.mxu0 %v11192_v44 }
 0x3cd   : > { %19942 = vst [vmem:[#allocation133_spill] sm:$0xff] %v15151_v17  ;;  %v15158_v32 = vpack.c.bf16 %v6014_v42, %v6013_v53  ;;  %v5830_v50 = vrot.slane %v5694_v59, 7  ;;  %v6374_v12 = vpack.c.bf16 %v5694_v59, %v5693_v43  ;;  %v5635_v8 = vadd.f32 %v10392_v61, %v15065_v22  ;;  %v10393_v26 = vpop.f32.mrb[78].mxu1  ;;  %10586 = vmatprep.subr.bf16.mxu0 %v11193_v51  ;;  %v19952_v53 = vld [vmem:[#allocation12_spill] sm:$0xff]  ;;  %v19957_v59 = vld [vmem:[#allocation14_spill] sm:$0xff] }
 0x3ce   : > { %v15161_v55 = vpack.c.bf16 %v6267_v40, %v6266_v38  ;;  %v15164_v63 = vsel %vm19947_vm2, %v5826_v37, %v5828_v15  ;;  %v15167_v6 = vsel %vm19948_vm4, %v5832_v60, %v5834_v34  ;;  %v5633_v33 = vadd.f32 %v15065_v22, %v5343_v24  ;;  %v5346_v44 = vpop.f32.mrb[79].mxu1 }
 0x3cf   : > { %19945 = vst [vmem:[#allocation144_spill] sm:$0xff] %v15158_v32  ;;  %v15173_v28 = vsel %vm19949_vm5, %v6080_v21, %v6082_v36  ;;  %v18368_v23 = vrot.slane %v15164_v63, 2  ;;  %v15178_v40 = vsel %vm19950_vm8, %v5828_v15, %v5830_v50  ;;  %v15181_v37 = vsel %vm19951_vm12, %v5830_v50, %v5832_v60  ;;  %10458 = vmatprep.mubr.msk.bf16.mxu0 %vm6435_vm13, %v6374_v12  ;;  %vm19970_vm5 = vmmov %vm19962_vm7 }
 0x3d0   : > { %19946 = vst [vmem:[#allocation145_spill] sm:$0xff] %v15161_v55  ;;  %v5699_v31 = vmax.f32 %v5635_v8, 0.0  ;;  %v5697_v21 = vmax.f32 %v5633_v33, 0.0  ;;  %10459 = vmatmul.mubr.msk.bf16.gmra.mrb[72].mxu0 %vm6435_vm13, %v6375_v45  ;;  %v5636_v57 = vadd.f32 %v10393_v26, %v15065_v22  ;;  %v5634_v0 = vadd.f32 %v15065_v22, %v5346_v44  ;;  %v19959_v45 = vld [vmem:[#allocation15_spill] sm:$0xff]  ;;  %v19964_v33 = vld [vmem:[#allocation78_spill] sm:$0xff]  ;;  %vm19971_vm8 = vmmov %vm19970_vm5 }
 0x3d1   : > { %vm19953_vm3 = vnez %v19952_v53  ;;  %vm19955_vm14 = vnez %v19954_v56  ;;  %vm19958_vm11 = vnez %v19957_v59  ;;  %vm19960_vm0 = vnez %v19959_v45  ;;  %v19966_v44 = vld [vmem:[#allocation79_spill] sm:$0xff]  ;;  %vm19972_vm12 = vmmov %vm19970_vm5 }
 0x3d2   : > { %v6015_v52 = vsel %vm19953_vm3, 0.0, %v15164_v63  ;;  %v6016_v60 = vsel %vm19955_vm14, 0.0, %v15178_v40  ;;  %v5840_v43 = vrot.slane %v5699_v31, 7  ;;  %v5836_v39 = vrot.slane %v5697_v21, 7 }
 0x3d3   : > { %v15195_v51 = vpack.c.bf16 %v6016_v60, %v6015_v52  ;;  %v6017_v11 = vsel %vm19958_vm11, 0.0, %v15181_v37  ;;  %v5700_v42 = vmax.f32 %v5636_v57, 0.0  ;;  %v5698_v15 = vmax.f32 %v5634_v0, 0.0  ;;  %v10396_v8 = vpop.f32.mrb[80].mxu1 }
 0x3d4   : > { %v6018_v61 = vsel %vm19960_vm0, 0.0, %v15167_v6  ;;  %v6085_v50 = vsel %vm19961_vm1, %v6082_v36, %v6084_v16  ;;  %v15209_v12 = vsel %vm19962_vm7, %v5834_v34, %v5836_v39  ;;  %vm19965_vm6 = vnez %v19964_v33  ;;  %v5359_v56 = vpop.f32.mrb[81].mxu1  ;;  %vm19982_vm0 = vmmov %vm19961_vm1 }
 0x3d5   : > { %19956 = vst [vmem:[#allocation147_spill] sm:$0xff] %v15195_v51  ;;  %v15211_v24 = vpack.c.bf16 %v6018_v61, %v6017_v11  ;;  %v6270_v26 = vsel %vm19965_vm6, 0.0, %v15173_v28  ;;  %vm19967_vm2 = vnez %v19966_v44  ;;  %v5842_v53 = vrot.slane %v5700_v42, 7  ;;  %v10397_v59 = vpop.f32.mrb[82].mxu1  ;;  %v19968_v11 = vld [vmem:[#allocation21_spill] sm:$0xff]  ;;  %vm19983_vm1 = vmmov %vm19982_vm0  ;;  %v20109_v51 = vld [vmem:[#allocation18_spill] sm:$0xff] }
 0x3d6   : > { %v6271_v57 = vsel %vm19967_vm2, 0.0, %v6085_v50  ;;  %v6377_v52 = vpack.c.bf16 %v5700_v42, %v5699_v31  ;;  %v5838_v18 = vrot.slane %v5698_v15, 7  ;;  %v6376_v36 = vpack.c.bf16 %v5698_v15, %v5697_v21  ;;  %v5362_v42 = vpop.f32.mrb[83].mxu1  ;;  %v19976_v15 = vld [vmem:[#allocation23_spill] sm:$0xff]  ;;  %vm19984_vm7 = vmmov %vm19970_vm5 }
 0x3d7   : > { %19963 = vst [vmem:[#allocation148_spill] sm:$0xff] %v15211_v24  ;;  %v5639_v34 = vadd.f32 %v10396_v8, %v15065_v22  ;;  %v5637_v60 = vadd.f32 %v15065_v22, %v5359_v56  ;;  %vm19969_vm4 = vnez %v19968_v11  ;;  %v15225_v28 = vsel %vm19970_vm5, %v5840_v43, %v5842_v53  ;;  %vm19985_vm6 = vmmov %vm19970_vm5 }
 0x3d8   : > { %v6019_v45 = vsel %vm19969_vm4, 0.0, %v15209_v12  ;;  %v15228_v61 = vsel %vm19971_vm8, %v5836_v39, %v5838_v18  ;;  %v15231_v31 = vsel %vm19972_vm12, %v5838_v18, %v5840_v43  ;;  %v5640_v21 = vadd.f32 %v10397_v59, %v15065_v22  ;;  %10462 = vmatprep.mubr.msk.bf16.mxu0 %vm6435_vm13, %v6376_v36  ;;  %v19973_v43 = vld [vmem:[#allocation22_spill] sm:$0xff]  ;;  %vm19986_vm2 = vmmov %vm19970_vm5 }
 0x3d9   : > { %v5703_v33 = vmax.f32 %v5639_v34, 0.0  ;;  %v5701_v44 = vmax.f32 %v5637_v60, 0.0  ;;  %v5638_v39 = vadd.f32 %v15065_v22, %v5362_v42  ;;  %10463 = vmatmul.mubr.msk.bf16.gmra.mrb[76].mxu0 %vm6435_vm13, %v6377_v52  ;;  %vm19974_vm3 = vnez %v19973_v43  ;;  %v19978_v34 = vld [vmem:[#allocation24_spill] sm:$0xff]  ;;  %vm19987_vm4 = vmmov %vm19986_vm2 }
 0x3da   : > { %v5704_v56 = vmax.f32 %v5640_v21, 0.0  ;;  %v6020_v18 = vsel %vm19974_vm3, 0.0, %v15228_v61  ;;  %vm19977_vm14 = vnez %v19976_v15  ;;  %vm19979_vm11 = vnez %v19978_v34 }
 0x3db   : > { %v5848_v59 = vrot.slane %v5703_v33, 7  ;;  %v15243_v11 = vpack.c.bf16 %v6020_v18, %v6019_v45  ;;  %v6021_v8 = vsel %vm19977_vm14, 0.0, %v15231_v31  ;;  %v6022_v36 = vsel %vm19979_vm11, 0.0, %v15225_v28  ;;  %v10400_v52 = vpop.f32.mrb[84].mxu1  ;;  %vm19998_vm14 = vmmov %vm19986_vm2 }
 0x3dc   : > { %v5844_v60 = vrot.slane %v5701_v44, 7  ;;  %v5850_v21 = vrot.slane %v5704_v56, 7  ;;  %v6379_v42 = vpack.c.bf16 %v5704_v56, %v5703_v33  ;;  %v5702_v50 = vmax.f32 %v5638_v39, 0.0  ;;  %v5375_v56 = vpop.f32.mrb[85].mxu1 }
 0x3dd   : > { %19975 = vst [vmem:[#allocation150_spill] sm:$0xff] %v15243_v11  ;;  %v15251_v0 = vpack.c.bf16 %v6022_v36, %v6021_v8  ;;  %v15253_v43 = vpack.c.bf16 %v6271_v57, %v6270_v26  ;;  %v15260_v45 = vsel %vm19982_vm0, %v6084_v16, %v6086_v29  ;;  %v15267_v15 = vsel %vm19983_vm1, %v6086_v29, %v18368_v23  ;;  %v10401_v18 = vpop.f32.mrb[86].mxu1 }
 0x3de   : > { %v15270_v33 = vsel %vm19984_vm7, %v5842_v53, %v5844_v60  ;;  %v15273_v26 = vsel %vm19985_vm6, %v5848_v59, %v5850_v21  ;;  %v5846_v57 = vrot.slane %v5702_v50, 7  ;;  %v6378_v8 = vpack.c.bf16 %v5702_v50, %v5701_v44  ;;  %v5378_v50 = vpop.f32.mrb[87].mxu1  ;;  %v19988_v44 = vld [vmem:[#allocation30_spill] sm:$0xff]  ;;  %vm20005_vm7 = vmmov %vm19986_vm2 }
 0x3df   : > { %19980 = vst [vmem:[#allocation151_spill] sm:$0xff] %v15251_v0  ;;  %19981 = vst [vmem:[#allocation153_spill] sm:$0xff] %v15253_v43  ;;  %v5643_v39 = vadd.f32 %v10400_v52, %v15065_v22  ;;  %v5641_v5 = vadd.f32 %v15065_v22, %v5375_v56  ;;  %v5644_v34 = vadd.f32 %v10401_v18, %v15065_v22  ;;  %vm19989_vm5 = vnez %v19988_v44 }
 0x3e0   : > { %v15280_v29 = vsel %vm19986_vm2, %v5844_v60, %v5846_v57  ;;  %v15283_v53 = vsel %vm19987_vm4, %v5846_v57, %v5848_v59  ;;  %10466 = vmatprep.mubr.msk.bf16.mxu0 %vm6435_vm13, %v6378_v8  ;;  %v6023_v36 = vsel %vm19989_vm5, 0.0, %v15270_v33  ;;  %v5642_v38 = vadd.f32 %v15065_v22, %v5378_v50  ;;  %v19990_v59 = vld [vmem:[#allocation31_spill] sm:$0xff]  ;;  %v19992_v8 = vld [vmem:[#allocation32_spill] sm:$0xff]  ;;  %vm20008_vm4 = vmmov %vm19986_vm2 }
 0x3e1   : > { %v5707_v16 = vmax.f32 %v5643_v39, 0.0  ;;  %v5705_v54 = vmax.f32 %v5641_v5, 0.0  ;;  %v5708_v60 = vmax.f32 %v5644_v34, 0.0  ;;  %10467 = vmatmul.mubr.msk.bf16.gmra.mrb[80].mxu0 %vm6435_vm13, %v6379_v42  ;;  %vm19991_vm8 = vnez %v19990_v59  ;;  %v19995_v39 = vld [vmem:[#allocation33_spill] sm:$0xff] }
 0x3e2   : > { %v6024_v57 = vsel %vm19991_vm8, 0.0, %v15280_v29  ;;  %vm19993_vm12 = vnez %v19992_v8  ;;  %vm19996_vm3 = vnez %v19995_v39  ;;  %v5706_v56 = vmax.f32 %v5642_v38, 0.0  ;;  %v19999_v8 = vld [vmem:[#allocation80_spill] sm:$0xff] }
 0x3e3   : > { %v6025_v18 = vsel %vm19993_vm12, 0.0, %v15283_v53  ;;  %v5856_v44 = vrot.slane %v5707_v16, 7  ;;  %v5852_v30 = vrot.slane %v5705_v54, 7  ;;  %v15300_v52 = vpack.c.bf16 %v6024_v57, %v6023_v36  ;;  %v10404_v23 = vpop.f32.mrb[88].mxu1  ;;  %v20001_v36 = vld [vmem:[#allocation81_spill] sm:$0xff] }
 0x3e4   : > { %v6026_v5 = vsel %vm19996_vm3, 0.0, %v15273_v26  ;;  %v5858_v34 = vrot.slane %v5708_v60, 7  ;;  %v6381_v50 = vpack.c.bf16 %v5708_v60, %v5707_v16  ;;  %vm20000_vm11 = vnez %v19999_v8  ;;  %vm20018_vm3 = vmmov %vm19986_vm2 }
 0x3e5   : > { %19994 = vst [vmem:[#allocation154_spill] sm:$0xff] %v15300_v52  ;;  %v15305_v42 = vpack.c.bf16 %v6026_v5, %v6025_v18  ;;  %v15308_v59 = vsel %vm19998_vm14, %v5850_v21, %v5852_v30  ;;  %v6272_v20 = vsel %vm20000_vm11, 0.0, %v15260_v45  ;;  %vm20002_vm0 = vnez %v20001_v36  ;;  %v5391_v5 = vpop.f32.mrb[89].mxu1  ;;  %vm20021_vm14 = vmmov %vm19983_vm1 }
 0x3e6   : > { %v6273_v57 = vsel %vm20002_vm0, 0.0, %v15267_v15  ;;  %v20003_v39 = vrot.slane %v15178_v40, 2  ;;  %v20004_v43 = vrot.slane %v15164_v63, 2  ;;  %v15325_v21 = vsel %vm20005_vm7, %v5856_v44, %v5858_v34  ;;  %v10405_v36 = vpop.f32.mrb[90].mxu1  ;;  %v20006_v63 = vld [vmem:[#allocation39_spill] sm:$0xff]  ;;  %vm20026_vm0 = vmmov %vm19983_vm1 }
 0x3e7   : > { %19997 = vst [vmem:[#allocation156_spill] sm:$0xff] %v15305_v42  ;;  %v5854_v60 = vrot.slane %v5706_v56, 7  ;;  %v6380_v18 = vpack.c.bf16 %v5706_v56, %v5705_v54  ;;  %v5647_v8 = vadd.f32 %v10404_v23, %v15065_v22  ;;  %v5645_v15 = vadd.f32 %v15065_v22, %v5391_v5  ;;  %v5394_v56 = vpop.f32.mrb[91].mxu1  ;;  %v20009_v23 = vld [vmem:[#allocation42_spill] sm:$0xff] }
 0x3e8   : > { %v15321_v38 = vsel %vm19983_vm1, %v20004_v43, %v20003_v39  ;;  %vm20007_vm6 = vnez %v20006_v63  ;;  %v5648_v54 = vadd.f32 %v10405_v36, %v15065_v22  ;;  %vm20010_vm5 = vnez %v20009_v23  ;;  %vm20027_vm1 = vmmov %vm19986_vm2 }
 0x3e9   : > { %v6027_v43 = vsel %vm20007_vm6, 0.0, %v15308_v59  ;;  %v15334_v39 = vsel %vm19986_vm2, %v5852_v30, %v5854_v60  ;;  %v15337_v16 = vsel %vm20008_vm4, %v5854_v60, %v5856_v44  ;;  %10470 = vmatprep.mubr.msk.bf16.mxu0 %vm6435_vm13, %v6380_v18  ;;  %v6030_v5 = vsel %vm20010_vm5, 0.0, %v15325_v21  ;;  %v20011_v44 = vld [vmem:[#allocation40_spill] sm:$0xff]  ;;  %v20013_v18 = vld [vmem:[#allocation41_spill] sm:$0xff]  ;;  %vm20030_vm6 = vmmov %vm20027_vm1 }
 0x3ea   : > { %v5711_v17 = vmax.f32 %v5647_v8, 0.0  ;;  %v5709_v55 = vmax.f32 %v5645_v15, 0.0  ;;  %v5712_v30 = vmax.f32 %v5648_v54, 0.0  ;;  %v5646_v42 = vadd.f32 %v15065_v22, %v5394_v56  ;;  %10471 = vmatmul.mubr.msk.bf16.gmra.mrb[84].mxu0 %vm6435_vm13, %v6381_v50  ;;  %vm20031_vm2 = vmmov %vm20027_vm1 }
 0x3eb   : > { %vm20012_vm8 = vnez %v20011_v44  ;;  %vm20014_vm12 = vnez %v20013_v18  ;;  %v15358_v56 = vpack.c.bf16 %v6273_v57, %v6272_v20  ;;  %v10408_v44 = vpop.f32.mrb[92].mxu1  ;;  %v20019_v0 = vrot.slane %v15181_v37, 2  ;;  %v20028_v37 = vld [vmem:[#allocation47_spill] sm:$0xff] }
 0x3ec   : > { %v6028_v60 = vsel %vm20012_vm8, 0.0, %v15334_v39  ;;  %v6029_v36 = vsel %vm20014_vm12, 0.0, %v15337_v16  ;;  %v5864_v23 = vrot.slane %v5711_v17, 7  ;;  %v5860_v52 = vrot.slane %v5709_v55, 7 }
 0x3ed   : > { %v15354_v45 = vpack.c.bf16 %v6028_v60, %v6027_v43  ;;  %v15356_v63 = vpack.c.bf16 %v6030_v5, %v6029_v36  ;;  %v5866_v8 = vrot.slane %v5712_v30, 7  ;;  %v6383_v15 = vpack.c.bf16 %v5712_v30, %v5711_v17  ;;  %20017 = vst [vmem:[#allocation135_spill] sm:$0xff] %v15358_v56  ;;  %v20022_v43 = vld [vmem:[#allocation84_spill] sm:$0xff]  ;;  %v5407_v30 = vpop.f32.mrb[93].mxu1 }
 0x3ee   : > { %v5710_v54 = vmax.f32 %v5646_v42, 0.0  ;;  %v15361_v50 = vsel %vm20018_vm3, %v5858_v34, %v5860_v52  ;;  %v20020_v18 = vrot.slane %v15178_v40, 2  ;;  %vm20023_vm11 = vnez %v20022_v43  ;;  %vm20042_vm3 = vmmov %vm20027_vm1 }
 0x3ef   : > { %20015 = vst [vmem:[#allocation157_spill] sm:$0xff] %v15354_v45  ;;  %20016 = vst [vmem:[#allocation159_spill] sm:$0xff] %v15356_v63  ;;  %v6274_v5 = vsel %vm20023_vm11, 0.0, %v15321_v38  ;;  %v20024_v60 = vrot.slane %v15167_v6, 2  ;;  %v20025_v17 = vmov %v20019_v0  ;;  %v15380_v42 = vsel %vm20027_vm1, %v5864_v23, %v5866_v8 }
 0x3f0   : > { %v6093_v46 = vsel %vm20021_vm14, %v20020_v18, %v20019_v0  ;;  %v5862_v57 = vrot.slane %v5710_v54, 7  ;;  %v6382_v40 = vpack.c.bf16 %v5710_v54, %v5709_v55  ;;  %v5651_v36 = vadd.f32 %v10408_v44, %v15065_v22  ;;  %v10409_v18 = vpop.f32.mrb[94].mxu1  ;;  %v20032_v44 = vld [vmem:[#allocation50_spill] sm:$0xff]  ;;  %vm20046_vm14 = vmmov %vm20026_vm0 }
 0x3f1   : > { %v15376_v20 = vsel %vm20026_vm0, %v20025_v17, %v20024_v60  ;;  %v5649_v38 = vadd.f32 %v15065_v22, %v5407_v30  ;;  %vm20029_vm7 = vnez %v20028_v37  ;;  %v5652_v55 = vadd.f32 %v10409_v18, %v15065_v22  ;;  %v5410_v54 = vpop.f32.mrb[95].mxu1  ;;  %vm20049_vm0 = vmmov %vm20027_vm1 }
 0x3f2   : > { %v6031_v43 = vsel %vm20029_vm7, 0.0, %v15361_v50  ;;  %v15389_v60 = vsel %vm20030_vm6, %v5860_v52, %v5862_v57  ;;  %v15392_v17 = vsel %vm20031_vm2, %v5862_v57, %v5864_v23  ;;  %10474 = vmatprep.mubr.msk.bf16.mxu0 %vm6435_vm13, %v6382_v40  ;;  %vm20033_vm4 = vnez %v20032_v44  ;;  %v20034_v23 = vld [vmem:[#allocation48_spill] sm:$0xff]  ;;  %v20036_v40 = vld [vmem:[#allocation49_spill] sm:$0xff]  ;;  %vm20052_vm7 = vmmov %vm20049_vm0 }
 0x3f3   : > { %v6034_v30 = vsel %vm20033_vm4, 0.0, %v15380_v42  ;;  %v5715_v34 = vmax.f32 %v5651_v36, 0.0  ;;  %v5713_v56 = vmax.f32 %v5649_v38, 0.0  ;;  %v5716_v52 = vmax.f32 %v5652_v55, 0.0  ;;  %10475 = vmatmul.mubr.msk.bf16.gmra.mrb[88].mxu0 %vm6435_vm13, %v6383_v15  ;;  %vm20053_vm6 = vmmov %vm20049_vm0 }
 0x3f4   : > { %v5650_v63 = vadd.f32 %v15065_v22, %v5410_v54  ;;  %vm20035_vm5 = vnez %v20034_v23  ;;  %vm20037_vm8 = vnez %v20036_v40  ;;  %v20040_v54 = vld [vmem:[#allocation85_spill] sm:$0xff]  ;;  %v10412_v23 = vpop.f32.mrb[96].mxu1  ;;  %v20044_v40 = vrot.slane %v15209_v12, 2 }
 0x3f5   : > { %v6032_v57 = vsel %vm20035_vm5, 0.0, %v15389_v60  ;;  %v6033_v18 = vsel %vm20037_vm8, 0.0, %v15392_v17  ;;  %v5872_v44 = vrot.slane %v5715_v34, 7  ;;  %v5868_v45 = vrot.slane %v5713_v56, 7 }
 0x3f6   : > { %v15409_v0 = vpack.c.bf16 %v6032_v57, %v6031_v43  ;;  %v15411_v37 = vpack.c.bf16 %v6034_v30, %v6033_v18  ;;  %v5874_v36 = vrot.slane %v5716_v52, 7  ;;  %v6385_v38 = vpack.c.bf16 %v5716_v52, %v5715_v34  ;;  %v20047_v30 = vld [vmem:[#allocation86_spill] sm:$0xff]  ;;  %v5423_v57 = vpop.f32.mrb[97].mxu1 }
 0x3f7   : > { %v5714_v55 = vmax.f32 %v5650_v63, 0.0  ;;  %vm20041_vm12 = vnez %v20040_v54  ;;  %v15416_v11 = vsel %vm20042_vm3, %v5866_v8, %v5868_v45  ;;  %v20045_v24 = vrot.slane %v15167_v6, 2  ;;  %v10413_v54 = vpop.f32.mrb[98].mxu1  ;;  %vm20068_vm3 = vmmov %vm20046_vm14 }
 0x3f8   : > { %20038 = vst [vmem:[#allocation160_spill] sm:$0xff] %v15409_v0  ;;  %20039 = vst [vmem:[#allocation136_spill] sm:$0xff] %v15411_v37  ;;  %v6275_v15 = vsel %vm20041_vm12, 0.0, %v6093_v46  ;;  %vm20048_vm11 = vnez %v20047_v30  ;;  %v15430_v46 = vsel %vm20049_vm0, %v5872_v44, %v5874_v36  ;;  %v5655_v18 = vadd.f32 %v10412_v23, %v15065_v22  ;;  %v20054_v23 = vld [vmem:[#allocation58_spill] sm:$0xff] }
 0x3f9   : > { %v15418_v48 = vpack.c.bf16 %v6275_v15, %v6274_v5  ;;  %v6097_v43 = vsel %vm20046_vm14, %v20045_v24, %v20044_v40  ;;  %v6276_v34 = vsel %vm20048_vm11, 0.0, %v15376_v20  ;;  %v5870_v8 = vrot.slane %v5714_v55, 7  ;;  %v20050_v24 = vld [vmem:[#allocation55_spill] sm:$0xff]  ;;  %vm20064_vm12 = vmmov %vm20049_vm0 }
 0x3fa   : > { %v6384_v52 = vpack.c.bf16 %v5714_v55, %v5713_v56  ;;  %v5653_v6 = vadd.f32 %v15065_v22, %v5423_v57  ;;  %vm20051_vm1 = vnez %v20050_v24  ;;  %v5656_v56 = vadd.f32 %v10413_v54, %v15065_v22  ;;  %v5426_v55 = vpop.f32.mrb[99].mxu1  ;;  %vm20071_vm14 = vmmov %vm20068_vm3 }
 0x3fb   : > { %20043 = vst [vmem:[#allocation162_spill] sm:$0xff] %v15418_v48  ;;  %v6035_v15 = vsel %vm20051_vm1, 0.0, %v15416_v11  ;;  %v15439_v20 = vsel %vm20052_vm7, %v5868_v45, %v5870_v8  ;;  %v15442_v40 = vsel %vm20053_vm6, %v5870_v8, %v5872_v44  ;;  %vm20055_vm2 = vnez %v20054_v23  ;;  %v20056_v44 = vld [vmem:[#allocation56_spill] sm:$0xff]  ;;  %vm20072_vm11 = vmmov %vm20049_vm0 }
 0x3fc   : > { %10478 = vmatprep.mubr.msk.bf16.mxu0 %vm6435_vm13, %v6384_v52  ;;  %v6038_v30 = vsel %vm20055_vm2, 0.0, %v15430_v46  ;;  %v5719_v5 = vmax.f32 %v5655_v18, 0.0  ;;  %v5717_v63 = vmax.f32 %v5653_v6, 0.0  ;;  %v5720_v45 = vmax.f32 %v5656_v56, 0.0  ;;  %v20058_v52 = vld [vmem:[#allocation57_spill] sm:$0xff]  ;;  %vm20075_vm1 = vmmov %vm20053_vm6 }
 0x3fd   : > { %v5654_v48 = vadd.f32 %v15065_v22, %v5426_v55  ;;  %10479 = vmatmul.mubr.msk.bf16.gmra.mrb[92].mxu0 %vm6435_vm13, %v6385_v38  ;;  %vm20057_vm4 = vnez %v20056_v44  ;;  %vm20059_vm5 = vnez %v20058_v52  ;;  %v20062_v55 = vld [vmem:[#allocation87_spill] sm:$0xff]  ;;  %v10416_v44 = vpop.f32.mrb[100].mxu1  ;;  %v20066_v52 = vrot.slane %v15228_v61, 2  ;;  %v20073_v61 = vld [vmem:[#allocation64_spill] sm:$0xff]  ;;  %vm20076_vm7 = vmmov %vm20075_vm1 }
 0x3fe   : > { %v6036_v8 = vsel %vm20057_vm4, 0.0, %v15439_v20  ;;  %v6037_v54 = vsel %vm20059_vm5, 0.0, %v15442_v40  ;;  %v5880_v23 = vrot.slane %v5719_v5, 7  ;;  %v5876_v37 = vrot.slane %v5717_v63, 7 }
 0x3ff   : > { %v15459_v57 = vpack.c.bf16 %v6036_v8, %v6035_v15  ;;  %v15461_v24 = vpack.c.bf16 %v6038_v30, %v6037_v54  ;;  %v5882_v18 = vrot.slane %v5720_v45, 7  ;;  %v6387_v6 = vpack.c.bf16 %v5720_v45, %v5719_v5  ;;  %v5439_v8 = vpop.f32.mrb[101].mxu1 }
 0x400   : > { %v5718_v56 = vmax.f32 %v5654_v48, 0.0  ;;  %vm20063_vm8 = vnez %v20062_v55  ;;  %v15466_v0 = vsel %vm20064_vm12, %v5874_v36, %v5876_v37  ;;  %v20067_v13 = vrot.slane %v15209_v12, 2  ;;  %v10417_v55 = vpop.f32.mrb[102].mxu1 }
 0x401   : > { %20060 = vst [vmem:[#allocation163_spill] sm:$0xff] %v15459_v57  ;;  %20061 = vst [vmem:[#allocation165_spill] sm:$0xff] %v15461_v24  ;;  %v6277_v38 = vsel %vm20063_vm8, 0.0, %v6097_v43  ;;  %v20069_v30 = vrot.slane %v15231_v31, 2  ;;  %v20070_v48 = vmov %v20066_v52  ;;  %v15486_v43 = vsel %vm20072_vm11, %v5880_v23, %v5882_v18 }
 0x402   : > { %v15468_v19 = vpack.c.bf16 %v6277_v38, %v6276_v34  ;;  %v15475_v15 = vsel %vm20068_vm3, %v20067_v13, %v20066_v52  ;;  %v5878_v34 = vrot.slane %v5718_v56, 7  ;;  %v6386_v45 = vpack.c.bf16 %v5718_v56, %v5717_v63  ;;  %v5442_v56 = vpop.f32.mrb[103].mxu1  ;;  %vm20087_vm8 = vmmov %vm20075_vm1 }
 0x403   : > { %v15482_v5 = vsel %vm20071_vm14, %v20070_v48, %v20069_v30  ;;  %v5659_v13 = vadd.f32 %v10416_v44, %v15065_v22  ;;  %v5657_v54 = vadd.f32 %v15065_v22, %v5439_v8  ;;  %vm20074_vm0 = vnez %v20073_v61  ;;  %v20077_v44 = vld [vmem:[#allocation68_spill] sm:$0xff]  ;;  %v10420_v57 = vpop.f32.mrb[104].mxu1  ;;  %vm20094_vm14 = vmmov %vm20068_vm3 }
 0x404   : > { %20065 = vst [vmem:[#allocation54_spill] sm:$0xff] %v15468_v19  ;;  %v6039_v38 = vsel %vm20074_vm0, 0.0, %v15466_v0  ;;  %v15495_v52 = vsel %vm20075_vm1, %v5876_v37, %v5878_v34  ;;  %v15498_v30 = vsel %vm20076_vm7, %v5878_v34, %v5880_v23  ;;  %v5660_v63 = vadd.f32 %v10417_v55, %v15065_v22  ;;  %10482 = vmatprep.mubr.msk.bf16.mxu0 %vm6435_vm13, %v6386_v45  ;;  %v20079_v23 = vld [vmem:[#allocation65_spill] sm:$0xff]  ;;  %v20081_v45 = vld [vmem:[#allocation67_spill] sm:$0xff]  ;;  %vm20095_vm11 = vmmov %vm20075_vm1 }
 0x405   : > { %vm20078_vm6 = vnez %v20077_v44  ;;  %v5723_v12 = vmax.f32 %v5659_v13, 0.0  ;;  %v5721_v36 = vmax.f32 %v5657_v54, 0.0  ;;  %v5658_v19 = vadd.f32 %v15065_v22, %v5442_v56  ;;  %10483 = vmatmul.mubr.msk.bf16.gmra.mrb[96].mxu0 %vm6435_vm13, %v6387_v6  ;;  %v20085_v56 = vld [vmem:[#allocation88_spill] sm:$0xff]  ;;  %vm20098_vm7 = vmmov %vm20075_vm1 }
 0x406   : > { %v6042_v48 = vsel %vm20078_vm6, 0.0, %v15486_v43  ;;  %v5724_v37 = vmax.f32 %v5660_v63, 0.0  ;;  %vm20080_vm2 = vnez %v20079_v23  ;;  %vm20082_vm4 = vnez %v20081_v45  ;;  %v20088_v45 = vld [vmem:[#allocation89_spill] sm:$0xff] }
 0x407   : > { %v6040_v34 = vsel %vm20080_vm2, 0.0, %v15495_v52  ;;  %v6041_v55 = vsel %vm20082_vm4, 0.0, %v15498_v30  ;;  %v5888_v44 = vrot.slane %v5723_v12, 7  ;;  %v5884_v24 = vrot.slane %v5721_v36, 7 }
 0x408   : > { %v15515_v8 = vpack.c.bf16 %v6040_v34, %v6039_v38  ;;  %v15517_v61 = vpack.c.bf16 %v6042_v48, %v6041_v55  ;;  %v5890_v13 = vrot.slane %v5724_v37, 7  ;;  %v6389_v54 = vpack.c.bf16 %v5724_v37, %v5723_v12 }
 0x409   : > { %v5722_v63 = vmax.f32 %v5658_v19, 0.0  ;;  %vm20086_vm5 = vnez %v20085_v56  ;;  %v15523_v23 = vsel %vm20087_vm8, %v5882_v18, %v5884_v24  ;;  %vm20089_vm12 = vnez %v20088_v45  ;;  %v5455_v56 = vpop.f32.mrb[105].mxu1 }
 0x40a   : > { %20083 = vst [vmem:[#allocation167_spill] sm:$0xff] %v15515_v8  ;;  %20084 = vst [vmem:[#allocation168_spill] sm:$0xff] %v15517_v61  ;;  %v6278_v6 = vsel %vm20086_vm5, 0.0, %v15475_v15  ;;  %v6279_v1 = vsel %vm20089_vm12, 0.0, %v15482_v5  ;;  %v20090_v38 = vrot.slane %v15225_v28, 2  ;;  %v20091_v48 = vrot.slane %v15231_v31, 2 }
 0x40b   : > { %v20092_v19 = vrot.slane %v15270_v33, 2  ;;  %v15544_v37 = vsel %vm20095_vm11, %v5888_v44, %v5890_v13  ;;  %v5886_v5 = vrot.slane %v5722_v63, 7  ;;  %v6388_v55 = vpack.c.bf16 %v5722_v63, %v5721_v36  ;;  %v20096_v28 = vld [vmem:[#allocation74_spill] sm:$0xff]  ;;  %vm20108_vm5 = vmmov %vm20075_vm1 }
 0x40c   : > { %v15533_v34 = vsel %vm20068_vm3, %v20091_v48, %v20090_v38  ;;  %v20093_v12 = vmov %v20090_v38  ;;  %v5663_v45 = vadd.f32 %v10420_v57, %v15065_v22  ;;  %v5661_v38 = vadd.f32 %v15065_v22, %v5455_v56  ;;  %v10421_v48 = vpop.f32.mrb[106].mxu1  ;;  %v20099_v57 = vld [vmem:[#allocation77_spill] sm:$0xff] }
 0x40d   : > { %v15540_v15 = vsel %vm20094_vm14, %v20093_v12, %v20092_v19  ;;  %vm20097_vm0 = vnez %v20096_v28  ;;  %v15553_v12 = vsel %vm20075_vm1, %v5884_v24, %v5886_v5  ;;  %v15556_v18 = vsel %vm20098_vm7, %v5886_v5, %v5888_v44  ;;  %10486 = vmatprep.mubr.msk.bf16.mxu0 %vm6435_vm13, %v6388_v55  ;;  %v5458_v63 = vpop.f32.mrb[107].mxu1  ;;  %v20101_v44 = vld [vmem:[#allocation75_spill] sm:$0xff]  ;;  %v20103_v55 = vld [vmem:[#allocation76_spill] sm:$0xff]  ;;  %vm20115_vm14 = vmmov %vm20075_vm1 }
 0x40e   : > { %v6043_v19 = vsel %vm20097_vm0, 0.0, %v15523_v23  ;;  %v5664_v36 = vadd.f32 %v10421_v48, %v15065_v22  ;;  %vm20100_vm6 = vnez %v20099_v57  ;;  %v5727_v61 = vmax.f32 %v5663_v45, 0.0  ;;  %10487 = vmatmul.mubr.msk.bf16.gmra.mrb[100].mxu0 %vm6435_vm13, %v6389_v54  ;;  %vm20118_vm0 = vmmov %vm20075_vm1 }
 0x40f   : > { %v6046_v56 = vsel %vm20100_vm6, 0.0, %v15544_v37  ;;  %v5725_v8 = vmax.f32 %v5661_v38, 0.0  ;;  %v5662_v2 = vadd.f32 %v15065_v22, %v5458_v63  ;;  %vm20102_vm2 = vnez %v20101_v44  ;;  %v10424_v44 = vpop.f32.mrb[108].mxu1  ;;  %vm20119_vm1 = vmmov %vm20118_vm0 }
 0x410   : > { %v5728_v24 = vmax.f32 %v5664_v36, 0.0  ;;  %v6044_v5 = vsel %vm20102_vm2, 0.0, %v15553_v12  ;;  %vm20104_vm4 = vnez %v20103_v55  ;;  %v5896_v57 = vrot.slane %v5727_v61, 7 }
 0x411   : > { %v6045_v48 = vsel %vm20104_vm4, 0.0, %v15556_v18  ;;  %v5892_v3 = vrot.slane %v5725_v8, 7  ;;  %v15573_v31 = vpack.c.bf16 %v6044_v5, %v6043_v19  ;;  %v5726_v36 = vmax.f32 %v5662_v2, 0.0  ;;  %vm20129_vm4 = vmmov %vm20118_vm0 }
 0x412   : > { %v15575_v28 = vpack.c.bf16 %v6046_v56, %v6045_v48  ;;  %v5898_v45 = vrot.slane %v5728_v24, 7  ;;  %v6391_v38 = vpack.c.bf16 %v5728_v24, %v5727_v61  ;;  %v15577_v63 = vpack.c.bf16 %v6279_v1, %v6278_v6 }
 0x413   : > { %20105 = vst [vmem:[#allocation61_spill] sm:$0xff] %v15573_v31  ;;  %v15580_v54 = vsel %vm20108_vm5, %v5890_v13, %v5892_v3  ;;  %vm20110_vm8 = vnez %v20109_v51  ;;  %vm20112_vm12 = vnez %v20111_v27  ;;  %v20113_v56 = vrot.slane %v15280_v29, 2  ;;  %v5471_v51 = vpop.f32.mrb[109].mxu1  ;;  %vm20132_vm5 = vmmov %vm20068_vm3 }
 0x414   : > { %20106 = vst [vmem:[#allocation170_spill] sm:$0xff] %v15575_v28  ;;  %20107 = vst [vmem:[#allocation71_spill] sm:$0xff] %v15577_v63  ;;  %v6280_v55 = vsel %vm20110_vm8, 0.0, %v15533_v34  ;;  %v6281_v19 = vsel %vm20112_vm12, 0.0, %v15540_v15  ;;  %v20114_v5 = vrot.slane %v15270_v33, 2  ;;  %v15597_v61 = vsel %vm20115_vm14, %v5896_v57, %v5898_v45  ;;  %v10425_v24 = vpop.f32.mrb[110].mxu1 }
 0x415   : > { %v5894_v13 = vrot.slane %v5726_v36, 7  ;;  %v6390_v6 = vpack.c.bf16 %v5726_v36, %v5725_v8  ;;  %v5667_v27 = vadd.f32 %v10424_v44, %v15065_v22  ;;  %v5665_v15 = vadd.f32 %v15065_v22, %v5471_v51  ;;  %v20116_v33 = vld [vmem:[#allocation44_spill] sm:$0xff]  ;;  %v5474_v36 = vpop.f32.mrb[111].mxu1  ;;  %v20120_v44 = vld [vmem:[#allocation17_spill] sm:$0xff]  ;;  %vm20137_vm12 = vmmov %vm20068_vm3 }
 0x416   : > { %v15593_v2 = vsel %vm20068_vm3, %v20114_v5, %v20113_v56  ;;  %vm20117_vm11 = vnez %v20116_v33  ;;  %v5668_v8 = vadd.f32 %v10425_v24, %v15065_v22  ;;  %vm20121_vm7 = vnez %v20120_v44  ;;  %vm20138_vm3 = vmmov %vm20118_vm0 }
 0x417   : > { %v6047_v48 = vsel %vm20117_vm11, 0.0, %v15580_v54  ;;  %v15606_v56 = vsel %vm20118_vm0, %v5892_v3, %v5894_v13  ;;  %v15609_v5 = vsel %vm20119_vm1, %v5894_v13, %v5896_v57  ;;  %10490 = vmatprep.mubr.msk.bf16.mxu0 %vm6435_vm13, %v6390_v6  ;;  %v6050_v51 = vsel %vm20121_vm7, 0.0, %v15597_v61  ;;  %v20122_v57 = vld [vmem:[#allocation45_spill] sm:$0xff]  ;;  %v20124_v6 = vld [vmem:[#allocation16_spill] sm:$0xff]  ;;  %vm20142_vm11 = vmmov %vm20118_vm0 }
 0x418   : > { %v5731_v1 = vmax.f32 %v5667_v27, 0.0  ;;  %v5729_v63 = vmax.f32 %v5665_v15, 0.0  ;;  %v5732_v3 = vmax.f32 %v5668_v8, 0.0  ;;  %v5666_v28 = vadd.f32 %v15065_v22, %v5474_v36  ;;  %10491 = vmatmul.mubr.msk.bf16.gmra.mrb[104].mxu0 %vm6435_vm13, %v6391_v38 }
 0x419   : > { %vm20123_vm6 = vnez %v20122_v57  ;;  %vm20125_vm2 = vnez %v20124_v6  ;;  %v15630_v36 = vpack.c.bf16 %v6281_v19, %v6280_v55  ;;  %v10428_v57 = vpop.f32.mrb[112].mxu1  ;;  %v20130_v14 = vrot.slane %v15283_v53, 2  ;;  %v20140_v53 = vld [vmem:[#allocation90_spill] sm:$0xff] }
 0x41a   : > { %v6048_v13 = vsel %vm20123_vm6, 0.0, %v15606_v56  ;;  %v6049_v24 = vsel %vm20125_vm2, 0.0, %v15609_v5  ;;  %v5904_v44 = vrot.slane %v5731_v1, 7  ;;  %v5900_v31 = vrot.slane %v5729_v63, 7 }
 0x41b   : > { %v15626_v34 = vpack.c.bf16 %v6048_v13, %v6047_v48  ;;  %v15628_v33 = vpack.c.bf16 %v6050_v51, %v6049_v24  ;;  %v5906_v27 = vrot.slane %v5732_v3, 7  ;;  %v6393_v15 = vpack.c.bf16 %v5732_v3, %v5731_v1  ;;  %20128 = vst [vmem:[#allocation105_spill] sm:$0xff] %v15630_v36  ;;  %v20133_v48 = vld [vmem:[#allocation29_spill] sm:$0xff]  ;;  %v5487_v3 = vpop.f32.mrb[113].mxu1 }
 0x41c   : > { %v5730_v8 = vmax.f32 %v5666_v28, 0.0  ;;  %v15633_v38 = vsel %vm20129_vm4, %v5898_v45, %v5900_v31  ;;  %v20131_v6 = vrot.slane %v15280_v29, 2  ;;  %vm20134_vm8 = vnez %v20133_v48  ;;  %vm20153_vm4 = vmmov %vm20118_vm0 }
 0x41d   : > { %20126 = vst [vmem:[#allocation137_spill] sm:$0xff] %v15626_v34  ;;  %20127 = vst [vmem:[#allocation73_spill] sm:$0xff] %v15628_v33  ;;  %v6282_v51 = vsel %vm20134_vm8, 0.0, %v15593_v2  ;;  %v20135_v13 = vrot.slane %v15273_v26, 2  ;;  %v20136_v28 = vmov %v20130_v14  ;;  %v15652_v19 = vsel %vm20138_vm3, %v5904_v44, %v5906_v27 }
 0x41e   : > { %v6109_v32 = vsel %vm20132_vm5, %v20131_v6, %v20130_v14  ;;  %20139 = vst [vmem:[#allocation138_spill] sm:$0xff] %v15652_v19  ;;  %v5902_v1 = vrot.slane %v5730_v8, 7  ;;  %v6392_v29 = vpack.c.bf16 %v5730_v8, %v5729_v63  ;;  %v5671_v24 = vadd.f32 %v10428_v57, %v15065_v22  ;;  %v10429_v6 = vpop.f32.mrb[114].mxu1  ;;  %v20143_v57 = vld [vmem:[#allocation93_spill] sm:$0xff] }
 0x41f   : > { %v15648_v55 = vsel %vm20137_vm12, %v20136_v28, %v20135_v13  ;;  %v5669_v2 = vadd.f32 %v15065_v22, %v5487_v3  ;;  %vm20141_vm14 = vnez %v20140_v53  ;;  %v5672_v63 = vadd.f32 %v10429_v6, %v15065_v22  ;;  %v5490_v8 = vpop.f32.mrb[115].mxu1  ;;  %vm20159_vm12 = vmmov %vm20118_vm0 }
 0x420   : > { %v6051_v48 = vsel %vm20141_vm14, 0.0, %v15633_v38  ;;  %v15661_v13 = vsel %vm20142_vm11, %v5900_v31, %v5902_v1  ;;  %v15664_v28 = vsel %vm20118_vm0, %v5902_v1, %v5904_v44  ;;  %10494 = vmatprep.mubr.msk.bf16.mxu0 %vm6435_vm13, %v6392_v29  ;;  %vm20144_vm1 = vnez %v20143_v57  ;;  %v20145_v44 = vld [vmem:[#allocation91_spill] sm:$0xff]  ;;  %v20147_v29 = vld [vmem:[#allocation92_spill] sm:$0xff]  ;;  %vm20163_vm14 = vmmov %vm20118_vm0 }
 0x421   : > { %v6054_v3 = vsel %vm20144_vm1, 0.0, %v15652_v19  ;;  %v5735_v45 = vmax.f32 %v5671_v24, 0.0  ;;  %v5733_v36 = vmax.f32 %v5669_v2, 0.0  ;;  %v5736_v31 = vmax.f32 %v5672_v63, 0.0  ;;  %10495 = vmatmul.mubr.msk.bf16.gmra.mrb[108].mxu0 %vm6435_vm13, %v6393_v15  ;;  %vm20164_vm11 = vmmov %vm20118_vm0 }
 0x422   : > { %v5670_v33 = vadd.f32 %v15065_v22, %v5490_v8  ;;  %vm20146_vm7 = vnez %v20145_v44  ;;  %vm20148_vm6 = vnez %v20147_v29  ;;  %v20151_v8 = vld [vmem:[#allocation25_spill] sm:$0xff]  ;;  %v10432_v44 = vpop.f32.mrb[116].mxu1  ;;  %v20155_v29 = vrot.slane %v15308_v59, 2 }
 0x423   : > { %v6052_v1 = vsel %vm20146_vm7, 0.0, %v15661_v13  ;;  %v6053_v6 = vsel %vm20148_vm6, 0.0, %v15664_v28  ;;  %v5912_v57 = vrot.slane %v5735_v45, 7  ;;  %v5908_v34 = vrot.slane %v5733_v36, 7 }
 0x424   : > { %v15681_v14 = vpack.c.bf16 %v6052_v1, %v6051_v48  ;;  %v15683_v53 = vpack.c.bf16 %v6054_v3, %v6053_v6  ;;  %v5914_v24 = vrot.slane %v5736_v31, 7  ;;  %v6395_v2 = vpack.c.bf16 %v5736_v31, %v5735_v45  ;;  %v20157_v3 = vld [vmem:[#allocation26_spill] sm:$0xff]  ;;  %v5503_v1 = vpop.f32.mrb[117].mxu1 }
 0x425   : > { %v5734_v63 = vmax.f32 %v5670_v33, 0.0  ;;  %vm20152_vm2 = vnez %v20151_v8  ;;  %v15688_v58 = vsel %vm20153_vm4, %v5906_v27, %v5908_v34  ;;  %v20156_v19 = vrot.slane %v15273_v26, 2  ;;  %v10433_v8 = vpop.f32.mrb[118].mxu1 }
 0x426   : > { %20149 = vst [vmem:[#allocation20_spill] sm:$0xff] %v15681_v14  ;;  %20150 = vst [vmem:[#allocation140_spill] sm:$0xff] %v15683_v53  ;;  %v6283_v15 = vsel %vm20152_vm2, 0.0, %v6109_v32  ;;  %vm20158_vm8 = vnez %v20157_v3  ;;  %v15702_v32 = vsel %vm20159_vm12, %v5912_v57, %v5914_v24  ;;  %v5675_v6 = vadd.f32 %v10432_v44, %v15065_v22  ;;  %v20165_v44 = vld [vmem:[#allocation97_spill] sm:$0xff] }
 0x427   : > { %v15690_v47 = vpack.c.bf16 %v6283_v15, %v6282_v51  ;;  %v6113_v48 = vsel %vm20132_vm5, %v20156_v19, %v20155_v29  ;;  %v6284_v45 = vsel %vm20158_vm8, 0.0, %v15648_v55  ;;  %20160 = vst [vmem:[#allocation146_spill] sm:$0xff] %v15702_v32  ;;  %v5910_v27 = vrot.slane %v5734_v63, 7  ;;  %v20161_v19 = vld [vmem:[#allocation94_spill] sm:$0xff]  ;;  %vm20175_vm2 = vmmov %vm20153_vm4 }
 0x428   : > { %v6394_v31 = vpack.c.bf16 %v5734_v63, %v5733_v36  ;;  %v5673_v26 = vadd.f32 %v15065_v22, %v5503_v1  ;;  %vm20162_vm3 = vnez %v20161_v19  ;;  %v5676_v36 = vadd.f32 %v10433_v8, %v15065_v22  ;;  %v5506_v63 = vpop.f32.mrb[119].mxu1  ;;  %vm20179_vm4 = vmmov %vm20132_vm5 }
 0x429   : > { %20154 = vst [vmem:[#allocation143_spill] sm:$0xff] %v15690_v47  ;;  %v6055_v15 = vsel %vm20162_vm3, 0.0, %v15688_v58  ;;  %v15711_v55 = vsel %vm20163_vm14, %v5908_v34, %v5910_v27  ;;  %v15714_v29 = vsel %vm20164_vm11, %v5910_v27, %v5912_v57  ;;  %vm20166_vm0 = vnez %v20165_v44  ;;  %v20167_v57 = vld [vmem:[#allocation95_spill] sm:$0xff]  ;;  %vm20182_vm5 = vmmov %vm20179_vm4 }
 0x42a   : > { %10498 = vmatprep.mubr.msk.bf16.mxu0 %vm6435_vm13, %v6394_v31  ;;  %v6058_v3 = vsel %vm20166_vm0, 0.0, %v15702_v32  ;;  %v5739_v51 = vmax.f32 %v5675_v6, 0.0  ;;  %v5737_v33 = vmax.f32 %v5673_v26, 0.0  ;;  %v5740_v34 = vmax.f32 %v5676_v36, 0.0  ;;  %v20169_v31 = vld [vmem:[#allocation96_spill] sm:$0xff]  ;;  %vm20183_vm8 = vmmov %vm20175_vm2 }
 0x42b   : > { %v5674_v47 = vadd.f32 %v15065_v22, %v5506_v63  ;;  %10499 = vmatmul.mubr.msk.bf16.gmra.mrb[112].mxu0 %vm6435_vm13, %v6395_v2  ;;  %vm20168_vm1 = vnez %v20167_v57  ;;  %vm20170_vm7 = vnez %v20169_v31  ;;  %v20173_v22 = vld [vmem:[#allocation27_spill] sm:$0xff]  ;;  %v10436_v57 = vpop.f32.mrb[120].mxu1  ;;  %v20177_v31 = vrot.slane %v15334_v39, 2  ;;  %vm20187_vm3 = vmmov %vm20175_vm2 }
 0x42c   : > { %v6056_v27 = vsel %vm20168_vm1, 0.0, %v15711_v55  ;;  %v6057_v8 = vsel %vm20170_vm7, 0.0, %v15714_v29  ;;  %v5920_v44 = vrot.slane %v5739_v51, 7  ;;  %v5916_v53 = vrot.slane %v5737_v33, 7  ;;  %vm20189_vm14 = vmmov %vm20175_vm2 }
 0x42d   : > { %v15731_v1 = vpack.c.bf16 %v6056_v27, %v6055_v15  ;;  %v15733_v19 = vpack.c.bf16 %v6058_v3, %v6057_v8  ;;  %v5922_v6 = vrot.slane %v5740_v34, 7  ;;  %v6397_v26 = vpack.c.bf16 %v5740_v34, %v5739_v51  ;;  %v5519_v27 = vpop.f32.mrb[121].mxu1 }
 0x42e   : > { %v5738_v36 = vmax.f32 %v5674_v47, 0.0  ;;  %vm20174_vm6 = vnez %v20173_v22  ;;  %v15738_v63 = vsel %vm20175_vm2, %v5914_v24, %v5916_v53  ;;  %v20178_v32 = vrot.slane %v15308_v59, 2  ;;  %v10437_v39 = vpop.f32.mrb[122].mxu1  ;;  %v20191_v59 = vld [vmem:[#allocation101_spill] sm:$0xff] }
 0x42f   : > { %20171 = vst [vmem:[#allocation149_spill] sm:$0xff] %v15731_v1  ;;  %20172 = vst [vmem:[#allocation152_spill] sm:$0xff] %v15733_v19  ;;  %v6285_v2 = vsel %vm20174_vm6, 0.0, %v6113_v48  ;;  %v20180_v3 = vrot.slane %v15337_v16, 2  ;;  %v20181_v47 = vmov %v20177_v31  ;;  %v15758_v48 = vsel %vm20183_vm8, %v5920_v44, %v5922_v6 }
 0x430   : > { %v15740_v14 = vpack.c.bf16 %v6285_v2, %v6284_v45  ;;  %v15747_v15 = vsel %vm20179_vm4, %v20178_v32, %v20177_v31  ;;  %20184 = vst [vmem:[#allocation158_spill] sm:$0xff] %v15758_v48  ;;  %v5918_v45 = vrot.slane %v5738_v36, 7  ;;  %v6396_v34 = vpack.c.bf16 %v5738_v36, %v5737_v33  ;;  %v11215_v32 = vld [vmem:[%s17745_s4] ss:$0 sm:$0xff]  ;;  %v5522_v36 = vpop.f32.mrb[123].mxu1  ;;  %vm20201_vm6 = vmmov %vm20175_vm2 }
 0x431   : > { %v15754_v51 = vsel %vm20182_vm5, %v20181_v47, %v20180_v3  ;;  %v5679_v8 = vadd.f32 %v11215_v32, %v10436_v57  ;;  %v5677_v22 = vadd.f32 %v11215_v32, %v5519_v27  ;;  %v20185_v2 = vld [vmem:[#allocation98_spill] sm:$0xff]  ;;  %v5680_v33 = vadd.f32 %v11215_v32, %v10437_v39  ;;  %v10440_v24 = vpop.f32.mrb[124].mxu1  ;;  %vm20209_vm5 = vmmov %vm20179_vm4 }
 0x432   : > { %20176 = vst [vmem:[#allocation155_spill] sm:$0xff] %v15740_v14  ;;  %vm20186_vm12 = vnez %v20185_v2  ;;  %v15768_v3 = vsel %vm20187_vm3, %v5916_v53, %v5918_v45  ;;  %v15771_v47 = vsel %vm20189_vm14, %v5918_v45, %v5920_v44  ;;  %10502 = vmatprep.mubr.msk.bf16.mxu0 %vm6435_vm13, %v6396_v34  ;;  %vm20192_vm11 = vnez %v20191_v59  ;;  %v20193_v44 = vld [vmem:[#allocation99_spill] sm:$0xff]  ;;  %v20195_v34 = vld [vmem:[#allocation100_spill] sm:$0xff]  ;;  %vm20210_vm8 = vmmov %vm20187_vm3 }
 0x433   : > { %v6059_v31 = vsel %vm20186_vm12, 0.0, %v15738_v63  ;;  %20188 = vst [vmem:[#allocation161_spill] sm:$0xff] %v15768_v3  ;;  %20190 = vst [vmem:[#allocation164_spill] sm:$0xff] %v15771_v47  ;;  %v6062_v57 = vsel %vm20192_vm11, 0.0, %v15758_v48  ;;  %v5743_v2 = vmax.f32 %v5679_v8, 0.0  ;;  %v5741_v14 = vmax.f32 %v5677_v22, 0.0  ;;  %10503 = vmatmul.mubr.msk.bf16.gmra.mrb[116].mxu0 %vm6435_vm13, %v6397_v26 }
 0x434   : > { %v5744_v19 = vmax.f32 %v5680_v33, 0.0  ;;  %v5678_v53 = vadd.f32 %v11215_v32, %v5522_v36  ;;  %vm20194_vm0 = vnez %v20193_v44  ;;  %vm20196_vm1 = vnez %v20195_v34  ;;  %v20199_v36 = vld [vmem:[#allocation28_spill] sm:$0xff]  ;;  %v20203_v34 = vld [vmem:[#allocation34_spill] sm:$0xff]  ;;  %vm20214_vm14 = vmmov %vm20187_vm3 }
 0x435   : > { %v6060_v45 = vsel %vm20194_vm0, 0.0, %v15768_v3  ;;  %v6061_v39 = vsel %vm20196_vm1, 0.0, %v15771_v47  ;;  %v5928_v59 = vrot.slane %v5743_v2, 7  ;;  %v5924_v1 = vrot.slane %v5741_v14, 7 }
 0x436   : > { %v15786_v48 = vpack.c.bf16 %v6060_v45, %v6059_v31  ;;  %v15788_v27 = vpack.c.bf16 %v6062_v57, %v6061_v39  ;;  %v5930_v8 = vrot.slane %v5744_v19, 7  ;;  %v6399_v22 = vpack.c.bf16 %v5744_v19, %v5743_v2 }
 0x437   : > { %v5742_v33 = vmax.f32 %v5678_v53, 0.0  ;;  %vm20200_vm7 = vnez %v20199_v36  ;;  %v15794_v44 = vsel %vm20201_vm6, %v5922_v6, %v5924_v1  ;;  %vm20204_vm2 = vnez %v20203_v34  ;;  %v20225_v34 = vld [vmem:[#allocation38_spill] sm:$0xff] }
 0x438   : > { %20197 = vst [vmem:[#allocation166_spill] sm:$0xff] %v15786_v48  ;;  %20198 = vst [vmem:[#allocation169_spill] sm:$0xff] %v15788_v27  ;;  %v6286_v26 = vsel %vm20200_vm7, 0.0, %v15747_v15  ;;  %v6287_v47 = vsel %vm20204_vm2, 0.0, %v15754_v51  ;;  %v20205_v31 = vrot.slane %v15325_v21, 2  ;;  %v20206_v57 = vrot.slane %v15337_v16, 2 }
 0x439   : > { %20202 = vst [vmem:[#allocation171_spill] sm:$0xff] %v15794_v44  ;;  %v20207_v19 = vrot.slane %v15361_v50, 2  ;;  %v15811_v53 = vsel %vm20210_vm8, %v5928_v59, %v5930_v8  ;;  %v5926_v39 = vrot.slane %v5742_v33, 7  ;;  %v6398_v36 = vpack.c.bf16 %v5742_v33, %v5741_v14  ;;  %v5535_v51 = vpop.f32.mrb[125].mxu1  ;;  %v20216_v33 = vld [vmem:[#allocation106_spill] sm:$0xff]  ;;  %vm20222_vm7 = vmmov %vm20187_vm3 }
 0x43a   : > { %v6119_v45 = vsel %vm20179_vm4, %v20206_v57, %v20205_v31  ;;  %v20208_v2 = vmov %v20205_v31  ;;  %20211 = vst [vmem:[#allocation172_spill] sm:$0xff] %v15811_v53  ;;  %v5683_v27 = vadd.f32 %v11215_v32, %v10440_v24  ;;  %v5681_v16 = vadd.f32 %v11215_v32, %v5535_v51  ;;  %v10441_v48 = vpop.f32.mrb[126].mxu1  ;;  %v20212_v31 = vld [vmem:[#allocation102_spill] sm:$0xff]  ;;  %vm20230_vm8 = vmmov %vm20187_vm3 }
 0x43b   : > { %v6121_v15 = vsel %vm20209_vm5, %v20208_v2, %v20207_v19  ;;  %vm20213_vm12 = vnez %v20212_v31  ;;  %v15818_v21 = vsel %vm20187_vm3, %v5924_v1, %v5926_v39  ;;  %v15821_v19 = vsel %vm20214_vm14, %v5926_v39, %v5928_v59  ;;  %10506 = vmatprep.mubr.msk.bf16.mxu0 %vm6435_vm13, %v6398_v36  ;;  %v5538_v14 = vpop.f32.mrb[127].mxu1  ;;  %v20218_v59 = vld [vmem:[#allocation103_spill] sm:$0xff]  ;;  %v20220_v39 = vld [vmem:[#allocation104_spill] sm:$0xff]  ;;  %vm20229_vm5 = vmmov %vm20187_vm3 }
 0x43c   : > { %v6063_v57 = vsel %vm20213_vm12, 0.0, %v15794_v44  ;;  %20215 = vst [vmem:[#allocation173_spill] sm:$0xff] %v15821_v19  ;;  %v5684_v2 = vadd.f32 %v11215_v32, %v10441_v48  ;;  %vm20217_vm11 = vnez %v20216_v33  ;;  %v5747_v31 = vmax.f32 %v5683_v27, 0.0  ;;  %10507 = vmatmul.mubr.msk.bf16.gmra.mrb[120].mxu0 %vm6435_vm13, %v6399_v22  ;;  %vm20233_vm14 = vmmov %vm20187_vm3 }
 0x43d   : > { %v6066_v24 = vsel %vm20217_vm11, 0.0, %v15811_v53  ;;  %v5745_v6 = vmax.f32 %v5681_v16, 0.0  ;;  %v5682_v1 = vadd.f32 %v11215_v32, %v5538_v14  ;;  %vm20219_vm0 = vnez %v20218_v59  ;;  %v20223_v14 = vld [vmem:[#allocation35_spill] sm:$0xff] }
 0x43e   : > { %v5748_v44 = vmax.f32 %v5684_v2, 0.0  ;;  %v6064_v48 = vsel %vm20219_vm0, 0.0, %v15818_v21  ;;  %vm20221_vm1 = vnez %v20220_v39  ;;  %v5936_v33 = vrot.slane %v5747_v31, 7 }
 0x43f   : > { %v6065_v36 = vsel %vm20221_vm1, 0.0, %v15821_v19  ;;  %v5932_v53 = vrot.slane %v5745_v6, 7  ;;  %v15836_v3 = vpack.c.bf16 %v6064_v48, %v6063_v57  ;;  %v5746_v2 = vmax.f32 %v5682_v1, 0.0  ;;  %v20234_v48 = vld [vmem:[#allocation111_spill] sm:$0xff] }
 0x440   : > { %v15838_v51 = vpack.c.bf16 %v6066_v24, %v6065_v36  ;;  %v5938_v27 = vrot.slane %v5748_v44, 7  ;;  %v6401_v16 = vpack.c.bf16 %v5748_v44, %v5747_v31  ;;  %v15840_v32 = vpack.c.bf16 %v6287_v47, %v6286_v26  ;;  %v20231_v31 = vld [vmem:[#allocation83_spill] sm:$0xff] }
 0x441   : > { %v15843_v22 = vsel %vm20222_vm7, %v5930_v8, %v5932_v53  ;;  %vm20224_vm6 = vnez %v20223_v14  ;;  %vm20226_vm2 = vnez %v20225_v34  ;;  %v20227_v19 = vrot.slane %v15389_v60, 2  ;;  %vm20242_vm7 = vmmov %vm20179_vm4 }
 0x442   : > { %v6288_v59 = vsel %vm20224_vm6, 0.0, %v6119_v45  ;;  %v6289_v39 = vsel %vm20226_vm2, 0.0, %v6121_v15  ;;  %v20228_v57 = vrot.slane %v15361_v50, 2  ;;  %v6192_v44 = vrot.slane %v15843_v22, 2 }
 0x443   : > { %v15856_v47 = vsel %vm20229_vm5, %v5936_v33, %v5938_v27  ;;  %v15859_v8 = vsel %vm20230_vm8, %v5938_v27, 0.0  ;;  %v5934_v26 = vrot.slane %v5746_v2, 7  ;;  %v6400_v15 = vpack.c.bf16 %v5746_v2, %v5745_v6  ;;  %v20236_v2 = vld [vmem:[#allocation108_spill] sm:$0xff]  ;;  %vm20251_vm5 = vmmov %vm20179_vm4 }
 0x444   : > { %v6123_v24 = vsel %vm20179_vm4, %v20228_v57, %v20227_v19  ;;  %v6198_v45 = vrot.slane %v15856_v47, 2  ;;  %vm20232_vm12 = vnez %v20231_v31  ;;  %vm20235_vm11 = vnez %v20234_v48  ;;  %v20238_v57 = vld [vmem:[#allocation109_spill] sm:$0xff]  ;;  %v20243_v48 = vld [vmem:[#allocation36_spill] sm:$0xff]  ;;  %vm20254_vm8 = vmmov %vm20179_vm4 }
 0x445   : > { %v6067_v50 = vsel %vm20232_vm12, 0.0, %v15843_v22  ;;  %v15867_v19 = vsel %vm20187_vm3, %v5932_v53, %v5934_v26  ;;  %v15870_v1 = vsel %vm20233_vm14, %v5934_v26, %v5936_v33  ;;  %v6070_v36 = vsel %vm20235_vm11, 0.0, %v15856_v47  ;;  %10510 = vmatprep.mubr.msk.bf16.mxu0 %vm6435_vm13, %v6400_v15  ;;  %vm20261_vm14 = vmmov %vm20179_vm4  ;;  %v20432_v47 = vld [vmem:[#allocation157_spill] sm:$0xff] }
 0x446   : > { %v15875_v27 = vpack.c.bf16 %v6289_v39, %v6288_v59  ;;  %v6194_v14 = vrot.slane %v15867_v19, 2  ;;  %v6196_v6 = vrot.slane %v15870_v1, 2  ;;  %vm20237_vm0 = vnez %v20236_v2  ;;  %10511 = vmatmul.mubr.msk.bf16.gmra.mrb[124].mxu0 %vm6435_vm13, %v6401_v16 }
 0x447   : > { %v6068_v53 = vsel %vm20237_vm0, 0.0, %v15867_v19  ;;  %vm20239_vm1 = vnez %v20238_v57  ;;  %v20240_v39 = vrot.slane %v15392_v17, 2  ;;  %v20241_v31 = vrot.slane %v15389_v60, 2  ;;  %10522 = vmatprep.mubr.msk.bf16.mxu0 %vm6435_vm13, %v15107_v25  ;;  %v20245_v57 = vld [vmem:[#allocation37_spill] sm:$0xff]  ;;  %v20257_v17 = vld [vmem:[#allocation63_spill] sm:$0xff] }
 0x448   : > { %v6069_v33 = vsel %vm20239_vm1, 0.0, %v15870_v1  ;;  %v15887_v26 = vpack.c.bf16 %v6068_v53, %v6067_v50  ;;  %vm20244_vm6 = vnez %v20243_v48  ;;  %vm20246_vm2 = vnez %v20245_v57  ;;  %vm20268_vm1 = vmmov %vm20179_vm4 }
 0x449   : > { %v15889_v59 = vpack.c.bf16 %v6070_v36, %v6069_v33  ;;  %v6125_v15 = vsel %vm20242_vm7, %v20241_v31, %v20240_v39  ;;  %v6290_v2 = vsel %vm20244_vm6, 0.0, %v6123_v24  ;;  %v20247_v16 = vrot.slane %v15380_v42, 2  ;;  %vm20271_vm7 = vmmov %vm20268_vm1 }
 0x44a   : > { %v6291_v34 = vsel %vm20246_vm2, 0.0, %v6125_v15  ;;  %v20248_v50 = vmov %v20240_v39  ;;  %v20249_v53 = vrot.slane %v15416_v11, 2  ;;  %v20252_v24 = vrot.slane %v15439_v20, 2  ;;  %v20255_v15 = vld [vmem:[#allocation43_spill] sm:$0xff]  ;;  %vm20276_vm2 = vmmov %vm20268_vm1 }
 0x44b   : > { %v6127_v36 = vsel %vm20179_vm4, %v20248_v50, %v20247_v16  ;;  %v20250_v60 = vmov %v20247_v16  ;;  %v15917_v31 = vpack.c.bf16 %v6291_v34, %v6290_v2  ;;  %vm20256_vm12 = vnez %v20255_v15 }
 0x44c   : > { %v6129_v33 = vsel %vm20251_vm5, %v20250_v60, %v20249_v53  ;;  %v20253_v39 = vmov %v20249_v53  ;;  %v6292_v48 = vsel %vm20256_vm12, 0.0, %v6127_v36  ;;  %vm20258_vm3 = vnez %v20257_v17  ;;  %v20262_v60 = vld [vmem:[#allocation51_spill] sm:$0xff]  ;;  %v20272_v17 = vld [vmem:[#allocation53_spill] sm:$0xff]  ;;  %vm20280_vm5 = vmmov %vm20268_vm1 }
 0x44d   : > { %v6131_v25 = vsel %vm20254_vm8, %v20253_v39, %v20252_v24  ;;  %v6293_v57 = vsel %vm20258_vm3, 0.0, %v6129_v33  ;;  %v20259_v16 = vrot.slane %v15442_v40, 2  ;;  %v20260_v42 = vmov %v20252_v24  ;;  %v20264_v24 = vld [vmem:[#allocation52_spill] sm:$0xff]  ;;  %vm20285_vm12 = vmmov %vm20268_vm1 }
 0x44e   : > { %v15928_v53 = vpack.c.bf16 %v6293_v57, %v6292_v48  ;;  %vm20263_vm11 = vnez %v20262_v60  ;;  %vm20265_vm0 = vnez %v20264_v24  ;;  %v20266_v2 = vrot.slane %v15430_v46, 2  ;;  %10523 = vmatmul.mubr.msk.bf16.vlgmr.msra.gmra.mrb[64].mxu0 %vm6435_vm13, %v15089_v41 }
 0x44f   : > { %v6133_v50 = vsel %vm20261_vm14, %v20260_v42, %v20259_v16  ;;  %v6294_v11 = vsel %vm20263_vm11, 0.0, %v6131_v25  ;;  %v20267_v36 = vmov %v20259_v16  ;;  %v20269_v20 = vrot.slane %v15466_v0, 2  ;;  %vm20290_vm14 = vmmov %vm20268_vm1  ;;  %10526 = vmatprep.mubr.msk.bf16.mxu0 %vm6435_vm13, %v15153_v49  ;;  %v11195_v49 = vld [vmem:[%s17746_s5 + $0x50] sm:$0xff]  }
 0x450   : > { %v6295_v34 = vsel %vm20265_vm0, 0.0, %v6133_v50  ;;  %v6135_v33 = vsel %vm20268_vm1, %v20267_v36, %v20266_v2  ;;  %v20270_v15 = vmov %v20266_v2  ;;  %vm20273_vm6 = vnez %v20272_v17 }
 0x451   : > { %v15939_v39 = vpack.c.bf16 %v6295_v34, %v6294_v11  ;;  %v6137_v48 = vsel %vm20271_vm7, %v20270_v15, %v20269_v20  ;;  %v6296_v25 = vsel %vm20273_vm6, 0.0, %v6135_v33  ;;  %v20274_v57 = vrot.slane %v15495_v52, 2  ;;  %v20281_v11 = vld [vmem:[#allocation59_spill] sm:$0xff]  ;;  %v20286_v33 = vld [vmem:[#allocation60_spill] sm:$0xff]  ;;  %vm20298_vm7 = vmmov %vm20268_vm1 }
 0x452   : > { %v20275_v16 = vmov %v20269_v20  ;;  %vm20277_vm4 = vnez %v19685_v35  ;;  %v20278_v50 = vrot.slane %v15498_v30, 2  ;;  %vm20282_vm8 = vnez %v20281_v11  ;;  %v11194_v35 = vld [vmem:[%s17746_s5 + $0x48] sm:$0xff]  }
 0x453   : > { %v6139_v42 = vsel %vm20276_vm2, %v20275_v16, %v20274_v57  ;;  %v6297_v40 = vsel %vm20277_vm4, 0.0, %v6137_v48  ;;  %v20279_v60 = vmov %v20274_v57  ;;  %v20283_v34 = vrot.slane %v15486_v43, 2  ;;  %v20292_v57 = vld [vmem:[#allocation62_spill] sm:$0xff]  ;;  %vm20304_vm4 = vmmov %vm20268_vm1 }
 0x454   : > { %v6141_v46 = vsel %vm20280_vm5, %v20279_v60, %v20278_v50  ;;  %v6298_v24 = vsel %vm20282_vm8, 0.0, %v6139_v42  ;;  %v20284_v2 = vmov %v20278_v50  ;;  %v15970_v36 = vpack.c.bf16 %v6297_v40, %v6296_v25  ;;  %vm20307_vm5 = vmmov %vm20268_vm1 }
 0x455   : > { %v6143_v0 = vsel %vm20285_vm12, %v20284_v2, %v20283_v34  ;;  %vm20287_vm3 = vnez %v20286_v33  ;;  %v20288_v20 = vrot.slane %v15523_v23, 2  ;;  %v20289_v15 = vmov %v20283_v34  ;;  %vm20312_vm12 = vmmov %vm20268_vm1 }
 0x456   : > { %v6299_v52 = vsel %vm20287_vm3, 0.0, %v6141_v46  ;;  %vm20291_vm11 = vnez %v19701_v62  ;;  %vm20293_vm0 = vnez %v20292_v57  ;;  %v20294_v25 = vrot.slane %v15553_v12, 2  ;;  %v20299_v46 = vld [vmem:[#allocation70_spill] sm:$0xff]  ;;  %vm20315_vm3 = vmmov %vm20268_vm1 }
 0x457   : > { %v6145_v48 = vsel %vm20290_vm14, %v20289_v15, %v20288_v20  ;;  %v6300_v30 = vsel %vm20291_vm11, 0.0, %v6143_v0  ;;  %v15981_v17 = vpack.c.bf16 %v6299_v52, %v6298_v24  ;;  %v20295_v42 = vmov %v20288_v20  ;;  %v11216_v12 = vld [vmem:[%s17746_s5 + $0x40] sm:$0xff]   ;;  %v20308_v52 = vld [vmem:[#allocation72_spill] sm:$0xff]  ;;  %vm20319_vm11 = vmmov %vm20268_vm1 }
 0x458   : > { %v6301_v16 = vsel %vm20293_vm0, 0.0, %v6145_v48  ;;  %v6147_v40 = vsel %vm20268_vm1, %v20295_v42, %v20294_v25  ;;  %v20296_v50 = vrot.slane %v15556_v18, 2  ;;  %v20297_v43 = vmov %v20294_v25  ;;  %10587 = vmatpush3.bf16.msra.mxu0 %v11216_v12 }
 0x459   : > { %v15997_v62 = vpack.c.bf16 %v6301_v16, %v6300_v30  ;;  %vm20300_vm6 = vnez %v20299_v46  ;;  %vm20301_vm2 = vnez %v19716_v4  ;;  %v20302_v23 = vrot.slane %v15544_v37, 2  ;;  %10588 = vmatprep.subr.bf16.mxu0 %v11194_v35 }
 0x45a   : > { %v6149_v60 = vsel %vm20298_vm7, %v20297_v43, %v20296_v50  ;;  %v6302_v11 = vsel %vm20300_vm6, 0.0, %v6147_v40  ;;  %v20303_v34 = vmov %v20296_v50  ;;  %v20305_v0 = vrot.slane %v15580_v54, 2  ;;  %v20320_v43 = vld [vmem:[#allocation107_spill] sm:$0xff]  ;;  %vm20330_vm6 = vmmov %vm20315_vm3 }
 0x45b   : > { %v6303_v24 = vsel %vm20301_vm2, 0.0, %v6149_v60  ;;  %v6151_v2 = vsel %vm20304_vm4, %v20303_v34, %v20302_v23  ;;  %v20306_v4 = vmov %v20302_v23  ;;  %vm20309_vm8 = vnez %v20308_v52  ;;  %vm20333_vm2 = vmmov %vm20315_vm3  ;;  %v20336_v52 = vld [vmem:[#allocation110_spill] sm:$0xff] }
 0x45c   : > { %v16013_v41 = vpack.c.bf16 %v6303_v24, %v6302_v11  ;;  %v6153_v33 = vsel %vm20307_vm5, %v20306_v4, %v20305_v0  ;;  %v6304_v18 = vsel %vm20309_vm8, 0.0, %v6151_v2  ;;  %v20310_v20 = vrot.slane %v15606_v56, 2  ;;  %v20326_v24 = vld [vmem:[#allocation82_spill] sm:$0xff]  ;;  %10589 = vmatpush3.bf16.msra.mxu0 %v11194_v35  ;;  %vm20341_vm8 = vmmov %vm20333_vm2 }
 0x45d   : > { %v20311_v15 = vmov %v20305_v0  ;;  %v6305_v30 = vsel %vm19729_vm15, 0.0, %v6153_v33  ;;  %v20313_v37 = vrot.slane %v15609_v5, 2  ;;  %vm20316_vm14 = vnez %v19732_v10  ;;  %vm20324_vm15 = vmmov %vm20268_vm1  ;;  %v20334_v4 = vld [vmem:[#allocation46_spill] sm:$0xff]  ;;  %10590 = vmatprep.subr.bf16.mxu0 %v11195_v49 }
 0x45e   : > { %v6155_v48 = vsel %vm20312_vm12, %v20311_v15, %v20310_v20  ;;  %v20314_v57 = vmov %v20310_v20  ;;  %v20317_v54 = vrot.slane %v15597_v61, 2  ;;  %v16044_v50 = vpack.c.bf16 %v6305_v30, %v6304_v18  ;;  %v20338_v20 = vld [vmem:[#allocation138_spill] sm:$0xff]  ;;  %vm20344_vm12 = vmmov %vm20333_vm2 }
 0x45f   : > { %v6157_v16 = vsel %vm20315_vm3, %v20314_v57, %v20313_v37  ;;  %v6306_v25 = vsel %vm20316_vm14, 0.0, %v6155_v48  ;;  %v20318_v42 = vmov %v20313_v37  ;;  %vm20321_vm0 = vnez %v20320_v43  ;;  %vm20349_vm14 = vmmov %vm20333_vm2 }
 0x460   : > { %v6159_v40 = vsel %vm20319_vm11, %v20318_v42, %v20317_v54  ;;  %v6307_v9 = vsel %vm20321_vm0, 0.0, %v6157_v16  ;;  %v20322_v60 = vrot.slane %v15633_v38, 2  ;;  %v20323_v56 = vmov %v20317_v54  ;;  %v20345_v16 = vld [vmem:[#allocation112_spill] sm:$0xff]  ;;  %vm20354_vm0 = vmmov %vm20333_vm2  ;;  %10591 = vmatpush3.bf16.msra.mxu0 %v11195_v49 }
 0x461   : > { %vm20325_vm1 = vnez %v19744_v7  ;;  %v16055_v11 = vpack.c.bf16 %v6307_v9, %v6306_v25  ;;  %vm20327_vm7 = vnez %v20326_v24  ;;  %v20328_v23 = vrot.slane %v15661_v13, 2  ;;  %v11196_v13 = vld [vmem:[%s17746_s5 + $0x58] sm:$0xff]   ;;  %v20357_v24 = vld [vmem:[#allocation146_spill] sm:$0xff] }
 0x462   : > { %v6161_v46 = vsel %vm20324_vm15, %v20323_v56, %v20322_v60  ;;  %v6308_v10 = vsel %vm20325_vm1, 0.0, %v6159_v40  ;;  %v20329_v34 = vmov %v20322_v60  ;;  %v20331_v12 = vrot.slane %v15664_v28, 2  ;;  %v20350_v40 = vld [vmem:[#allocation113_spill] sm:$0xff]  ;;  %vm20360_vm1 = vmmov %vm20354_vm0  ;;  %10592 = vmatprep.subr.bf16.mxu0 %v11196_v13 }
 0x463   : > { %v6309_v5 = vsel %vm20327_vm7, 0.0, %v6161_v46  ;;  %v6163_v2 = vsel %vm20330_vm6, %v20329_v34, %v20328_v23  ;;  %v20332_v61 = vmov %v20328_v23  ;;  %vm20335_vm4 = vnez %v20334_v4  ;;  %v20355_v46 = vld [vmem:[#allocation114_spill] sm:$0xff]  ;;  %v20361_v34 = vld [vmem:[#allocation144_spill] sm:$0xff]  ;;  %vm20366_vm6 = vmmov %vm20354_vm0 }
 0x464   : > { %v6165_v0 = vsel %vm20333_vm2, %v20332_v61, %v20331_v12  ;;  %v16069_v7 = vpack.c.bf16 %v6309_v5, %v6308_v10  ;;  %v6310_v33 = vsel %vm20335_vm4, 0.0, %v6163_v2  ;;  %vm20337_vm5 = vnez %v20336_v52  ;;  %10527 = vmatmul.mubr.msk.bf16.gmra.mrb[68].mxu0 %vm6435_vm13, %v20361_v34 }
 0x465   : > { %v6311_v18 = vsel %vm20337_vm5, 0.0, %v6165_v0  ;;  %v20339_v15 = vrot.slane %v20338_v20, 2  ;;  %v20340_v38 = vmov %v20331_v12  ;;  %v20342_v30 = vrot.slane %v15688_v58, 2  ;;  %v20362_v12 = vld [vmem:[#allocation115_spill] sm:$0xff]  ;;  %v20370_v20 = vld [vmem:[#allocation117_spill] sm:$0xff]  ;;  %vm20375_vm5 = vmmov %vm20354_vm0  ;;  %10593 = vmatpush3.bf16.msra.mxu0 %v11196_v13 }
 0x466   : > { %v16083_v35 = vpack.c.bf16 %v6311_v18, %v6310_v33  ;;  %vm20346_vm3 = vnez %v20345_v16  ;;  %v20347_v28 = vrot.slane %v15711_v55, 2  ;;  %vm20351_vm11 = vnez %v20350_v40  ;;  %v20367_v33 = vld [vmem:[#allocation116_spill] sm:$0xff]  ;;  %v20381_v40 = vld [vmem:[#allocation119_spill] sm:$0xff] }
 0x467   : > { %v6167_v48 = vsel %vm20341_vm8, %v20340_v38, %v20339_v15  ;;  %v20343_v37 = vmov %v20339_v15  ;;  %v20348_v54 = vmov %v20342_v30  ;;  %v20352_v9 = vrot.slane %v15714_v29, 2  ;;  %v20369_v29 = vld [vmem:[#allocation147_spill] sm:$0xff]  ;;  %v20372_v38 = vld [vmem:[#allocation161_spill] sm:$0xff]  ;;  %vm20379_vm8 = vmmov %vm20354_vm0 }
 0x468   : > { %v6169_v57 = vsel %vm20344_vm12, %v20343_v37, %v20342_v30  ;;  %v6312_v25 = vsel %vm20346_vm3, 0.0, %v6167_v48  ;;  %v6171_v42 = vsel %vm20349_vm14, %v20348_v54, %v20347_v28  ;;  %v20353_v60 = vmov %v20347_v28  ;;  %10530 = vmatprep.mubr.msk.bf16.mxu0 %vm6435_vm13, %v20369_v29  ;;  %vm20386_vm3 = vmmov %vm20354_vm0 }
 0x469   : > { %v6313_v43 = vsel %vm20351_vm11, 0.0, %v6169_v57  ;;  %v6173_v56 = vsel %vm20354_vm0, %v20353_v60, %v20352_v9  ;;  %vm20356_vm15 = vnez %v20355_v46  ;;  %v20358_v5 = vrot.slane %v20357_v24, 2  ;;  %v20376_v57 = vld [vmem:[#allocation164_spill] sm:$0xff]  ;;  %vm20390_vm14 = vmmov %vm20354_vm0 }
 0x46a   : > { %v6314_v10 = vsel %vm20356_vm15, 0.0, %v6171_v42  ;;  %v20359_v23 = vmov %v20352_v9  ;;  %v16113_v2 = vpack.c.bf16 %v6313_v43, %v6312_v25  ;;  %vm20363_vm7 = vnez %v20362_v12  ;;  %v20383_v9 = vld [vmem:[#allocation158_spill] sm:$0xff]  ;;  %vm20401_vm15 = vmmov %vm20360_vm1 }
 0x46b   : > { %v6175_v58 = vsel %vm20360_vm1, %v20359_v23, %v20358_v5  ;;  %v6315_v61 = vsel %vm20363_vm7, 0.0, %v6173_v56  ;;  %v20364_v55 = vrot.slane %v15738_v63, 2  ;;  %v20365_v0 = vmov %v20358_v5 }
 0x46c   : > { %vm20368_vm2 = vnez %v20367_v33  ;;  %v16126_v18 = vpack.c.bf16 %v6315_v61, %v6314_v10  ;;  %vm20371_vm4 = vnez %v20370_v20  ;;  %v20373_v48 = vrot.slane %v20372_v38, 2  ;;  %v20387_v10 = vld [vmem:[#allocation171_spill] sm:$0xff]  ;;  %v20398_v33 = vld [vmem:[#allocation173_spill] sm:$0xff] }
 0x46d   : > { %v6177_v4 = vsel %vm20366_vm6, %v20365_v0, %v20364_v55  ;;  %v6316_v52 = vsel %vm20368_vm2, 0.0, %v6175_v58  ;;  %v20374_v30 = vmov %v20364_v55  ;;  %v20377_v16 = vrot.slane %v20376_v57, 2  ;;  %v20391_v58 = vld [vmem:[#allocation120_spill] sm:$0xff]  ;;  %v20396_v0 = vld [vmem:[#allocation121_spill] sm:$0xff]  ;;  %vm20409_vm6 = vmmov %vm20360_vm1 }
 0x46e   : > { %v6317_v15 = vsel %vm20371_vm4, 0.0, %v6177_v4  ;;  %v6179_v37 = vsel %vm20375_vm5, %v20374_v30, %v20373_v48  ;;  %v20378_v25 = vmov %v20373_v48  ;;  %vm20382_vm12 = vnez %v20381_v40  ;;  %v20403_v48 = vld [vmem:[#allocation172_spill] sm:$0xff]  ;;  %vm20414_vm4 = vmmov %vm20360_vm1 }
 0x46f   : > { %v6181_v28 = vsel %vm20379_vm8, %v20378_v25, %v20377_v16  ;;  %v16140_v54 = vpack.c.bf16 %v6317_v15, %v6316_v52  ;;  %v6318_v42 = vsel %vm19796_vm10, 0.0, %v6179_v37  ;;  %v20384_v60 = vrot.slane %v20383_v9, 2  ;;  %vm20395_vm10 = vmmov %vm20354_vm0  ;;  %v20406_v25 = vld [vmem:[#allocation123_spill] sm:$0xff]  ;;  %v20412_v9 = vld [vmem:[#allocation125_spill] sm:$0xff] }
 0x470   : > { %v6319_v43 = vsel %vm20382_vm12, 0.0, %v6181_v28  ;;  %v20385_v63 = vmov %v20377_v16  ;;  %v20388_v24 = vrot.slane %v20387_v10, 2  ;;  %vm20392_vm11 = vnez %v20391_v58  ;;  %vm20415_vm5 = vmmov %vm20360_vm1  ;;  %v20416_v10 = vld [vmem:[#allocation126_spill] sm:$0xff]  ;;  %v20438_v15 = vld [vmem:[#allocation167_spill] sm:$0xff] }
 0x471   : > { %v6183_v56 = vsel %vm20386_vm3, %v20385_v63, %v20384_v60  ;;  %v16151_v46 = vpack.c.bf16 %v6319_v43, %v6318_v42  ;;  %v20389_v5 = vmov %v20384_v60  ;;  %v20393_v12 = vrot.slane %v15818_v21, 2  ;;  %v20410_v42 = vld [vmem:[#allocation124_spill] sm:$0xff]  ;;  %vm20420_vm3 = vmmov %vm20360_vm1 }
 0x472   : > { %v6185_v23 = vsel %vm20390_vm14, %v20389_v5, %v20388_v24  ;;  %v6320_v34 = vsel %vm20392_vm11, 0.0, %v6183_v56  ;;  %v20394_v61 = vmov %v20388_v24  ;;  %vm20397_vm0 = vnez %v20396_v0  ;;  %v20418_v5 = vld [vmem:[#allocation127_spill] sm:$0xff]  ;;  %vm20423_vm14 = vmmov %vm20360_vm1 }
 0x473   : > { %v6187_v55 = vsel %vm20395_vm10, %v20394_v61, %v20393_v12  ;;  %v6321_v4 = vsel %vm20397_vm0, 0.0, %v6185_v23  ;;  %v20399_v52 = vrot.slane %v20398_v33, 2  ;;  %v20400_v29 = vmov %v20393_v12  ;;  %v20426_v61 = vld [vmem:[#allocation150_spill] sm:$0xff]  ;;  %v20429_v0 = vld [vmem:[#allocation151_spill] sm:$0xff]  ;;  %v20434_v33 = vld [vmem:[#allocation160_spill] sm:$0xff] }
 0x474   : > { %v6322_v38 = vsel %vm19816_vm9, 0.0, %v6187_v55  ;;  %v20404_v30 = vrot.slane %v20403_v48, 2  ;;  %v16179_v16 = vpack.c.bf16 %v6321_v4, %v6320_v34  ;;  %vm20407_vm7 = vnez %v20406_v25  ;;  %v20424_v34 = vld [vmem:[#allocation128_spill] sm:$0xff]  ;;  %v20427_v55 = vld [vmem:[#allocation129_spill] sm:$0xff]  ;;  %v20430_v4 = vld [vmem:[#allocation154_spill] sm:$0xff] }
 0x475   : > { %v6189_v20 = vsel %vm20401_vm15, %v20400_v29, %v20399_v52  ;;  %v20405_v37 = vmov %v20399_v52  ;;  %vm20411_vm9 = vnez %v20410_v42  ;;  %vm20413_vm2 = vnez %v20412_v9  ;;  %v20435_v52 = vld [vmem:[#allocation136_spill] sm:$0xff]  ;;  %v20436_v29 = vld [vmem:[#allocation163_spill] sm:$0xff]  ;;  %v20440_v48 = vld [vmem:[#allocation61_spill] sm:$0xff] }
 0x476   : > { %v6191_v57 = vsel %vm20360_vm1, %v20405_v37, %v20404_v30  ;;  %v6323_v28 = vsel %vm20407_vm7, 0.0, %v6189_v20  ;;  %v20408_v21 = vmov %v20404_v30  ;;  %v6195_v13 = vsel %vm20414_vm4, %v6192_v44, %v6194_v14  ;;  %v20437_v20 = vld [vmem:[#allocation165_spill] sm:$0xff]  ;;  %v20441_v30 = vld [vmem:[#allocation170_spill] sm:$0xff]  ;;  %v20444_v25 = vld [vmem:[#allocation20_spill] sm:$0xff] }
 0x477   : > { %v6193_v49 = vsel %vm20409_vm6, %v20408_v21, %v6192_v44  ;;  %v6324_v40 = vsel %vm20411_vm9, 0.0, %v6191_v57  ;;  %v16190_v43 = vpack.c.bf16 %v6323_v28, %v6322_v38  ;;  %v6197_v63 = vsel %vm20415_vm5, %v6194_v14, %v6196_v6  ;;  %v20421_v44 = vld [vmem:[#allocation148_spill] sm:$0xff]  ;;  %v20442_v37 = vld [vmem:[#allocation137_spill] sm:$0xff]  ;;  %v20448_v42 = vld [vmem:[#allocation166_spill] sm:$0xff] }
 0x478   : > { %v6325_v60 = vsel %vm20413_vm2, 0.0, %v6193_v49  ;;  %vm20417_vm8 = vnez %v20416_v10  ;;  %vm20419_vm12 = vnez %v20418_v5  ;;  %v6199_v22 = vsel %vm20420_vm3, %v6196_v6, %v6198_v45  ;;  %10531 = vmatmul.mubr.msk.bf16.gmra.mrb[72].mxu0 %vm6435_vm13, %v20421_v44  ;;  %v20439_v38 = vld [vmem:[#allocation168_spill] sm:$0xff]  ;;  %v20443_v57 = vld [vmem:[#allocation73_spill] sm:$0xff]  ;;  %v20458_v10 = vld [vmem:[#allocation143_spill] sm:$0xff] }
 0x479   : > { %v16204_v56 = vpack.c.bf16 %v6325_v60, %v6324_v40  ;;  %v6326_v24 = vsel %vm20417_vm8, 0.0, %v6195_v13  ;;  %v6327_v23 = vsel %vm20419_vm12, 0.0, %v6197_v63  ;;  %v20422_v14 = vrot.slane %v15859_v8, 2  ;;  %10534 = vmatprep.mubr.msk.bf16.mxu0 %vm6435_vm13, %v20426_v61  ;;  %v20431_v8 = vld [vmem:[#allocation156_spill] sm:$0xff]  ;;  %v20446_v21 = vld [vmem:[#allocation149_spill] sm:$0xff]  ;;  %v20453_v63 = vld [vmem:[#allocation135_spill] sm:$0xff] }
 0x47a   : > { %v7260_v19 = vpack.c.bf16 %v6327_v23, %v6326_v24  ;;  %vm20425_vm11 = vnez %v20424_v34  ;;  %vm20428_vm10 = vnez %v20427_v55  ;;  %v20445_v28 = vld [vmem:[#allocation140_spill] sm:$0xff]  ;;  %v20449_v40 = vld [vmem:[#allocation169_spill] sm:$0xff]  ;;  %v20459_v24 = vld [vmem:[#allocation155_spill] sm:$0xff]  ;;  %vm7944_vm0 = vcmask 1041409  }
 0x47b   : > { %v6201_v58 = vsel %vm20423_vm14, %v6198_v45, %v20422_v14  ;;  %v6328_v12 = vsel %vm20425_vm11, 0.0, %v6199_v22  ;;  %v20433_v45 = vld [vmem:[#allocation159_spill] sm:$0xff]  ;;  %v20447_v49 = vld [vmem:[#allocation152_spill] sm:$0xff]  ;;  %v20450_v9 = vld [vmem:[#allocation145_spill] sm:$0xff]  ;;  %vm7947_vm15 = vcmask 1042434   ;;  %vm7950_vm1 = vcmask 1043459  }
 0x47c   : > { %v6329_v1 = vsel %vm20428_vm10, 0.0, %v6201_v58  ;;  %v20451_v60 = vld [vmem:[#allocation133_spill] sm:$0xff]  ;;  %vm7956_vm7 = vcmask 1045509   ;;  %vm7953_vm6 = vcmask 1044484   ;;  %vm7959_vm9 = vcmask 1046534  }
 0x47d   : > { %v7261_v6 = vpack.c.bf16 %v6329_v1, %v6328_v12  ;;  %v20452_v13 = vld [vmem:[#allocation153_spill] sm:$0xff]  ;;  %vm7962_vm2 = vcmask 1047559   ;;  %vm20497_vm4 = vcmask 261120   ;;  %vm9022_vm12 = vcmask 785408  }
 0x47e   : > { %vm20498_vm5 = vmmov %vm20497_vm4 }
 0x47f   : > { %vm20499_vm8 = vmmov %vm20497_vm4 }
 0x480   : > { %10535 = vmatmul.mubr.msk.bf16.gmra.mrb[76].mxu0 %vm6435_vm13, %v20429_v0  ;;  %vm20500_vm3 = vmmov %vm20497_vm4 }
 0x481   : > { %10538 = vmatprep.mubr.msk.bf16.mxu0 %vm6435_vm13, %v20430_v4  ;;  %vm20516_vm14 = vmmov %vm20500_vm3 }
 0x482   : > { %vm20517_vm11 = vmmov %vm20500_vm3 }
 0x483   : > { %vm20518_vm10 = vmmov %vm20500_vm3 }
 0x488   : > { %10539 = vmatmul.mubr.msk.bf16.gmra.mrb[80].mxu0 %vm6435_vm13, %v20431_v8 }
 0x489   : > { %10542 = vmatprep.mubr.msk.bf16.mxu0 %vm6435_vm13, %v20432_v47 }
 0x490   : > { %10543 = vmatmul.mubr.msk.bf16.gmra.mrb[84].mxu0 %vm6435_vm13, %v20433_v45 }
 0x491   : > { %10546 = vmatprep.mubr.msk.bf16.mxu0 %vm6435_vm13, %v20434_v33 }
 0x498   : > { %10547 = vmatmul.mubr.msk.bf16.gmra.mrb[88].mxu0 %vm6435_vm13, %v20435_v52 }
 0x499   : > { %10550 = vmatprep.mubr.msk.bf16.mxu0 %vm6435_vm13, %v20436_v29 }
 0x4a0   : > { %10551 = vmatmul.mubr.msk.bf16.gmra.mrb[92].mxu0 %vm6435_vm13, %v20437_v20 }
 0x4a1   : > { %10554 = vmatprep.mubr.msk.bf16.mxu0 %vm6435_vm13, %v20438_v15 }
 0x4a8   : > { %10555 = vmatmul.mubr.msk.bf16.gmra.mrb[96].mxu0 %vm6435_vm13, %v20439_v38 }
 0x4a9   : > { %10558 = vmatprep.mubr.msk.bf16.mxu0 %vm6435_vm13, %v20440_v48 }
 0x4b0   : > { %10559 = vmatmul.mubr.msk.bf16.gmra.mrb[100].mxu0 %vm6435_vm13, %v20441_v30 }
 0x4b1   : > { %10562 = vmatprep.mubr.msk.bf16.mxu0 %vm6435_vm13, %v20442_v37 }
 0x4b8   : > { %10563 = vmatmul.mubr.msk.bf16.gmra.mrb[104].mxu0 %vm6435_vm13, %v20443_v57 }
 0x4b9   : > { %10566 = vmatprep.mubr.msk.bf16.mxu0 %vm6435_vm13, %v20444_v25 }
 0x4c0   : > { %10567 = vmatmul.mubr.msk.bf16.gmra.mrb[108].mxu0 %vm6435_vm13, %v20445_v28 }
 0x4c1   : > { %10570 = vmatprep.mubr.msk.bf16.mxu0 %vm6435_vm13, %v20446_v21 }
 0x4c8   : > { %10571 = vmatmul.mubr.msk.bf16.gmra.mrb[112].mxu0 %vm6435_vm13, %v20447_v49 }
 0x4c9   : > { %10574 = vmatprep.mubr.msk.bf16.mxu0 %vm6435_vm13, %v20448_v42 }
 0x4d0   : > { %10575 = vmatmul.mubr.msk.bf16.gmra.mrb[116].mxu0 %vm6435_vm13, %v20449_v40 }
 0x4d1   : > { %10578 = vmatprep.mubr.msk.bf16.mxu0 %vm6435_vm13, %v15836_v3  ;;  %v20454_v3 = vld [vmem:[#allocation162_spill] sm:$0xff] }
 0x4d8   : > { %10579 = vmatmul.mubr.msk.bf16.gmra.mrb[120].mxu0 %vm6435_vm13, %v15838_v51  ;;  %v20455_v51 = vld [vmem:[#allocation54_spill] sm:$0xff] }
 0x4d9   : > { %10582 = vmatprep.mubr.msk.bf16.mxu0 %vm6435_vm13, %v15887_v26  ;;  %v20456_v26 = vld [vmem:[#allocation71_spill] sm:$0xff] }
 0x4e0   : > { %10583 = vmatmul.mubr.msk.bf16.gmra.mrb[124].mxu0 %vm6435_vm13, %v15889_v59  ;;  %v20457_v59 = vld [vmem:[#allocation105_spill] sm:$0xff] }
 0x4e1   : > { %10594 = vmatprep.mubr.msk.bf16.mxu0 %vm6435_vm13, %v20450_v9 }
 0x4e8   : > { %10595 = vmatmul.mubr.msk.bf16.vlgmr.msra.gmra.mrb[64].mxu0 %vm6435_vm13, %v20451_v60 }
 0x4e9   : > { %10598 = vmatprep.mubr.msk.bf16.mxu0 %vm6435_vm13, %v20452_v13 }
 0x4f0   : > { %10599 = vmatmul.mubr.msk.bf16.gmra.mrb[68].mxu0 %vm6435_vm13, %v20453_v63 }
 0x4f1   : > { %10602 = vmatprep.mubr.msk.bf16.mxu0 %vm6435_vm13, %v20454_v3 }
 0x4f8   : > { %10603 = vmatmul.mubr.msk.bf16.gmra.mrb[72].mxu0 %vm6435_vm13, %v20455_v51 }
 0x4f9   : > { %10606 = vmatprep.mubr.msk.bf16.mxu0 %vm6435_vm13, %v20456_v26 }
 0x500   : > { %10607 = vmatmul.mubr.msk.bf16.gmra.mrb[76].mxu0 %vm6435_vm13, %v20457_v59 }
 0x501   : > { %10610 = vmatprep.mubr.msk.bf16.mxu0 %vm6435_vm13, %v20458_v10 }
 0x508   : > { %10611 = vmatmul.mubr.msk.bf16.gmra.mrb[80].mxu0 %vm6435_vm13, %v20459_v24 }
 0x509   : > { %10614 = vmatprep.mubr.msk.bf16.mxu0 %vm6435_vm13, %v15840_v32  ;;  %v16343_v32 = vld [vmem:[%s17747_s6] ss:$0 sm:$0xff] }
 0x510   : > { %10615 = vmatmul.mubr.msk.bf16.gmra.mrb[84].mxu0 %vm6435_vm13, %v15875_v27 }
 0x511   : > { %10618 = vmatprep.mubr.msk.bf16.mxu0 %vm6435_vm13, %v15917_v31 }
 0x518   : > { %10619 = vmatmul.mubr.msk.bf16.gmra.mrb[88].mxu0 %vm6435_vm13, %v15928_v53 }
 0x519   : > { %10622 = vmatprep.mubr.msk.bf16.mxu0 %vm6435_vm13, %v15939_v39 }
 0x520   : > { %10623 = vmatmul.mubr.msk.bf16.gmra.mrb[92].mxu0 %vm6435_vm13, %v15970_v36 }
 0x521   : > { %10626 = vmatprep.mubr.msk.bf16.mxu0 %vm6435_vm13, %v15981_v17 }
 0x528   : > { %10627 = vmatmul.mubr.msk.bf16.gmra.mrb[96].mxu0 %vm6435_vm13, %v15997_v62 }
 0x529   : > { %10630 = vmatprep.mubr.msk.bf16.mxu0 %vm6435_vm13, %v16013_v41 }
 0x530   : > { %10631 = vmatmul.mubr.msk.bf16.gmra.mrb[100].mxu0 %vm6435_vm13, %v16044_v50 }
 0x531   : > { %10634 = vmatprep.mubr.msk.bf16.mxu0 %vm6435_vm13, %v16055_v11 }
 0x538   : > { %10635 = vmatmul.mubr.msk.bf16.gmra.mrb[104].mxu0 %vm6435_vm13, %v16069_v7 }
 0x539   : > { %10638 = vmatprep.mubr.msk.bf16.mxu0 %vm6435_vm13, %v16083_v35 }
 0x540   : > { %10639 = vmatmul.mubr.msk.bf16.gmra.mrb[108].mxu0 %vm6435_vm13, %v16113_v2 }
 0x541   : > { %10642 = vmatprep.mubr.msk.bf16.mxu0 %vm6435_vm13, %v16126_v18 }
 0x548   : > { %10643 = vmatmul.mubr.msk.bf16.gmra.mrb[112].mxu0 %vm6435_vm13, %v16140_v54 }
 0x549   : > { %10646 = vmatprep.mubr.msk.bf16.mxu0 %vm6435_vm13, %v16151_v46 }
 0x550   : > { %10647 = vmatmul.mubr.msk.bf16.gmra.mrb[116].mxu0 %vm6435_vm13, %v16179_v16 }
 0x551   : > { %10650 = vmatprep.mubr.msk.bf16.mxu0 %vm6435_vm13, %v16190_v43 }
 0x558   : > { %10651 = vmatmul.mubr.msk.bf16.gmra.mrb[120].mxu0 %vm6435_vm13, %v16204_v56 }
 0x559   : > { %10654 = vmatprep.mubr.msk.bf16.mxu0 %vm6435_vm13, %v7260_v19 }
 0x560   : > { %10655 = vmatmul.mubr.msk.bf16.gmra.mrb[124].mxu0 %vm6435_vm13, %v7261_v6 }
 0x5bb   : > { %v10596_v27 = vpop.f32.mrb[64].mxu0 }
 0x5bc   : > { %v7753_v31 = vadd.f32 %v10596_v27, %v16343_v32  ;;  %v7425_v53 = vpop.f32.mrb[65].mxu0 }
 0x5bd   : > { %v7751_v39 = vadd.f32 %v16343_v32, %v7425_v53  ;;  %v10597_v36 = vpop.f32.mrb[66].mxu0 }
 0x5be   : > { %v16347_v17 = vmax.f32 %v7753_v31, 0.0  ;;  %v7754_v62 = vadd.f32 %v10597_v36, %v16343_v32  ;;  %v7428_v41 = vpop.f32.mrb[67].mxu0 }
 0x5bf   : > { %v16350_v50 = vmax.f32 %v7751_v39, 0.0  ;;  %v7752_v11 = vadd.f32 %v16343_v32, %v7428_v41 }
 0x5c0   : > { %v16353_v7 = vmax.f32 %v7754_v62, 0.0  ;;  %v8601_v35 = vrot.slane %v16347_v17, 3  ;;  %v8737_v2 = vrot.slane %v16347_v17, 4  ;;  %v8072_v18 = vrot.slane %v16347_v17, 7 }
 0x5c1   : > { %v16358_v54 = vmax.f32 %v7752_v11, 0.0  ;;  %v8598_v46 = vrot.slane %v16350_v50, 5  ;;  %v8734_v16 = vrot.slane %v16350_v50, 6  ;;  %v8070_v43 = vrot.slane %v16350_v50, 1 }
 0x5c2   : > { %v8603_v56 = vrot.slane %v16353_v7, 2  ;;  %v8739_v5 = vrot.slane %v16353_v7, 3  ;;  %v8074_v23 = vrot.slane %v16353_v7, 6  ;;  %v8206_v22 = vrot.slane %v16350_v50, 2 }
 0x5c3   : > { %v10600_v44 = vpop.f32.mrb[68].mxu0  ;;  %v8599_v19 = vrot.slane %v16358_v54, 4  ;;  %v8735_v14 = vrot.slane %v16358_v54, 5  ;;  %v8071_v58 = vsel %vm7944_vm0, %v16358_v54, %v8070_v43  ;;  %v8207_v34 = vrot.slane %v16358_v54, 1 }
 0x5c4   : > { %v7757_v12 = vadd.f32 %v10600_v44, %v16343_v32  ;;  %v7441_v61 = vpop.f32.mrb[69].mxu0  ;;  %v8073_v55 = vsel %vm7947_vm15, %v8072_v18, %v8071_v58  ;;  %v8210_v1 = vrot.slane %v16353_v7, 7  ;;  %v8870_v6 = vrot.slane %v16350_v50, 7 }
 0x5c5   : > { %v7755_v0 = vadd.f32 %v16343_v32, %v7441_v61  ;;  %v10601_v4 = vpop.f32.mrb[70].mxu0  ;;  %v8600_v8 = vsel %vm7944_vm0, %v8599_v19, %v8598_v46  ;;  %v8736_v47 = vsel %vm7944_vm0, %v8735_v14, %v8734_v16  ;;  %v8075_v45 = vsel %vm7950_vm1, %v8074_v23, %v8073_v55 }
 0x5c6   : > { %v16380_v33 = vmax.f32 %v7757_v12, 0.0  ;;  %v7758_v52 = vadd.f32 %v10601_v4, %v16343_v32  ;;  %v7444_v29 = vpop.f32.mrb[71].mxu0  ;;  %v8602_v20 = vsel %vm7947_vm15, %v8601_v35, %v8600_v8  ;;  %v8738_v15 = vsel %vm7947_vm15, %v8737_v2, %v8736_v47 }
 0x5c7   : > { %v16385_v38 = vmax.f32 %v7755_v0, 0.0  ;;  %v7756_v48 = vadd.f32 %v16343_v32, %v7444_v29  ;;  %v8604_v30 = vsel %vm7950_vm1, %v8603_v56, %v8602_v20  ;;  %v8740_v37 = vsel %vm7950_vm1, %v8739_v5, %v8738_v15 }
 0x5c8   : > { %v16390_v57 = vmax.f32 %v7758_v52, 0.0  ;;  %v8608_v25 = vrot.slane %v16380_v33, 7  ;;  %v8080_v28 = vrot.slane %v16380_v33, 3  ;;  %v8208_v21 = vsel %vm7944_vm0, %v8207_v34, %v8206_v22 }
 0x5c9   : > { %20460 = vst [vmem:[#allocation174_spill] sm:$0xff] %v16385_v38  ;;  %v16395_v49 = vmax.f32 %v7756_v48, 0.0  ;;  %v8605_v42 = vrot.slane %v16385_v38, 1  ;;  %v8741_v40 = vrot.slane %v16385_v38, 2  ;;  %v8076_v9 = vrot.slane %v16385_v38, 5  ;;  %v11197_v48 = vld [vmem:[%s17748_s7 + $0x40] sm:$0xff]  }
 0x5ca   : > { %v8610_v60 = vrot.slane %v16390_v57, 6  ;;  %v8746_v13 = vrot.slane %v16390_v57, 7  ;;  %v8082_v63 = vrot.slane %v16390_v57, 2  ;;  %v8209_v3 = vsel %vm7947_vm15, %v16347_v17, %v8208_v21  ;;  %10000 = vmatprep.subr.bf16.mxu1 %v11197_v48 }
 0x5cb   : > { %v10604_v51 = vpop.f32.mrb[72].mxu0  ;;  %v8606_v26 = vsel %vm7953_vm6, %v8605_v42, %v8604_v30  ;;  %v8742_v59 = vsel %vm7953_vm6, %v8741_v40, %v8740_v37  ;;  %v8743_v10 = vrot.slane %v16395_v49, 1  ;;  %v8077_v24 = vsel %vm7953_vm6, %v8076_v9, %v8075_v45 }
 0x5cc   : > { %v7761_v27 = vadd.f32 %v10604_v51, %v16343_v32  ;;  %v7457_v31 = vpop.f32.mrb[73].mxu0  ;;  %v8607_v53 = vsel %vm7956_vm7, %v16395_v49, %v8606_v26  ;;  %v8078_v39 = vrot.slane %v16395_v49, 4  ;;  %v8211_v36 = vsel %vm7950_vm1, %v8210_v1, %v8209_v3 }
 0x5cd   : > { %v7759_v62 = vadd.f32 %v16343_v32, %v7457_v31  ;;  %v10605_v41 = vpop.f32.mrb[74].mxu0  ;;  %v8609_v11 = vsel %vm7959_vm9, %v8608_v25, %v8607_v53  ;;  %v8744_v35 = vsel %vm7956_vm7, %v8743_v10, %v8742_v59  ;;  %v8212_v2 = vrot.slane %v16385_v38, 6 }
 0x5ce   : > { %v16418_v18 = vmax.f32 %v7761_v27, 0.0  ;;  %v7762_v46 = vadd.f32 %v10605_v41, %v16343_v32  ;;  %v7460_v16 = vpop.f32.mrb[75].mxu0  ;;  %v16422_v43 = vsel %vm7962_vm2, %v8610_v60, %v8609_v11  ;;  %v8745_v56 = vsel %vm7959_vm9, %v16380_v33, %v8744_v35 }
 0x5cf   : > { %v16426_v5 = vmax.f32 %v7759_v62, 0.0  ;;  %v7760_v23 = vadd.f32 %v16343_v32, %v7460_v16  ;;  %v16430_v22 = vsel %vm7962_vm2, %v8746_v13, %v8745_v56  ;;  %v8079_v44 = vsel %vm7956_vm7, %v8078_v39, %v8077_v24 }
 0x5d0   : > { %20461 = vst [vmem:[#allocation175_spill] sm:$0xff] %v16418_v18  ;;  %v16433_v19 = vmax.f32 %v7762_v46, 0.0  ;;  %v8615_v14 = vrot.slane %v16418_v18, 3  ;;  %v8751_v58 = vrot.slane %v16418_v18, 4  ;;  %v8081_v34 = vsel %vm7959_vm9, %v8080_v28, %v8079_v44 }
 0x5d1   : > { %v16438_v12 = vmax.f32 %v7760_v23, 0.0  ;;  %v8612_v61 = vrot.slane %v16426_v5, 5  ;;  %v8748_v55 = vrot.slane %v16426_v5, 6  ;;  %v16443_v1 = vsel %vm7962_vm2, %v8082_v63, %v8081_v34 }
 0x5d2   : > { %20462 = vst [vmem:[#allocation134_spill] sm:$0xff] %v16433_v19  ;;  %v8617_v0 = vrot.slane %v16433_v19, 2  ;;  %v8753_v4 = vrot.slane %v16433_v19, 3  ;;  %v8084_v8 = vrot.slane %v16426_v5, 1  ;;  %v8086_v47 = vrot.slane %v16418_v18, 7 }
 0x5d3   : > { %v10608_v45 = vpop.f32.mrb[76].mxu0  ;;  %v8613_v52 = vrot.slane %v16438_v12, 4  ;;  %v8749_v29 = vrot.slane %v16438_v12, 5  ;;  %v8088_v20 = vrot.slane %v16433_v19, 6  ;;  %v8213_v15 = vsel %vm7953_vm6, %v8212_v2, %v8211_v36 }
 0x5d4   : > { %v7765_v30 = vadd.f32 %v10608_v45, %v16343_v32  ;;  %v7473_v37 = vpop.f32.mrb[77].mxu0  ;;  %v8085_v25 = vsel %vm7944_vm0, %v16438_v12, %v8084_v8  ;;  %v8214_v28 = vrot.slane %v16395_v49, 5  ;;  %v8216_v21 = vrot.slane %v16380_v33, 4 }
 0x5d5   : > { %v7763_v42 = vadd.f32 %v16343_v32, %v7473_v37  ;;  %v10609_v40 = vpop.f32.mrb[78].mxu0  ;;  %v8614_v9 = vsel %vm7944_vm0, %v8613_v52, %v8612_v61  ;;  %v8750_v60 = vsel %vm7944_vm0, %v8749_v29, %v8748_v55  ;;  %v8087_v13 = vsel %vm7947_vm15, %v8086_v47, %v8085_v25  ;;  %v11198_v55 = vld [vmem:[%s17748_s7] sm:$0xff]  }
 0x5d6   : > { %v16465_v63 = vmax.f32 %v7765_v30, 0.0  ;;  %v7766_v3 = vadd.f32 %v10609_v40, %v16343_v32  ;;  %v7476_v51 = vpop.f32.mrb[79].mxu0  ;;  %v8616_v26 = vsel %vm7947_vm15, %v8615_v14, %v8614_v9  ;;  %v8752_v59 = vsel %vm7947_vm15, %v8751_v58, %v8750_v60  ;;  %10001 = vmatpush3.bf16.msra.mxu1 %v11198_v55 }
 0x5d7   : > { %v16470_v10 = vmax.f32 %v7763_v42, 0.0  ;;  %v7764_v24 = vadd.f32 %v16343_v32, %v7476_v51  ;;  %v8618_v27 = vsel %vm7950_vm1, %v8617_v0, %v8616_v26  ;;  %v8754_v31 = vsel %vm7950_vm1, %v8753_v4, %v8752_v59 }
 0x5d8   : > { %20463 = vst [vmem:[#allocation130_spill] sm:$0xff] %v16465_v63  ;;  %v16475_v53 = vmax.f32 %v7766_v3, 0.0  ;;  %v8622_v39 = vrot.slane %v16465_v63, 7  ;;  %v8089_v36 = vsel %vm7950_vm1, %v8088_v20, %v8087_v13  ;;  %v8094_v62 = vrot.slane %v16465_v63, 3 }
 0x5d9   : > { %20464 = vst [vmem:[#allocation132_spill] sm:$0xff] %v16470_v10  ;;  %v16480_v41 = vmax.f32 %v7764_v24, 0.0  ;;  %v8619_v11 = vrot.slane %v16470_v10, 1  ;;  %v8755_v35 = vrot.slane %v16470_v10, 2  ;;  %v8090_v2 = vrot.slane %v16470_v10, 5 }
 0x5da   : > { %20465 = vst [vmem:[#allocation139_spill] sm:$0xff] %v16475_v53  ;;  %v8624_v46 = vrot.slane %v16475_v53, 6  ;;  %v8760_v16 = vrot.slane %v16475_v53, 7  ;;  %v8096_v56 = vrot.slane %v16475_v53, 2  ;;  %v8215_v23 = vsel %vm7956_vm7, %v8214_v28, %v8213_v15 }
 0x5db   : > { %20466 = vst [vmem:[#allocation131_spill] sm:$0xff] %v16480_v41  ;;  %v10612_v44 = vpop.f32.mrb[80].mxu0  ;;  %v8620_v14 = vsel %vm7953_vm6, %v8619_v11, %v8618_v27  ;;  %v8756_v58 = vsel %vm7953_vm6, %v8755_v35, %v8754_v31  ;;  %v8757_v34 = vrot.slane %v16480_v41, 1  ;;  %v8091_v61 = vsel %vm7953_vm6, %v8090_v2, %v8089_v36  ;;  %v11199_v11 = vld [vmem:[%s17748_s7 + $0x48] sm:$0xff]  }
 0x5dc   : > { %v7769_v0 = vadd.f32 %v10612_v44, %v16343_v32  ;;  %v7489_v4 = vpop.f32.mrb[81].mxu0  ;;  %v8621_v8 = vsel %vm7956_vm7, %v16480_v41, %v8620_v14  ;;  %v8092_v47 = vrot.slane %v16480_v41, 4  ;;  %v8217_v45 = vsel %vm7959_vm9, %v8216_v21, %v8215_v23  ;;  %10002 = vmatprep.subr.bf16.mxu1 %v11199_v11 }
 0x5dd   : > { %v7767_v52 = vadd.f32 %v16343_v32, %v7489_v4  ;;  %v10613_v29 = vpop.f32.mrb[82].mxu0  ;;  %v8623_v20 = vsel %vm7959_vm9, %v8622_v39, %v8621_v8  ;;  %v8758_v15 = vsel %vm7956_vm7, %v8757_v34, %v8756_v58  ;;  %v8218_v48 = vrot.slane %v16390_v57, 3 }
 0x5de   : > { %v16505_v30 = vmax.f32 %v7769_v0, 0.0  ;;  %v7770_v37 = vadd.f32 %v10613_v29, %v16343_v32  ;;  %v7492_v25 = vpop.f32.mrb[83].mxu0  ;;  %v8625_v28 = vsel %vm7962_vm2, %v8624_v46, %v8623_v20  ;;  %v8759_v21 = vsel %vm7959_vm9, %v16465_v63, %v8758_v15 }
 0x5df   : > { %v16511_v42 = vmax.f32 %v7767_v52, 0.0  ;;  %v7768_v40 = vadd.f32 %v16343_v32, %v7492_v25  ;;  %v11059_v9 = vpack.i.bf16 %v8625_v28, %v16422_v43  ;;  %v8761_v60 = vsel %vm7962_vm2, %v8760_v16, %v8759_v21 }
 0x5e0   : > { %20467 = vst [vmem:[#allocation141_spill] sm:$0xff] %v16505_v30  ;;  %v16516_v13 = vmax.f32 %v7770_v37, 0.0  ;;  %v11069_v3 = vpack.i.bf16 %v8761_v60, %v16430_v22  ;;  %v8093_v51 = vsel %vm7956_vm7, %v8092_v47, %v8091_v61  ;;  %v8219_v26 = vsel %vm7962_vm2, %v8218_v48, %v8217_v45 }
 0x5e1   : > { %v16521_v59 = vmax.f32 %v7768_v40, 0.0  ;;  %11060 = vrot.lane.b32.xlu0 %v11059_v9, %s11226_s19  ;;  %v8095_v24 = vsel %vm7959_vm9, %v8094_v62, %v8093_v51  ;;  %v8220_v27 = vrot.slane %v16426_v5, 2  ;;  %v8221_v43 = vrot.slane %v16438_v12, 1  ;;  %v11200_v62 = vld [vmem:[%s17748_s7 + $0x8] sm:$0xff]  }
 0x5e2   : > { %20468 = vst [vmem:[#allocation142_spill] sm:$0xff] %v16516_v13  ;;  %11070 = vrot.lane.b32.xlu1 %v11069_v3, %s11227_s20  ;;  %v8097_v22 = vsel %vm7962_vm2, %v8096_v56, %v8095_v24  ;;  %v8224_v31 = vrot.slane %v16433_v19, 7  ;;  %v8226_v39 = vrot.slane %v16470_v10, 6  ;;  %v8228_v36 = vrot.slane %v16480_v41, 5  ;;  %10003 = vmatpush3.bf16.msra.mxu1 %v11200_v62 }
 0x5e3   : > { %20469 = vst [vmem:[#allocation5_spill] sm:$0xff] %v16521_v59  ;;  %v10616_v35 = vpop.f32.mrb[84].mxu0  ;;  %v11064_v2 = vpack.i.bf16 %v8097_v22, %v16443_v1  ;;  %v8222_v46 = vsel %vm7944_vm0, %v8221_v43, %v8220_v27  ;;  %v8230_v16 = vrot.slane %v16465_v63, 4  ;;  %v8232_v56 = vrot.slane %v16475_v53, 3 }
 0x5e4   : > { %v7773_v23 = vadd.f32 %v10616_v35, %v16343_v32  ;;  %v7505_v44 = vpop.f32.mrb[85].mxu0  ;;  %v8223_v14 = vsel %vm7947_vm15, %v16418_v18, %v8222_v46  ;;  %v8871_v58 = vrot.slane %v16358_v54, 6  ;;  %v8873_v34 = vrot.slane %v16347_v17, 5 }
 0x5e5   : > { %v7771_v61 = vadd.f32 %v16343_v32, %v7505_v44  ;;  %11065 = vrot.lane.b32.xlu0 %v11064_v2, %s11226_s19  ;;  %v10617_v1 = vpop.f32.mrb[86].mxu0  ;;  %v8225_v55 = vsel %vm7950_vm1, %v8224_v31, %v8223_v14  ;;  %v8875_v0 = vrot.slane %v16353_v7, 4  ;;  %v8877_v4 = vrot.slane %v16385_v38, 3 }
 0x5e6   : > { %v16552_v8 = vmax.f32 %v7773_v23, 0.0  ;;  %v7774_v47 = vadd.f32 %v10617_v1, %v16343_v32  ;;  %v8227_v45 = vsel %vm7953_vm6, %v8226_v39, %v8225_v55  ;;  %v7508_v52 = vpop.f32.mrb[87].mxu0  ;;  %v8872_v29 = vsel %vm7944_vm0, %v8871_v58, %v8870_v6 }
 0x5e7   : > { %v16559_v20 = vmax.f32 %v7771_v61, 0.0  ;;  %v8229_v15 = vsel %vm7956_vm7, %v8228_v36, %v8227_v45  ;;  %v7772_v48 = vadd.f32 %v16343_v32, %v7508_v52  ;;  %v8874_v37 = vsel %vm7947_vm15, %v8873_v34, %v8872_v29 }
 0x5e8   : > { %20470 = vst [vmem:[#allocation4_spill] sm:$0xff] %v16552_v8  ;;  %v16564_v25 = vmax.f32 %v7774_v47, 0.0  ;;  %v8231_v28 = vsel %vm7959_vm9, %v8230_v16, %v8229_v15  ;;  %v8876_v21 = vsel %vm7950_vm1, %v8875_v0, %v8874_v37  ;;  %v8879_v40 = vrot.slane %v16395_v49, 2 }
 0x5e9   : > { %20471 = vst [vmem:[#allocation3_spill] sm:$0xff] %v16559_v20  ;;  %v8233_v9 = vsel %vm7962_vm2, %v8232_v56, %v8231_v28  ;;  %v16570_v60 = vmax.f32 %v7772_v48, 0.0  ;;  %v8878_v6 = vsel %vm7953_vm6, %v8877_v4, %v8876_v21  ;;  %v8881_v3 = vrot.slane %v16380_v33, 1 }
 0x5ea   : > { %20472 = vst [vmem:[#allocation2_spill] sm:$0xff] %v16564_v25  ;;  %v11074_v51 = vpack.i.bf16 %v8233_v9, %v8219_v26  ;;  %v8880_v24 = vsel %vm7956_vm7, %v8879_v40, %v8878_v6  ;;  %v8884_v27 = vrot.slane %v16426_v5, 7  ;;  %v8885_v43 = vrot.slane %v16438_v12, 6 }
 0x5eb   : > { %20473 = vst [vmem:[#allocation6_spill] sm:$0xff] %v16570_v60  ;;  %v8882_v22 = vsel %vm7959_vm9, %v8881_v3, %v8880_v24  ;;  %v8887_v31 = vrot.slane %v16418_v18, 5  ;;  %v8889_v39 = vrot.slane %v16433_v19, 4  ;;  %v8891_v36 = vrot.slane %v16470_v10, 3  ;;  %v10620_v11 = vpop.f32.mrb[88].mxu0 }
 0x5ec   : > { %11075 = vrot.lane.b32.xlu1 %v11074_v51, %s11227_s20  ;;  %v8883_v26 = vsel %vm7962_vm2, %v16390_v57, %v8882_v22  ;;  %v8886_v62 = vsel %vm7944_vm0, %v8885_v43, %v8884_v27  ;;  %v8893_v35 = vrot.slane %v16480_v41, 2  ;;  %v8895_v2 = vrot.slane %v16465_v63, 1  ;;  %v7521_v46 = vpop.f32.mrb[89].mxu0 }
 0x5ed   : > { %v8888_v16 = vsel %vm7947_vm15, %v8887_v31, %v8886_v62  ;;  %v8342_v56 = vrot.slane %v16350_v50, 3  ;;  %v8343_v23 = vrot.slane %v16358_v54, 2  ;;  %v8345_v44 = vrot.slane %v16347_v17, 1  ;;  %v10621_v14 = vpop.f32.mrb[90].mxu0 }
 0x5ee   : > { %v8890_v58 = vsel %vm7950_vm1, %v8889_v39, %v8888_v16  ;;  %v8348_v34 = vrot.slane %v16385_v38, 7  ;;  %v8350_v61 = vrot.slane %v16395_v49, 6  ;;  %v8352_v1 = vrot.slane %v16380_v33, 5  ;;  %v7524_v55 = vpop.f32.mrb[91].mxu0 }
 0x5ef   : > { %v8892_v0 = vsel %vm7953_vm6, %v8891_v36, %v8890_v58  ;;  %v8344_v4 = vsel %vm7944_vm0, %v8343_v23, %v8342_v56  ;;  %v8354_v47 = vrot.slane %v16390_v57, 4  ;;  %v8356_v45 = vrot.slane %v16426_v5, 3 }
 0x5f0   : > { %v8894_v52 = vsel %vm7956_vm7, %v8893_v35, %v8892_v0  ;;  %v8346_v29 = vsel %vm7947_vm15, %v8345_v44, %v8344_v4  ;;  %v8357_v15 = vrot.slane %v16438_v12, 2  ;;  %v8359_v48 = vrot.slane %v16418_v18, 1 }
 0x5f1   : > { %v8896_v37 = vsel %vm7959_vm9, %v8895_v2, %v8894_v52  ;;  %v8347_v28 = vsel %vm7950_vm1, %v16353_v7, %v8346_v29  ;;  %v8362_v21 = vrot.slane %v16470_v10, 7  ;;  %v8364_v40 = vrot.slane %v16480_v41, 6 }
 0x5f2   : > { %v8897_v9 = vsel %vm7962_vm2, %v16475_v53, %v8896_v37  ;;  %v8349_v6 = vsel %vm7953_vm6, %v8348_v34, %v8347_v28  ;;  %v8358_v3 = vsel %vm7944_vm0, %v8357_v15, %v8356_v45  ;;  %v8366_v51 = vrot.slane %v16465_v63, 5 }
 0x5f3   : > { %v11079_v24 = vpack.i.bf16 %v8897_v9, %v8883_v26  ;;  %v8351_v27 = vsel %vm7956_vm7, %v8350_v61, %v8349_v6  ;;  %v8360_v43 = vsel %vm7947_vm15, %v8359_v48, %v8358_v3  ;;  %v8368_v22 = vrot.slane %v16475_v53, 4  ;;  %v10624_v31 = vpop.f32.mrb[92].mxu0 }
 0x5f4   : > { %v8353_v39 = vsel %vm7959_vm9, %v8352_v1, %v8351_v27  ;;  %v8361_v36 = vsel %vm7950_vm1, %v16433_v19, %v8360_v43  ;;  %v7777_v62 = vadd.f32 %v10620_v11, %v16343_v32  ;;  %v7775_v35 = vadd.f32 %v16343_v32, %v7521_v46  ;;  %v7537_v2 = vpop.f32.mrb[93].mxu0 }
 0x5f5   : > { %11080 = vrot.lane.b32.xlu0 %v11079_v24, %s11228_s25  ;;  %v8355_v26 = vsel %vm7962_vm2, %v8354_v47, %v8353_v39  ;;  %v8363_v16 = vsel %vm7953_vm6, %v8362_v21, %v8361_v36  ;;  %v7778_v56 = vadd.f32 %v10621_v14, %v16343_v32  ;;  %v7776_v23 = vadd.f32 %v16343_v32, %v7524_v55  ;;  %v10625_v44 = vpop.f32.mrb[94].mxu0 }
 0x5f6   : > { %v8365_v58 = vsel %vm7956_vm7, %v8364_v40, %v8363_v16  ;;  %v16627_v34 = vmax.f32 %v7777_v62, 0.0  ;;  %v16629_v11 = vmax.f32 %v7775_v35, 0.0  ;;  %v7781_v46 = vadd.f32 %v10624_v31, %v16343_v32  ;;  %v7540_v61 = vpop.f32.mrb[95].mxu0 }
 0x5f7   : > { %v8367_v1 = vsel %vm7959_vm9, %v8366_v51, %v8365_v58  ;;  %v16633_v0 = vmax.f32 %v7778_v56, 0.0  ;;  %v16635_v4 = vmax.f32 %v7776_v23, 0.0  ;;  %v7779_v14 = vadd.f32 %v16343_v32, %v7537_v2 }
 0x5f8   : > { %20474 = vst [vmem:[#allocation66_spill] sm:$0xff] %v16627_v34  ;;  %20475 = vst [vmem:[#allocation69_spill] sm:$0xff] %v16629_v11  ;;  %v8369_v55 = vsel %vm7962_vm2, %v8368_v22, %v8367_v1  ;;  %v16639_v47 = vmax.f32 %v7781_v46, 0.0  ;;  %v7782_v45 = vadd.f32 %v10625_v44, %v16343_v32  ;;  %v7780_v52 = vadd.f32 %v16343_v32, %v7540_v61 }
 0x5f9   : > { %20476 = vst [vmem:[#allocation7_spill] sm:$0xff] %v16633_v0  ;;  %20477 = vst [vmem:[#allocation9_spill] sm:$0xff] %v16635_v4  ;;  %v11084_v29 = vpack.i.bf16 %v8369_v55, %v8355_v26  ;;  %v16643_v15 = vmax.f32 %v7779_v14, 0.0  ;;  %v8626_v48 = vrot.slane %v16511_v42, 5  ;;  %v8627_v37 = vrot.slane %v16521_v59, 4 }
 0x5fa   : > { %20478 = vst [vmem:[#allocation10_spill] sm:$0xff] %v16639_v47  ;;  %v16647_v28 = vmax.f32 %v7782_v45, 0.0  ;;  %v16649_v21 = vmax.f32 %v7780_v52, 0.0  ;;  %v8629_v40 = vrot.slane %v16505_v30, 3  ;;  %v8631_v9 = vrot.slane %v16516_v13, 2 }
 0x5fb   : > { %20479 = vst [vmem:[#allocation8_spill] sm:$0xff] %v16643_v15  ;;  %11085 = vrot.lane.b32.xlu1 %v11084_v29, %s11228_s25  ;;  %v10628_v6 = vpop.f32.mrb[96].mxu0  ;;  %v8628_v3 = vsel %vm7944_vm0, %v8627_v37, %v8626_v48  ;;  %v8633_v51 = vrot.slane %v16559_v20, 1  ;;  %v8636_v24 = vrot.slane %v16552_v8, 7  ;;  %v8638_v27 = vrot.slane %v16564_v25, 6 }
 0x5fc   : > { %20480 = vst [vmem:[#allocation11_spill] sm:$0xff] %v16647_v28  ;;  %20481 = vst [vmem:[#allocation12_spill] sm:$0xff] %v16649_v21  ;;  %v7785_v43 = vadd.f32 %v10628_v6, %v16343_v32  ;;  %v7553_v22 = vpop.f32.mrb[97].mxu0  ;;  %v8630_v31 = vsel %vm7947_vm15, %v8629_v40, %v8628_v3  ;;  %v8640_v39 = vrot.slane %v16629_v11, 5  ;;  %v8641_v36 = vrot.slane %v16635_v4, 4 }
 0x5fd   : > { %v7783_v62 = vadd.f32 %v16343_v32, %v7553_v22  ;;  %v10629_v35 = vpop.f32.mrb[98].mxu0  ;;  %v8632_v2 = vsel %vm7950_vm1, %v8631_v9, %v8630_v31  ;;  %v8643_v26 = vrot.slane %v16627_v34, 3  ;;  %v8645_v16 = vrot.slane %v16633_v0, 2 }
 0x5fe   : > { %v16666_v56 = vmax.f32 %v7785_v43, 0.0  ;;  %v7786_v23 = vadd.f32 %v10629_v35, %v16343_v32  ;;  %v7556_v44 = vpop.f32.mrb[99].mxu0  ;;  %v8634_v58 = vsel %vm7953_vm6, %v8633_v51, %v8632_v2  ;;  %v8642_v46 = vsel %vm7944_vm0, %v8641_v36, %v8640_v39 }
 0x5ff   : > { %v16671_v61 = vmax.f32 %v7783_v62, 0.0  ;;  %v7784_v1 = vadd.f32 %v16343_v32, %v7556_v44  ;;  %v8635_v14 = vsel %vm7956_vm7, %v16570_v60, %v8634_v58  ;;  %v8644_v55 = vsel %vm7947_vm15, %v8643_v26, %v8642_v46  ;;  %v11201_v62 = vld [vmem:[%s17748_s7 + $0x50] sm:$0xff]  }
 0x600   : > { %v16677_v45 = vmax.f32 %v7786_v23, 0.0  ;;  %v8637_v52 = vsel %vm7959_vm9, %v8636_v24, %v8635_v14  ;;  %v8646_v29 = vsel %vm7950_vm1, %v8645_v16, %v8644_v55  ;;  %v8647_v48 = vrot.slane %v16643_v15, 1  ;;  %10004 = vmatprep.subr.bf16.mxu1 %v11201_v62 }
 0x601   : > { %v16682_v37 = vmax.f32 %v7784_v1, 0.0  ;;  %v8639_v40 = vsel %vm7962_vm2, %v8638_v27, %v8637_v52  ;;  %v8650_v9 = vrot.slane %v16639_v47, 7  ;;  %v8652_v6 = vrot.slane %v16647_v28, 6 }
 0x602   : > { %v8648_v3 = vsel %vm7953_vm6, %v8647_v48, %v8646_v29  ;;  %v8098_v51 = vrot.slane %v16511_v42, 1  ;;  %v8100_v43 = vrot.slane %v16505_v30, 7  ;;  %v8102_v24 = vrot.slane %v16516_v13, 6 }
 0x603   : > { %v8649_v22 = vsel %vm7956_vm7, %v16649_v21, %v8648_v3  ;;  %v8104_v31 = vrot.slane %v16559_v20, 5  ;;  %v8106_v39 = vrot.slane %v16570_v60, 4  ;;  %v8108_v27 = vrot.slane %v16552_v8, 3  ;;  %v10632_v36 = vpop.f32.mrb[100].mxu0 }
 0x604   : > { %v8651_v35 = vsel %vm7959_vm9, %v8650_v9, %v8649_v22  ;;  %v8099_v2 = vsel %vm7944_vm0, %v16521_v59, %v8098_v51  ;;  %v8110_v26 = vrot.slane %v16564_v25, 2  ;;  %v8112_v16 = vrot.slane %v16629_v11, 1  ;;  %v7569_v23 = vpop.f32.mrb[101].mxu0 }
 0x605   : > { %v8653_v44 = vsel %vm7962_vm2, %v8652_v6, %v8651_v35  ;;  %v8101_v58 = vsel %vm7947_vm15, %v8100_v43, %v8099_v2  ;;  %v8114_v46 = vrot.slane %v16627_v34, 7  ;;  %v8116_v1 = vrot.slane %v16633_v0, 6  ;;  %v10633_v14 = vpop.f32.mrb[102].mxu0 }
 0x606   : > { %v11089_v55 = vpack.i.bf16 %v8653_v44, %v8639_v40  ;;  %v8103_v52 = vsel %vm7950_vm1, %v8102_v24, %v8101_v58  ;;  %v8113_v29 = vsel %vm7944_vm0, %v16635_v4, %v8112_v16  ;;  %v8118_v48 = vrot.slane %v16643_v15, 5  ;;  %v16712_v9 = vpop.f32.mrb[103].mxu0 }
 0x607   : > { %v8105_v6 = vsel %vm7953_vm6, %v8104_v31, %v8103_v52  ;;  %v8115_v3 = vsel %vm7947_vm15, %v8114_v46, %v8113_v29  ;;  %v8120_v51 = vrot.slane %v16649_v21, 4  ;;  %v8122_v43 = vrot.slane %v16639_v47, 3 }
 0x608   : > { %11090 = vrot.lane.b32.xlu0 %v11089_v55, %s11226_s19  ;;  %v8107_v40 = vsel %vm7956_vm7, %v8106_v39, %v8105_v6  ;;  %v8117_v24 = vsel %vm7950_vm1, %v8116_v1, %v8115_v3  ;;  %v8124_v22 = vrot.slane %v16647_v28, 2  ;;  %v7789_v62 = vadd.f32 %v10632_v36, %v16343_v32 }
 0x609   : > { %v8109_v35 = vsel %vm7959_vm9, %v8108_v27, %v8107_v40  ;;  %v8119_v31 = vsel %vm7953_vm6, %v8118_v48, %v8117_v24  ;;  %v7787_v2 = vadd.f32 %v16343_v32, %v7569_v23  ;;  %v8762_v16 = vrot.slane %v16511_v42, 6 }
 0x60a   : > { %v8111_v44 = vsel %vm7962_vm2, %v8110_v26, %v8109_v35  ;;  %v8121_v58 = vsel %vm7956_vm7, %v8120_v51, %v8119_v31  ;;  %v16729_v46 = vmax.f32 %v7789_v62, 0.0  ;;  %v8763_v39 = vrot.slane %v16521_v59, 5  ;;  %v11202_v26 = vld [vmem:[%s17748_s7 + $0x10] sm:$0xff]  }
 0x60b   : > { %v8123_v1 = vsel %vm7959_vm9, %v8122_v43, %v8121_v58  ;;  %v16733_v55 = vmax.f32 %v7787_v2, 0.0  ;;  %v8765_v27 = vrot.slane %v16505_v30, 4  ;;  %v8767_v36 = vrot.slane %v16516_v13, 3  ;;  %v16737_v52 = vpop.f32.mrb[104].mxu0  ;;  %10005 = vmatpush3.bf16.msra.mxu1 %v11202_v26 }
 0x60c   : > { %v8125_v23 = vsel %vm7962_vm2, %v8124_v22, %v8123_v1  ;;  %v8764_v29 = vsel %vm7944_vm0, %v8763_v39, %v8762_v16  ;;  %v8769_v48 = vrot.slane %v16559_v20, 2  ;;  %v8771_v6 = vrot.slane %v16570_v60, 1  ;;  %v16746_v3 = vpop.f32.mrb[105].mxu0 }
 0x60d   : > { %v11094_v51 = vpack.i.bf16 %v8125_v23, %v8111_v44  ;;  %v8766_v43 = vsel %vm7947_vm15, %v8765_v27, %v8764_v29  ;;  %v8774_v40 = vrot.slane %v16564_v25, 7  ;;  %v8776_v24 = vrot.slane %v16629_v11, 6  ;;  %v16751_v62 = vpop.f32.mrb[106].mxu0 }
 0x60e   : > { %v8768_v22 = vsel %vm7950_vm1, %v8767_v36, %v8766_v43  ;;  %v8777_v35 = vrot.slane %v16635_v4, 5  ;;  %v8779_v31 = vrot.slane %v16627_v34, 4  ;;  %v8781_v2 = vrot.slane %v16633_v0, 3  ;;  %v16757_v16 = vpop.f32.mrb[107].mxu0 }
 0x60f   : > { %11095 = vrot.lane.b32.xlu1 %v11094_v51, %s11226_s19  ;;  %v8770_v44 = vsel %vm7953_vm6, %v8769_v48, %v8768_v22  ;;  %v8783_v58 = vrot.slane %v16643_v15, 2  ;;  %v8785_v39 = vrot.slane %v16649_v21, 1  ;;  %v8788_v1 = vrot.slane %v16647_v28, 7 }
 0x610   : > { %v8772_v27 = vsel %vm7956_vm7, %v8771_v6, %v8770_v44  ;;  %v8778_v36 = vsel %vm7944_vm0, %v8777_v35, %v8776_v24  ;;  %v7790_v26 = vadd.f32 %v10633_v14, %v16343_v32  ;;  %v8234_v23 = vrot.slane %v16511_v42, 2  ;;  %v11203_v14 = vld [vmem:[%s17748_s7 + $0x58] sm:$0xff]  }
 0x611   : > { %v8773_v29 = vsel %vm7959_vm9, %v16552_v8, %v8772_v27  ;;  %v8780_v51 = vsel %vm7947_vm15, %v8779_v31, %v8778_v36  ;;  %v8235_v48 = vrot.slane %v16521_v59, 1  ;;  %v8238_v43 = vrot.slane %v16516_v13, 7  ;;  %v11204_v35 = vld [vmem:[%s17748_s7 + $0x18] sm:$0xff]   ;;  %v11205_v31 = vld [vmem:[%s17748_s7 + $0x60] sm:$0xff]   ;;  %10006 = vmatprep.subr.bf16.mxu1 %v11203_v14 }
 0x612   : > { %v8775_v22 = vsel %vm7962_vm2, %v8774_v40, %v8773_v29  ;;  %v8782_v10 = vsel %vm7950_vm1, %v8781_v2, %v8780_v51  ;;  %v16775_v6 = vmax.f32 %v7790_v26, 0.0  ;;  %v8240_v24 = vrot.slane %v16559_v20, 6  ;;  %10007 = vmatpush3.bf16.msra.mxu1 %v11204_v35 }
 0x613   : > { %v8784_v40 = vsel %vm7953_vm6, %v8783_v58, %v8782_v10  ;;  %v8236_v2 = vsel %vm7944_vm0, %v8235_v48, %v8234_v23  ;;  %v8242_v44 = vrot.slane %v16570_v60, 5  ;;  %v8244_v27 = vrot.slane %v16552_v8, 4  ;;  %v16791_v36 = vpop.f32.mrb[108].mxu0  ;;  %10008 = vmatprep.subr.bf16.mxu1 %v11205_v31 }
 0x614   : > { %v8786_v26 = vsel %vm7956_vm7, %v8785_v39, %v8784_v40  ;;  %v8237_v29 = vsel %vm7947_vm15, %v16505_v30, %v8236_v2  ;;  %v8246_v51 = vrot.slane %v16564_v25, 3  ;;  %v8248_v41 = vrot.slane %v16629_v11, 2  ;;  %v16798_v53 = vpop.f32.mrb[109].mxu0  ;;  %v11206_v40 = vld [vmem:[%s17748_s7 + $0x20] sm:$0xff]  }
 0x615   : > { %v8787_v10 = vsel %vm7959_vm9, %v16639_v47, %v8786_v26  ;;  %v8239_v58 = vsel %vm7950_vm1, %v8238_v43, %v8237_v29  ;;  %v8249_v23 = vrot.slane %v16635_v4, 1  ;;  %v8252_v48 = vrot.slane %v16633_v0, 7  ;;  %v16805_v39 = vpop.f32.mrb[110].mxu0 }
 0x616   : > { %v8789_v2 = vsel %vm7962_vm2, %v8788_v1, %v8787_v10  ;;  %v8241_v14 = vsel %vm7953_vm6, %v8240_v24, %v8239_v58  ;;  %v8254_v38 = vrot.slane %v16643_v15, 6  ;;  %v8256_v26 = vrot.slane %v16649_v21, 5  ;;  %v16814_v43 = vpop.f32.mrb[111].mxu0  ;;  %10009 = vmatpush3.bf16.msra.mxu1 %v11206_v40 }
 0x617   : > { %v11099_v29 = vpack.i.bf16 %v8789_v2, %v8775_v22  ;;  %v8243_v63 = vsel %vm7956_vm7, %v8242_v44, %v8241_v14  ;;  %v8250_v35 = vsel %vm7944_vm0, %v8249_v23, %v8248_v41  ;;  %v8258_v19 = vrot.slane %v16639_v47, 4  ;;  %v11207_v22 = vld [vmem:[%s17748_s7 + $0x68] sm:$0xff]  }
 0x618   : > { %v8245_v18 = vsel %vm7959_vm9, %v8244_v27, %v8243_v63  ;;  %v8251_v1 = vsel %vm7947_vm15, %v16627_v34, %v8250_v35  ;;  %v8260_v24 = vrot.slane %v16647_v28, 3  ;;  %v7788_v10 = vadd.f32 %v16343_v32, %v16712_v9  ;;  %v11208_v27 = vld [vmem:[%s17748_s7 + $0x28] sm:$0xff]   ;;  %10010 = vmatprep.subr.bf16.mxu1 %v11207_v22 }
 0x619   : > { %11100 = vrot.lane.b32.xlu0 %v11099_v29, %s11227_s20  ;;  %v8247_v41 = vsel %vm7962_vm2, %v8246_v51, %v8245_v18  ;;  %v8253_v31 = vsel %vm7950_vm1, %v8252_v48, %v8251_v1  ;;  %v8898_v63 = vrot.slane %v16511_v42, 7  ;;  %v8899_v44 = vrot.slane %v16521_v59, 6 }
 0x61a   : > { %v8255_v32 = vsel %vm7953_vm6, %v8254_v38, %v8253_v31  ;;  %v16837_v9 = vmax.f32 %v7788_v10, 0.0  ;;  %v8901_v58 = vrot.slane %v16505_v30, 5  ;;  %v8903_v23 = vrot.slane %v16516_v13, 4  ;;  %10011 = vmatpush3.bf16.msra.mxu1 %v11208_v27 }
 0x61b   : > { %v8257_v18 = vsel %vm7956_vm7, %v8256_v26, %v8255_v32  ;;  %v8900_v51 = vsel %vm7944_vm0, %v8899_v44, %v8898_v63  ;;  %v8905_v48 = vrot.slane %v16559_v20, 3  ;;  %v8907_v40 = vrot.slane %v16570_v60, 2  ;;  %v16845_v2 = vpop.f32.mrb[112].mxu0 }
 0x61c   : > { %v8259_v14 = vsel %vm7959_vm9, %v8258_v19, %v8257_v18  ;;  %v8902_v38 = vsel %vm7947_vm15, %v8901_v58, %v8900_v51  ;;  %v8909_v29 = vrot.slane %v16552_v8, 1  ;;  %v8912_v35 = vrot.slane %v16629_v11, 7  ;;  %v16851_v1 = vpop.f32.mrb[113].mxu0 }
 0x61d   : > { %v8261_v26 = vsel %vm7962_vm2, %v8260_v24, %v8259_v14  ;;  %v8904_v10 = vsel %vm7950_vm1, %v8903_v23, %v8902_v38  ;;  %v8913_v22 = vrot.slane %v16635_v4, 6  ;;  %v8915_v31 = vrot.slane %v16627_v34, 5  ;;  %v16857_v63 = vpop.f32.mrb[114].mxu0 }
 0x61e   : > { %v11104_v19 = vpack.i.bf16 %v8261_v26, %v8247_v41  ;;  %v8906_v44 = vsel %vm7953_vm6, %v8905_v48, %v8904_v10  ;;  %v8917_v32 = vrot.slane %v16633_v0, 4  ;;  %v8919_v58 = vrot.slane %v16643_v15, 3  ;;  %v16862_v18 = vpop.f32.mrb[115].mxu0 }
 0x61f   : > { %v8908_v24 = vsel %vm7956_vm7, %v8907_v40, %v8906_v44  ;;  %v8914_v23 = vsel %vm7944_vm0, %v8913_v22, %v8912_v35  ;;  %v8921_v51 = vrot.slane %v16649_v21, 2  ;;  %v8923_v14 = vrot.slane %v16639_v47, 1  ;;  %v11209_v22 = vld [vmem:[%s17748_s7 + $0x70] sm:$0xff]  }
 0x620   : > { %11105 = vrot.lane.b32.xlu1 %v11104_v19, %s11227_s20  ;;  %v8910_v41 = vsel %vm7959_vm9, %v8909_v29, %v8908_v24  ;;  %v8916_v27 = vsel %vm7947_vm15, %v8915_v31, %v8914_v23  ;;  %v8370_v48 = vrot.slane %v16511_v42, 3  ;;  %v8371_v38 = vrot.slane %v16521_v59, 2  ;;  %v11210_v29 = vld [vmem:[%s17748_s7 + $0x30] sm:$0xff]   ;;  %10012 = vmatprep.subr.bf16.mxu1 %v11209_v22 }
 0x621   : > { %v8911_v26 = vsel %vm7962_vm2, %v16564_v25, %v8910_v41  ;;  %v8918_v40 = vsel %vm7950_vm1, %v8917_v32, %v8916_v27  ;;  %v8373_v35 = vrot.slane %v16505_v30, 1  ;;  %v8376_v10 = vrot.slane %v16559_v20, 7  ;;  %10013 = vmatpush3.bf16.msra.mxu1 %v11210_v29 }
 0x622   : > { %v8920_v31 = vsel %vm7953_vm6, %v8919_v58, %v8918_v40  ;;  %v8372_v19 = vsel %vm7944_vm0, %v8371_v38, %v8370_v48  ;;  %v8378_v44 = vrot.slane %v16570_v60, 6  ;;  %v8380_v32 = vrot.slane %v16552_v8, 5  ;;  %v11211_v58 = vld [vmem:[%s17748_s7 + $0x78] sm:$0xff]  }
 0x623   : > { %v8922_v24 = vsel %vm7956_vm7, %v8921_v51, %v8920_v31  ;;  %v8374_v23 = vsel %vm7947_vm15, %v8373_v35, %v8372_v19  ;;  %v8382_v41 = vrot.slane %v16564_v25, 4  ;;  %v8384_v27 = vrot.slane %v16629_v11, 3  ;;  %v16892_v20 = vpop.f32.mrb[116].mxu0  ;;  %10014 = vmatprep.subr.bf16.mxu1 %v11211_v58  ;;  %v16925_v58 = vld [vmem:[%s17747_s6] ss:$0 sm:$0xff] }
 0x624   : > { %v8924_v48 = vsel %vm7959_vm9, %v8923_v14, %v8922_v24  ;;  %v8375_v38 = vsel %vm7950_vm1, %v16516_v13, %v8374_v23  ;;  %v8385_v51 = vrot.slane %v16635_v4, 2  ;;  %v8387_v40 = vrot.slane %v16627_v34, 1  ;;  %v16902_v35 = vpop.f32.mrb[117].mxu0  ;;  %v11212_v24 = vld [vmem:[%s17748_s7 + $0x38] sm:$0xff]  }
 0x625   : > { %v8925_v31 = vsel %vm7962_vm2, %v16647_v28, %v8924_v48  ;;  %v8377_v22 = vsel %vm7953_vm6, %v8376_v10, %v8375_v38  ;;  %v8390_v19 = vrot.slane %v16643_v15, 7  ;;  %v8392_v25 = vrot.slane %v16649_v21, 6  ;;  %v16909_v14 = vpop.f32.mrb[118].mxu0  ;;  %10015 = vmatpush3.bf16.msra.mxu1 %v11212_v24 }
 0x626   : > { %v11109_v23 = vpack.i.bf16 %v8925_v31, %v8911_v26  ;;  %v8379_v34 = vsel %vm7956_vm7, %v8378_v44, %v8377_v22  ;;  %v8386_v29 = vsel %vm7944_vm0, %v8385_v51, %v8384_v27  ;;  %v8394_v48 = vrot.slane %v16639_v47, 5  ;;  %v16917_v4 = vpop.f32.mrb[119].mxu0 }
 0x627   : > { %v8381_v10 = vsel %vm7959_vm9, %v8380_v32, %v8379_v34  ;;  %v8388_v38 = vsel %vm7947_vm15, %v8387_v40, %v8386_v29  ;;  %v8396_v15 = vrot.slane %v16647_v28, 4  ;;  %v7793_v26 = vadd.f32 %v16925_v58, %v16737_v52 }
 0x628   : > { %11110 = vrot.lane.b32.xlu0 %v11109_v23, %s11228_s25  ;;  %v8383_v44 = vsel %vm7962_vm2, %v8382_v41, %v8381_v10  ;;  %v8389_v27 = vsel %vm7950_vm1, %v16633_v0, %v8388_v38  ;;  %v7791_v34 = vadd.f32 %v16925_v58, %v16746_v3  ;;  %v7794_v32 = vadd.f32 %v16925_v58, %v16751_v62 }
 0x629   : > { %v8391_v51 = vsel %vm7953_vm6, %v8390_v19, %v8389_v27  ;;  %v16938_v40 = vmax.f32 %v7793_v26, 0.0  ;;  %v7792_v52 = vadd.f32 %v16925_v58, %v16757_v16  ;;  %v7797_v31 = vadd.f32 %v16925_v58, %v16791_v36 }
 0x62a   : > { %v8393_v41 = vsel %vm7956_vm7, %v8392_v25, %v8391_v51  ;;  %v16945_v22 = vmax.f32 %v7791_v34, 0.0  ;;  %v16947_v23 = vmax.f32 %v7794_v32, 0.0  ;;  %v7795_v3 = vadd.f32 %v16925_v58, %v16798_v53 }
 0x62b   : > { %v8395_v62 = vsel %vm7959_vm9, %v8394_v48, %v8393_v41  ;;  %v16952_v19 = vmax.f32 %v7792_v52, 0.0  ;;  %v16954_v29 = vmax.f32 %v7797_v31, 0.0  ;;  %v7798_v16 = vadd.f32 %v16925_v58, %v16805_v39  ;;  %v16958_v36 = vpop.f32.mrb[120].mxu0 }
 0x62c   : > { %v8397_v25 = vsel %vm7962_vm2, %v8396_v15, %v8395_v62  ;;  %v16961_v24 = vmax.f32 %v7795_v3, 0.0  ;;  %v7796_v10 = vadd.f32 %v16925_v58, %v16814_v43  ;;  %v7801_v53 = vadd.f32 %v16925_v58, %v16845_v2  ;;  %v16967_v48 = vpop.f32.mrb[121].mxu0 }
 0x62d   : > { %v11114_v38 = vpack.i.bf16 %v8397_v25, %v8383_v44  ;;  %v16969_v26 = vmax.f32 %v7798_v16, 0.0  ;;  %v7799_v39 = vadd.f32 %v16925_v58, %v16851_v1  ;;  %v7802_v27 = vadd.f32 %v16925_v58, %v16857_v63  ;;  %v16975_v15 = vpop.f32.mrb[122].mxu0 }
 0x62e   : > { %v16977_v34 = vmax.f32 %v7796_v10, 0.0  ;;  %v16979_v32 = vmax.f32 %v7801_v53, 0.0  ;;  %v7800_v43 = vadd.f32 %v16925_v58, %v16862_v18  ;;  %v8654_v2 = vrot.slane %v16671_v61, 5  ;;  %v16984_v44 = vpop.f32.mrb[123].mxu0 }
 0x62f   : > { %11115 = vrot.lane.b32.xlu1 %v11114_v38, %s11228_s25  ;;  %v16987_v51 = vmax.f32 %v7799_v39, 0.0  ;;  %v16989_v1 = vmax.f32 %v7802_v27, 0.0  ;;  %v8655_v63 = vrot.slane %v16682_v37, 4  ;;  %v8657_v52 = vrot.slane %v16666_v56, 3 }
 0x630   : > { %v16993_v31 = vmax.f32 %v7800_v43, 0.0  ;;  %v8659_v41 = vrot.slane %v16677_v45, 2  ;;  %v8661_v18 = vrot.slane %v16733_v55, 1  ;;  %v8664_v3 = vrot.slane %v16729_v46, 7 }
 0x631   : > { %v8656_v62 = vsel %vm7944_vm0, %v8655_v63, %v8654_v2  ;;  %v8666_v16 = vrot.slane %v16775_v6, 6  ;;  %v8668_v25 = vrot.slane %v16945_v22, 5  ;;  %v8669_v10 = vrot.slane %v16952_v19, 4 }
 0x632   : > { %v8658_v53 = vsel %vm7947_vm15, %v8657_v52, %v8656_v62  ;;  %v8671_v38 = vrot.slane %v16938_v40, 3  ;;  %v8673_v39 = vrot.slane %v16947_v23, 2  ;;  %v8675_v27 = vrot.slane %v16961_v24, 1 }
 0x633   : > { %v8660_v43 = vsel %vm7950_vm1, %v8659_v41, %v8658_v53  ;;  %v8670_v21 = vsel %vm7944_vm0, %v8669_v10, %v8668_v25  ;;  %v8678_v2 = vrot.slane %v16954_v29, 7  ;;  %v8680_v63 = vrot.slane %v16969_v26, 6  ;;  %v17010_v28 = vpop.f32.mrb[124].mxu0 }
 0x634   : > { %v8662_v47 = vsel %vm7953_vm6, %v8661_v18, %v8660_v43  ;;  %v8672_v52 = vsel %vm7947_vm15, %v8671_v38, %v8670_v21  ;;  %v8126_v62 = vrot.slane %v16671_v61, 1  ;;  %v8128_v0 = vrot.slane %v16666_v56, 7  ;;  %v17016_v11 = vpop.f32.mrb[125].mxu0 }
 0x635   : > { %v8663_v41 = vsel %vm7956_vm7, %v16837_v9, %v8662_v47  ;;  %v8674_v25 = vsel %vm7950_vm1, %v8673_v39, %v8672_v52  ;;  %v8130_v10 = vrot.slane %v16677_v45, 6  ;;  %v8132_v53 = vrot.slane %v16733_v55, 5  ;;  %v17023_v8 = vpop.f32.mrb[126].mxu0 }
 0x636   : > { %v8665_v18 = vsel %vm7959_vm9, %v8664_v3, %v8663_v41  ;;  %v8676_v21 = vsel %vm7953_vm6, %v8675_v27, %v8674_v25  ;;  %v8127_v38 = vsel %vm7944_vm0, %v16682_v37, %v8126_v62  ;;  %v8134_v43 = vrot.slane %v16837_v9, 4  ;;  %v17030_v60 = vpop.f32.mrb[127].mxu0 }
 0x637   : > { %v8667_v47 = vsel %vm7962_vm2, %v8666_v16, %v8665_v18  ;;  %v8677_v39 = vsel %vm7956_vm7, %v16977_v34, %v8676_v21  ;;  %v8129_v52 = vsel %vm7947_vm15, %v8128_v0, %v8127_v38  ;;  %v8136_v13 = vrot.slane %v16729_v46, 3 }
 0x638   : > { %v8679_v3 = vsel %vm7959_vm9, %v8678_v2, %v8677_v39  ;;  %v8131_v27 = vsel %vm7950_vm1, %v8130_v10, %v8129_v52  ;;  %v8138_v41 = vrot.slane %v16775_v6, 2  ;;  %v8140_v62 = vrot.slane %v16945_v22, 1 }
 0x639   : > { %v8681_v25 = vsel %vm7962_vm2, %v8680_v63, %v8679_v3  ;;  %v8133_v30 = vsel %vm7953_vm6, %v8132_v53, %v8131_v27  ;;  %v8142_v16 = vrot.slane %v16938_v40, 7  ;;  %v8144_v18 = vrot.slane %v16947_v23, 6 }
 0x63a   : > { %v11119_v21 = vpack.i.bf16 %v8681_v25, %v8667_v47  ;;  %v8135_v0 = vsel %vm7956_vm7, %v8134_v43, %v8133_v30  ;;  %v8141_v2 = vsel %vm7944_vm0, %v16952_v19, %v8140_v62  ;;  %v8146_v10 = vrot.slane %v16961_v24, 5 }
 0x63b   : > { %v8137_v38 = vsel %vm7959_vm9, %v8136_v13, %v8135_v0  ;;  %v8143_v39 = vsel %vm7947_vm15, %v8142_v16, %v8141_v2  ;;  %v8148_v63 = vrot.slane %v16977_v34, 4  ;;  %v8150_v53 = vrot.slane %v16954_v29, 3 }
 0x63c   : > { %11120 = vrot.lane.b32.xlu0 %v11119_v21, %s11226_s19  ;;  %v8139_v52 = vsel %vm7962_vm2, %v8138_v41, %v8137_v38  ;;  %v8145_v47 = vsel %vm7950_vm1, %v8144_v18, %v8143_v39  ;;  %v8152_v30 = vrot.slane %v16969_v26, 2  ;;  %v7805_v43 = vadd.f32 %v16925_v58, %v16892_v20 }
 0x63d   : > { %v8147_v3 = vsel %vm7953_vm6, %v8146_v10, %v8145_v47  ;;  %v7803_v13 = vadd.f32 %v16925_v58, %v16902_v35  ;;  %v8790_v27 = vrot.slane %v16671_v61, 6  ;;  %v8791_v62 = vrot.slane %v16682_v37, 5 }
 0x63e   : > { %v8149_v25 = vsel %vm7956_vm7, %v8148_v63, %v8147_v3  ;;  %v17065_v16 = vmax.f32 %v7805_v43, 0.0  ;;  %v8793_v41 = vrot.slane %v16666_v56, 4  ;;  %v8795_v18 = vrot.slane %v16677_v45, 3 }
 0x63f   : > { %v8151_v21 = vsel %vm7959_vm9, %v8150_v53, %v8149_v25  ;;  %v17070_v20 = vmax.f32 %v7803_v13, 0.0  ;;  %v8792_v0 = vsel %vm7944_vm0, %v8791_v62, %v8790_v27  ;;  %v8797_v35 = vrot.slane %v16733_v55, 2 }
 0x640   : > { %20482 = vst [vmem:[#allocation13_spill] sm:$0xff] %v17065_v16  ;;  %v8153_v2 = vsel %vm7962_vm2, %v8152_v30, %v8151_v21  ;;  %v8794_v10 = vsel %vm7947_vm15, %v8793_v41, %v8792_v0  ;;  %v8799_v38 = vrot.slane %v16837_v9, 1  ;;  %v8802_v39 = vrot.slane %v16775_v6, 7 }
 0x641   : > { %20483 = vst [vmem:[#allocation14_spill] sm:$0xff] %v17070_v20  ;;  %v11124_v63 = vpack.i.bf16 %v8153_v2, %v8139_v52  ;;  %v8796_v47 = vsel %vm7950_vm1, %v8795_v18, %v8794_v10  ;;  %v8804_v43 = vrot.slane %v16945_v22, 6  ;;  %v8805_v53 = vrot.slane %v16952_v19, 5 }
 0x642   : > { %v8798_v3 = vsel %vm7953_vm6, %v8797_v35, %v8796_v47  ;;  %v8807_v13 = vrot.slane %v16938_v40, 4  ;;  %v8809_v27 = vrot.slane %v16947_v23, 3  ;;  %v8811_v30 = vrot.slane %v16961_v24, 2 }
 0x643   : > { %11125 = vrot.lane.b32.xlu1 %v11124_v63, %s11226_s19  ;;  %v8800_v62 = vsel %vm7956_vm7, %v8799_v38, %v8798_v3  ;;  %v8806_v52 = vsel %vm7944_vm0, %v8805_v53, %v8804_v43  ;;  %v8813_v25 = vrot.slane %v16977_v34, 1  ;;  %v8816_v41 = vrot.slane %v16969_v26, 7 }
 0x644   : > { %v8801_v18 = vsel %vm7959_vm9, %v16729_v46, %v8800_v62  ;;  %v8808_v21 = vsel %vm7947_vm15, %v8807_v13, %v8806_v52  ;;  %v7806_v0 = vadd.f32 %v16925_v58, %v16909_v14  ;;  %v8262_v35 = vrot.slane %v16671_v61, 2 }
 0x645   : > { %v8803_v2 = vsel %vm7962_vm2, %v8802_v39, %v8801_v18  ;;  %v8810_v10 = vsel %vm7950_vm1, %v8809_v27, %v8808_v21  ;;  %v8263_v38 = vrot.slane %v16682_v37, 1  ;;  %v8266_v63 = vrot.slane %v16677_v45, 7 }
 0x646   : > { %v8812_v47 = vsel %vm7953_vm6, %v8811_v30, %v8810_v10  ;;  %v17101_v43 = vmax.f32 %v7806_v0, 0.0  ;;  %v8268_v53 = vrot.slane %v16733_v55, 6  ;;  %v8270_v3 = vrot.slane %v16837_v9, 5 }
 0x647   : > { %v8814_v14 = vsel %vm7956_vm7, %v8813_v25, %v8812_v47  ;;  %v8264_v13 = vsel %vm7944_vm0, %v8263_v38, %v8262_v35  ;;  %v8272_v39 = vrot.slane %v16729_v46, 4  ;;  %v8274_v27 = vrot.slane %v16775_v6, 3 }
 0x648   : > { %20484 = vst [vmem:[#allocation15_spill] sm:$0xff] %v17101_v43  ;;  %v8815_v62 = vsel %vm7959_vm9, %v16954_v29, %v8814_v14  ;;  %v8265_v30 = vsel %vm7947_vm15, %v16666_v56, %v8264_v13  ;;  %v8276_v52 = vrot.slane %v16945_v22, 2  ;;  %v8277_v18 = vrot.slane %v16952_v19, 1 }
 0x649   : > { %v8817_v21 = vsel %vm7962_vm2, %v8816_v41, %v8815_v62  ;;  %v8267_v25 = vsel %vm7950_vm1, %v8266_v63, %v8265_v30  ;;  %v8280_v0 = vrot.slane %v16947_v23, 7  ;;  %v8282_v35 = vrot.slane %v16961_v24, 6 }
 0x64a   : > { %v11129_v10 = vpack.i.bf16 %v8817_v21, %v8803_v2  ;;  %v8269_v38 = vsel %vm7953_vm6, %v8268_v53, %v8267_v25  ;;  %v8278_v47 = vsel %vm7944_vm0, %v8277_v18, %v8276_v52  ;;  %v8284_v14 = vrot.slane %v16977_v34, 5 }
 0x64b   : > { %v8271_v13 = vsel %vm7956_vm7, %v8270_v3, %v8269_v38  ;;  %v8279_v59 = vsel %vm7947_vm15, %v16938_v40, %v8278_v47  ;;  %v8286_v41 = vrot.slane %v16954_v29, 4  ;;  %v8288_v63 = vrot.slane %v16969_v26, 3 }
 0x64c   : > { %11130 = vrot.lane.b32.xlu0 %v11129_v10, %s11227_s20  ;;  %v8273_v62 = vsel %vm7959_vm9, %v8272_v39, %v8271_v13  ;;  %v8281_v2 = vsel %vm7950_vm1, %v8280_v0, %v8279_v59  ;;  %v7804_v53 = vadd.f32 %v16925_v58, %v16917_v4  ;;  %v8926_v30 = vrot.slane %v16671_v61, 7 }
 0x64d   : > { %v8275_v3 = vsel %vm7962_vm2, %v8274_v27, %v8273_v62  ;;  %v8283_v52 = vsel %vm7953_vm6, %v8282_v35, %v8281_v2  ;;  %v8927_v18 = vrot.slane %v16682_v37, 6  ;;  %v8929_v21 = vrot.slane %v16666_v56, 5 }
 0x64e   : > { %v8285_v25 = vsel %vm7956_vm7, %v8284_v14, %v8283_v52  ;;  %v17138_v10 = vmax.f32 %v7804_v53, 0.0  ;;  %v8931_v39 = vrot.slane %v16677_v45, 4  ;;  %v8933_v59 = vrot.slane %v16733_v55, 3 }
 0x64f   : > { %v8287_v4 = vsel %vm7959_vm9, %v8286_v41, %v8285_v25  ;;  %v8928_v0 = vsel %vm7944_vm0, %v8927_v18, %v8926_v30  ;;  %v8935_v27 = vrot.slane %v16837_v9, 2  ;;  %v8937_v35 = vrot.slane %v16729_v46, 1 }
 0x650   : > { %20485 = vst [vmem:[#allocation78_spill] sm:$0xff] %v17138_v10  ;;  %v8289_v38 = vsel %vm7962_vm2, %v8288_v63, %v8287_v4  ;;  %v8930_v47 = vsel %vm7947_vm15, %v8929_v21, %v8928_v0  ;;  %v8940_v14 = vrot.slane %v16945_v22, 7  ;;  %v8941_v13 = vrot.slane %v16952_v19, 6 }
 0x651   : > { %v11134_v62 = vpack.i.bf16 %v8289_v38, %v8275_v3  ;;  %v8932_v2 = vsel %vm7950_vm1, %v8931_v39, %v8930_v47  ;;  %v8943_v53 = vrot.slane %v16938_v40, 5  ;;  %v8945_v41 = vrot.slane %v16947_v23, 4 }
 0x652   : > { %v8934_v30 = vsel %vm7953_vm6, %v8933_v59, %v8932_v2  ;;  %v8942_v52 = vsel %vm7944_vm0, %v8941_v13, %v8940_v14  ;;  %v8947_v18 = vrot.slane %v16961_v24, 3  ;;  %v8949_v63 = vrot.slane %v16977_v34, 2 }
 0x653   : > { %11135 = vrot.lane.b32.xlu1 %v11134_v62, %s11227_s20  ;;  %v8936_v21 = vsel %vm7956_vm7, %v8935_v27, %v8934_v30  ;;  %v8944_v3 = vsel %vm7947_vm15, %v8943_v53, %v8942_v52  ;;  %v8951_v25 = vrot.slane %v16954_v29, 1  ;;  %v8398_v39 = vrot.slane %v16671_v61, 3 }
 0x654   : > { %v8938_v4 = vsel %vm7959_vm9, %v8937_v35, %v8936_v21  ;;  %v8946_v59 = vsel %vm7950_vm1, %v8945_v41, %v8944_v3  ;;  %v8399_v0 = vrot.slane %v16682_v37, 2  ;;  %v8401_v38 = vrot.slane %v16666_v56, 1 }
 0x655   : > { %v8939_v47 = vsel %vm7962_vm2, %v16775_v6, %v8938_v4  ;;  %v8948_v14 = vsel %vm7953_vm6, %v8947_v18, %v8946_v59  ;;  %v8404_v27 = vrot.slane %v16733_v55, 7  ;;  %v8406_v13 = vrot.slane %v16837_v9, 6 }
 0x656   : > { %v8950_v62 = vsel %vm7956_vm7, %v8949_v63, %v8948_v14  ;;  %v8400_v2 = vsel %vm7944_vm0, %v8399_v0, %v8398_v39  ;;  %v8408_v35 = vrot.slane %v16729_v46, 5  ;;  %v8410_v53 = vrot.slane %v16775_v6, 4 }
 0x657   : > { %v8952_v41 = vsel %vm7959_vm9, %v8951_v25, %v8950_v62  ;;  %v8402_v30 = vsel %vm7947_vm15, %v8401_v38, %v8400_v2  ;;  %v8412_v52 = vrot.slane %v16945_v22, 3  ;;  %v8413_v18 = vrot.slane %v16952_v19, 2 }
 0x658   : > { %v8953_v21 = vsel %vm7962_vm2, %v16969_v26, %v8952_v41  ;;  %v8403_v63 = vsel %vm7950_vm1, %v16677_v45, %v8402_v30  ;;  %v8415_v3 = vrot.slane %v16938_v40, 1  ;;  %v8418_v39 = vrot.slane %v16961_v24, 7 }
 0x659   : > { %v11139_v4 = vpack.i.bf16 %v8953_v21, %v8939_v47  ;;  %v8405_v59 = vsel %vm7953_vm6, %v8404_v27, %v8403_v63  ;;  %v8414_v25 = vsel %vm7944_vm0, %v8413_v18, %v8412_v52  ;;  %v8420_v0 = vrot.slane %v16977_v34, 6 }
 0x65a   : > { %v8407_v38 = vsel %vm7956_vm7, %v8406_v13, %v8405_v59  ;;  %v8416_v14 = vsel %vm7947_vm15, %v8415_v3, %v8414_v25  ;;  %v8422_v62 = vrot.slane %v16954_v29, 5  ;;  %v8424_v2 = vrot.slane %v16969_v26, 4 }
 0x65b   : > { %11140 = vrot.lane.b32.xlu0 %v11139_v4, %s11228_s25  ;;  %v8409_v41 = vsel %vm7959_vm9, %v8408_v35, %v8407_v38  ;;  %v8417_v47 = vsel %vm7950_vm1, %v16947_v23, %v8416_v14  ;;  %v7809_v27 = vadd.f32 %v16925_v58, %v16958_v36  ;;  %v7807_v30 = vadd.f32 %v16925_v58, %v16967_v48 }
 0x65c   : > { %v8411_v13 = vsel %vm7962_vm2, %v8410_v53, %v8409_v41  ;;  %v8419_v52 = vsel %vm7953_vm6, %v8418_v39, %v8417_v47  ;;  %v7810_v18 = vadd.f32 %v16925_v58, %v16975_v15  ;;  %v7808_v21 = vadd.f32 %v16925_v58, %v16984_v44 }
 0x65d   : > { %v8421_v35 = vsel %vm7956_vm7, %v8420_v0, %v8419_v52  ;;  %v17207_v63 = vmax.f32 %v7809_v27, 0.0  ;;  %v17209_v3 = vmax.f32 %v7807_v30, 0.0  ;;  %v7813_v36 = vadd.f32 %v16925_v58, %v17010_v28 }
 0x65e   : > { %v8423_v48 = vsel %vm7959_vm9, %v8422_v62, %v8421_v35  ;;  %v17214_v53 = vmax.f32 %v7810_v18, 0.0  ;;  %v17216_v39 = vmax.f32 %v7808_v21, 0.0  ;;  %v7811_v15 = vadd.f32 %v16925_v58, %v17016_v11 }
 0x65f   : > { %v8425_v44 = vsel %vm7962_vm2, %v8424_v2, %v8423_v48  ;;  %v17221_v4 = vmax.f32 %v7813_v36, 0.0  ;;  %v7814_v59 = vadd.f32 %v16925_v58, %v17023_v8  ;;  %v7812_v25 = vadd.f32 %v16925_v58, %v17030_v60 }
 0x660   : > { %v11144_v28 = vpack.i.bf16 %v8425_v44, %v8411_v13  ;;  %v17227_v0 = vmax.f32 %v7811_v15, 0.0  ;;  %v8682_v38 = vrot.slane %v16987_v51, 5  ;;  %v8683_v14 = vrot.slane %v16993_v31, 4 }
 0x661   : > { %20486 = vst [vmem:[#allocation79_spill] sm:$0xff] %v17221_v4  ;;  %v17231_v62 = vmax.f32 %v7814_v59, 0.0  ;;  %v17233_v11 = vmax.f32 %v7812_v25, 0.0  ;;  %v8685_v2 = vrot.slane %v16979_v32, 3  ;;  %v8687_v41 = vrot.slane %v16989_v1, 2 }
 0x662   : > { %20487 = vst [vmem:[#allocation21_spill] sm:$0xff] %v17227_v0  ;;  %11145 = vrot.lane.b32.xlu1 %v11144_v28, %s11228_s25  ;;  %v8684_v8 = vsel %vm7944_vm0, %v8683_v14, %v8682_v38  ;;  %v8689_v60 = vrot.slane %v17070_v20, 1  ;;  %v8692_v58 = vrot.slane %v17065_v16, 7  ;;  %v8694_v47 = vrot.slane %v17101_v43, 6 }
 0x663   : > { %20488 = vst [vmem:[#allocation22_spill] sm:$0xff] %v17231_v62  ;;  %20489 = vst [vmem:[#allocation23_spill] sm:$0xff] %v17233_v11  ;;  %v8686_v27 = vsel %vm7947_vm15, %v8685_v2, %v8684_v8  ;;  %v8696_v30 = vrot.slane %v17209_v3, 5  ;;  %v8697_v13 = vrot.slane %v17216_v39, 4  ;;  %v8699_v52 = vrot.slane %v17207_v63, 3 }
 0x664   : > { %v8688_v18 = vsel %vm7950_vm1, %v8687_v41, %v8686_v27  ;;  %v8701_v21 = vrot.slane %v17214_v53, 2  ;;  %v8703_v35 = vrot.slane %v17227_v0, 1  ;;  %v8706_v36 = vrot.slane %v17221_v4, 7 }
 0x665   : > { %v8690_v48 = vsel %vm7953_vm6, %v8689_v60, %v8688_v18  ;;  %v8698_v15 = vsel %vm7944_vm0, %v8697_v13, %v8696_v30  ;;  %v8708_v44 = vrot.slane %v17231_v62, 6  ;;  %v8154_v59 = vrot.slane %v16987_v51, 1 }
 0x666   : > { %v8691_v25 = vsel %vm7956_vm7, %v17138_v10, %v8690_v48  ;;  %v8700_v28 = vsel %vm7947_vm15, %v8699_v52, %v8698_v15  ;;  %v8156_v38 = vrot.slane %v16979_v32, 7  ;;  %v8158_v14 = vrot.slane %v16989_v1, 6 }
 0x667   : > { %v8693_v2 = vsel %vm7959_vm9, %v8692_v58, %v8691_v25  ;;  %v8702_v41 = vsel %vm7950_vm1, %v8701_v21, %v8700_v28  ;;  %v8155_v8 = vsel %vm7944_vm0, %v16993_v31, %v8154_v59  ;;  %v8160_v60 = vrot.slane %v17070_v20, 5 }
 0x668   : > { %v8695_v27 = vsel %vm7962_vm2, %v8694_v47, %v8693_v2  ;;  %v8704_v30 = vsel %vm7953_vm6, %v8703_v35, %v8702_v41  ;;  %v8157_v13 = vsel %vm7947_vm15, %v8156_v38, %v8155_v8  ;;  %v8162_v52 = vrot.slane %v17138_v10, 4 }
 0x669   : > { %v8705_v18 = vsel %vm7956_vm7, %v17233_v11, %v8704_v30  ;;  %v8159_v58 = vsel %vm7950_vm1, %v8158_v14, %v8157_v13  ;;  %v8164_v21 = vrot.slane %v17065_v16, 3  ;;  %v8166_v48 = vrot.slane %v17101_v43, 2 }
 0x66a   : > { %v8707_v15 = vsel %vm7959_vm9, %v8706_v36, %v8705_v18  ;;  %v8161_v59 = vsel %vm7953_vm6, %v8160_v60, %v8159_v58  ;;  %v8168_v47 = vrot.slane %v17209_v3, 1  ;;  %v8170_v35 = vrot.slane %v17207_v63, 7 }
 0x66b   : > { %v8709_v25 = vsel %vm7962_vm2, %v8708_v44, %v8707_v15  ;;  %v8163_v28 = vsel %vm7956_vm7, %v8162_v52, %v8161_v59  ;;  %v8172_v38 = vrot.slane %v17214_v53, 6  ;;  %v8174_v14 = vrot.slane %v17227_v0, 5 }
 0x66c   : > { %v11149_v2 = vpack.i.bf16 %v8709_v25, %v8695_v27  ;;  %v8165_v41 = vsel %vm7959_vm9, %v8164_v21, %v8163_v28  ;;  %v8169_v36 = vsel %vm7944_vm0, %v17216_v39, %v8168_v47  ;;  %v8176_v8 = vrot.slane %v17233_v11, 4 }
 0x66d   : > { %v8167_v60 = vsel %vm7962_vm2, %v8166_v48, %v8165_v41  ;;  %v8171_v30 = vsel %vm7947_vm15, %v8170_v35, %v8169_v36  ;;  %v8178_v44 = vrot.slane %v17221_v4, 3  ;;  %v8180_v13 = vrot.slane %v17231_v62, 2 }
 0x66e   : > { %11150 = vrot.lane.b32.xlu0 %v11149_v2, %s11226_s19  ;;  %v8173_v52 = vsel %vm7950_vm1, %v8172_v38, %v8171_v30  ;;  %v8818_v27 = vrot.slane %v16987_v51, 6  ;;  %v8819_v18 = vrot.slane %v16993_v31, 5  ;;  %v8821_v58 = vrot.slane %v16979_v32, 4 }
 0x66f   : > { %v8175_v21 = vsel %vm7953_vm6, %v8174_v14, %v8173_v52  ;;  %v8823_v48 = vrot.slane %v16989_v1, 3  ;;  %v8825_v15 = vrot.slane %v17070_v20, 2  ;;  %v8827_v59 = vrot.slane %v17138_v10, 1 }
 0x670   : > { %v8177_v47 = vsel %vm7956_vm7, %v8176_v8, %v8175_v21  ;;  %v8820_v35 = vsel %vm7944_vm0, %v8819_v18, %v8818_v27  ;;  %v8830_v25 = vrot.slane %v17101_v43, 7  ;;  %v8832_v28 = vrot.slane %v17209_v3, 6 }
 0x671   : > { %v8179_v38 = vsel %vm7959_vm9, %v8178_v44, %v8177_v47  ;;  %v8822_v2 = vsel %vm7947_vm15, %v8821_v58, %v8820_v35  ;;  %v8833_v14 = vrot.slane %v17216_v39, 5  ;;  %v8835_v41 = vrot.slane %v17207_v63, 4 }
 0x672   : > { %v8181_v36 = vsel %vm7962_vm2, %v8180_v13, %v8179_v38  ;;  %v8824_v30 = vsel %vm7950_vm1, %v8823_v48, %v8822_v2  ;;  %v8837_v8 = vrot.slane %v17214_v53, 3  ;;  %v8839_v52 = vrot.slane %v17227_v0, 2 }
 0x673   : > { %v11154_v27 = vpack.i.bf16 %v8181_v36, %v8167_v60  ;;  %v8826_v18 = vsel %vm7953_vm6, %v8825_v15, %v8824_v30  ;;  %v8834_v21 = vsel %vm7944_vm0, %v8833_v14, %v8832_v28  ;;  %v8841_v44 = vrot.slane %v17233_v11, 1 }
 0x674   : > { %v8828_v58 = vsel %vm7956_vm7, %v8827_v59, %v8826_v18  ;;  %v8836_v47 = vsel %vm7947_vm15, %v8835_v41, %v8834_v21  ;;  %v8844_v35 = vrot.slane %v17231_v62, 7  ;;  %v8290_v13 = vrot.slane %v16987_v51, 2 }
 0x675   : > { %11155 = vrot.lane.b32.xlu1 %v11154_v27, %s11226_s19  ;;  %v8829_v48 = vsel %vm7959_vm9, %v17065_v16, %v8828_v58  ;;  %v8838_v60 = vsel %vm7950_vm1, %v8837_v8, %v8836_v47  ;;  %v8291_v15 = vrot.slane %v16993_v31, 1  ;;  %v8294_v28 = vrot.slane %v16989_v1, 7  ;;  %s9335_s19 = sshll.u32 %s9328_s10, 3 }
 0x676   : > { %v8831_v38 = vsel %vm7962_vm2, %v8830_v25, %v8829_v48  ;;  %v8840_v59 = vsel %vm7953_vm6, %v8839_v52, %v8838_v60  ;;  %v8296_v2 = vrot.slane %v17070_v20, 6  ;;  %v8298_v14 = vrot.slane %v17138_v10, 5  ;;  %p331_p4 = scmp.lt.s32.totalorder %s9335_s19, 15 }
 0x677   : > { %v8842_v41 = vsel %vm7956_vm7, %v8841_v44, %v8840_v59  ;;  %v8292_v36 = vsel %vm7944_vm0, %v8291_v15, %v8290_v13  ;;  %v8300_v30 = vrot.slane %v17065_v16, 4  ;;  %v8302_v8 = vrot.slane %v17101_v43, 3 }
 0x678   : > { %v8843_v27 = vsel %vm7959_vm9, %v17221_v4, %v8842_v41  ;;  %v8293_v25 = vsel %vm7947_vm15, %v16979_v32, %v8292_v36  ;;  %v8304_v52 = vrot.slane %v17209_v3, 2  ;;  %v8305_v18 = vrot.slane %v17216_v39, 1  ;;  %s20538_s19 = smov (!%p331_p4, %s9335_s19), 15 }
 0x679   : > { %v8845_v21 = vsel %vm7962_vm2, %v8844_v35, %v8843_v27  ;;  %v8295_v44 = vsel %vm7950_vm1, %v8294_v28, %v8293_v25  ;;  %v8308_v58 = vrot.slane %v17214_v53, 7  ;;  %v8310_v47 = vrot.slane %v17227_v0, 6 }
 0x67a   : > { %v11159_v13 = vpack.i.bf16 %v8845_v21, %v8831_v38  ;;  %v8297_v48 = vsel %vm7953_vm6, %v8296_v2, %v8295_v44  ;;  %v8306_v60 = vsel %vm7944_vm0, %v8305_v18, %v8304_v52  ;;  %v8312_v15 = vrot.slane %v17233_v11, 5 }
 0x67b   : > { %v8299_v59 = vsel %vm7956_vm7, %v8298_v14, %v8297_v48  ;;  %v8307_v41 = vsel %vm7947_vm15, %v17207_v63, %v8306_v60  ;;  %v8314_v35 = vrot.slane %v17221_v4, 4  ;;  %v8316_v28 = vrot.slane %v17231_v62, 3 }
 0x67c   : > { %11160 = vrot.lane.b32.xlu0 %v11159_v13, %s11227_s20  ;;  %v8301_v36 = vsel %vm7959_vm9, %v8300_v30, %v8299_v59  ;;  %v8309_v38 = vsel %vm7950_vm1, %v8308_v58, %v8307_v41  ;;  %v8954_v2 = vrot.slane %v16987_v51, 7  ;;  %v8955_v27 = vrot.slane %v16993_v31, 6 }
 0x67d   : > { %v8303_v25 = vsel %vm7962_vm2, %v8302_v8, %v8301_v36  ;;  %v8311_v14 = vsel %vm7953_vm6, %v8310_v47, %v8309_v38  ;;  %v8957_v52 = vrot.slane %v16979_v32, 5  ;;  %v8959_v18 = vrot.slane %v16989_v1, 4 }
 0x67e   : > { %v8313_v21 = vsel %vm7956_vm7, %v8312_v15, %v8311_v14  ;;  %v8956_v44 = vsel %vm7944_vm0, %v8955_v27, %v8954_v2  ;;  %v8961_v30 = vrot.slane %v17070_v20, 3  ;;  %v8963_v58 = vrot.slane %v17138_v10, 2 }
 0x67f   : > { %v8315_v13 = vsel %vm7959_vm9, %v8314_v35, %v8313_v21  ;;  %v8958_v48 = vsel %vm7947_vm15, %v8957_v52, %v8956_v44  ;;  %v8965_v8 = vrot.slane %v17065_v16, 1  ;;  %v8968_v47 = vrot.slane %v17209_v3, 7 }
 0x680   : > { %v8317_v60 = vsel %vm7962_vm2, %v8316_v28, %v8315_v13  ;;  %v8960_v59 = vsel %vm7950_vm1, %v8959_v18, %v8958_v48  ;;  %v8969_v15 = vrot.slane %v17216_v39, 6  ;;  %v8971_v41 = vrot.slane %v17207_v63, 5 }
 0x681   : > { %v11164_v36 = vpack.i.bf16 %v8317_v60, %v8303_v25  ;;  %v8962_v38 = vsel %vm7953_vm6, %v8961_v30, %v8960_v59  ;;  %v8973_v2 = vrot.slane %v17214_v53, 4  ;;  %v8975_v35 = vrot.slane %v17227_v0, 3 }
 0x682   : > { %v8964_v27 = vsel %vm7956_vm7, %v8963_v58, %v8962_v38  ;;  %v8970_v14 = vsel %vm7944_vm0, %v8969_v15, %v8968_v47  ;;  %v8977_v52 = vrot.slane %v17233_v11, 2  ;;  %v8979_v28 = vrot.slane %v17221_v4, 1 }
 0x683   : > { %11165 = vrot.lane.b32.xlu1 %v11164_v36, %s11227_s20  ;;  %v8966_v18 = vsel %vm7959_vm9, %v8965_v8, %v8964_v27  ;;  %v8972_v25 = vsel %vm7947_vm15, %v8971_v41, %v8970_v14  ;;  %v8426_v21 = vrot.slane %v16987_v51, 3  ;;  %v8427_v44 = vrot.slane %v16993_v31, 2  ;;  %s9336_s20 = sshll.u32 %s20538_s19, 3 }
 0x684   : > { %v8967_v30 = vsel %vm7962_vm2, %v17101_v43, %v8966_v18  ;;  %v8974_v58 = vsel %vm7950_vm1, %v8973_v2, %v8972_v25  ;;  %v8429_v13 = vrot.slane %v16979_v32, 1  ;;  %v8432_v48 = vrot.slane %v17070_v20, 7  ;;  %s17720_s22 = scalar_lea.vmem %s17750_s9, %s9336_s20 }
 0x685   : > { %v8976_v47 = vsel %vm7953_vm6, %v8975_v35, %v8974_v58  ;;  %v8428_v60 = vsel %vm7944_vm0, %v8427_v44, %v8426_v21  ;;  %v8434_v8 = vrot.slane %v17138_v10, 6  ;;  %v8436_v59 = vrot.slane %v17065_v16, 5 }
 0x686   : > { %v8978_v15 = vsel %vm7956_vm7, %v8977_v52, %v8976_v47  ;;  %v8430_v41 = vsel %vm7947_vm15, %v8429_v13, %v8428_v60  ;;  %v8438_v36 = vrot.slane %v17101_v43, 4  ;;  %v8440_v38 = vrot.slane %v17209_v3, 3  ;;  %v11071_v43 = vpop.permute.xlu1 %11070 }
 0x687   : > { %v8980_v2 = vsel %vm7959_vm9, %v8979_v28, %v8978_v15  ;;  %v8431_v27 = vsel %vm7950_vm1, %v16989_v1, %v8430_v41  ;;  %v8441_v35 = vrot.slane %v17216_v39, 2  ;;  %v8443_v14 = vrot.slane %v17207_v63, 1 }
 0x688   : > { %v8981_v18 = vsel %vm7962_vm2, %v17231_v62, %v8980_v2  ;;  %v8433_v52 = vsel %vm7953_vm6, %v8432_v48, %v8431_v27  ;;  %v8446_v25 = vrot.slane %v17227_v0, 7  ;;  %v8448_v21 = vrot.slane %v17233_v11, 6  ;;  %v20493_v0 = vld [vmem:[#allocation174_spill] sm:$0xff] }
 0x689   : > { %v11169_v44 = vpack.i.bf16 %v8981_v18, %v8967_v30  ;;  %v8435_v58 = vsel %vm7956_vm7, %v8434_v8, %v8433_v52  ;;  %v8442_v28 = vsel %vm7944_vm0, %v8441_v35, %v8440_v38  ;;  %v8450_v13 = vrot.slane %v17221_v4, 5 }
 0x68a   : > { %v8437_v47 = vsel %vm7959_vm9, %v8436_v59, %v8435_v58  ;;  %v8444_v60 = vsel %vm7947_vm15, %v8443_v14, %v8442_v28  ;;  %v8452_v15 = vrot.slane %v17231_v62, 4  ;;  %v8478_v41 = vrot.slane %v16350_v50, 4 }
 0x68b   : > { %11170 = vrot.lane.b32.xlu0 %v11169_v44, %s11228_s25  ;;  %v8439_v48 = vsel %vm7962_vm2, %v8438_v36, %v8437_v47  ;;  %v8445_v30 = vsel %vm7950_vm1, %v17214_v53, %v8444_v60  ;;  %v8479_v8 = vrot.slane %v16358_v54, 3  ;;  %v8481_v38 = vrot.slane %v16347_v17, 2  ;;  %v11061_v44 = vpop.permute.xlu0 %11060  ;;  %v20490_v47 = vld [vmem:[#allocation175_spill] sm:$0xff] }
 0x68c   : > { %v8447_v2 = vsel %vm7953_vm6, %v8446_v25, %v8445_v30  ;;  %v8483_v59 = vrot.slane %v16353_v7, 1  ;;  %v8486_v27 = vrot.slane %v16395_v49, 7  ;;  %v8488_v35 = vrot.slane %v16380_v33, 6 }
 0x68d   : > { %v8449_v14 = vsel %vm7956_vm7, %v8448_v21, %v8447_v2  ;;  %v8480_v18 = vsel %vm7944_vm0, %v8479_v8, %v8478_v41  ;;  %v8490_v36 = vrot.slane %v16390_v57, 5  ;;  %v8492_v52 = vrot.slane %v16426_v5, 4  ;;  %v20491_v21 = vld [vmem:[#allocation134_spill] sm:$0xff] }
 0x68e   : > { %v8451_v58 = vsel %vm7959_vm9, %v8450_v13, %v8449_v14  ;;  %v8482_v28 = vsel %vm7947_vm15, %v8481_v38, %v8480_v18  ;;  %v8493_v25 = vrot.slane %v16438_v12, 3  ;;  %v8495_v60 = vrot.slane %v20490_v47, 2  ;;  %v20492_v41 = vld [vmem:[#allocation130_spill] sm:$0xff]  ;;  %v20494_v38 = vld [vmem:[#allocation139_spill] sm:$0xff] }
 0x68f   : > { %v8453_v30 = vsel %vm7962_vm2, %v8452_v15, %v8451_v58  ;;  %v8484_v62 = vsel %vm7950_vm1, %v8483_v59, %v8482_v28  ;;  %v8497_v2 = vrot.slane %v20491_v21, 1  ;;  %v8502_v8 = vrot.slane %v20492_v41, 6 }
 0x690   : > { %v11174_v4 = vpack.i.bf16 %v8453_v30, %v8439_v48  ;;  %v8485_v16 = vsel %vm7953_vm6, %v20493_v0, %v8484_v62  ;;  %v8494_v13 = vsel %vm7944_vm0, %v8493_v25, %v8492_v52  ;;  %v8504_v14 = vrot.slane %v20494_v38, 5  ;;  %v20495_v48 = vld [vmem:[#allocation131_spill] sm:$0xff]  ;;  %v20496_v52 = vld [vmem:[#allocation132_spill] sm:$0xff] }
 0x691   : > { %v8487_v18 = vsel %vm7956_vm7, %v8486_v27, %v8485_v16  ;;  %v8496_v20 = vsel %vm7947_vm15, %v8495_v60, %v8494_v13  ;;  %v11063_v15 = vunpack.i.h.bf16 %v11061_v44  ;;  %v11062_v58 = vunpack.i.l.bf16 %v11061_v44  ;;  %v11066_v27 = vpop.permute.xlu0 %11065  ;;  %v11076_v13 = vpop.permute.xlu1 %11075 }
 0x692   : > { %11175 = vrot.lane.b32.xlu1 %v11174_v4, %s11228_s25  ;;  %v8489_v59 = vsel %vm7959_vm9, %v8488_v35, %v8487_v18  ;;  %v8498_v28 = vsel %vm7950_vm1, %v8497_v2, %v8496_v20  ;;  %v8500_v30 = vrot.slane %v20495_v48, 7  ;;  %v11073_v11 = vunpack.i.h.bf16 %v11071_v43 }
 0x693   : > { %v8491_v62 = vsel %vm7962_vm2, %v8490_v36, %v8489_v59  ;;  %v8499_v25 = vsel %vm7953_vm6, %v20496_v52, %v8498_v28  ;;  %v11072_v10 = vunpack.i.l.bf16 %v11071_v43  ;;  %v7943_v16 = vrot.slane %v16358_v54, 7 }
 0x694   : > { %v8501_v44 = vsel %vm7956_vm7, %v8500_v30, %v8499_v25  ;;  %v9031_v4 = vsel %vm20497_vm4, %v8491_v62, %v11062_v58  ;;  %v7946_v35 = vrot.slane %v16347_v17, 6  ;;  %v7949_v20 = vrot.slane %v16353_v7, 5  ;;  %vm20519_vm4 = vmmov %vm20500_vm3 }
 0x695   : > { %v8503_v60 = vsel %vm7959_vm9, %v8502_v8, %v8501_v44  ;;  %v9039_v2 = vsel %vm6435_vm13, %v9031_v4, %v11072_v10  ;;  %v7945_v36 = vsel %vm7944_vm0, %v7943_v16, %v16350_v50  ;;  %v7952_v43 = vrot.slane %v20493_v0, 4 }
 0x696   : > { %v8505_v54 = vsel %vm7962_vm2, %v8504_v14, %v8503_v60  ;;  %v7948_v18 = vsel %vm7947_vm15, %v7946_v35, %v7945_v36  ;;  %v7955_v58 = vrot.slane %v16395_v49, 3  ;;  %v7958_v17 = vrot.slane %v16380_v33, 2 }
 0x697   : > { %v9032_v7 = vsel %vm20498_vm5, %v8505_v54, %v11063_v15  ;;  %v7951_v8 = vsel %vm7950_vm1, %v7949_v20, %v7948_v18  ;;  %v7961_v10 = vrot.slane %v16390_v57, 1  ;;  %v7964_v59 = vrot.slane %v16438_v12, 7  ;;  %v11081_v57 = vpop.permute.xlu0 %11080  ;;  %vm20520_vm5 = vmmov %vm20500_vm3 }
 0x698   : > { %v9040_v50 = vsel %vm6435_vm13, %v9032_v7, %v11073_v11  ;;  %v7954_v0 = vsel %vm7953_vm6, %v7952_v43, %v7951_v8  ;;  %v7966_v14 = vrot.slane %v20490_v47, 6  ;;  %v7968_v28 = vrot.slane %v20491_v21, 5 }
 0x699   : > { %v7957_v49 = vsel %vm7956_vm7, %v7955_v58, %v7954_v0  ;;  %v7965_v33 = vsel %vm7944_vm0, %v7964_v59, %v16426_v5  ;;  %v7970_v15 = vrot.slane %v20496_v52, 4  ;;  %v7974_v30 = vrot.slane %v20492_v41, 2  ;;  %v11086_v5 = vpop.permute.xlu1 %11085 }
 0x69a   : > { %v7960_v12 = vsel %vm7959_vm9, %v7958_v17, %v7957_v49  ;;  %v7967_v11 = vsel %vm7947_vm15, %v7966_v14, %v7965_v33  ;;  %v7976_v62 = vrot.slane %v20494_v38, 1  ;;  %v11068_v25 = vunpack.i.h.bf16 %v11066_v27  ;;  %v20502_v14 = vld [vmem:[#allocation141_spill] sm:$0xff]  ;;  %v20503_v49 = vld [vmem:[#allocation142_spill] sm:$0xff] }
 0x69b   : > { %v7963_v47 = vsel %vm7962_vm2, %v7961_v10, %v7960_v12  ;;  %v7969_v21 = vsel %vm7950_vm1, %v7968_v28, %v7967_v11  ;;  %v11067_v16 = vunpack.i.l.bf16 %v11066_v27  ;;  %v7972_v44 = vrot.slane %v20495_v48, 3  ;;  %v20501_v10 = vld [vmem:[#allocation5_spill] sm:$0xff]  ;;  %v11091_v11 = vpop.permute.xlu0 %11090 }
 0x69c   : > { %v7971_v52 = vsel %vm7953_vm6, %v7970_v15, %v7969_v21  ;;  %v11078_v4 = vunpack.i.h.bf16 %v11076_v13  ;;  %v11077_v41 = vunpack.i.l.bf16 %v11076_v13  ;;  %v11083_v35 = vunpack.i.h.bf16 %v11081_v57 }
 0x69d   : > { %v7973_v20 = vsel %vm7956_vm7, %v7972_v44, %v7971_v52  ;;  %v9006_v60 = vsel %vm20499_vm8, %v7963_v47, %v11067_v16  ;;  %v11082_v36 = vunpack.i.l.bf16 %v11081_v57  ;;  %v11088_v54 = vunpack.i.h.bf16 %v11086_v5  ;;  %v20505_v57 = vld [vmem:[#allocation4_spill] sm:$0xff]  ;;  %v20506_v47 = vld [vmem:[#allocation69_spill] sm:$0xff]  ;;  %vm20521_vm8 = vmmov %vm20500_vm3 }
 0x69e   : > { %v7975_v38 = vsel %vm7959_vm9, %v7974_v30, %v7973_v20  ;;  %v9014_v43 = vsel %vm6435_vm13, %v9006_v60, %v11077_v41  ;;  %v11087_v27 = vunpack.i.l.bf16 %v11086_v5  ;;  %v9048_v58 = vsel %vm9022_vm12, %v9040_v50, %v11083_v35  ;;  %v20504_v50 = vld [vmem:[#allocation6_spill] sm:$0xff]  ;;  %v20507_v16 = vld [vmem:[#allocation9_spill] sm:$0xff]  ;;  %v17502_v5 = vpop.permute.xlu1 %11095  ;;  %v20510_v60 = vld [vmem:[#allocation7_spill] sm:$0xff] }
 0x69f   : > { %v7977_v48 = vsel %vm7962_vm2, %v7976_v62, %v7975_v38  ;;  %v9047_v18 = vsel %vm9022_vm12, %v9039_v2, %v11082_v36  ;;  %v8506_v13 = vrot.slane %v16511_v42, 4  ;;  %v8507_v59 = vrot.slane %v20501_v10, 3  ;;  %v20509_v35 = vld [vmem:[#allocation66_spill] sm:$0xff]  ;;  %v20511_v38 = vld [vmem:[#allocation3_spill] sm:$0xff] }
 0x6a0   : > { %v9007_v17 = vsel %vm20500_vm3, %v7977_v48, %v11068_v25  ;;  %v9023_v7 = vsel %vm9022_vm12, %v9014_v43, %v11087_v27  ;;  %v9056_v8 = vpack.c.bf16 %v9048_v58, %v9047_v18  ;;  %v8509_v28 = vrot.slane %v20502_v14, 2  ;;  %v20512_v27 = vld [vmem:[#allocation10_spill] sm:$0xff]  ;;  %v20513_v18 = vld [vmem:[#allocation11_spill] sm:$0xff] }
 0x6a1   : > { %v9015_v0 = vsel %vm6435_vm13, %v9007_v17, %v11078_v4  ;;  %v8511_v33 = vrot.slane %v20503_v49, 1  ;;  %v8508_v2 = vsel %vm7944_vm0, %v8507_v59, %v8506_v13  ;;  %v8514_v30 = vrot.slane %v20504_v50, 7  ;;  %v20508_v4 = vld [vmem:[#allocation2_spill] sm:$0xff] }
 0x6a2   : > { %v9024_v15 = vsel %vm9022_vm12, %v9015_v0, %v11088_v54  ;;  %9230 = vmatprep.mubr.bf16.mxu1 %v9056_v8  ;;  %v8516_v12 = vrot.slane %v20505_v57, 6  ;;  %v8510_v25 = vsel %vm7947_vm15, %v8509_v28, %v8508_v2  ;;  %v8520_v21 = vrot.slane %v20506_v47, 4  ;;  %v20514_v8 = vld [vmem:[#allocation12_spill] sm:$0xff] }
 0x6a3   : > { %v9055_v62 = vpack.c.bf16 %v9024_v15, %v9023_v7  ;;  %v8521_v44 = vrot.slane %v20507_v16, 3  ;;  %v8512_v52 = vsel %vm7950_vm1, %v8511_v33, %v8510_v25  ;;  %v8518_v41 = vrot.slane %v20508_v4, 5 }
 0x6a4   : > { %v8523_v20 = vrot.slane %v20509_v35, 2  ;;  %v8525_v36 = vrot.slane %v20510_v60, 1  ;;  %v8513_v43 = vsel %vm7953_vm6, %v20511_v38, %v8512_v52  ;;  %v8530_v48 = vrot.slane %v20512_v27, 6 }
 0x6a5   : > { %9231 = vmatmul.mubr.bf16.vlgmr.msra.gmra.mrb[128].mxu1 %v9055_v62  ;;  %v8522_v54 = vsel %vm7944_vm0, %v8521_v44, %v8520_v21  ;;  %v8532_v58 = vrot.slane %v20513_v18, 5  ;;  %v8515_v13 = vsel %vm7956_vm7, %v8514_v30, %v8513_v43  ;;  %v11092_v7 = vunpack.i.l.bf16 %v11091_v11  ;;  %v20515_v62 = vld [vmem:[#allocation8_spill] sm:$0xff]  ;;  %v11101_v44 = vpop.permute.xlu0 %11100 }
 0x6a6   : > { %v8524_v17 = vsel %vm7947_vm15, %v8523_v20, %v8522_v54  ;;  %v8528_v59 = vrot.slane %v20514_v8, 7  ;;  %v8517_v0 = vsel %vm7959_vm9, %v8516_v12, %v8515_v13  ;;  %v11093_v33 = vunpack.i.h.bf16 %v11091_v11 }
 0x6a7   : > { %v8526_v28 = vsel %vm7950_vm1, %v8525_v36, %v8524_v17  ;;  %v7978_v15 = vrot.slane %v20501_v10, 7  ;;  %v8519_v2 = vsel %vm7962_vm2, %v8518_v41, %v8517_v0  ;;  %v7980_v21 = vrot.slane %v20502_v14, 6  ;;  %v11106_v10 = vpop.permute.xlu1 %11105 }
 0x6a8   : > { %v8527_v25 = vsel %vm7953_vm6, %v20515_v62, %v8526_v28  ;;  %v7984_v30 = vrot.slane %v20511_v38, 4  ;;  %v7982_v20 = vrot.slane %v20503_v49, 5  ;;  %v7986_v11 = vrot.slane %v20504_v50, 3 }
 0x6a9   : > { %v8529_v52 = vsel %vm7956_vm7, %v8528_v59, %v8527_v25  ;;  %v7979_v12 = vsel %vm7944_vm0, %v7978_v15, %v16511_v42  ;;  %v9033_v36 = vsel %vm20516_vm14, %v8519_v2, %v11092_v7  ;;  %v7988_v14 = vrot.slane %v20505_v57, 2  ;;  %vm20522_vm14 = vmmov %vm20500_vm3 }
 0x6aa   : > { %v8531_v41 = vsel %vm7959_vm9, %v8530_v48, %v8529_v52  ;;  %v7981_v43 = vsel %vm7947_vm15, %v7980_v21, %v7979_v12  ;;  %v7990_v13 = vrot.slane %v20508_v4, 1  ;;  %v7992_v42 = vrot.slane %v20507_v16, 7 }
 0x6ab   : > { %v8533_v38 = vsel %vm7962_vm2, %v8532_v58, %v8531_v41  ;;  %v7983_v54 = vsel %vm7950_vm1, %v7982_v20, %v7981_v43  ;;  %v7994_v48 = vrot.slane %v20509_v35, 6  ;;  %v7998_v17 = vrot.slane %v20515_v62, 4  ;;  %v11111_v35 = vpop.permute.xlu0 %11110  ;;  %v11116_v62 = vpop.permute.xlu1 %11115 }
 0x6ac   : > { %v9034_v49 = vsel %vm20517_vm11, %v8533_v38, %v11093_v33  ;;  %v7985_v50 = vsel %vm7953_vm6, %v7984_v30, %v7983_v54  ;;  %v7993_v57 = vsel %vm7944_vm0, %v7992_v42, %v20506_v47  ;;  %v7996_v58 = vrot.slane %v20510_v60, 5 }
 0x6ad   : > { %v7987_v7 = vsel %vm7956_vm7, %v7986_v11, %v7985_v50  ;;  %v8002_v59 = vrot.slane %v20512_v27, 2  ;;  %v7995_v16 = vsel %vm7947_vm15, %v7994_v48, %v7993_v57  ;;  %v8004_v0 = vrot.slane %v20513_v18, 1 }
 0x6ae   : > { %v7989_v4 = vsel %vm7959_vm9, %v7988_v14, %v7987_v7  ;;  %v11097_v28 = vunpack.i.l.bf16 %v17502_v5  ;;  %v7997_v15 = vsel %vm7950_vm1, %v7996_v58, %v7995_v16  ;;  %v8000_v2 = vrot.slane %v20514_v8, 3 }
 0x6af   : > { %v7991_v33 = vsel %vm7962_vm2, %v7990_v13, %v7989_v4  ;;  %v11103_v47 = vunpack.i.h.bf16 %v11101_v44  ;;  %v7999_v60 = vsel %vm7953_vm6, %v7998_v17, %v7997_v15  ;;  %v11098_v27 = vunpack.i.h.bf16 %v17502_v5 }
 0x6b0   : > { %v9008_v25 = vsel %vm20518_vm10, %v7991_v33, %v11097_v28  ;;  %v11102_v21 = vunpack.i.l.bf16 %v11101_v44  ;;  %v8001_v18 = vsel %vm7956_vm7, %v8000_v2, %v7999_v60  ;;  %v11108_v30 = vunpack.i.h.bf16 %v11106_v10 }
 0x6b1   : > { %v11107_v52 = vunpack.i.l.bf16 %v11106_v10  ;;  %v11113_v12 = vunpack.i.h.bf16 %v11111_v35  ;;  %v8003_v20 = vsel %vm7959_vm9, %v8002_v59, %v8001_v18  ;;  %v9042_v11 = vsel %vm6435_vm13, %v9034_v49, %v11103_v47  ;;  %v11121_v47 = vpop.permute.xlu0 %11120 }
 0x6b2   : > { %v11112_v41 = vunpack.i.l.bf16 %v11111_v35  ;;  %v11118_v8 = vunpack.i.h.bf16 %v11116_v62  ;;  %v8005_v43 = vsel %vm7962_vm2, %v8004_v0, %v8003_v20  ;;  %v9041_v14 = vsel %vm6435_vm13, %v9033_v36, %v11102_v21 }
 0x6b3   : > { %v11117_v38 = vunpack.i.l.bf16 %v11116_v62  ;;  %v9050_v5 = vsel %vm9022_vm12, %v9042_v11, %v11113_v12  ;;  %v9009_v44 = vsel %vm20519_vm4, %v8005_v43, %v11098_v27  ;;  %v9016_v54 = vsel %vm6435_vm13, %v9008_v25, %v11107_v52 }
 0x6b4   : > { %v9049_v10 = vsel %vm9022_vm12, %v9041_v14, %v11112_v41  ;;  %v9017_v13 = vsel %vm6435_vm13, %v9009_v44, %v11108_v30  ;;  %v8535_v36 = vrot.slane %v16682_v37, 3  ;;  %v8549_v17 = vrot.slane %v16952_v19, 3 }
 0x6b5   : > { %v9058_v42 = vpack.c.bf16 %v9050_v5, %v9049_v10  ;;  %v9025_v49 = vsel %vm9022_vm12, %v9016_v54, %v11117_v38  ;;  %v9026_v50 = vsel %vm9022_vm12, %v9017_v13, %v11118_v8  ;;  %v8534_v7 = vrot.slane %v16671_v61, 4  ;;  %v11126_v44 = vpop.permute.xlu1 %11125 }
 0x6b6   : > { %v9057_v48 = vpack.c.bf16 %v9026_v50, %v9025_v49  ;;  %v8548_v57 = vrot.slane %v16945_v22, 4  ;;  %v8537_v59 = vrot.slane %v16666_v56, 2  ;;  %v8551_v16 = vrot.slane %v16938_v40, 2 }
 0x6b7   : > { %9238 = vmatprep.mubr.bf16.mxu1 %v9058_v42  ;;  %v8536_v58 = vsel %vm7944_vm0, %v8535_v36, %v8534_v7  ;;  %v8006_v28 = vrot.slane %v16682_v37, 7  ;;  %v8539_v35 = vrot.slane %v16677_v45, 1  ;;  %v8020_v15 = vrot.slane %v16952_v19, 7 }
 0x6b8   : > { %9239 = vmatmul.mubr.bf16.gmra.mrb[132].mxu1 %v9057_v48  ;;  %v8550_v4 = vsel %vm7944_vm0, %v8549_v17, %v8548_v57  ;;  %v8538_v0 = vsel %vm7947_vm15, %v8537_v59, %v8536_v58  ;;  %v8553_v2 = vrot.slane %v16947_v23, 1  ;;  %v8542_v60 = vrot.slane %v16837_v9, 7 }
 0x6b9   : > { %v8552_v33 = vsel %vm7947_vm15, %v8551_v16, %v8550_v4  ;;  %v8540_v62 = vsel %vm7950_vm1, %v8539_v35, %v8538_v0  ;;  %v8556_v25 = vrot.slane %v16977_v34, 7  ;;  %v8007_v37 = vsel %vm7944_vm0, %v8006_v28, %v16671_v61 }
 0x6ba   : > { %v8554_v27 = vsel %vm7950_vm1, %v8553_v2, %v8552_v33  ;;  %v8008_v21 = vrot.slane %v16666_v56, 6  ;;  %v8021_v18 = vsel %vm7944_vm0, %v8020_v15, %v16945_v22  ;;  %v8541_v19 = vsel %vm7953_vm6, %v16733_v55, %v8540_v62 }
 0x6bb   : > { %v8544_v30 = vrot.slane %v16729_v46, 6  ;;  %v8022_v52 = vrot.slane %v16938_v40, 6  ;;  %v8543_v12 = vsel %vm7956_vm7, %v8542_v60, %v8541_v19  ;;  %v8555_v20 = vsel %vm7953_vm6, %v16961_v24, %v8554_v27 }
 0x6bc   : > { %v8009_v11 = vsel %vm7947_vm15, %v8008_v21, %v8007_v37  ;;  %v8012_v61 = vrot.slane %v16733_v55, 4  ;;  %v8557_v56 = vsel %vm7956_vm7, %v8556_v25, %v8555_v20  ;;  %v8010_v22 = vrot.slane %v16677_v45, 5 }
 0x6bd   : > { %v8023_v41 = vsel %vm7947_vm15, %v8022_v52, %v8021_v18  ;;  %v8026_v8 = vrot.slane %v16961_v24, 4  ;;  %v8546_v40 = vrot.slane %v16775_v6, 5  ;;  %v8558_v14 = vrot.slane %v16954_v29, 6 }
 0x6be   : > { %v11131_v43 = vpop.permute.xlu0 %11130  ;;  %v11123_v38 = vunpack.i.h.bf16 %v11121_v47  ;;  %v8024_v5 = vrot.slane %v16947_v23, 5  ;;  %v8545_v54 = vsel %vm7959_vm9, %v8544_v30, %v8543_v12  ;;  %v11122_v55 = vunpack.i.l.bf16 %v11121_v47 }
 0x6bf   : > { %v8011_v10 = vsel %vm7950_vm1, %v8010_v22, %v8009_v11  ;;  %v8014_v45 = vrot.slane %v16837_v9, 3  ;;  %v8559_v13 = vsel %vm7959_vm9, %v8558_v14, %v8557_v56  ;;  %v8028_v49 = vrot.slane %v16977_v34, 3 }
 0x6c0   : > { %v8013_v24 = vsel %vm7953_vm6, %v8012_v61, %v8011_v10  ;;  %v8025_v42 = vsel %vm7950_vm1, %v8024_v5, %v8023_v41  ;;  %v8560_v50 = vrot.slane %v16969_v26, 5  ;;  %v11133_v48 = vunpack.i.h.bf16 %v11131_v43 }
 0x6c1   : > { %v8027_v23 = vsel %vm7953_vm6, %v8026_v8, %v8025_v42  ;;  %v11132_v36 = vunpack.i.l.bf16 %v11131_v43  ;;  %v8547_v17 = vsel %vm7962_vm2, %v8546_v40, %v8545_v54  ;;  %v8015_v57 = vsel %vm7956_vm7, %v8014_v45, %v8013_v24 }
 0x6c2   : > { %v8561_v7 = vsel %vm7962_vm2, %v8560_v50, %v8559_v13  ;;  %v9035_v9 = vsel %vm20520_vm5, %v8547_v17, %v11122_v55  ;;  %v8016_v58 = vrot.slane %v16729_v46, 2  ;;  %v8029_v34 = vsel %vm7956_vm7, %v8028_v49, %v8027_v23  ;;  %v20523_v50 = vld [vmem:[#allocation78_spill] sm:$0xff]  ;;  %v20524_v17 = vld [vmem:[#allocation23_spill] sm:$0xff] }
 0x6c3   : > { %v9036_v4 = vsel %vm20521_vm8, %v8561_v7, %v11123_v38  ;;  %v8030_v35 = vrot.slane %v16954_v29, 2  ;;  %v9043_v33 = vsel %vm6435_vm13, %v9035_v9, %v11132_v36  ;;  %v11128_v62 = vunpack.i.h.bf16 %v11126_v44 }
 0x6c4   : > { %v9044_v15 = vsel %vm6435_vm13, %v9036_v4, %v11133_v48  ;;  %v8017_v2 = vsel %vm7959_vm9, %v8016_v58, %v8015_v57  ;;  %v11127_v60 = vunpack.i.l.bf16 %v11126_v44  ;;  %v8018_v37 = vrot.slane %v16775_v6, 1 }
 0x6c5   : > { %v11136_v16 = vpop.permute.xlu1 %11135  ;;  %v8031_v27 = vsel %vm7959_vm9, %v8030_v35, %v8029_v34  ;;  %v8032_v21 = vrot.slane %v16969_v26, 1  ;;  %v8563_v8 = vrot.slane %v16993_v31, 3  ;;  %v8577_v43 = vrot.slane %v17216_v39, 3  ;;  %v20526_v34 = vld [vmem:[#allocation13_spill] sm:$0xff] }
 0x6c6   : > { %v11138_v29 = vunpack.i.h.bf16 %v11136_v16  ;;  %v11137_v18 = vunpack.i.l.bf16 %v11136_v16  ;;  %v8019_v19 = vsel %vm7962_vm2, %v8018_v37, %v8017_v2  ;;  %v8562_v40 = vrot.slane %v16987_v51, 4 }
 0x6c7   : > { %v8033_v30 = vsel %vm7962_vm2, %v8032_v21, %v8031_v27  ;;  %v9010_v12 = vsel %vm20500_vm3, %v8019_v19, %v11127_v60  ;;  %v8576_v14 = vrot.slane %v17209_v3, 4  ;;  %v8565_v5 = vrot.slane %v16979_v32, 2  ;;  %v20529_v60 = vld [vmem:[#allocation15_spill] sm:$0xff] }
 0x6c8   : > { %v9011_v20 = vsel %vm20522_vm14, %v8033_v30, %v11128_v62  ;;  %v9018_v56 = vsel %vm6435_vm13, %v9010_v12, %v11137_v18  ;;  %v8564_v38 = vsel %vm7944_vm0, %v8563_v8, %v8562_v40  ;;  %v8579_v54 = vrot.slane %v17207_v63, 2  ;;  %v20530_v12 = vld [vmem:[#allocation22_spill] sm:$0xff] }
 0x6c9   : > { %v9019_v6 = vsel %vm6435_vm13, %v9011_v20, %v11138_v29  ;;  %v8578_v44 = vsel %vm7944_vm0, %v8577_v43, %v8576_v14  ;;  %v8566_v55 = vsel %vm7947_vm15, %v8565_v5, %v8564_v38  ;;  %v8567_v10 = vrot.slane %v16989_v1, 1 }
 0x6ca   : > { %v8580_v45 = vsel %vm7947_vm15, %v8579_v54, %v8578_v44  ;;  %v8034_v13 = vrot.slane %v16993_v31, 7  ;;  %v8048_v24 = vrot.slane %v17216_v39, 7  ;;  %v8581_v42 = vrot.slane %v17214_v53, 1  ;;  %v20525_v31 = vld [vmem:[#allocation14_spill] sm:$0xff] }
 0x6cb   : > { %v8568_v49 = vsel %vm7950_vm1, %v8567_v10, %v8566_v55  ;;  %v8570_v23 = vrot.slane %v20523_v50, 7  ;;  %v8584_v7 = vrot.slane %v20524_v17, 7  ;;  %v8036_v58 = vrot.slane %v16979_v32, 6  ;;  %v20528_v32 = vld [vmem:[#allocation79_spill] sm:$0xff] }
 0x6cc   : > { %v8582_v36 = vsel %vm7950_vm1, %v8581_v42, %v8580_v45  ;;  %v8035_v9 = vsel %vm7944_vm0, %v8034_v13, %v16987_v51  ;;  %v8049_v57 = vsel %vm7944_vm0, %v8048_v24, %v17209_v3  ;;  %v8569_v39 = vsel %vm7953_vm6, %v20525_v31, %v8568_v49  ;;  %vm20531_vm0 = vmmov %vm20500_vm3 }
 0x6cd   : > { %v11141_v59 = vpop.permute.xlu0 %11140  ;;  %v8571_v4 = vsel %vm7956_vm7, %v8570_v23, %v8569_v39  ;;  %v8572_v16 = vrot.slane %v20526_v34, 6  ;;  %v8040_v35 = vrot.slane %v20525_v31, 4  ;;  %v8037_v3 = vsel %vm7947_vm15, %v8036_v58, %v8035_v9 }
 0x6ce   : > { %v11143_v0 = vunpack.i.h.bf16 %v11141_v59  ;;  %v11142_v28 = vunpack.i.l.bf16 %v11141_v59  ;;  %v8050_v59 = vrot.slane %v17207_v63, 6  ;;  %v8586_v2 = vrot.slane %v20528_v32, 6 }
 0x6cf   : > { %v8038_v63 = vrot.slane %v16989_v1, 5  ;;  %v8573_v62 = vsel %vm7959_vm9, %v8572_v16, %v8571_v4  ;;  %v8574_v27 = vrot.slane %v20529_v60, 5  ;;  %v8056_v19 = vrot.slane %v20524_v17, 3 }
 0x6d0   : > { %v9051_v47 = vsel %vm9022_vm12, %v9043_v33, %v11142_v28  ;;  %v9052_v46 = vsel %vm9022_vm12, %v9044_v15, %v11143_v0  ;;  %v20527_v0 = vld [vmem:[#allocation21_spill] sm:$0xff]  ;;  %v8051_v33 = vsel %vm7947_vm15, %v8050_v59, %v8049_v57  ;;  %v8588_v20 = vrot.slane %v20530_v12, 5  ;;  %vm20532_vm15 = vmmov %vm20531_vm0 }
 0x6d1   : > { %v9060_v25 = vpack.c.bf16 %v9052_v46, %v9051_v47  ;;  %v8583_v28 = vsel %vm7953_vm6, %v20527_v0, %v8582_v36  ;;  %v8054_v15 = vrot.slane %v20527_v0, 4  ;;  %v8052_v47 = vrot.slane %v17214_v53, 5 }
 0x6d2   : > { %v8585_v51 = vsel %vm7956_vm7, %v8584_v7, %v8583_v28  ;;  %v8039_v29 = vsel %vm7950_vm1, %v8038_v63, %v8037_v3  ;;  %v8058_v44 = vrot.slane %v20528_v32, 2  ;;  %v8046_v23 = vrot.slane %v20529_v60, 1 }
 0x6d3   : > { %9246 = vmatprep.mubr.bf16.mxu1 %v9060_v25  ;;  %v8042_v25 = vrot.slane %v20523_v50, 3  ;;  %v8587_v21 = vsel %vm7959_vm9, %v8586_v2, %v8585_v51  ;;  %v8053_v18 = vsel %vm7950_vm1, %v8052_v47, %v8051_v33  ;;  %v8041_v53 = vsel %vm7953_vm6, %v8040_v35, %v8039_v29  ;;  %vm20533_vm1 = vmmov %vm20531_vm0  ;;  %v9672_v51 = vld [vmem:[%s17749_s8] ss:$0 sm:$0xff] }
 0x6d4   : > { %v11146_v52 = vpop.permute.xlu1 %11145 }
 0x6d5   : > { %v11148_v11 = vunpack.i.h.bf16 %v11146_v52  ;;  %v11147_v61 = vunpack.i.l.bf16 %v11146_v52  ;;  %v8055_v52 = vsel %vm7953_vm6, %v8054_v15, %v8053_v18 }
 0x6d7   : > { %v9027_v26 = vsel %vm9022_vm12, %v9018_v56, %v11147_v61  ;;  %v9028_v22 = vsel %vm9022_vm12, %v9019_v6, %v11148_v11  ;;  %v8575_v56 = vsel %vm7962_vm2, %v8574_v27, %v8573_v62  ;;  %v8589_v6 = vsel %vm7962_vm2, %v8588_v20, %v8587_v21 }
 0x6d8   : > { %v9059_v41 = vpack.c.bf16 %v9028_v22, %v9027_v26  ;;  %v8043_v26 = vsel %vm7956_vm7, %v8042_v25, %v8041_v53  ;;  %v8044_v22 = vrot.slane %v20526_v34, 2 }
 0x6da   : > { %9247 = vmatmul.mubr.bf16.gmra.mrb[136].mxu1 %v9059_v41  ;;  %v8057_v41 = vsel %vm7956_vm7, %v8056_v19, %v8055_v52  ;;  %v8045_v10 = vsel %vm7959_vm9, %v8044_v22, %v8043_v26  ;;  %vm20534_vm7 = vmmov %vm20531_vm0 }
 0x6db   : > { %v8059_v49 = vsel %vm7959_vm9, %v8058_v44, %v8057_v41  ;;  %v8047_v7 = vsel %vm7962_vm2, %v8046_v23, %v8045_v10 }
 0x6e0   : > { %v11151_v48 = vpop.permute.xlu0 %11150 }
 0x6e1   : > { %v11153_v30 = vunpack.i.h.bf16 %v11151_v48  ;;  %v11152_v1 = vunpack.i.l.bf16 %v11151_v48  ;;  %v8060_v48 = vrot.slane %v20530_v12, 1 }
 0x6e3   : > { %v9037_v43 = vsel %vm20531_vm0, %v8575_v56, %v11152_v1  ;;  %v9038_v40 = vsel %vm20532_vm15, %v8589_v6, %v11153_v30  ;;  %v8061_v9 = vsel %vm7962_vm2, %v8060_v48, %v8059_v49 }
 0x6e7   : > { %v11156_v37 = vpop.permute.xlu1 %11155 }
 0x6e8   : > { %v11158_v24 = vunpack.i.h.bf16 %v11156_v37  ;;  %v11157_v42 = vunpack.i.l.bf16 %v11156_v37 }
 0x6ea   : > { %v9012_v31 = vsel %vm20533_vm1, %v8047_v7, %v11157_v42  ;;  %v9013_v39 = vsel %vm20534_vm7, %v8061_v9, %v11158_v24 }
 0x6ee   : > { %v11161_v46 = vpop.permute.xlu0 %11160 }
 0x6ef   : > { %v11163_v11 = vunpack.i.h.bf16 %v11161_v46  ;;  %v11162_v61 = vunpack.i.l.bf16 %v11161_v46 }
 0x6f1   : > { %v9045_v54 = vsel %vm6435_vm13, %v9037_v43, %v11162_v61  ;;  %v9046_v55 = vsel %vm6435_vm13, %v9038_v40, %v11163_v11 }
 0x6f5   : > { %v11166_v14 = vpop.permute.xlu1 %11165 }
 0x6f6   : > { %v11168_v36 = vunpack.i.h.bf16 %v11166_v14  ;;  %v11167_v17 = vunpack.i.l.bf16 %v11166_v14 }
 0x6f8   : > { %v9020_v4 = vsel %vm6435_vm13, %v9012_v31, %v11167_v17  ;;  %v9021_v34 = vsel %vm6435_vm13, %v9013_v39, %v11168_v36  ;;  %vm9263_vm13 = vcmask 130048  }
 0x6fd   : > { %v11171_v8 = vpop.permute.xlu0 %11170 }
 0x6fe   : > { %v11173_v38 = vunpack.i.h.bf16 %v11171_v8  ;;  %v11172_v5 = vunpack.i.l.bf16 %v11171_v8 }
 0x700   : > { %v9053_v45 = vsel %vm9022_vm12, %v9045_v54, %v11172_v5  ;;  %v9054_v13 = vsel %vm9022_vm12, %v9046_v55, %v11173_v38 }
 0x701   : > { %v9062_v50 = vpack.c.bf16 %v9054_v13, %v9053_v45 }
 0x703   : > { %9254 = vmatprep.mubr.bf16.mxu1 %v9062_v50 }
 0x704   : > { %v11176_v57 = vpop.permute.xlu1 %11175 }
 0x705   : > { %v11178_v58 = vunpack.i.h.bf16 %v11176_v57  ;;  %v11177_v59 = vunpack.i.l.bf16 %v11176_v57 }
 0x707   : > { %v9029_v16 = vsel %vm9022_vm12, %v9020_v4, %v11177_v59  ;;  %v9030_v0 = vsel %vm9022_vm12, %v9021_v34, %v11178_v58 }
 0x708   : > { %v9061_v28 = vpack.c.bf16 %v9030_v0, %v9029_v16 }
 0x70a   : > { %9255 = vmatmul.mubr.bf16.gmra.mrb[140].mxu1 %v9061_v28 }
 0x778   : > { %v10016_v35 = vpop.f32.mrb[128].mxu1 }
 0x779   : > { %v10017_v3 = vpop.f32.mrb[129].mxu1 }
 0x77a   : > { %v10018_v33 = vadd.f32 %v10017_v3, %v10016_v35  ;;  %v10019_v15 = vpop.f32.mrb[130].mxu1 }
 0x77b   : > { %v10020_v32 = vpop.f32.mrb[131].mxu1 }
 0x77c   : > { %v9233_v2 = vadd.f32 %v10018_v33, %v9672_v51  ;;  %v10021_v63 = vadd.f32 %v10020_v32, %v10019_v15 }
 0x77e   : > { %9264 = vst.msk [vmem:[%s17720_s22] sm:$0xff] %vm9263_vm13, %v9233_v2  ;;  %v9236_v47 = vadd.f32 %v10021_v63, %v9672_v51 }
 0x780   : > { %9265 = vst.msk [vmem:[%s17720_s22 + $0x8] sm:$0xff] %vm9263_vm13, %v9236_v47 }
 0x78b   : > { %v10022_v46 = vpop.f32.mrb[132].mxu1 }
 0x78c   : > { %v10023_v62 = vpop.f32.mrb[133].mxu1 }
 0x78d   : > { %v10024_v60 = vadd.f32 %v10023_v62, %v10022_v46  ;;  %v10025_v27 = vpop.f32.mrb[134].mxu1 }
 0x78e   : > { %v10026_v25 = vpop.f32.mrb[135].mxu1 }
 0x78f   : > { %v9241_v37 = vadd.f32 %v10024_v60, %v9672_v51  ;;  %v10027_v21 = vadd.f32 %v10026_v25, %v10025_v27 }
 0x791   : > { %9266 = vst.msk [vmem:[%s17720_s22 + $0x10] sm:$0xff] %vm9263_vm13, %v9241_v37  ;;  %v9244_v29 = vadd.f32 %v10027_v21, %v9672_v51 }
 0x793   : > { %9267 = vst.msk [vmem:[%s17720_s22 + $0x18] sm:$0xff] %vm9263_vm13, %v9244_v29 }
 0x7ad   : > { %v10028_v18 = vpop.f32.mrb[136].mxu1 }
 0x7ae   : > { %v10029_v19 = vpop.f32.mrb[137].mxu1 }
 0x7af   : > { %v10030_v30 = vadd.f32 %v10029_v19, %v10028_v18  ;;  %v10031_v1 = vpop.f32.mrb[138].mxu1 }
 0x7b0   : > { %v10032_v53 = vpop.f32.mrb[139].mxu1 }
 0x7b1   : > { %v9249_v52 = vadd.f32 %v10030_v30, %v9672_v51  ;;  %v10033_v12 = vadd.f32 %v10032_v53, %v10031_v1 }
 0x7b3   : > { %9268 = vst.msk [vmem:[%s17720_s22 + $0x20] sm:$0xff] %vm9263_vm13, %v9249_v52  ;;  %v9252_v20 = vadd.f32 %v10033_v12, %v9672_v51 }
 0x7b5   : > { %9269 = vst.msk [vmem:[%s17720_s22 + $0x28] sm:$0xff] %vm9263_vm13, %v9252_v20 }
 0x7dd   : > { %v10034_v11 = vpop.f32.mrb[140].mxu1 }
 0x7de   : > { %v10035_v61 = vpop.f32.mrb[141].mxu1 }
 0x7df   : > { %v10036_v56 = vadd.f32 %v10035_v61, %v10034_v11  ;;  %v10037_v6 = vpop.f32.mrb[142].mxu1 }
 0x7e0   : > { %v10038_v26 = vpop.f32.mrb[143].mxu1 }
 0x7e1   : > { %v9257_v22 = vadd.f32 %v10036_v56, %v9672_v51  ;;  %v10039_v41 = vadd.f32 %v10038_v26, %v10037_v6 }
 0x7e3   : > { %9270 = vst.msk [vmem:[%s17720_s22 + $0x30] sm:$0xff] %vm9263_vm13, %v9257_v22  ;;  %v9260_v8 = vadd.f32 %v10039_v41, %v9672_v51 }
 0x7e5   : > { %9271 = vst.msk [vmem:[%s17720_s22 + $0x38] sm:$0xff] %vm9263_vm13, %v9260_v8 }
 0x7e6 PF: > { %s19_s30 = sadd.s32 1, %s11224_s30  }
 0x7e7   : > { %p16_p5 = scmp.ge.s32.totalorder %s19_s30, 4  }
 0x7e9   :  { %18 = sbr.rel (!%p16_p5) target bundleno = 1 (0x1), region = 92 }

</bundles_post_ra>
